<compile_context>
chip_gen: v7x
topology: tpu7x:2x2x1
jax: 0.10.0
libtpu: 0.0.40
codegen_flags: <defaults>
</compile_context>

<pallas_src>
import functools
import math

import jax
import jax.numpy as jnp
from jax.experimental import pallas as pl
from jax.experimental.pallas import tpu as pltpu


def _round_up(x, m):
    return (x + m - 1) // m * m


_VMEM_LIMIT = 32 * 1024 * 1024  # safe on v5e/v6e (128 MiB) and v7x (64 MiB)


# -----------------------------------------------------------------------------
# Fused kernel.  grid = (image, row_tile); row_tile is the stem reduction axis.
#   * every step: stem 7x7/s2 conv as a (tile_rows, 147) @ (147, 128) bf16
#     matmul, ReLU, partial global-average-pool sum into a VMEM accumulator.
#   * last tile of each image: write the pooled feature row into a persistent
#     VMEM scratch.
#   * very last step: run the whole tail (trunk, backbone.fc, cross-MHA, fc)
#     on the pooled features of all 2B frames with VMEM-resident weights.
# -----------------------------------------------------------------------------
def _smda_kernel(patch_ref, conv_w_ref,
                 trunk_w_ref, trunk_b_ref, fcb_w_ref, fcb_b_ref,
                 wq_ref, bq_ref, wkv_ref, bkv_ref, wo_ref, bo_ref,
                 fcw_ref, fcb_ref,
                 o_ref,
                 acc_ref, pooled_ref,
                 *, batch, num_heads, inv_hw):
    i = pl.program_id(0)
    t = pl.program_id(1)
    last_i = pl.num_programs(0) - 1
    last_t = pl.num_programs(1) - 1

    # ---- Stem: conv-as-matmul (K = 147, unpadded) + ReLU + partial GAP sum.
    @pl.when(t == 0)
    def _init():
        acc_ref[...] = jnp.zeros_like(acc_ref)

    x = patch_ref[0]                                            # (tile_rows, 147) bf16
    act = jnp.dot(x, conv_w_ref[...], preferred_element_type=jnp.float32)
    act = jnp.maximum(act, 0.0)
    # Spatial-padding rows are all-zero and the conv has no bias, so they add
    # exactly 0 to the pooled sum -- no row mask needed (review item 3).
    acc_ref[...] += jnp.sum(act, axis=0, keepdims=True)

    @pl.when(t == last_t)
    def _store_pool():
        pooled_ref[i] = acc_ref[...] * inv_hw                   # (1, c_pad) f32

    # ---- Fused tail on the final grid step (weights already VMEM-resident).
    @pl.when((i == last_i) & (t == last_t))
    def _tail():
        n_img = pooled_ref.shape[0]
        pooled = jnp.concatenate([pooled_ref[j] for j in range(n_img)], axis=0)
        pooled = pooled.astype(jnp.bfloat16)                    # (2B, c_pad)

        # TODO(synk): synthetic 64->2048 trunk stands in for the ResNet-50 body.
        h = jnp.dot(pooled, trunk_w_ref[...],
                    preferred_element_type=jnp.float32) + trunk_b_ref[...]
        h = jnp.maximum(h, 0.0)
        feat = jnp.dot(h.astype(jnp.bfloat16), fcb_w_ref[...],
                       preferred_element_type=jnp.float32) + fcb_b_ref[...]

        B = batch
        E = wo_ref.shape[0]
        hd = E // num_heads
        scale = 1.0 / math.sqrt(hd)

        pre = feat[0:B].astype(jnp.bfloat16)        # key / value source
        nxt = feat[B:2 * B].astype(jnp.bfloat16)    # query source

        # Split in-projection (review item 11): q from next, k|v from pre.
        q = (jnp.dot(nxt, wq_ref[...], preferred_element_type=jnp.float32)
             + bq_ref[...]) * scale                              # (B, E) f32
        kv = jnp.dot(pre, wkv_ref[...],
                     preferred_element_type=jnp.float32) + bkv_ref[...]
        k = kv[:, 0:E]
        v = kv[:, E:2 * E]

        qh = q.reshape(B, num_heads, hd).astype(jnp.bfloat16)
        kh = k.reshape(B, num_heads, hd).astype(jnp.bfloat16)
        vh = v.reshape(B, num_heads, hd).astype(jnp.bfloat16)

        s = jnp.einsum('lhd,mhd->hlm', qh, kh,
                       preferred_element_type=jnp.float32)       # (H, B, B)
        s = s - jnp.max(s, axis=-1, keepdims=True)
        p = jnp.exp(s)
        p = p * pl.reciprocal(jnp.sum(p, axis=-1, keepdims=True), approx=True)
        ctx = jnp.einsum('hlm,mhd->lhd', p.astype(jnp.bfloat16), vh,
                         preferred_element_type=jnp.float32).reshape(B, E)

        attn = jnp.dot(ctx.astype(jnp.bfloat16), wo_ref[...],
                       preferred_element_type=jnp.float32) + bo_ref[...]
        logits = jnp.dot(attn.astype(jnp.bfloat16), fcw_ref[...],
                         preferred_element_type=jnp.float32) + fcb_ref[...]
        o_ref[...] = logits.astype(o_ref.dtype)


def _resident_spec(shape):
    """Weight stays resident in VMEM for the whole grid (constant index map)."""
    ndim = len(shape)
    return pl.BlockSpec(shape, lambda i, t: (0,) * ndim)


def _patch_spec(tile_rows, k_dim, n_tiles):
    index_map = lambda i, t: (i, t, 0)
    if n_tiles > 2:
        try:
            # 3-deep pipelining on the dominant patch stream (review items 4/5).
            return pl.BlockSpec((1, tile_rows, k_dim), index_map,
                                pipeline_mode=pl.Buffered(3))
        except Exception:  # runtime without pipeline_mode / Buffered
            pass
    return pl.BlockSpec((1, tile_rows, k_dim), index_map)


def pallas_smda_forward(patches, pp, *, batch, num_heads, hw, tile_rows):
    """patches: (2B, hw_pad, 147) bf16, pp: padded bf16 params -> (B, nc_pad) f32."""
    n_img, hw_pad, k_dim = patches.shape
    assert hw_pad % tile_rows == 0
    n_tiles = hw_pad // tile_rows
    c_pad = pp["conv_w"].shape[1]
    nc_pad = pp["fc_w"].shape[1]

    weights = [pp["conv_w"],
               pp["trunk_w"], pp["trunk_b"], pp["fcb_w"], pp["fcb_b"],
               pp["w_q"], pp["b_q"], pp["w_kv"], pp["b_kv"],
               pp["w_o"], pp["b_o"], pp["fc_w"], pp["fc_b"]]

    kernel = functools.partial(_smda_kernel, batch=batch, num_heads=num_heads,
                               inv_hw=1.0 / float(hw))
    return pl.pallas_call(
        kernel,
        out_shape=jax.ShapeDtypeStruct((batch, nc_pad), jnp.float32),
        grid=(n_img, n_tiles),
        in_specs=[_patch_spec(tile_rows, k_dim, n_tiles)]
                 + [_resident_spec(w.shape) for w in weights],
        out_specs=pl.BlockSpec((batch, nc_pad), lambda i, t: (0, 0)),
        scratch_shapes=[
            pltpu.VMEM((1, c_pad), jnp.float32),           # per-image GAP accumulator
            pltpu.VMEM((n_img, 1, c_pad), jnp.float32),    # pooled feats, all frames
        ],
        compiler_params=pltpu.CompilerParams(
            # The fused tail reads every image's pooled features from scratch,
            # so the image axis must stay "arbitrary" (a megacore "parallel"
            # split on v7x would give each TensorCore a private scratch).
            dimension_semantics=("arbitrary", "arbitrary"),
            vmem_limit_bytes=_VMEM_LIMIT),
    )(patches, *weights)


# -----------------------------------------------------------------------------
# Glue (im2col, parameter init / padding, model wrapper)
# -----------------------------------------------------------------------------
def im2col(x_nhwc, kh, kw, stride, pad):
    # TODO(synk): review item 1 -- build these patches inside the kernel from
    # NHWC row strips (or via manual strided DMA) so the 49x-expanded slab
    # never hits HBM; kept host-side here for lowering robustness.
    B, H, W, C = x_nhwc.shape
    xp = jnp.pad(x_nhwc, ((0, 0), (pad, pad), (pad, pad), (0, 0)))
    Ho = (H + 2 * pad - kh) // stride + 1
    Wo = (W + 2 * pad - kw) // stride + 1
    cols = []
    for i in range(kh):
        for j in range(kw):
            cols.append(xp[:, i:i + stride * Ho:stride, j:j + stride * Wo:stride, :])
    patches = jnp.stack(cols, axis=3)                    # (B, Ho, Wo, kh*kw, C)
    patches = patches.reshape(B * Ho * Wo, kh * kw * C)  # K = 147, unpadded
    return patches, Ho, Wo


def init_params(key, num_classes, embed=512, stem_out=64, trunk_out=2048):
    ks = jax.random.split(key, 12)
    s = 0.02
    return {
        # resnet50 conv1: 7x7 stride 2, 3->64, bias=False
        "conv_w": jax.random.normal(ks[0], (7 * 7 * 3, stem_out), jnp.float32) * s,
        # TODO(synk): synthetic 64->2048 linear stands in for the ResNet-50 trunk.
        "trunk_w": jax.random.normal(ks[1], (stem_out, trunk_out), jnp.float32) * s,
        "trunk_b": jnp.zeros((trunk_out,), jnp.float32),
        # backbone.fc = Linear(2048, 512)
        "fcb_w": jax.random.normal(ks[2], (trunk_out, embed), jnp.float32) * s,
        "fcb_b": jax.random.normal(ks[3], (embed,), jnp.float32) * s,
        # MultiheadAttention(512, 8): in_proj (q/k/v) + out_proj
        "wq": jax.random.normal(ks[4], (embed, embed), jnp.float32) * s,
        "wk": jax.random.normal(ks[5], (embed, embed), jnp.float32) * s,
        "wv": jax.random.normal(ks[6], (embed, embed), jnp.float32) * s,
        "bq": jnp.zeros((embed,), jnp.float32),
        "bk": jnp.zeros((embed,), jnp.float32),
        "bv": jnp.zeros((embed,), jnp.float32),
        "wo": jax.random.normal(ks[7], (embed, embed), jnp.float32) * s,
        "bo": jnp.zeros((embed,), jnp.float32),
        # final fc: Linear(512, num_classes)
        "fc_w": jax.random.normal(ks[8], (embed, num_classes), jnp.float32) * s,
        "fc_b": jax.random.normal(ks[9], (num_classes,), jnp.float32) * s,
    }


def _pad_params(p, num_classes):
    """Pad only ragged *output* dims to lane width and cast weights to bf16.

    The im2col K dim (147) stays unpadded (review item 2).
    TODO(synk): weight-only int8 (v5e/v6e) / fp8 (v7x) quantization of the big
    tail matrices (trunk_w / fcb_w / w_kv) would halve the tail weight stream.
    """
    c_raw = p["conv_w"].shape[1]                      # 64
    c_pad = _round_up(c_raw, 128)                     # 128
    nc_pad = _round_up(num_classes, 128)
    bf = jnp.bfloat16
    conv_w = jnp.pad(p["conv_w"], ((0, 0), (0, c_pad - c_raw)))      # (147, 128)
    trunk_w = jnp.pad(p["trunk_w"], ((0, c_pad - c_raw), (0, 0)))    # (128, 2048)
    fc_w = jnp.pad(p["fc_w"], ((0, 0), (0, nc_pad - num_classes)))
    fc_b = jnp.pad(p["fc_b"], (0, nc_pad - num_classes))
    w_kv = jnp.concatenate([p["wk"], p["wv"]], axis=1)               # (512, 1024)
    b_kv = jnp.concatenate([p["bk"], p["bv"]], axis=0)
    return {
        "conv_w": conv_w.astype(bf),
        "trunk_w": trunk_w.astype(bf),
        "trunk_b": p["trunk_b"].reshape(1, -1).astype(jnp.float32),
        "fcb_w": p["fcb_w"].astype(bf),
        "fcb_b": p["fcb_b"].reshape(1, -1).astype(jnp.float32),
        "w_q": p["wq"].astype(bf),
        "b_q": p["bq"].reshape(1, -1).astype(jnp.float32),
        "w_kv": w_kv.astype(bf),
        "b_kv": b_kv.reshape(1, -1).astype(jnp.float32),
        "w_o": p["wo"].astype(bf),
        "b_o": p["bo"].reshape(1, -1).astype(jnp.float32),
        "fc_w": fc_w.astype(bf),
        "fc_b": fc_b.reshape(1, -1).astype(jnp.float32),
    }


def smda_net_video_forward(x, params, num_classes, num_heads=8):
    """x: (B, num_clip, 3, H, W) float32 -> logits (B, num_classes)."""
    B = x.shape[0]
    pp = _pad_params(params, num_classes)
    # Batch both clip frames (rows 0..B-1 = pre, rows B..2B-1 = next) through
    # the stem in one pass so every weight is loaded into VMEM exactly once.
    frames = jnp.concatenate([x[:, 0], x[:, 1]], axis=0)        # (2B, 3, H, W)
    nhwc = jnp.transpose(frames, (0, 2, 3, 1)).astype(jnp.bfloat16)
    patches, Ho, Wo = im2col(nhwc, 7, 7, stride=2, pad=3)       # (2B*HW, 147) bf16
    hw = Ho * Wo
    n_img = frames.shape[0]
    k_dim = patches.shape[1]
    # Big row tiles amortize per-grid-step overhead (review items 4/5); padded
    # rows are zero and therefore harmless to the pooled sum.
    tile_rows = min(1024, _round_up(hw, 8))
    hw_pad = _round_up(hw, tile_rows)
    patches = patches.reshape(n_img, hw, k_dim)
    if hw_pad != hw:
        patches = jnp.pad(patches, ((0, 0), (0, hw_pad - hw), (0, 0)))
    # unsqueeze(1) + batch_first=False => seq_len = B, batch = 1: attention
    # mixes information ACROSS the clip batch (query=next, key/value=pre).
    logits_pad = pallas_smda_forward(patches, pp, batch=B, num_heads=num_heads,
                                     hw=hw, tile_rows=tile_rows)
    return logits_pad[:, :num_classes]


if __name__ == "__main__":
    key = jax.random.PRNGKey(0)
    k_x, k_p = jax.random.split(key)

    B, NUM_CLIP, C, H, W = 2, 2, 3, 32, 32
    NUM_CLASSES = 10

    x = jax.random.normal(k_x, (B, NUM_CLIP, C, H, W), jnp.float32)
    params = init_params(k_p, NUM_CLASSES)

    fwd = jax.jit(functools.partial(smda_net_video_forward,
                                    num_classes=NUM_CLASSES))
    logits = jax.block_until_ready(fwd(x, params))
    assert logits.shape == (B, NUM_CLASSES)
    assert bool(jnp.all(jnp.isfinite(logits)))
    print("KERNEL_OK")
</pallas_src>

<mosaic_0001>
module attributes {stable_mosaic.version = 11 : i64} {
  func.func @_smda_kernel(%arg0: i32, %arg1: i32, %arg2: memref<1x256x147xbf16, #tpu.memory_space<vmem>>, %arg3: memref<147x128xbf16, #tpu.memory_space<vmem>>, %arg4: memref<128x2048xbf16, #tpu.memory_space<vmem>>, %arg5: memref<1x2048xf32, #tpu.memory_space<vmem>>, %arg6: memref<2048x512xbf16, #tpu.memory_space<vmem>>, %arg7: memref<1x512xf32, #tpu.memory_space<vmem>>, %arg8: memref<512x512xbf16, #tpu.memory_space<vmem>>, %arg9: memref<1x512xf32, #tpu.memory_space<vmem>>, %arg10: memref<512x1024xbf16, #tpu.memory_space<vmem>>, %arg11: memref<1x1024xf32, #tpu.memory_space<vmem>>, %arg12: memref<512x512xbf16, #tpu.memory_space<vmem>>, %arg13: memref<1x512xf32, #tpu.memory_space<vmem>>, %arg14: memref<512x128xbf16, #tpu.memory_space<vmem>>, %arg15: memref<1x128xf32, #tpu.memory_space<vmem>>, %arg16: memref<2x128xf32, #tpu.memory_space<vmem>>, %arg17: memref<1x128xf32, #tpu.memory_space<vmem>>, %arg18: memref<4x1x128xf32, #tpu.memory_space<vmem>>) attributes {dimension_semantics = [#tpu.dimension_semantics<arbitrary>, #tpu.dimension_semantics<arbitrary>], iteration_bounds = array<i64: 4, 1>, scalar_prefetch = 0 : i64, scratch_operands = 2 : i64, tpu.core_type = #tpu.core_type<tc>, window_params = [{transform_indices = @transform_0, window_bounds = array<i64: 1, 256, 147>}, {pipeline_mode = #tpu.pipeline_mode<synchronous>, transform_indices = @transform_1, window_bounds = array<i64: 147, 128>}, {pipeline_mode = #tpu.pipeline_mode<synchronous>, transform_indices = @transform_2, window_bounds = array<i64: 128, 2048>}, {pipeline_mode = #tpu.pipeline_mode<synchronous>, transform_indices = @transform_3, window_bounds = array<i64: 1, 2048>}, {pipeline_mode = #tpu.pipeline_mode<synchronous>, transform_indices = @transform_4, window_bounds = array<i64: 2048, 512>}, {pipeline_mode = #tpu.pipeline_mode<synchronous>, transform_indices = @transform_5, window_bounds = array<i64: 1, 512>}, {pipeline_mode = #tpu.pipeline_mode<synchronous>, transform_indices = @transform_6, window_bounds = array<i64: 512, 512>}, {pipeline_mode = #tpu.pipeline_mode<synchronous>, transform_indices = @transform_7, window_bounds = array<i64: 1, 512>}, {pipeline_mode = #tpu.pipeline_mode<synchronous>, transform_indices = @transform_8, window_bounds = array<i64: 512, 1024>}, {pipeline_mode = #tpu.pipeline_mode<synchronous>, transform_indices = @transform_9, window_bounds = array<i64: 1, 1024>}, {pipeline_mode = #tpu.pipeline_mode<synchronous>, transform_indices = @transform_10, window_bounds = array<i64: 512, 512>}, {pipeline_mode = #tpu.pipeline_mode<synchronous>, transform_indices = @transform_11, window_bounds = array<i64: 1, 512>}, {pipeline_mode = #tpu.pipeline_mode<synchronous>, transform_indices = @transform_12, window_bounds = array<i64: 512, 128>}, {pipeline_mode = #tpu.pipeline_mode<synchronous>, transform_indices = @transform_13, window_bounds = array<i64: 1, 128>}, {pipeline_mode = #tpu.pipeline_mode<synchronous>, transform_indices = @transform_14, window_bounds = array<i64: 2, 128>}]} {
    %c0_i32 = arith.constant 0 : i32
    %0 = arith.cmpi eq, %arg1, %c0_i32 : i32
    %1 = arith.extui %0 : i1 to i32
    %c0_i32_0 = arith.constant 0 : i32
    %2 = arith.cmpi ne, %1, %c0_i32_0 : i32
    scf.if %2 {
      %cst_15 = arith.constant 0.000000e+00 : f32
      %22 = vector.broadcast %cst_15 : f32 to vector<1x128xf32>
      %c0_16 = arith.constant 0 : index
      %c0_17 = arith.constant 0 : index
      %23 = vector.load %arg17[%c0_16, %c0_17] : memref<1x128xf32, #tpu.memory_space<vmem>>, vector<1x128xf32>
      tpu.vector_store %arg17[%c0_16, %c0_17], %22 {strides = array<i32>} : memref<1x128xf32, #tpu.memory_space<vmem>>, vector<1x128xf32>,
    } else {
    }
    %c0 = arith.constant 0 : index
    %c0_1 = arith.constant 0 : index
    %c0_2 = arith.constant 0 : index
    %3 = vector.load %arg2[%c0, %c0_1, %c0_2] : memref<1x256x147xbf16, #tpu.memory_space<vmem>>, vector<1x256x147xbf16>
    %4 = vector.shape_cast %3 : vector<1x256x147xbf16> to vector<256x147xbf16>
    %c0_3 = arith.constant 0 : index
    %c0_4 = arith.constant 0 : index
    %5 = vector.load %arg3[%c0_3, %c0_4] : memref<147x128xbf16, #tpu.memory_space<vmem>>, vector<147x128xbf16>
    %cst = arith.constant dense<0.000000e+00> : vector<256x128xf32>
    %6 = tpu.matmul %4, %5, %cst {dimension_numbers = #tpu.dot_dimension_numbers<[1], [0], [0], [1], [0, 0, 1, 1], [], []>} : vector<256x147xbf16>, vector<147x128xbf16>, vector<256x128xf32> -> vector<256x128xf32>
    %cst_5 = arith.constant 0.000000e+00 : f32
    %7 = vector.broadcast %cst_5 : f32 to vector<256x128xf32>
    %8 = arith.maximumf %6, %7 : vector<256x128xf32>
    %c0_6 = arith.constant 0 : index
    %c0_7 = arith.constant 0 : index
    %9 = vector.load %arg17[%c0_6, %c0_7] : memref<1x128xf32, #tpu.memory_space<vmem>>, vector<1x128xf32>
    %cst_8 = arith.constant dense<0.000000e+00> : vector<128xf32>
    %10 = vector.multi_reduction <add>, %8, %cst_8 [0] : vector<256x128xf32> to vector<128xf32>
    %11 = vector.shape_cast %10 : vector<128xf32> to vector<1x128xf32>
    %12 = arith.addf %9, %11 : vector<1x128xf32>
    %c0_9 = arith.constant 0 : index
    %c0_10 = arith.constant 0 : index
    %13 = vector.load %arg17[%c0_9, %c0_10] : memref<1x128xf32, #tpu.memory_space<vmem>>, vector<1x128xf32>
    tpu.vector_store %arg17[%c0_9, %c0_10], %12 {strides = array<i32>} : memref<1x128xf32, #tpu.memory_space<vmem>>, vector<1x128xf32>,
    %c0_i32_11 = arith.constant 0 : i32
    %14 = arith.cmpi eq, %arg1, %c0_i32_11 : i32
    %15 = arith.extui %14 : i1 to i32
    %c0_i32_12 = arith.constant 0 : i32
    %16 = arith.cmpi ne, %15, %c0_i32_12 : i32
    scf.if %16 {
      %c0_15 = arith.constant 0 : index
      %c0_16 = arith.constant 0 : index
      %22 = vector.load %arg17[%c0_15, %c0_16] : memref<1x128xf32, #tpu.memory_space<vmem>>, vector<1x128xf32>
      %cst_17 = arith.constant 3.906250e-03 : f32
      %23 = vector.broadcast %cst_17 : f32 to vector<1x128xf32>
      %24 = arith.mulf %22, %23 : vector<1x128xf32>
      %25 = arith.index_cast %arg0 : i32 to index
      %c0_18 = arith.constant 0 : index
      %c0_19 = arith.constant 0 : index
      %26 = vector.load %arg18[%25, %c0_18, %c0_19] : memref<4x1x128xf32, #tpu.memory_space<vmem>>, vector<1x1x128xf32>
      %27 = vector.shape_cast %26 : vector<1x1x128xf32> to vector<1x128xf32>
      %28 = vector.shape_cast %24 : vector<1x128xf32> to vector<1x1x128xf32>
      tpu.vector_store %arg18[%25, %c0_18, %c0_19], %28 {strides = array<i32>} : memref<4x1x128xf32, #tpu.memory_space<vmem>>, vector<1x1x128xf32>,
    } else {
    }
    %c3_i32 = arith.constant 3 : i32
    %17 = arith.cmpi eq, %arg0, %c3_i32 : i32
    %c0_i32_13 = arith.constant 0 : i32
    %18 = arith.cmpi eq, %arg1, %c0_i32_13 : i32
    %19 = arith.andi %17, %18 : i1
    %20 = arith.extui %19 : i1 to i32
    %c0_i32_14 = arith.constant 0 : i32
    %21 = arith.cmpi ne, %20, %c0_i32_14 : i32
    scf.if %21 {
      %c0_15 = arith.constant 0 : index
      %c0_16 = arith.constant 0 : index
      %c0_17 = arith.constant 0 : index
      %22 = vector.load %arg18[%c0_15, %c0_16, %c0_17] : memref<4x1x128xf32, #tpu.memory_space<vmem>>, vector<1x1x128xf32>
      %23 = vector.shape_cast %22 : vector<1x1x128xf32> to vector<1x128xf32>
      %c1 = arith.constant 1 : index
      %c0_18 = arith.constant 0 : index
      %c0_19 = arith.constant 0 : index
      %24 = vector.load %arg18[%c1, %c0_18, %c0_19] : memref<4x1x128xf32, #tpu.memory_space<vmem>>, vector<1x1x128xf32>
      %25 = vector.shape_cast %24 : vector<1x1x128xf32> to vector<1x128xf32>
      %c2 = arith.constant 2 : index
      %c0_20 = arith.constant 0 : index
      %c0_21 = arith.constant 0 : index
      %26 = vector.load %arg18[%c2, %c0_20, %c0_21] : memref<4x1x128xf32, #tpu.memory_space<vmem>>, vector<1x1x128xf32>
      %27 = vector.shape_cast %26 : vector<1x1x128xf32> to vector<1x128xf32>
      %c3 = arith.constant 3 : index
      %c0_22 = arith.constant 0 : index
      %c0_23 = arith.constant 0 : index
      %28 = vector.load %arg18[%c3, %c0_22, %c0_23] : memref<4x1x128xf32, #tpu.memory_space<vmem>>, vector<1x1x128xf32>
      %29 = vector.shape_cast %28 : vector<1x1x128xf32> to vector<1x128xf32>
      %30 = tpu.concatenate %23, %25, %27, %29 in 0 : vector<1x128xf32>, vector<1x128xf32>, vector<1x128xf32>, vector<1x128xf32> -> vector<4x128xf32>
      %31 = arith.truncf %30 : vector<4x128xf32> to vector<4x128xbf16>
      %c0_24 = arith.constant 0 : index
      %c0_25 = arith.constant 0 : index
      %32 = vector.load %arg4[%c0_24, %c0_25] : memref<128x2048xbf16, #tpu.memory_space<vmem>>, vector<128x2048xbf16>
      %cst_26 = arith.constant dense<0.000000e+00> : vector<4x2048xf32>
      %33 = tpu.matmul %31, %32, %cst_26 {dimension_numbers = #tpu.dot_dimension_numbers<[1], [0], [0], [1], [0, 0, 1, 1], [], []>} : vector<4x128xbf16>, vector<128x2048xbf16>, vector<4x2048xf32> -> vector<4x2048xf32>
      %c0_27 = arith.constant 0 : index
      %c0_28 = arith.constant 0 : index
      %34 = vector.load %arg5[%c0_27, %c0_28] : memref<1x2048xf32, #tpu.memory_space<vmem>>, vector<1x2048xf32>
      %35 = vector.broadcast %34 : vector<1x2048xf32> to vector<4x2048xf32>
      %36 = arith.addf %33, %35 : vector<4x2048xf32>
      %cst_29 = arith.constant 0.000000e+00 : f32
      %37 = vector.broadcast %cst_29 : f32 to vector<4x2048xf32>
      %38 = arith.maximumf %36, %37 : vector<4x2048xf32>
      %39 = arith.truncf %38 : vector<4x2048xf32> to vector<4x2048xbf16>
      %c0_30 = arith.constant 0 : index
      %c0_31 = arith.constant 0 : index
      %40 = vector.load %arg6[%c0_30, %c0_31] : memref<2048x512xbf16, #tpu.memory_space<vmem>>, vector<2048x512xbf16>
      %cst_32 = arith.constant dense<0.000000e+00> : vector<4x512xf32>
      %41 = tpu.matmul %39, %40, %cst_32 {dimension_numbers = #tpu.dot_dimension_numbers<[1], [0], [0], [1], [0, 0, 1, 1], [], []>} : vector<4x2048xbf16>, vector<2048x512xbf16>, vector<4x512xf32> -> vector<4x512xf32>
      %c0_33 = arith.constant 0 : index
      %c0_34 = arith.constant 0 : index
      %42 = vector.load %arg7[%c0_33, %c0_34] : memref<1x512xf32, #tpu.memory_space<vmem>>, vector<1x512xf32>
      %43 = vector.broadcast %42 : vector<1x512xf32> to vector<4x512xf32>
      %44 = arith.addf %41, %43 : vector<4x512xf32>
      %45 = vector.extract_strided_slice %44 {offsets = [0, 0], sizes = [2, 512], strides = [1, 1]} : vector<4x512xf32> to vector<2x512xf32>
      %46 = arith.truncf %45 : vector<2x512xf32> to vector<2x512xbf16>
      %47 = vector.extract_strided_slice %44 {offsets = [2, 0], sizes = [2, 512], strides = [1, 1]} : vector<4x512xf32> to vector<2x512xf32>
      %48 = arith.truncf %47 : vector<2x512xf32> to vector<2x512xbf16>
      %c0_35 = arith.constant 0 : index
      %c0_36 = arith.constant 0 : index
      %49 = vector.load %arg8[%c0_35, %c0_36] : memref<512x512xbf16, #tpu.memory_space<vmem>>, vector<512x512xbf16>
      %cst_37 = arith.constant dense<0.000000e+00> : vector<2x512xf32>
      %50 = tpu.matmul %48, %49, %cst_37 {dimension_numbers = #tpu.dot_dimension_numbers<[1], [0], [0], [1], [0, 0, 1, 1], [], []>} : vector<2x512xbf16>, vector<512x512xbf16>, vector<2x512xf32> -> vector<2x512xf32>
      %c0_38 = arith.constant 0 : index
      %c0_39 = arith.constant 0 : index
      %51 = vector.load %arg9[%c0_38, %c0_39] : memref<1x512xf32, #tpu.memory_space<vmem>>, vector<1x512xf32>
      %52 = vector.broadcast %51 : vector<1x512xf32> to vector<2x512xf32>
      %53 = arith.addf %50, %52 : vector<2x512xf32>
      %cst_40 = arith.constant 1.250000e-01 : f32
      %54 = vector.broadcast %cst_40 : f32 to vector<2x512xf32>
      %55 = arith.mulf %53, %54 : vector<2x512xf32>
      %c0_41 = arith.constant 0 : index
      %c0_42 = arith.constant 0 : index
      %56 = vector.load %arg10[%c0_41, %c0_42] : memref<512x1024xbf16, #tpu.memory_space<vmem>>, vector<512x1024xbf16>
      %cst_43 = arith.constant dense<0.000000e+00> : vector<2x1024xf32>
      %57 = tpu.matmul %46, %56, %cst_43 {dimension_numbers = #tpu.dot_dimension_numbers<[1], [0], [0], [1], [0, 0, 1, 1], [], []>} : vector<2x512xbf16>, vector<512x1024xbf16>, vector<2x1024xf32> -> vector<2x1024xf32>
      %c0_44 = arith.constant 0 : index
      %c0_45 = arith.constant 0 : index
      %58 = vector.load %arg11[%c0_44, %c0_45] : memref<1x1024xf32, #tpu.memory_space<vmem>>, vector<1x1024xf32>
      %59 = vector.broadcast %58 : vector<1x1024xf32> to vector<2x1024xf32>
      %60 = arith.addf %57, %59 : vector<2x1024xf32>
      %61 = vector.extract_strided_slice %60 {offsets = [0, 0], sizes = [2, 512], strides = [1, 1]} : vector<2x1024xf32> to vector<2x512xf32>
      %62 = vector.extract_strided_slice %60 {offsets = [0, 512], sizes = [2, 512], strides = [1, 1]} : vector<2x1024xf32> to vector<2x512xf32>
      %63 = vector.shape_cast %55 : vector<2x512xf32> to vector<2x8x64xf32>
      %64 = arith.truncf %63 : vector<2x8x64xf32> to vector<2x8x64xbf16>
      %65 = vector.shape_cast %61 : vector<2x512xf32> to vector<2x8x64xf32>
      %66 = arith.truncf %65 : vector<2x8x64xf32> to vector<2x8x64xbf16>
      %67 = vector.shape_cast %62 : vector<2x512xf32> to vector<2x8x64xf32>
      %68 = arith.truncf %67 : vector<2x8x64xf32> to vector<2x8x64xbf16>
      "tpu.trace_start"() <{level = 10 : i32, message = "lhd,mhd->hlm"}> : () -> ()
      %cst_46 = arith.constant dense<0.000000e+00> : vector<8x2x2xf32>
      %69 = tpu.matmul %64, %66, %cst_46 {dimension_numbers = #tpu.dot_dimension_numbers<[2], [2], [0], [0], [0, 1, 0, 0, 1, 0], [1], [1]>} : vector<2x8x64xbf16>, vector<2x8x64xbf16>, vector<8x2x2xf32> -> vector<8x2x2xf32>
      "tpu.trace_stop"() : () -> ()
      %cst_47 = arith.constant dense<0xFF800000> : vector<8x2xf32>
      %70 = vector.multi_reduction <maximumf>, %69, %cst_47 [2] : vector<8x2x2xf32> to vector<8x2xf32>
      %71 = vector.shape_cast %70 : vector<8x2xf32> to vector<8x2x1xf32>
      %72 = vector.broadcast %71 : vector<8x2x1xf32> to vector<8x2x2xf32>
      %73 = arith.subf %69, %72 : vector<8x2x2xf32>
      %74 = math.exp %73 : vector<8x2x2xf32>
      %cst_48 = arith.constant dense<0.000000e+00> : vector<8x2xf32>
      %75 = vector.multi_reduction <add>, %74, %cst_48 [2] : vector<8x2x2xf32> to vector<8x2xf32>
      %76 = vector.shape_cast %75 : vector<8x2xf32> to vector<8x2x1xf32>
      %77 = tpu.reciprocal %76 {approx = true} : vector<8x2x1xf32> -> vector<8x2x1xf32>
      %78 = vector.broadcast %77 : vector<8x2x1xf32> to vector<8x2x2xf32>
      %79 = arith.mulf %74, %78 : vector<8x2x2xf32>
      %80 = arith.truncf %79 : vector<8x2x2xf32> to vector<8x2x2xbf16>
      "tpu.trace_start"() <{level = 10 : i32, message = "hlm,mhd->lhd"}> : () -> ()
      %cst_49 = arith.constant dense<0.000000e+00> : vector<8x64x2xf32>
      %81 = tpu.matmul %68, %80, %cst_49 {dimension_numbers = #tpu.dot_dimension_numbers<[0], [2], [2], [1], [0, 1, 0, 2, 1, 1], [1], [0]>} : vector<2x8x64xbf16>, vector<8x2x2xbf16>, vector<8x64x2xf32> -> vector<8x64x2xf32>
      %82 = tpu.transpose %81, [2, 0, 1] : vector<8x64x2xf32> -> vector<2x8x64xf32>
      "tpu.trace_stop"() : () -> ()
      %83 = vector.shape_cast %82 : vector<2x8x64xf32> to vector<2x512xf32>
      %84 = arith.truncf %83 : vector<2x512xf32> to vector<2x512xbf16>
      %c0_50 = arith.constant 0 : index
      %c0_51 = arith.constant 0 : index
      %85 = vector.load %arg12[%c0_50, %c0_51] : memref<512x512xbf16, #tpu.memory_space<vmem>>, vector<512x512xbf16>
      %cst_52 = arith.constant dense<0.000000e+00> : vector<2x512xf32>
      %86 = tpu.matmul %84, %85, %cst_52 {dimension_numbers = #tpu.dot_dimension_numbers<[1], [0], [0], [1], [0, 0, 1, 1], [], []>} : vector<2x512xbf16>, vector<512x512xbf16>, vector<2x512xf32> -> vector<2x512xf32>
      %c0_53 = arith.constant 0 : index
      %c0_54 = arith.constant 0 : index
      %87 = vector.load %arg13[%c0_53, %c0_54] : memref<1x512xf32, #tpu.memory_space<vmem>>, vector<1x512xf32>
      %88 = vector.broadcast %87 : vector<1x512xf32> to vector<2x512xf32>
      %89 = arith.addf %86, %88 : vector<2x512xf32>
      %90 = arith.truncf %89 : vector<2x512xf32> to vector<2x512xbf16>
      %c0_55 = arith.constant 0 : index
      %c0_56 = arith.constant 0 : index
      %91 = vector.load %arg14[%c0_55, %c0_56] : memref<512x128xbf16, #tpu.memory_space<vmem>>, vector<512x128xbf16>
      %cst_57 = arith.constant dense<0.000000e+00> : vector<2x128xf32>
      %92 = tpu.matmul %90, %91, %cst_57 {dimension_numbers = #tpu.dot_dimension_numbers<[1], [0], [0], [1], [0, 0, 1, 1], [], []>} : vector<2x512xbf16>, vector<512x128xbf16>, vector<2x128xf32> -> vector<2x128xf32>
      %c0_58 = arith.constant 0 : index
      %c0_59 = arith.constant 0 : index
      %93 = vector.load %arg15[%c0_58, %c0_59] : memref<1x128xf32, #tpu.memory_space<vmem>>, vector<1x128xf32>
      %94 = vector.broadcast %93 : vector<1x128xf32> to vector<2x128xf32>
      %95 = arith.addf %92, %94 : vector<2x128xf32>
      %c0_60 = arith.constant 0 : index
      %c0_61 = arith.constant 0 : index
      %96 = vector.load %arg16[%c0_60, %c0_61] : memref<2x128xf32, #tpu.memory_space<vmem>>, vector<2x128xf32>
      tpu.vector_store %arg16[%c0_60, %c0_61], %95 {strides = array<i32>} : memref<2x128xf32, #tpu.memory_space<vmem>>, vector<2x128xf32>,
    } else {
    }
    return
  }
  func.func @transform_0(%arg0: i32, %arg1: i32) -> (i32, i32, i32) {
    %c0_i32 = arith.constant 0 : i32
    %c0_i32_0 = arith.constant 0 : i32
    return %arg0, %arg1, %c0_i32 : i32, i32, i32
  }
  func.func @transform_1(%arg0: i32, %arg1: i32) -> (i32, i32) {
    %c0_i32 = arith.constant 0 : i32
    %c0_i32_0 = arith.constant 0 : i32
    %c0_i32_1 = arith.constant 0 : i32
    return %c0_i32, %c0_i32_0 : i32, i32
  }
  func.func @transform_2(%arg0: i32, %arg1: i32) -> (i32, i32) {
    %c0_i32 = arith.constant 0 : i32
    %c0_i32_0 = arith.constant 0 : i32
    %c0_i32_1 = arith.constant 0 : i32
    return %c0_i32, %c0_i32_0 : i32, i32
  }
  func.func @transform_3(%arg0: i32, %arg1: i32) -> (i32, i32) {
    %c0_i32 = arith.constant 0 : i32
    %c0_i32_0 = arith.constant 0 : i32
    %c0_i32_1 = arith.constant 0 : i32
    return %c0_i32, %c0_i32_0 : i32, i32
  }
  func.func @transform_4(%arg0: i32, %arg1: i32) -> (i32, i32) {
    %c0_i32 = arith.constant 0 : i32
    %c0_i32_0 = arith.constant 0 : i32
    %c0_i32_1 = arith.constant 0 : i32
    return %c0_i32, %c0_i32_0 : i32, i32
  }
  func.func @transform_5(%arg0: i32, %arg1: i32) -> (i32, i32) {
    %c0_i32 = arith.constant 0 : i32
    %c0_i32_0 = arith.constant 0 : i32
    %c0_i32_1 = arith.constant 0 : i32
    return %c0_i32, %c0_i32_0 : i32, i32
  }
  func.func @transform_6(%arg0: i32, %arg1: i32) -> (i32, i32) {
    %c0_i32 = arith.constant 0 : i32
    %c0_i32_0 = arith.constant 0 : i32
    %c0_i32_1 = arith.constant 0 : i32
    return %c0_i32, %c0_i32_0 : i32, i32
  }
  func.func @transform_7(%arg0: i32, %arg1: i32) -> (i32, i32) {
    %c0_i32 = arith.constant 0 : i32
    %c0_i32_0 = arith.constant 0 : i32
    %c0_i32_1 = arith.constant 0 : i32
    return %c0_i32, %c0_i32_0 : i32, i32
  }
  func.func @transform_8(%arg0: i32, %arg1: i32) -> (i32, i32) {
    %c0_i32 = arith.constant 0 : i32
    %c0_i32_0 = arith.constant 0 : i32
    %c0_i32_1 = arith.constant 0 : i32
    return %c0_i32, %c0_i32_0 : i32, i32
  }
  func.func @transform_9(%arg0: i32, %arg1: i32) -> (i32, i32) {
    %c0_i32 = arith.constant 0 : i32
    %c0_i32_0 = arith.constant 0 : i32
    %c0_i32_1 = arith.constant 0 : i32
    return %c0_i32, %c0_i32_0 : i32, i32
  }
  func.func @transform_10(%arg0: i32, %arg1: i32) -> (i32, i32) {
    %c0_i32 = arith.constant 0 : i32
    %c0_i32_0 = arith.constant 0 : i32
    %c0_i32_1 = arith.constant 0 : i32
    return %c0_i32, %c0_i32_0 : i32, i32
  }
  func.func @transform_11(%arg0: i32, %arg1: i32) -> (i32, i32) {
    %c0_i32 = arith.constant 0 : i32
    %c0_i32_0 = arith.constant 0 : i32
    %c0_i32_1 = arith.constant 0 : i32
    return %c0_i32, %c0_i32_0 : i32, i32
  }
  func.func @transform_12(%arg0: i32, %arg1: i32) -> (i32, i32) {
    %c0_i32 = arith.constant 0 : i32
    %c0_i32_0 = arith.constant 0 : i32
    %c0_i32_1 = arith.constant 0 : i32
    return %c0_i32, %c0_i32_0 : i32, i32
  }
  func.func @transform_13(%arg0: i32, %arg1: i32) -> (i32, i32) {
    %c0_i32 = arith.constant 0 : i32
    %c0_i32_0 = arith.constant 0 : i32
    %c0_i32_1 = arith.constant 0 : i32
    return %c0_i32, %c0_i32_0 : i32, i32
  }
  func.func @transform_14(%arg0: i32, %arg1: i32) -> (i32, i32) {
    %c0_i32 = arith.constant 0 : i32
    %c0_i32_0 = arith.constant 0 : i32
    %c0_i32_1 = arith.constant 0 : i32
    return %c0_i32, %c0_i32_0 : i32, i32
  }
}

</mosaic_0001>

<bundles_post_ra>
// kernel: smda_net_video_forward.1
= control target key start
LH: loop header
LB: loop body
LE: loop exit
PB: predicated region body
PF: predicated region fallthrough
CT: control target
= control target key end

     0   :  { %19 = vsyncpa [#allocation5], 0  ;;  %s19517_s29 = smov 0   ;;  %s19519_s30 = smov 0   ;;  %s24566_s0 = inlined_call_operand.vmem [shape: bf16[4,256,147], index: 0, kind: input, shape index: {}]   ;;  %s24567_s1 = inlined_call_operand.vmem [shape: bf16[147,128], index: 1, kind: input, shape index: {}]   ;;  %s24568_s2 = inlined_call_operand.vmem [shape: bf16[128,2048], index: 2, kind: input, shape index: {}]   ;;  %s24569_s3 = inlined_call_operand.vmem [shape: f32[1,2048], index: 3, kind: input, shape index: {}]   ;;  %s24570_s4 = inlined_call_operand.vmem [shape: bf16[2048,512], index: 4, kind: input, shape index: {}]   ;;  %s24571_s5 = inlined_call_operand.vmem [shape: f32[1,512], index: 5, kind: input, shape index: {}]   ;;  %s24572_s6 = inlined_call_operand.vmem [shape: bf16[512,512], index: 6, kind: input, shape index: {}]   ;;  %s24573_s7 = inlined_call_operand.vmem [shape: f32[1,512], index: 7, kind: input, shape index: {}]   ;;  %s24574_s8 = inlined_call_operand.vmem [shape: bf16[512,1024], index: 8, kind: input, shape index: {}]   ;;  %s24575_s9 = inlined_call_operand.vmem [shape: f32[1,1024], index: 9, kind: input, shape index: {}]   ;;  %s24576_s10 = inlined_call_operand.vmem [shape: bf16[512,512], index: 10, kind: input, shape index: {}]   ;;  %s24577_s11 = inlined_call_operand.vmem [shape: f32[1,512], index: 11, kind: input, shape index: {}]   ;;  %s24578_s12 = inlined_call_operand.vmem [shape: bf16[512,128], index: 12, kind: input, shape index: {}]   ;;  %s24579_s13 = inlined_call_operand.vmem [shape: f32[1,128], index: 13, kind: input, shape index: {}]   ;;  %s24580_s14 = inlined_call_operand.hbm [shape: f32[2,128], index: 14, kind: output, shape index: {}]  }
   0x1   :  { %s19521_s15 = smov 0  }
   0x2 LB: > { %s16316_s16 = sadd.s32 4294967295, %s19430_s15   ;;  %s37_s17 = sadd.s32 1, %s19426_s30  ;;  %s19430_s15 = sphi %s19521_s15, %s25_s15   ;;  %s19426_s30 = sphi %s19519_s30, %s24666_s30   ;;  %s19422_s29 = sphi %s19517_s29, %s24665_s29  }
   0x3   : > { %p39_p0 = scmp.ge.s32.totalorder %s37_s17, 4  ;;  %p16319_p1 = scmp.ge.s32.totalorder %s19430_s15, 1 }
   0x4   : > { %p428_p2 = scmp.lt.s32.totalorder %s19430_s15, 5 }
   0x5   : > { %s24668_s17 = smov (%p39_p0, %s37_s17), 0 }
   0x6   : > { %p429_p3 = pnand %p16319_p1, %p428_p2 }
   0x7   : > { %v18092_v0 = vld [vmem:[%s24567_s1] sm:$0xff] (!%p429_p3)   ;;  %v19432_v1 = vmov (!%p429_p3), 0   ;;  %v18093_v2 = vld [vmem:[%s24567_s1 + $0x8] sm:$0xff] (!%p429_p3)   ;;  %v18094_v3 = vld [vmem:[%s24567_s1 + $0x10] sm:$0xff] (!%p429_p3)   ;;  %p475_p4 = scmp.lt.s32.totalorder (!%p429_p3), %s19422_s29, 3  ;;  %vm743_vm0 = vcmask (!%p429_p3), 154624  }
   0x8   : > { %432 = sbr.rel (%p429_p3) target bundleno = 3930 (0xf5a), region = 76  ;;  %799 = vmatprep.subr.bf16.mxu0 (!%p429_p3), %v19432_v1  ;;  %17916 = vmatprep.subr.bf16.mxu1 (!%p429_p3), %v19432_v1  ;;  %v18095_v4 = vld [vmem:[%s24567_s1 + $0x18] sm:$0xff] (!%p429_p3)   ;;  %v18096_v6 = vld [vmem:[%s24567_s1 + $0x20] sm:$0xff] (!%p429_p3)   ;;  %v18097_v7 = vld [vmem:[%s24567_s1 + $0x28] sm:$0xff] (!%p429_p3)   ;;  %vm792_vm1 = vcmask (!%p429_p3), 1040384   ;;  %vm793_vm2 = vcmask (!%p429_p3), 1041408  }
   0x9   : > { %800 = vmatpush1.bf16.msra.mxu0 (!%p429_p3), %v18092_v0  ;;  %17926 = vmatpush1.bf16.msra.mxu1 (!%p429_p3), %v18092_v0  ;;  %v18098_v9 = vld [vmem:[%s24567_s1 + $0x30] sm:$0xff] (!%p429_p3)   ;;  %v18099_v10 = vld [vmem:[%s24567_s1 + $0x38] sm:$0xff] (!%p429_p3)   ;;  %v19433_v11 = vmov (!%p429_p3), 65535   ;;  %v18100_v13 = vld [vmem:[%s24567_s1 + $0x40] sm:$0xff] (!%p429_p3)   ;;  %v19434_v47 = vmov (!%p429_p3), 0.0   ;;  %p1039_p5 = scmp.eq.s32.totalorder (!%p429_p3), %s19422_s29, 3 }
   0xa   : > { %801 = vmatprep.subr.bf16.mxu0 (!%p429_p3), %v19432_v1  ;;  %17917 = vmatprep.subr.bf16.mxu1 (!%p429_p3), %v19432_v1  ;;  %v794_v12 = vsel (!%p429_p3), %vm792_vm1, 4294967295, %v19433_v11  ;;  %v18101_v14 = vld [vmem:[%s24567_s1 + $0x48] ss:$0 sps:$4 sm:$0x33] (!%p429_p3)   ;;  %490 = vst [vmem:[#allocation2] sm:$0x1] (!%p429_p3), %v19434_v47 }
   0xb   : > { %v795_v15 = vsel (!%p429_p3), %vm793_vm2, %v794_v12, 0 }
   0xc   : > { %v797_v16 = vand.u32 (!%p429_p3), %v18101_v14, %v795_v15 }
   0xd   : > { %802 = vmatpush1.bf16.msra.mxu0 (!%p429_p3), %v18093_v2  ;;  %17927 = vmatpush1.bf16.msra.mxu1 (!%p429_p3), %v18093_v2 }
   0xe   : > { %803 = vmatprep.subr.bf16.mxu0 (!%p429_p3), %v19432_v1  ;;  %17918 = vmatprep.subr.bf16.mxu1 (!%p429_p3), %v19432_v1 }
   0xf   : > { %s476_s24 = scalar_select %p475_p4, %s19422_s29, 3 }
  0x11   : > { %804 = vmatpush1.bf16.msra.mxu0 %v18094_v3  ;;  %17928 = vmatpush1.bf16.msra.mxu1 %v18094_v3  ;;  %s17614_s27 = sshll.u32 %s476_s24, 8 }
  0x12   : > { %805 = vmatprep.subr.bf16.mxu0 %v19432_v1  ;;  %s19555_s19 = scalar_lea.vmem %s24566_s0, %s17614_s27  ;;  %17919 = vmatprep.subr.bf16.mxu1 %v19432_v1 }
  0x13   : > { %v18104_v5 = vld [vmem:[%s19555_s19 + $0x4] ss:$8 sps:$4 sm:$0xff]   ;;  %v18102_v17 = vld [vmem:[%s19555_s19] ss:$8 sps:$4 sm:$0xff]   ;;  %v18105_v19 = vld [vmem:[%s19555_s19 + $0x14] ss:$8 sps:$4 sm:$0xff]  }
  0x14   : > { %16364 = vmatprep.mubr.msk.bf16.mxu0 %vm743_vm0, %v18104_v5  ;;  %v18116_v8 = vld [vmem:[%s19555_s19 + $0x84] ss:$8 sps:$4 sm:$0xff]   ;;  %v18114_v18 = vld [vmem:[%s19555_s19 + $0x80] ss:$8 sps:$4 sm:$0xff]   ;;  %v18120_v20 = vld [vmem:[%s19555_s19 + $0x94] ss:$8 sps:$4 sm:$0xff]  }
  0x15   : > { %806 = vmatpush1.bf16.msra.mxu0 %v18095_v4  ;;  %17929 = vmatpush1.bf16.msra.mxu1 %v18095_v4  ;;  %v18107_v21 = vld [vmem:[%s19555_s19 + $0x10] ss:$8 sps:$4 sm:$0xff]   ;;  %v18108_v23 = vld [vmem:[%s19555_s19 + $0x24] ss:$8 sps:$4 sm:$0xff]   ;;  %v18110_v25 = vld [vmem:[%s19555_s19 + $0x20] ss:$8 sps:$4 sm:$0xff]  }
  0x16   : > { %807 = vmatprep.subr.bf16.mxu0 %v19432_v1  ;;  %17920 = vmatprep.subr.bf16.mxu1 %v19432_v1  ;;  %v18122_v22 = vld [vmem:[%s19555_s19 + $0x90] ss:$8 sps:$4 sm:$0xff]   ;;  %v18126_v24 = vld [vmem:[%s19555_s19 + $0xa4] ss:$8 sps:$4 sm:$0xff]   ;;  %v18128_v26 = vld [vmem:[%s19555_s19 + $0xa0] ss:$8 sps:$4 sm:$0xff]  }
  0x17   : > { %16372 = vmatprep.mubr.msk.bf16.mxu1 %vm743_vm0, %v18116_v8  ;;  %v18111_v27 = vld [vmem:[%s19555_s19 + $0x34] ss:$8 sps:$4 sm:$0xff]   ;;  %v18113_v29 = vld [vmem:[%s19555_s19 + $0x30] ss:$8 sps:$4 sm:$0xff]   ;;  %v18117_v31 = vld [vmem:[%s19555_s19 + $0x44] ss:$8 sps:$4 sm:$0xff]  }
  0x18   : > { %v18132_v28 = vld [vmem:[%s19555_s19 + $0xb4] ss:$8 sps:$4 sm:$0xff]   ;;  %v18134_v30 = vld [vmem:[%s19555_s19 + $0xb0] ss:$8 sps:$4 sm:$0xff]   ;;  %v18138_v32 = vld [vmem:[%s19555_s19 + $0xc4] ss:$8 sps:$4 sm:$0xff]  }
  0x19   : > { %808 = vmatpush1.bf16.msra.mxu0 %v18096_v6  ;;  %17930 = vmatpush1.bf16.msra.mxu1 %v18096_v6  ;;  %v18119_v33 = vld [vmem:[%s19555_s19 + $0x40] ss:$8 sps:$4 sm:$0xff]   ;;  %v18123_v35 = vld [vmem:[%s19555_s19 + $0x54] ss:$8 sps:$4 sm:$0xff]   ;;  %v18125_v37 = vld [vmem:[%s19555_s19 + $0x50] ss:$8 sps:$4 sm:$0xff]  }
  0x1a   : > { %809 = vmatprep.subr.bf16.mxu0 %v19432_v1  ;;  %17921 = vmatprep.subr.bf16.mxu1 %v19432_v1  ;;  %v18140_v34 = vld [vmem:[%s19555_s19 + $0xc0] ss:$8 sps:$4 sm:$0xff]   ;;  %v18141_v36 = vld [vmem:[%s19555_s19 + $0xd4] ss:$8 sps:$4 sm:$0xff]   ;;  %v18143_v38 = vld [vmem:[%s19555_s19 + $0xd0] ss:$8 sps:$4 sm:$0xff]  }
  0x1b   : > { %v18129_v39 = vld [vmem:[%s19555_s19 + $0x64] ss:$8 sps:$4 sm:$0xff]   ;;  %v18131_v41 = vld [vmem:[%s19555_s19 + $0x60] ss:$8 sps:$4 sm:$0xff]   ;;  %v18135_v43 = vld [vmem:[%s19555_s19 + $0x74] ss:$8 sps:$4 sm:$0xff]  }
  0x1c   : > { %v18144_v40 = vld [vmem:[%s19555_s19 + $0xe4] ss:$8 sps:$4 sm:$0xff]   ;;  %v18146_v42 = vld [vmem:[%s19555_s19 + $0xe0] ss:$8 sps:$4 sm:$0xff]   ;;  %v18147_v44 = vld [vmem:[%s19555_s19 + $0xf4] ss:$8 sps:$4 sm:$0xff]  }
  0x1d   : > { %810 = vmatpush1.bf16.msra.mxu0 %v18097_v7  ;;  %17931 = vmatpush1.bf16.msra.mxu1 %v18097_v7  ;;  %v18137_v45 = vld [vmem:[%s19555_s19 + $0x70] ss:$8 sps:$4 sm:$0xff]  }
  0x1e   : > { %811 = vmatprep.subr.bf16.mxu0 %v19432_v1  ;;  %17922 = vmatprep.subr.bf16.mxu1 %v19432_v1  ;;  %v18149_v46 = vld [vmem:[%s19555_s19 + $0xf0] ss:$8 sps:$4 sm:$0xff]   ;;  %s1037_s19 = scalar_lea.vmem [#allocation3], %s19422_s29 }
  0x21   : > { %812 = vmatpush1.bf16.msra.mxu0 %v18098_v9  ;;  %17932 = vmatpush1.bf16.msra.mxu1 %v18098_v9 }
  0x22   : > { %813 = vmatprep.subr.bf16.mxu0 %v19432_v1  ;;  %17923 = vmatprep.subr.bf16.mxu1 %v19432_v1 }
  0x25   : > { %814 = vmatpush1.bf16.msra.mxu0 %v18099_v10  ;;  %17933 = vmatpush1.bf16.msra.mxu1 %v18099_v10 }
  0x26   : > { %815 = vmatprep.subr.bf16.mxu0 %v19432_v1  ;;  %17924 = vmatprep.subr.bf16.mxu1 %v19432_v1 }
  0x29   : > { %816 = vmatpush1.bf16.msra.mxu0 %v18100_v13  ;;  %17934 = vmatpush1.bf16.msra.mxu1 %v18100_v13 }
  0x2a   : > { %817 = vmatprep.subr.bf16.mxu0 %v19432_v1  ;;  %17925 = vmatprep.subr.bf16.mxu1 %v19432_v1 }
  0x2d   : > { %818 = vmatpush1.bf16.msra.mxu0 %v797_v16  ;;  %17935 = vmatpush1.bf16.msra.mxu1 %v797_v16 }
  0x30   : > { %832 = vmatmul.mubr.bf16.vlgmr.msra.gmra.mrb[0].mxu0 %v18102_v17  ;;  %896 = vmatmul.mubr.bf16.vlgmr.msra.gmra.mrb[0].mxu1 %v18114_v18 }
  0x31   : > { %16365 = vmatprep.mubr.msk.bf16.mxu0 %vm743_vm0, %v18105_v19  ;;  %16373 = vmatprep.mubr.msk.bf16.mxu1 %vm743_vm0, %v18120_v20 }
  0x38   : > { %840 = vmatmul.mubr.bf16.gmra.mrb[4].mxu0 %v18107_v21  ;;  %904 = vmatmul.mubr.bf16.gmra.mrb[4].mxu1 %v18122_v22 }
  0x39   : > { %16366 = vmatprep.mubr.msk.bf16.mxu0 %vm743_vm0, %v18108_v23  ;;  %16374 = vmatprep.mubr.msk.bf16.mxu1 %vm743_vm0, %v18126_v24 }
  0x40   : > { %848 = vmatmul.mubr.bf16.gmra.mrb[8].mxu0 %v18110_v25  ;;  %912 = vmatmul.mubr.bf16.gmra.mrb[8].mxu1 %v18128_v26 }
  0x41   : > { %16367 = vmatprep.mubr.msk.bf16.mxu0 %vm743_vm0, %v18111_v27  ;;  %16375 = vmatprep.mubr.msk.bf16.mxu1 %vm743_vm0, %v18132_v28 }
  0x48   : > { %856 = vmatmul.mubr.bf16.gmra.mrb[12].mxu0 %v18113_v29  ;;  %920 = vmatmul.mubr.bf16.gmra.mrb[12].mxu1 %v18134_v30 }
  0x49   : > { %16368 = vmatprep.mubr.msk.bf16.mxu0 %vm743_vm0, %v18117_v31  ;;  %16376 = vmatprep.mubr.msk.bf16.mxu1 %vm743_vm0, %v18138_v32 }
  0x50   : > { %864 = vmatmul.mubr.bf16.gmra.mrb[16].mxu0 %v18119_v33  ;;  %928 = vmatmul.mubr.bf16.gmra.mrb[16].mxu1 %v18140_v34 }
  0x51   : > { %16369 = vmatprep.mubr.msk.bf16.mxu0 %vm743_vm0, %v18123_v35  ;;  %16377 = vmatprep.mubr.msk.bf16.mxu1 %vm743_vm0, %v18141_v36 }
  0x58   : > { %872 = vmatmul.mubr.bf16.gmra.mrb[20].mxu0 %v18125_v37  ;;  %936 = vmatmul.mubr.bf16.gmra.mrb[20].mxu1 %v18143_v38 }
  0x59   : > { %16370 = vmatprep.mubr.msk.bf16.mxu0 %vm743_vm0, %v18129_v39  ;;  %16378 = vmatprep.mubr.msk.bf16.mxu1 %vm743_vm0, %v18144_v40 }
  0x60   : > { %880 = vmatmul.mubr.bf16.gmra.mrb[24].mxu0 %v18131_v41  ;;  %944 = vmatmul.mubr.bf16.gmra.mrb[24].mxu1 %v18146_v42 }
  0x61   : > { %16371 = vmatprep.mubr.msk.bf16.mxu0 %vm743_vm0, %v18135_v43  ;;  %16379 = vmatprep.mubr.msk.bf16.mxu1 %vm743_vm0, %v18147_v44 }
  0x68   : > { %888 = vmatmul.mubr.bf16.gmra.mrb[28].mxu0 %v18137_v45  ;;  %952 = vmatmul.mubr.bf16.gmra.mrb[28].mxu1 %v18149_v46 }
 0x103   : > { %v833_v48 = vpop.f32.mrb[0].mxu0  ;;  %v19626_v49 = vpop.f32.mrb[0].mxu1 }
 0x104   : > { %v835_v50 = vpop.f32.mrb[1].mxu0  ;;  %v899_v51 = vpop.f32.mrb[1].mxu1  ;;  %v960_v54 = vmax.f32 %v833_v48, 0.0 }
 0x105   : > { %v836_v52 = vpop.f32.mrb[2].mxu0  ;;  %v19628_v53 = vpop.f32.mrb[2].mxu1 }
 0x106   : > { %v961_v55 = vmax.f32 %v836_v52, 0.0  ;;  %v838_v56 = vpop.f32.mrb[3].mxu0  ;;  %v902_v57 = vpop.f32.mrb[3].mxu1 }
 0x108   : > { %v993_v58 = vadd.f32 %v961_v55, %v960_v54 }
 0x10b   : > { %v841_v59 = vpop.f32.mrb[4].mxu0  ;;  %v19630_v60 = vpop.f32.mrb[4].mxu1 }
 0x10c   : > { %v962_v61 = vmax.f32 %v841_v59, 0.0  ;;  %v843_v62 = vpop.f32.mrb[5].mxu0  ;;  %v907_v63 = vpop.f32.mrb[5].mxu1 }
 0x10d   : > { %v844_v0 = vpop.f32.mrb[6].mxu0  ;;  %v19632_v1 = vpop.f32.mrb[6].mxu1 }
 0x10e   : > { %v994_v2 = vadd.f32 %v993_v58, %v962_v61  ;;  %v963_v3 = vmax.f32 %v844_v0, 0.0  ;;  %v846_v4 = vpop.f32.mrb[7].mxu0  ;;  %v910_v5 = vpop.f32.mrb[7].mxu1 }
 0x110   : > { %v995_v6 = vadd.f32 %v994_v2, %v963_v3 }
 0x113   : > { %v849_v7 = vpop.f32.mrb[8].mxu0  ;;  %v19634_v8 = vpop.f32.mrb[8].mxu1 }
 0x114   : > { %v964_v9 = vmax.f32 %v849_v7, 0.0  ;;  %v851_v10 = vpop.f32.mrb[9].mxu0  ;;  %v915_v11 = vpop.f32.mrb[9].mxu1 }
 0x115   : > { %v852_v12 = vpop.f32.mrb[10].mxu0  ;;  %v19636_v13 = vpop.f32.mrb[10].mxu1 }
 0x116   : > { %v996_v14 = vadd.f32 %v995_v6, %v964_v9  ;;  %v965_v15 = vmax.f32 %v852_v12, 0.0  ;;  %v854_v16 = vpop.f32.mrb[11].mxu0  ;;  %v918_v17 = vpop.f32.mrb[11].mxu1 }
 0x118   : > { %v997_v18 = vadd.f32 %v996_v14, %v965_v15 }
 0x11b   : > { %v857_v19 = vpop.f32.mrb[12].mxu0  ;;  %v19638_v20 = vpop.f32.mrb[12].mxu1 }
 0x11c   : > { %v966_v21 = vmax.f32 %v857_v19, 0.0  ;;  %v859_v22 = vpop.f32.mrb[13].mxu0  ;;  %v923_v23 = vpop.f32.mrb[13].mxu1 }
 0x11d   : > { %v860_v24 = vpop.f32.mrb[14].mxu0  ;;  %v19640_v25 = vpop.f32.mrb[14].mxu1  ;;  %v977_v23 = vmax.f32 %v19628_v53, 0.0 }
 0x11e   : > { %v998_v26 = vadd.f32 %v997_v18, %v966_v21  ;;  %v967_v27 = vmax.f32 %v860_v24, 0.0  ;;  %v862_v28 = vpop.f32.mrb[15].mxu0  ;;  %v926_v29 = vpop.f32.mrb[15].mxu1  ;;  %v976_v21 = vmax.f32 %v19626_v49, 0.0  ;;  %v983_v49 = vmax.f32 %v19640_v25, 0.0 }
 0x11f   : > { %v979_v28 = vmax.f32 %v19632_v1, 0.0 }
 0x120   : > { %v999_v30 = vadd.f32 %v998_v26, %v967_v27  ;;  %v978_v26 = vmax.f32 %v19630_v60, 0.0 }
 0x123   : > { %v865_v31 = vpop.f32.mrb[16].mxu0  ;;  %v19642_v32 = vpop.f32.mrb[16].mxu1 }
 0x124   : > { %v968_v33 = vmax.f32 %v865_v31, 0.0  ;;  %v867_v34 = vpop.f32.mrb[17].mxu0  ;;  %v931_v35 = vpop.f32.mrb[17].mxu1  ;;  %v984_v53 = vmax.f32 %v19642_v32, 0.0 }
 0x125   : > { %v868_v36 = vpop.f32.mrb[18].mxu0  ;;  %v932_v37 = vpop.f32.mrb[18].mxu1  ;;  %v982_v35 = vmax.f32 %v19638_v20, 0.0 }
 0x126   : > { %v1000_v38 = vadd.f32 %v999_v30, %v968_v33  ;;  %v969_v39 = vmax.f32 %v868_v36, 0.0  ;;  %v870_v40 = vpop.f32.mrb[19].mxu0  ;;  %v934_v41 = vpop.f32.mrb[19].mxu1  ;;  %v980_v30 = vmax.f32 %v19634_v8, 0.0  ;;  %v981_v33 = vmax.f32 %v19636_v13, 0.0 }
 0x127   : > { %v985_v40 = vmax.f32 %v932_v37, 0.0  ;;  %v992_v37 = vld [vmem:[#allocation2] sm:$0x1] }
 0x128   : > { %v1001_v42 = vadd.f32 %v1000_v38, %v969_v39 }
 0x12b   : > { %v873_v43 = vpop.f32.mrb[20].mxu0  ;;  %v937_v44 = vpop.f32.mrb[20].mxu1 }
 0x12c   : > { %v970_v45 = vmax.f32 %v873_v43, 0.0  ;;  %v875_v46 = vpop.f32.mrb[21].mxu0  ;;  %v939_v47 = vpop.f32.mrb[21].mxu1  ;;  %v986_v1 = vmax.f32 %v937_v44, 0.0 }
 0x12d   : > { %v876_v48 = vpop.f32.mrb[22].mxu0  ;;  %v940_v50 = vpop.f32.mrb[22].mxu1 }
 0x12e   : > { %v1002_v51 = vadd.f32 %v1001_v42, %v970_v45  ;;  %v971_v52 = vmax.f32 %v876_v48, 0.0  ;;  %v878_v54 = vpop.f32.mrb[23].mxu0  ;;  %v942_v55 = vpop.f32.mrb[23].mxu1  ;;  %v987_v43 = vmax.f32 %v940_v50, 0.0 }
 0x130   : > { %v1003_v56 = vadd.f32 %v1002_v51, %v971_v52 }
 0x133   : > { %v881_v57 = vpop.f32.mrb[24].mxu0  ;;  %v945_v58 = vpop.f32.mrb[24].mxu1 }
 0x134   : > { %v972_v59 = vmax.f32 %v881_v57, 0.0  ;;  %v883_v61 = vpop.f32.mrb[25].mxu0  ;;  %v947_v62 = vpop.f32.mrb[25].mxu1  ;;  %v988_v45 = vmax.f32 %v945_v58, 0.0 }
 0x135   : > { %v884_v63 = vpop.f32.mrb[26].mxu0  ;;  %v948_v0 = vpop.f32.mrb[26].mxu1 }
 0x136   : > { %v1004_v2 = vadd.f32 %v1003_v56, %v972_v59  ;;  %v973_v3 = vmax.f32 %v884_v63, 0.0  ;;  %v886_v4 = vpop.f32.mrb[27].mxu0  ;;  %v950_v5 = vpop.f32.mrb[27].mxu1  ;;  %v989_v13 = vmax.f32 %v948_v0, 0.0 }
 0x138   : > { %v1005_v6 = vadd.f32 %v1004_v2, %v973_v3 }
 0x13b   : > { %v889_v7 = vpop.f32.mrb[28].mxu0  ;;  %v953_v9 = vpop.f32.mrb[28].mxu1 }
 0x13c   : > { %v974_v10 = vmax.f32 %v889_v7, 0.0  ;;  %v891_v11 = vpop.f32.mrb[29].mxu0  ;;  %v955_v12 = vpop.f32.mrb[29].mxu1  ;;  %v990_v47 = vmax.f32 %v953_v9, 0.0 }
 0x13d   : > { %v892_v14 = vpop.f32.mrb[30].mxu0  ;;  %v956_v15 = vpop.f32.mrb[30].mxu1 }
 0x13e   : > { %v1006_v16 = vadd.f32 %v1005_v6, %v974_v10  ;;  %v975_v17 = vmax.f32 %v892_v14, 0.0  ;;  %v894_v18 = vpop.f32.mrb[31].mxu0  ;;  %v958_v19 = vpop.f32.mrb[31].mxu1  ;;  %v991_v51 = vmax.f32 %v956_v15, 0.0 }
 0x140   : > { %v1007_v22 = vadd.f32 %v1006_v16, %v975_v17 }
 0x142   : > { %v1008_v24 = vadd.f32 %v1007_v22, %v976_v21 }
 0x144   : > { %v1009_v27 = vadd.f32 %v1008_v24, %v977_v23 }
 0x146   : > { %v1010_v29 = vadd.f32 %v1009_v27, %v978_v26 }
 0x148   : > { %v1011_v31 = vadd.f32 %v1010_v29, %v979_v28 }
 0x14a   : > { %v1012_v34 = vadd.f32 %v1011_v31, %v980_v30 }
 0x14c   : > { %v1013_v36 = vadd.f32 %v1012_v34, %v981_v33 }
 0x14e   : > { %v1014_v38 = vadd.f32 %v1013_v36, %v982_v35 }
 0x150   : > { %v1015_v39 = vadd.f32 %v1014_v38, %v983_v49 }
 0x152   : > { %v1016_v60 = vadd.f32 %v1015_v39, %v984_v53 }
 0x154   : > { %v1017_v41 = vadd.f32 %v1016_v60, %v985_v40 }
 0x156   : > { %v1018_v42 = vadd.f32 %v1017_v41, %v986_v1 }
 0x158   : > { %v1019_v8 = vadd.f32 %v1018_v42, %v987_v43 }
 0x15a   : > { %v1020_v46 = vadd.f32 %v1019_v8, %v988_v45 }
 0x15c   : > { %v1021_v20 = vadd.f32 %v1020_v46, %v989_v13 }
 0x15e   : > { %v1022_v48 = vadd.f32 %v1021_v20, %v990_v47 }
 0x160   : > { %v1023_v25 = vadd.f32 %v1022_v48, %v991_v51 }
 0x162   : > { %v1024_v52 = vrot.slane %v1023_v25, 4 }
 0x164   : > { %v1025_v54 = vadd.f32 %v1024_v52, %v1023_v25 }
 0x166   : > { %v1026_v32 = vrot.slane %v1025_v54, 2 }
 0x168   : > { %v1027_v55 = vadd.f32 %v1026_v32, %v1025_v54 }
 0x16a   : > { %v1028_v56 = vrot.slane %v1027_v55, 1 }
 0x16c   : > { %v1029_v57 = vadd.f32 %v1028_v56, %v1027_v55 }
 0x16e   : > { %v1030_v44 = vadd.f32 %v1029_v57, %v992_v37 }
 0x170   : > { %1031 = vst [vmem:[#allocation2] sm:$0x1] %v1030_v44 }
 0x174   : > { %1043 = sbr.rel (!%p1039_p5) target bundleno = 3905 (0xf41), region = 88 }
 0x177   : > { %v1035_v50 = vld [vmem:[#allocation2] sm:$0x1] }
 0x178   : > { %v1036_v59 = vmul.f32 0.00390625, %v1035_v50 }
 0x17a   : > { %1038 = vst [vmem:[%s1037_s19] sm:$0x1] %v1036_v59 }
 0x17b   : > { %v1074_v58 = vld [vmem:[%s24568_s2] sm:$0xff]  ;;  %v24581_v3 = vmov 0   ;;  %v1075_v12 = vld [vmem:[%s24568_s2 + $0x8] sm:$0xff]  ;;  %vm1071_vm3 = vcmask 1042432   ;;  %v1076_v59 = vld [vmem:[%s24568_s2 + $0x10] sm:$0xff]  ;;  %s19436_s29 = smov 64  }
 0x17c   : > { %v1082_v61 = vld [vmem:[%s24568_s2 + $0x40] sm:$0xff]  ;;  %1958 = vmatprep.mubr.bf16.mxu0 %v24581_v3  ;;  %1999 = vmatprep.mubr.bf16.mxu1 %v24581_v3  ;;  %v1083_v14 = vld [vmem:[%s24568_s2 + $0x48] sm:$0xff]  ;;  %vm19440_vm4 = vmmov 0   ;;  %vm11350_vm5 = vcmask 523264   ;;  %vm11695_vm6 = vcmask 9216   ;;  %vm13912_vm7 = vcmask 15360  }
 0x17d   : > { %v1090_v62 = vld [vmem:[%s24568_s2 + $0x80] sm:$0xff]  ;;  %v16385_v63 = vcombine.high %v1074_v58, %v1082_v61  ;;  %v16384_v0 = vcombine.low %v1074_v58, %v1082_v61  ;;  %v1091_v15 = vld [vmem:[%s24568_s2 + $0x88] sm:$0xff]  ;;  %v16387_v18 = vcombine.high %v1075_v12, %v1083_v14  ;;  %v16386_v19 = vcombine.low %v1075_v12, %v1083_v14  ;;  %v1084_v58 = vld [vmem:[%s24568_s2 + $0x50] sm:$0xff] }
 0x17e   : > { %v1098_v2 = vld [vmem:[%s24568_s2 + $0xc0] sm:$0xff]  ;;  %v1099_v16 = vld [vmem:[%s24568_s2 + $0xc8] sm:$0xff]  ;;  %v16388_v12 = vcombine.low %v1076_v59, %v1084_v58  ;;  %v1077_v14 = vld [vmem:[%s24568_s2 + $0x18] sm:$0xff] }
 0x17f   : > { %v16401_v4 = vcombine.high %v1090_v62, %v1098_v2  ;;  %v1106_v5 = vld [vmem:[%s24568_s2 + $0x100] sm:$0xff]  ;;  %1926 = vmatprep.subr.bf16.mxu0 %v16385_v63  ;;  %v16400_v7 = vcombine.low %v1090_v62, %v1098_v2  ;;  %v16403_v21 = vcombine.high %v1091_v15, %v1099_v16  ;;  %v1107_v23 = vld [vmem:[%s24568_s2 + $0x108] sm:$0xff]  ;;  %1967 = vmatprep.subr.bf16.mxu1 %v16387_v18  ;;  %v1116_v18 = vld [vmem:[%s24568_s2 + $0x150] sm:$0xff] }
 0x180   : > { %v1114_v6 = vld [vmem:[%s24568_s2 + $0x140] sm:$0xff]  ;;  %1927 = vmatpush1.bf16.msra.mxu0 %v16384_v0  ;;  %v1115_v24 = vld [vmem:[%s24568_s2 + $0x148] sm:$0xff]  ;;  %1968 = vmatpush1.bf16.msra.mxu1 %v16386_v19  ;;  %v16402_v28 = vcombine.low %v1091_v15, %v1099_v16  ;;  %v1085_v15 = vld [vmem:[%s24568_s2 + $0x58] sm:$0xff] }
 0x181   : > { %1928 = vmatprep.subr.bf16.mxu0 %v16401_v4  ;;  %v16417_v9 = vcombine.high %v1106_v5, %v1114_v6  ;;  %v1122_v10 = vld [vmem:[%s24568_s2 + $0x180] sm:$0xff]  ;;  %v16416_v17 = vcombine.low %v1106_v5, %v1114_v6  ;;  %1969 = vmatprep.subr.bf16.mxu1 %v16403_v21  ;;  %v16419_v30 = vcombine.high %v1107_v23, %v1115_v24  ;;  %v1123_v33 = vld [vmem:[%s24568_s2 + $0x188] sm:$0xff]  ;;  %v1092_v6 = vld [vmem:[%s24568_s2 + $0x90] sm:$0xff] }
 0x182   : > { %v1130_v11 = vld [vmem:[%s24568_s2 + $0x1c0] sm:$0xff]  ;;  %v1131_v34 = vld [vmem:[%s24568_s2 + $0x1c8] sm:$0xff]  ;;  %v16418_v49 = vcombine.low %v1107_v23, %v1115_v24  ;;  %v16389_v5 = vcombine.high %v1076_v59, %v1084_v58  ;;  %v16391_v21 = vcombine.high %v1077_v14, %v1085_v15  ;;  %v1093_v23 = vld [vmem:[%s24568_s2 + $0x98] sm:$0xff] }
 0x183   : > { %v16433_v22 = vcombine.high %v1122_v10, %v1130_v11  ;;  %v1138_v26 = vld [vmem:[%s24568_s2 + $0x200] sm:$0xff]  ;;  %v16432_v29 = vcombine.low %v1122_v10, %v1130_v11  ;;  %v16435_v53 = vcombine.high %v1123_v33, %v1131_v34  ;;  %v1139_v60 = vld [vmem:[%s24568_s2 + $0x208] sm:$0xff]  ;;  %v16434_v8 = vcombine.low %v1123_v33, %v1131_v34  ;;  %v1101_v24 = vld [vmem:[%s24568_s2 + $0xd8] sm:$0xff] }
 0x184   : > { %1929 = vmatpush1.bf16.msra.mxu0 %v16400_v7  ;;  %v1146_v27 = vld [vmem:[%s24568_s2 + $0x240] sm:$0xff]  ;;  %1970 = vmatpush1.bf16.msra.mxu1 %v16402_v28  ;;  %v1147_v40 = vld [vmem:[%s24568_s2 + $0x248] sm:$0xff]  ;;  %v1100_v7 = vld [vmem:[%s24568_s2 + $0xd0] sm:$0xff] }
 0x185   : > { %1930 = vmatprep.subr.bf16.mxu0 %v16417_v9  ;;  %v16449_v31 = vcombine.high %v1138_v26, %v1146_v27  ;;  %v1154_v35 = vld [vmem:[%s24568_s2 + $0x280] sm:$0xff]  ;;  %v16448_v38 = vcombine.low %v1138_v26, %v1146_v27  ;;  %1971 = vmatprep.subr.bf16.mxu1 %v16419_v30  ;;  %v16451_v46 = vcombine.high %v1139_v60, %v1147_v40  ;;  %v1155_v47 = vld [vmem:[%s24568_s2 + $0x288] sm:$0xff]  ;;  %v1124_v27 = vld [vmem:[%s24568_s2 + $0x190] sm:$0xff] }
 0x186   : > { %v1162_v36 = vld [vmem:[%s24568_s2 + $0x2c0] sm:$0xff]  ;;  %v1163_v20 = vld [vmem:[%s24568_s2 + $0x2c8] sm:$0xff]  ;;  %v16450_v54 = vcombine.low %v1139_v60, %v1147_v40  ;;  %v16405_v16 = vcombine.high %v1092_v6, %v1100_v7  ;;  %v1132_v28 = vld [vmem:[%s24568_s2 + $0x1d0] sm:$0xff]  ;;  %v16407_v30 = vcombine.high %v1093_v23, %v1101_v24 }
 0x187   : > { %v16465_v39 = vcombine.high %v1154_v35, %v1162_v36  ;;  %v1170_v41 = vld [vmem:[%s24568_s2 + $0x300] sm:$0xff]  ;;  %v16464_v45 = vcombine.low %v1154_v35, %v1162_v36  ;;  %v16467_v55 = vcombine.high %v1155_v47, %v1163_v20  ;;  %v1171_v44 = vld [vmem:[%s24568_s2 + $0x308] sm:$0xff]  ;;  %v16466_v61 = vcombine.low %v1155_v47, %v1163_v20  ;;  %v1109_v33 = vld [vmem:[%s24568_s2 + $0x118] sm:$0xff] }
 0x188   : > { %1931 = vmatpush1.bf16.msra.mxu0 %v16416_v17  ;;  %v1178_v1 = vld [vmem:[%s24568_s2 + $0x340] sm:$0xff]  ;;  %1972 = vmatpush1.bf16.msra.mxu1 %v16418_v49  ;;  %v1179_v50 = vld [vmem:[%s24568_s2 + $0x348] sm:$0xff]  ;;  %v1108_v17 = vld [vmem:[%s24568_s2 + $0x110] sm:$0xff]  ;;  %v16437_v35 = vcombine.high %v1124_v27, %v1132_v28 }
 0x189   : > { %1932 = vmatprep.subr.bf16.mxu0 %v16433_v22  ;;  %v1044_v42 = vld [vmem:[#allocation3] sm:$0x1]  ;;  %v16381_v43 = vld [vmem:[#allocation3 + $0x1] ss:$0 sm:$0xff]  ;;  %1973 = vmatprep.subr.bf16.mxu1 %v16435_v53  ;;  %v16481_v13 = vcombine.high %v1170_v41, %v1178_v1  ;;  %v16382_v25 = vld [vmem:[#allocation3 + $0x2] ss:$0 sm:$0xff]  ;;  %v16480_v32 = vcombine.low %v1170_v41, %v1178_v1  ;;  %v16483_v0 = vcombine.high %v1171_v44, %v1179_v50 }
 0x18a   : > { %v1186_v48 = vld [vmem:[%s24568_s2 + $0x380] sm:$0xff]  ;;  %v1069_v52 = vsel %vm792_vm1, %v1044_v42, %v16381_v43  ;;  %v1187_v2 = vld [vmem:[%s24568_s2 + $0x388] sm:$0xff]  ;;  %v16482_v10 = vcombine.low %v1171_v44, %v1179_v50  ;;  %v16404_v22 = vcombine.low %v1092_v6, %v1100_v7  ;;  %v16421_v26 = vcombine.high %v1108_v17, %v1116_v18  ;;  %v1117_v34 = vld [vmem:[%s24568_s2 + $0x158] sm:$0xff] }
 0x18b   : > { %v1194_v51 = vld [vmem:[%s24568_s2 + $0x3c0] sm:$0xff]  ;;  %v1070_v57 = vsel %vm793_vm2, %v1069_v52, %v16382_v25  ;;  %v1195_v4 = vld [vmem:[%s24568_s2 + $0x3c8] sm:$0xff]  ;;  %v1140_v36 = vld [vmem:[%s24568_s2 + $0x210] sm:$0xff]  ;;  %v16423_v53 = vcombine.high %v1109_v33, %v1117_v34  ;;  %v16422_v43 = vcombine.low %v1109_v33, %v1117_v34 }
 0x18c   : > { %1933 = vmatpush1.bf16.msra.mxu0 %v16432_v29  ;;  %1974 = vmatpush1.bf16.msra.mxu1 %v16434_v8  ;;  %v16497_v56 = vcombine.high %v1186_v48, %v1194_v51  ;;  %v16383_v37 = vld [vmem:[#allocation3 + $0x3] ss:$0 sm:$0xff]  ;;  %v16496_v62 = vcombine.low %v1186_v48, %v1194_v51  ;;  %v16499_v11 = vcombine.high %v1187_v2, %v1195_v4  ;;  %v1148_v49 = vld [vmem:[%s24568_s2 + $0x250] sm:$0xff]  ;;  %v1125_v60 = vld [vmem:[%s24568_s2 + $0x198] sm:$0xff] }
 0x18d   : > { %1934 = vmatprep.subr.bf16.mxu0 %v16449_v31  ;;  %1975 = vmatprep.subr.bf16.mxu1 %v16451_v46  ;;  %v1072_v63 = vsel %vm1071_vm3, %v1070_v57, %v16383_v37  ;;  %v16498_v19 = vcombine.low %v1187_v2, %v1195_v4  ;;  %v16390_v29 = vcombine.low %v1077_v14, %v1085_v15  ;;  %v1133_v40 = vld [vmem:[%s24568_s2 + $0x1d8] sm:$0xff]  ;;  %v1156_v1 = vld [vmem:[%s24568_s2 + $0x290] sm:$0xff] }
 0x18e   : > { %v19768_v9 = vpack.c.bf16 %v1072_v63, %v1072_v63  ;;  %v16420_v31 = vcombine.low %v1108_v17, %v1116_v18  ;;  %v16453_v41 = vcombine.high %v1140_v36, %v1148_v49  ;;  %v1164_v42 = vld [vmem:[%s24568_s2 + $0x2d0] sm:$0xff]  ;;  %v16439_v8 = vcombine.high %v1125_v60, %v1133_v40  ;;  %v1141_v46 = vld [vmem:[%s24568_s2 + $0x218] sm:$0xff]  ;;  %v1086_v63 = vld [vmem:[%s24568_s2 + $0x60] sm:$0xff] }
 0x18f   : > { %v16469_v47 = vcombine.high %v1156_v1, %v1164_v42  ;;  %v1172_v20 = vld [vmem:[%s24568_s2 + $0x310] sm:$0xff]  ;;  %v16438_v51 = vcombine.low %v1125_v60, %v1133_v40  ;;  %v16468_v52 = vcombine.low %v1156_v1, %v1164_v42  ;;  %v1173_v59 = vld [vmem:[%s24568_s2 + $0x318] sm:$0xff]  ;;  %v1087_v17 = vld [vmem:[%s24568_s2 + $0x68] sm:$0xff] }
 0x190   : > { %1935 = vmatpush1.bf16.msra.mxu0 %v16448_v38  ;;  %1976 = vmatpush1.bf16.msra.mxu1 %v16450_v54  ;;  %v16406_v38 = vcombine.low %v1093_v23, %v1101_v24  ;;  %v1180_v48 = vld [vmem:[%s24568_s2 + $0x350] sm:$0xff]  ;;  %v1157_v54 = vld [vmem:[%s24568_s2 + $0x298] sm:$0xff]  ;;  %v1135_v1 = vld [vmem:[%s24568_s2 + $0x1e8] sm:$0xff] }
 0x191   : > { %1936 = vmatprep.subr.bf16.mxu0 %v16465_v39  ;;  %1977 = vmatprep.subr.bf16.mxu1 %v16467_v55  ;;  %v16436_v39 = vcombine.low %v1124_v27, %v1132_v28  ;;  %v16485_v55 = vcombine.high %v1172_v20, %v1180_v48  ;;  %v1196_v37 = vld [vmem:[%s24568_s2 + $0x3d0] sm:$0xff]  ;;  %v16484_v50 = vcombine.low %v1172_v20, %v1180_v48  ;;  %v1181_v58 = vld [vmem:[%s24568_s2 + $0x358] sm:$0xff]  ;;  %v1103_v27 = vld [vmem:[%s24568_s2 + $0xe8] sm:$0xff] }
 0x192   : > { %v16487_v2 = vcombine.high %v1173_v59, %v1181_v58  ;;  %v1197_v6 = vld [vmem:[%s24568_s2 + $0x3d8] sm:$0xff]  ;;  %v1151_v20 = vld [vmem:[%s24568_s2 + $0x268] sm:$0xff] }
 0x194   : > { %1937 = vmatpush1.bf16.msra.mxu0 %v16464_v45  ;;  %1978 = vmatpush1.bf16.msra.mxu1 %v16466_v61  ;;  %v16452_v45 = vcombine.low %v1140_v36, %v1148_v49  ;;  %v1119_v36 = vld [vmem:[%s24568_s2 + $0x168] sm:$0xff] }
 0x195   : > { %1938 = vmatprep.subr.bf16.mxu0 %v16481_v13  ;;  %1979 = vmatprep.subr.bf16.mxu1 %v16483_v0  ;;  %v1149_v13 = vld [vmem:[%s24568_s2 + $0x258] sm:$0xff] }
 0x196   : > { %v16455_v25 = vcombine.high %v1141_v46, %v1149_v13  ;;  %v16454_v57 = vcombine.low %v1141_v46, %v1149_v13  ;;  %v1143_v46 = vld [vmem:[%s24568_s2 + $0x228] sm:$0xff] }
 0x198   : > { %1939 = vmatpush1.bf16.msra.mxu0 %v16480_v32  ;;  %1980 = vmatpush1.bf16.msra.mxu1 %v16482_v10  ;;  %v1165_v32 = vld [vmem:[%s24568_s2 + $0x2d8] sm:$0xff]  ;;  %v1094_v10 = vld [vmem:[%s24568_s2 + $0xa0] sm:$0xff] }
 0x199   : > { %1940 = vmatprep.subr.bf16.mxu0 %v16497_v56  ;;  %1981 = vmatprep.subr.bf16.mxu1 %v16499_v11  ;;  %v1188_v56 = vld [vmem:[%s24568_s2 + $0x390] sm:$0xff]  ;;  %v16471_v44 = vcombine.high %v1157_v54, %v1165_v32  ;;  %v16470_v0 = vcombine.low %v1157_v54, %v1165_v32  ;;  %v1102_v11 = vld [vmem:[%s24568_s2 + $0xe0] sm:$0xff]  ;;  %v1159_v54 = vld [vmem:[%s24568_s2 + $0x2a8] sm:$0xff] }
 0x19a   : > { %v16501_v61 = vcombine.high %v1188_v56, %v1196_v37  ;;  %v16500_v4 = vcombine.low %v1188_v56, %v1196_v37  ;;  %v16409_v18 = vcombine.high %v1094_v10, %v1102_v11  ;;  %v16408_v24 = vcombine.low %v1094_v10, %v1102_v11  ;;  %v1167_v32 = vld [vmem:[%s24568_s2 + $0x2e8] sm:$0xff]  ;;  %v1190_v37 = vld [vmem:[%s24568_s2 + $0x3a0] sm:$0xff]  ;;  %v1096_v11 = vld [vmem:[%s24568_s2 + $0xb0] sm:$0xff] }
 0x19c   : > { %1941 = vmatpush1.bf16.msra.mxu0 %v16496_v62  ;;  %1982 = vmatpush1.bf16.msra.mxu1 %v16498_v19  ;;  %v1078_v62 = vld [vmem:[%s24568_s2 + $0x20] sm:$0xff] }
 0x19d   : > { %2008 = vmatprep.subr.bf16.mxu0 %v16389_v5  ;;  %2049 = vmatprep.subr.bf16.mxu1 %v16391_v21  ;;  %v1189_v5 = vld [vmem:[%s24568_s2 + $0x398] sm:$0xff]  ;;  %v16393_v7 = vcombine.high %v1078_v62, %v1086_v63  ;;  %v16392_v15 = vcombine.low %v1078_v62, %v1086_v63  ;;  %v1110_v19 = vld [vmem:[%s24568_s2 + $0x120] sm:$0xff]  ;;  %v1080_v63 = vld [vmem:[%s24568_s2 + $0x30] sm:$0xff] }
 0x19e   : > { %v16503_v14 = vcombine.high %v1189_v5, %v1197_v6  ;;  %v1118_v21 = vld [vmem:[%s24568_s2 + $0x160] sm:$0xff] }
 0x19f   : > { %1959 = vmatmul.mubr.bf16.vlgmr.msra.gmra.mrb[0].mxu0 %v19768_v9  ;;  %2000 = vmatmul.mubr.bf16.vlgmr.msra.gmra.mrb[0].mxu1 %v19768_v9  ;;  %v16425_v28 = vcombine.high %v1110_v19, %v1118_v21  ;;  %v16424_v34 = vcombine.low %v1110_v19, %v1118_v21  ;;  %v1112_v21 = vld [vmem:[%s24568_s2 + $0x130] sm:$0xff] }
 0x1a0   : > { %2009 = vmatpush1.bf16.msra.mxu0 %v16388_v12  ;;  %2040 = vmatprep.mubr.bf16.mxu0 %v24581_v3  ;;  %v16486_v12 = vcombine.low %v1173_v59, %v1181_v58  ;;  %v1175_v59 = vld [vmem:[%s24568_s2 + $0x328] sm:$0xff] }
 0x1a1   : > { %2010 = vmatprep.subr.bf16.mxu0 %v16405_v16  ;;  %2050 = vmatpush1.bf16.msra.mxu1 %v16390_v29  ;;  %v1079_v16 = vld [vmem:[%s24568_s2 + $0x28] sm:$0xff]  ;;  %v1126_v29 = vld [vmem:[%s24568_s2 + $0x1a0] sm:$0xff] }
 0x1a2   : > { %2081 = vmatprep.mubr.bf16.mxu1 %v24581_v3  ;;  %2051 = vmatprep.subr.bf16.mxu1 %v16407_v30  ;;  %v16395_v23 = vcombine.high %v1079_v16, %v1087_v17  ;;  %v1134_v30 = vld [vmem:[%s24568_s2 + $0x1e0] sm:$0xff]  ;;  %v1183_v58 = vld [vmem:[%s24568_s2 + $0x368] sm:$0xff] }
 0x1a3   : > { %v16441_v49 = vcombine.high %v1126_v29, %v1134_v30  ;;  %v16440_v40 = vcombine.low %v1126_v29, %v1134_v30  ;;  %v1128_v30 = vld [vmem:[%s24568_s2 + $0x1b0] sm:$0xff] }
 0x1a4   : > { %2011 = vmatpush1.bf16.msra.mxu0 %v16404_v22  ;;  %v16502_v22 = vcombine.low %v1189_v5, %v1197_v6  ;;  %v1191_v5 = vld [vmem:[%s24568_s2 + $0x3a8] sm:$0xff] }
 0x1a5   : > { %2012 = vmatprep.subr.bf16.mxu0 %v16421_v26  ;;  %2052 = vmatpush1.bf16.msra.mxu1 %v16406_v38  ;;  %v1095_v26 = vld [vmem:[%s24568_s2 + $0xa8] sm:$0xff]  ;;  %v1142_v38 = vld [vmem:[%s24568_s2 + $0x220] sm:$0xff] }
 0x1a6   : > { %2053 = vmatprep.subr.bf16.mxu1 %v16423_v53  ;;  %v16411_v33 = vcombine.high %v1095_v26, %v1103_v27  ;;  %v1150_v53 = vld [vmem:[%s24568_s2 + $0x260] sm:$0xff]  ;;  %v1199_v6 = vld [vmem:[%s24568_s2 + $0x3e8] sm:$0xff] }
 0x1a7   : > { %v16457_v42 = vcombine.high %v1142_v38, %v1150_v53 }
 0x1a8   : > { %2013 = vmatpush1.bf16.msra.mxu0 %v16420_v31  ;;  %v16394_v31 = vcombine.low %v1079_v16, %v1087_v17  ;;  %v1081_v16 = vld [vmem:[%s24568_s2 + $0x38] sm:$0xff] }
 0x1a9   : > { %2014 = vmatprep.subr.bf16.mxu0 %v16437_v35  ;;  %2054 = vmatpush1.bf16.msra.mxu1 %v16422_v43  ;;  %v1111_v35 = vld [vmem:[%s24568_s2 + $0x128] sm:$0xff]  ;;  %v1158_v43 = vld [vmem:[%s24568_s2 + $0x2a0] sm:$0xff]  ;;  %v1089_v17 = vld [vmem:[%s24568_s2 + $0x78] sm:$0xff] }
 0x1aa   : > { %2055 = vmatprep.subr.bf16.mxu1 %v16439_v8  ;;  %v16427_v60 = vcombine.high %v1111_v35, %v1119_v36  ;;  %v1166_v8 = vld [vmem:[%s24568_s2 + $0x2e0] sm:$0xff] }
 0x1ab   : > { %v16473_v48 = vcombine.high %v1158_v43, %v1166_v8  ;;  %v16472_v56 = vcombine.low %v1158_v43, %v1166_v8  ;;  %v1160_v8 = vld [vmem:[%s24568_s2 + $0x2b0] sm:$0xff] }
 0x1ac   : > { %2015 = vmatpush1.bf16.msra.mxu0 %v16436_v39  ;;  %v16410_v39 = vcombine.low %v1095_v26, %v1103_v27  ;;  %v1097_v26 = vld [vmem:[%s24568_s2 + $0xb8] sm:$0xff] }
 0x1ad   : > { %2016 = vmatprep.subr.bf16.mxu0 %v16453_v41  ;;  %2056 = vmatpush1.bf16.msra.mxu1 %v16438_v51  ;;  %v1127_v41 = vld [vmem:[%s24568_s2 + $0x1a8] sm:$0xff]  ;;  %v1174_v51 = vld [vmem:[%s24568_s2 + $0x320] sm:$0xff]  ;;  %v1105_v27 = vld [vmem:[%s24568_s2 + $0xf8] sm:$0xff] }
 0x1ae   : > { %2057 = vmatprep.subr.bf16.mxu1 %v16455_v25  ;;  %v16443_v13 = vcombine.high %v1127_v41, %v1135_v1  ;;  %v1182_v25 = vld [vmem:[%s24568_s2 + $0x360] sm:$0xff] }
 0x1af   : > { %v16488_v62 = vcombine.low %v1174_v51, %v1182_v25 }
 0x1b0   : > { %2017 = vmatpush1.bf16.msra.mxu0 %v16452_v45  ;;  %v16426_v45 = vcombine.low %v1111_v35, %v1119_v36  ;;  %v1113_v35 = vld [vmem:[%s24568_s2 + $0x138] sm:$0xff] }
 0x1b1   : > { %2018 = vmatprep.subr.bf16.mxu0 %v16469_v47  ;;  %2058 = vmatpush1.bf16.msra.mxu1 %v16454_v57  ;;  %v16456_v47 = vcombine.low %v1142_v38, %v1150_v53  ;;  %v1198_v57 = vld [vmem:[%s24568_s2 + $0x3e0] sm:$0xff]  ;;  %v1121_v36 = vld [vmem:[%s24568_s2 + $0x178] sm:$0xff]  ;;  %v1144_v53 = vld [vmem:[%s24568_s2 + $0x230] sm:$0xff] }
 0x1b2   : > { %2059 = vmatprep.subr.bf16.mxu1 %v16471_v44  ;;  %v16489_v44 = vcombine.high %v1174_v51, %v1182_v25  ;;  %v16504_v10 = vcombine.low %v1190_v37, %v1198_v57  ;;  %v1176_v25 = vld [vmem:[%s24568_s2 + $0x330] sm:$0xff] }
 0x1b4   : > { %2019 = vmatpush1.bf16.msra.mxu0 %v16468_v52  ;;  %v16442_v52 = vcombine.low %v1127_v41, %v1135_v1  ;;  %v1129_v41 = vld [vmem:[%s24568_s2 + $0x1b8] sm:$0xff] }
 0x1b5   : > { %2020 = vmatprep.subr.bf16.mxu0 %v16485_v55  ;;  %2060 = vmatpush1.bf16.msra.mxu1 %v16470_v0  ;;  %v16459_v55 = vcombine.high %v1143_v46, %v1151_v20  ;;  %v1088_v0 = vld [vmem:[%s24568_s2 + $0x70] sm:$0xff]  ;;  %v1137_v1 = vld [vmem:[%s24568_s2 + $0x1f8] sm:$0xff] }
 0x1b6   : > { %2061 = vmatprep.subr.bf16.mxu1 %v16487_v2  ;;  %v16505_v2 = vcombine.high %v1190_v37, %v1198_v57  ;;  %v16396_v19 = vcombine.low %v1080_v63, %v1088_v0  ;;  %v1161_v37 = vld [vmem:[%s24568_s2 + $0x2b8] sm:$0xff] }
 0x1b7   : > { %v1169_v57 = vld [vmem:[%s24568_s2 + $0x2f8] sm:$0xff] }
 0x1b8   : > { %2021 = vmatpush1.bf16.msra.mxu0 %v16484_v50  ;;  %v16458_v50 = vcombine.low %v1143_v46, %v1151_v20  ;;  %v1153_v20 = vld [vmem:[%s24568_s2 + $0x278] sm:$0xff] }
 0x1b9   : > { %2022 = vmatprep.subr.bf16.mxu0 %v16501_v61  ;;  %2062 = vmatpush1.bf16.msra.mxu1 %v16486_v12  ;;  %v16475_v61 = vcombine.high %v1159_v54, %v1167_v32  ;;  %v1104_v12 = vld [vmem:[%s24568_s2 + $0xf0] sm:$0xff] }
 0x1ba   : > { %2063 = vmatprep.subr.bf16.mxu1 %v16503_v14  ;;  %v16397_v14 = vcombine.high %v1080_v63, %v1088_v0  ;;  %v16412_v29 = vcombine.low %v1096_v11, %v1104_v12  ;;  %v1177_v63 = vld [vmem:[%s24568_s2 + $0x338] sm:$0xff] }
 0x1bb   : > { %v1185_v0 = vld [vmem:[%s24568_s2 + $0x378] sm:$0xff] }
 0x1bc   : > { %2023 = vmatpush1.bf16.msra.mxu0 %v16500_v4  ;;  %v16474_v4 = vcombine.low %v1159_v54, %v1167_v32  ;;  %v16446_v32 = vcombine.low %v1129_v41, %v1137_v1 }
 0x1bd   : > { %2090 = vmatprep.subr.bf16.mxu0 %v16393_v7  ;;  %2064 = vmatpush1.bf16.msra.mxu1 %v16502_v22  ;;  %v16491_v7 = vcombine.high %v1175_v59, %v1183_v58  ;;  %v1120_v22 = vld [vmem:[%s24568_s2 + $0x170] sm:$0xff] }
 0x1be   : > { %2131 = vmatprep.subr.bf16.mxu1 %v16395_v23  ;;  %v16413_v23 = vcombine.high %v1096_v11, %v1104_v12  ;;  %v16428_v38 = vcombine.low %v1112_v21, %v1120_v22  ;;  %v18162_v11 = vld [vmem:[%s24570_s4 + $0x4] ss:$16 sps:$4 sm:$0xff]   ;;  %v16494_v12 = vcombine.low %v1177_v63, %v1185_v0 }
 0x1bf   : > { %2041 = vmatmul.mubr.bf16.vlgmr.msra.gmra.mrb[4].mxu0 %v19768_v9 }
 0x1c0   : > { %2091 = vmatpush1.bf16.msra.mxu0 %v16392_v15  ;;  %2122 = vmatprep.mubr.bf16.mxu0 %v24581_v3  ;;  %v16490_v15 = vcombine.low %v1175_v59, %v1183_v58  ;;  %v1200_v59 = vld [vmem:[%s24568_s2 + $0x3f0] sm:$0xff] }
 0x1c1   : > { %2092 = vmatprep.subr.bf16.mxu0 %v16409_v18  ;;  %2082 = vmatmul.mubr.bf16.vlgmr.msra.gmra.mrb[4].mxu1 %v19768_v9  ;;  %v16507_v18 = vcombine.high %v1191_v5, %v1199_v6 }
 0x1c2   : > { %2132 = vmatpush1.bf16.msra.mxu1 %v16394_v31  ;;  %2163 = vmatprep.mubr.bf16.mxu1 %v24581_v3  ;;  %v1136_v31 = vld [vmem:[%s24568_s2 + $0x1f0] sm:$0xff] }
 0x1c3   : > { %2133 = vmatprep.subr.bf16.mxu1 %v16411_v33  ;;  %v16429_v33 = vcombine.high %v1112_v21, %v1120_v22  ;;  %v16444_v43 = vcombine.low %v1128_v30, %v1136_v31  ;;  %v18163_v21 = vld [vmem:[%s24570_s4 + $0x8] ss:$16 sps:$4 sm:$0xff]   ;;  %v18174_v22 = vld [vmem:[%s24570_s4 + $0x44] ss:$16 sps:$4 sm:$0xff]  }
 0x1c4   : > { %2093 = vmatpush1.bf16.msra.mxu0 %v16408_v24  ;;  %v16506_v24 = vcombine.low %v1191_v5, %v1199_v6  ;;  %v16495_v5 = vcombine.high %v1177_v63, %v1185_v0  ;;  %v18238_v63 = vld [vmem:[%s24570_s4 + $0x1a0] ss:$16 sps:$4 sm:$0xff]   ;;  %v18235_v0 = vld [vmem:[%s24570_s4 + $0x188] ss:$16 sps:$4 sm:$0xff]  }
 0x1c5   : > { %2094 = vmatprep.subr.bf16.mxu0 %v16425_v28  ;;  %v16399_v28 = vcombine.high %v1081_v16, %v1089_v17 }
 0x1c6   : > { %2134 = vmatpush1.bf16.msra.mxu1 %v16410_v39  ;;  %v1152_v39 = vld [vmem:[%s24568_s2 + $0x270] sm:$0xff] }
 0x1c7   : > { %2135 = vmatprep.subr.bf16.mxu1 %v16427_v60  ;;  %v16445_v60 = vcombine.high %v1128_v30, %v1136_v31  ;;  %v16461_v46 = vcombine.high %v1144_v53, %v1152_v39  ;;  %v16460_v51 = vcombine.low %v1144_v53, %v1152_v39  ;;  %v18175_v30 = vld [vmem:[%s24570_s4 + $0x48] ss:$16 sps:$4 sm:$0xff]   ;;  %v18183_v31 = vld [vmem:[%s24570_s4 + $0x6c] ss:$16 sps:$4 sm:$0xff]   ;;  %v18198_v53 = vld [vmem:[%s24570_s4 + $0xc4] ss:$16 sps:$4 sm:$0xff]  }
 0x1c8   : > { %2095 = vmatpush1.bf16.msra.mxu0 %v16424_v34  ;;  %v16398_v34 = vcombine.low %v1081_v16, %v1089_v17  ;;  %v18168_v16 = vld [vmem:[%s24570_s4 + $0x24] ss:$16 sps:$4 sm:$0xff]   ;;  %v18195_v39 = vld [vmem:[%s24570_s4 + $0xac] ss:$16 sps:$4 sm:$0xff]  }
 0x1c9   : > { %2096 = vmatprep.subr.bf16.mxu0 %v16441_v49  ;;  %v16415_v49 = vcombine.high %v1097_v26, %v1105_v27 }
 0x1ca   : > { %2136 = vmatpush1.bf16.msra.mxu1 %v16426_v45  ;;  %v1168_v45 = vld [vmem:[%s24568_s2 + $0x2f0] sm:$0xff] }
 0x1cb   : > { %2137 = vmatprep.subr.bf16.mxu1 %v16443_v13  ;;  %v16430_v13 = vcombine.low %v1113_v35, %v1121_v36  ;;  %v16477_v54 = vcombine.high %v1160_v8, %v1168_v45 }
 0x1cc   : > { %2097 = vmatpush1.bf16.msra.mxu0 %v16440_v40  ;;  %v16414_v40 = vcombine.low %v1097_v26, %v1105_v27  ;;  %v18169_v26 = vld [vmem:[%s24570_s4 + $0x28] ss:$16 sps:$4 sm:$0xff]   ;;  %v18180_v27 = vld [vmem:[%s24570_s4 + $0x64] ss:$16 sps:$4 sm:$0xff]  }
 0x1cd   : > { %2098 = vmatprep.subr.bf16.mxu0 %v16457_v42  ;;  %v16431_v42 = vcombine.high %v1113_v35, %v1121_v36  ;;  %v18192_v35 = vld [vmem:[%s24570_s4 + $0xa4] ss:$16 sps:$4 sm:$0xff]   ;;  %v18189_v36 = vld [vmem:[%s24570_s4 + $0x8c] ss:$16 sps:$4 sm:$0xff]  }
 0x1ce   : > { %2138 = vmatpush1.bf16.msra.mxu1 %v16442_v52  ;;  %v1184_v52 = vld [vmem:[%s24568_s2 + $0x370] sm:$0xff] }
 0x1cf   : > { %2139 = vmatprep.subr.bf16.mxu1 %v16459_v55 }
 0x1d0   : > { %2099 = vmatpush1.bf16.msra.mxu0 %v16456_v47  ;;  %v1145_v47 = vld [vmem:[%s24568_s2 + $0x238] sm:$0xff] }
 0x1d1   : > { %2100 = vmatprep.subr.bf16.mxu0 %v16473_v48  ;;  %v16447_v48 = vcombine.high %v1129_v41, %v1137_v1  ;;  %v16463_v55 = vcombine.high %v1145_v47, %v1153_v20  ;;  %v16462_v58 = vcombine.low %v1145_v47, %v1153_v20  ;;  %v18204_v41 = vld [vmem:[%s24570_s4 + $0xe4] ss:$16 sps:$4 sm:$0xff]   ;;  %v18201_v1 = vld [vmem:[%s24570_s4 + $0xcc] ss:$16 sps:$4 sm:$0xff]  }
 0x1d2   : > { %2140 = vmatpush1.bf16.msra.mxu1 %v16458_v50  ;;  %v1192_v50 = vld [vmem:[%s24568_s2 + $0x3b0] sm:$0xff]  ;;  %v18213_v20 = vld [vmem:[%s24570_s4 + $0x10c] ss:$16 sps:$4 sm:$0xff]  }
 0x1d3   : > { %2141 = vmatprep.subr.bf16.mxu1 %v16475_v61  ;;  %v16479_v61 = vcombine.high %v1161_v37, %v1169_v57  ;;  %v16508_v6 = vcombine.low %v1192_v50, %v1200_v59  ;;  %v18216_v47 = vld [vmem:[%s24570_s4 + $0x124] ss:$16 sps:$4 sm:$0xff]  }
 0x1d4   : > { %2101 = vmatpush1.bf16.msra.mxu0 %v16472_v56  ;;  %v16476_v56 = vcombine.low %v1160_v8, %v1168_v45  ;;  %v18210_v8 = vld [vmem:[%s24570_s4 + $0x104] ss:$16 sps:$4 sm:$0xff]   ;;  %v18207_v45 = vld [vmem:[%s24570_s4 + $0xec] ss:$16 sps:$4 sm:$0xff]  }
 0x1d5   : > { %2102 = vmatprep.subr.bf16.mxu0 %v16489_v44  ;;  %v16493_v44 = vcombine.high %v1176_v25, %v1184_v52 }
 0x1d6   : > { %2142 = vmatpush1.bf16.msra.mxu1 %v16474_v4  ;;  %v16478_v4 = vcombine.low %v1161_v37, %v1169_v57  ;;  %v18226_v37 = vld [vmem:[%s24570_s4 + $0x160] ss:$16 sps:$4 sm:$0xff]   ;;  %v18223_v57 = vld [vmem:[%s24570_s4 + $0x148] ss:$16 sps:$4 sm:$0xff]  }
 0x1d7   : > { %2143 = vmatprep.subr.bf16.mxu1 %v16491_v7  ;;  %v1193_v7 = vld [vmem:[%s24568_s2 + $0x3b8] sm:$0xff] }
 0x1d8   : > { %2103 = vmatpush1.bf16.msra.mxu0 %v16488_v62  ;;  %v16492_v62 = vcombine.low %v1176_v25, %v1184_v52  ;;  %v18222_v25 = vld [vmem:[%s24570_s4 + $0x144] ss:$16 sps:$4 sm:$0xff]   ;;  %v18219_v52 = vld [vmem:[%s24570_s4 + $0x12c] ss:$16 sps:$4 sm:$0xff]  }
 0x1d9   : > { %2104 = vmatprep.subr.bf16.mxu0 %v16505_v2  ;;  %v16509_v2 = vcombine.high %v1192_v50, %v1200_v59  ;;  %v18231_v50 = vld [vmem:[%s24570_s4 + $0x16c] ss:$16 sps:$4 sm:$0xff]   ;;  %v18232_v59 = vld [vmem:[%s24570_s4 + $0x180] ss:$16 sps:$4 sm:$0xff]  }
 0x1da   : > { %2144 = vmatpush1.bf16.msra.mxu1 %v16490_v15  ;;  %v18160_v15 = vld [vmem:[%s24570_s4] ss:$16 sps:$4 sm:$0xff]  }
 0x1db   : > { %2145 = vmatprep.subr.bf16.mxu1 %v16507_v18  ;;  %v18165_v18 = vld [vmem:[%s24570_s4 + $0xc] ss:$16 sps:$4 sm:$0xff]  }
 0x1dc   : > { %2105 = vmatpush1.bf16.msra.mxu0 %v16504_v10  ;;  %v1201_v10 = vld [vmem:[%s24568_s2 + $0x3f8] sm:$0xff] }
 0x1dd   : > { %2172 = vmatprep.subr.bf16.mxu0 %v16397_v14  ;;  %v16511_v14 = vcombine.high %v1193_v7, %v1201_v10  ;;  %v16510_v17 = vcombine.low %v1193_v7, %v1201_v10  ;;  %v18252_v7 = vld [vmem:[%s24570_s4 + $0x1e4] ss:$16 sps:$4 sm:$0xff]   ;;  %v18249_v10 = vld [vmem:[%s24570_s4 + $0x1cc] ss:$16 sps:$4 sm:$0xff]  }
 0x1de   : > { %2146 = vmatpush1.bf16.msra.mxu1 %v16506_v24  ;;  %v18172_v24 = vld [vmem:[%s24570_s4 + $0x40] ss:$16 sps:$4 sm:$0xff]  }
 0x1df   : > { %2123 = vmatmul.mubr.bf16.vlgmr.msra.gmra.mrb[8].mxu0 %v19768_v9  ;;  %2213 = vmatprep.subr.bf16.mxu1 %v16399_v28  ;;  %v18177_v28 = vld [vmem:[%s24570_s4 + $0x4c] ss:$16 sps:$4 sm:$0xff]  }
 0x1e0   : > { %2173 = vmatpush1.bf16.msra.mxu0 %v16396_v19  ;;  %2204 = vmatprep.mubr.bf16.mxu0 %v24581_v3  ;;  %v18166_v19 = vld [vmem:[%s24570_s4 + $0x20] ss:$16 sps:$4 sm:$0xff]  }
 0x1e1   : > { %2174 = vmatprep.subr.bf16.mxu0 %v16413_v23  ;;  %2164 = vmatmul.mubr.bf16.vlgmr.msra.gmra.mrb[8].mxu1 %v19768_v9  ;;  %v18171_v23 = vld [vmem:[%s24570_s4 + $0x2c] ss:$16 sps:$4 sm:$0xff]  }
 0x1e2   : > { %2214 = vmatpush1.bf16.msra.mxu1 %v16398_v34  ;;  %2245 = vmatprep.mubr.bf16.mxu1 %v24581_v3  ;;  %v18181_v34 = vld [vmem:[%s24570_s4 + $0x68] ss:$16 sps:$4 sm:$0xff]  }
 0x1e3   : > { %2215 = vmatprep.subr.bf16.mxu1 %v16415_v49  ;;  %v18190_v49 = vld [vmem:[%s24570_s4 + $0xa0] ss:$16 sps:$4 sm:$0xff]  }
 0x1e4   : > { %2175 = vmatpush1.bf16.msra.mxu0 %v16412_v29  ;;  %v18178_v29 = vld [vmem:[%s24570_s4 + $0x60] ss:$16 sps:$4 sm:$0xff]  }
 0x1e5   : > { %2176 = vmatprep.subr.bf16.mxu0 %v16429_v33  ;;  %v18184_v33 = vld [vmem:[%s24570_s4 + $0x80] ss:$16 sps:$4 sm:$0xff]  }
 0x1e6   : > { %2216 = vmatpush1.bf16.msra.mxu1 %v16414_v40  ;;  %v18193_v40 = vld [vmem:[%s24570_s4 + $0xa8] ss:$16 sps:$4 sm:$0xff]  }
 0x1e7   : > { %2217 = vmatprep.subr.bf16.mxu1 %v16431_v42  ;;  %v18202_v42 = vld [vmem:[%s24570_s4 + $0xe0] ss:$16 sps:$4 sm:$0xff]  }
 0x1e8   : > { %2177 = vmatpush1.bf16.msra.mxu0 %v16428_v38  ;;  %v18187_v38 = vld [vmem:[%s24570_s4 + $0x88] ss:$16 sps:$4 sm:$0xff]  }
 0x1e9   : > { %2178 = vmatprep.subr.bf16.mxu0 %v16445_v60  ;;  %v18196_v60 = vld [vmem:[%s24570_s4 + $0xc0] ss:$16 sps:$4 sm:$0xff]  }
 0x1ea   : > { %2218 = vmatpush1.bf16.msra.mxu1 %v16430_v13  ;;  %v18205_v13 = vld [vmem:[%s24570_s4 + $0xe8] ss:$16 sps:$4 sm:$0xff]  }
 0x1eb   : > { %2219 = vmatprep.subr.bf16.mxu1 %v16447_v48  ;;  %v18214_v48 = vld [vmem:[%s24570_s4 + $0x120] ss:$16 sps:$4 sm:$0xff]  }
 0x1ec   : > { %2179 = vmatpush1.bf16.msra.mxu0 %v16444_v43  ;;  %v18199_v43 = vld [vmem:[%s24570_s4 + $0xc8] ss:$16 sps:$4 sm:$0xff]  }
 0x1ed   : > { %2180 = vmatprep.subr.bf16.mxu0 %v16461_v46  ;;  %v18208_v46 = vld [vmem:[%s24570_s4 + $0x100] ss:$16 sps:$4 sm:$0xff]  }
 0x1ee   : > { %2220 = vmatpush1.bf16.msra.mxu1 %v16446_v32  ;;  %v18217_v32 = vld [vmem:[%s24570_s4 + $0x128] ss:$16 sps:$4 sm:$0xff]  }
 0x1ef   : > { %2221 = vmatprep.subr.bf16.mxu1 %v16463_v55  ;;  %v18228_v55 = vld [vmem:[%s24570_s4 + $0x164] ss:$16 sps:$4 sm:$0xff]  }
 0x1f0   : > { %2181 = vmatpush1.bf16.msra.mxu0 %v16460_v51  ;;  %v18211_v51 = vld [vmem:[%s24570_s4 + $0x108] ss:$16 sps:$4 sm:$0xff]  }
 0x1f1   : > { %2182 = vmatprep.subr.bf16.mxu0 %v16477_v54  ;;  %v18220_v54 = vld [vmem:[%s24570_s4 + $0x140] ss:$16 sps:$4 sm:$0xff]  }
 0x1f2   : > { %2222 = vmatpush1.bf16.msra.mxu1 %v16462_v58  ;;  %v18229_v58 = vld [vmem:[%s24570_s4 + $0x168] ss:$16 sps:$4 sm:$0xff]  }
 0x1f3   : > { %2223 = vmatprep.subr.bf16.mxu1 %v16479_v61  ;;  %v18240_v61 = vld [vmem:[%s24570_s4 + $0x1a4] ss:$16 sps:$4 sm:$0xff]  }
 0x1f4   : > { %2183 = vmatpush1.bf16.msra.mxu0 %v16476_v56  ;;  %v18225_v56 = vld [vmem:[%s24570_s4 + $0x14c] ss:$16 sps:$4 sm:$0xff]  }
 0x1f5   : > { %2184 = vmatprep.subr.bf16.mxu0 %v16493_v44  ;;  %v18234_v44 = vld [vmem:[%s24570_s4 + $0x184] ss:$16 sps:$4 sm:$0xff]  }
 0x1f6   : > { %2224 = vmatpush1.bf16.msra.mxu1 %v16478_v4  ;;  %v18243_v4 = vld [vmem:[%s24570_s4 + $0x1ac] ss:$16 sps:$4 sm:$0xff]  }
 0x1f7   : > { %2225 = vmatprep.subr.bf16.mxu1 %v16495_v5  ;;  %v18244_v5 = vld [vmem:[%s24570_s4 + $0x1c0] ss:$16 sps:$4 sm:$0xff]  }
 0x1f8   : > { %2185 = vmatpush1.bf16.msra.mxu0 %v16492_v62  ;;  %v18237_v62 = vld [vmem:[%s24570_s4 + $0x18c] ss:$16 sps:$4 sm:$0xff]  }
 0x1f9   : > { %2186 = vmatprep.subr.bf16.mxu0 %v16509_v2  ;;  %v18246_v2 = vld [vmem:[%s24570_s4 + $0x1c4] ss:$16 sps:$4 sm:$0xff]  }
 0x1fa   : > { %2226 = vmatpush1.bf16.msra.mxu1 %v16494_v12  ;;  %v18258_v12 = vld [vmem:[%s24570_s4 + $0x204] ss:$16 sps:$4 sm:$0xff]  }
 0x1fb   : > { %2227 = vmatprep.subr.bf16.mxu1 %v16511_v14  ;;  %v18247_v14 = vld [vmem:[%s24570_s4 + $0x1c8] ss:$16 sps:$4 sm:$0xff]  }
 0x1fc   : > { %2187 = vmatpush1.bf16.msra.mxu0 %v16508_v6  ;;  %v18241_v6 = vld [vmem:[%s24570_s4 + $0x1a8] ss:$16 sps:$4 sm:$0xff]  }
 0x1fd   : > { %5380 = vmatprep.subr.bf16.mxu0 %v18162_v11  ;;  %v18250_v11 = vld [vmem:[%s24570_s4 + $0x1e0] ss:$16 sps:$4 sm:$0xff]  }
 0x1fe   : > { %2228 = vmatpush1.bf16.msra.mxu1 %v16510_v17  ;;  %v18261_v17 = vld [vmem:[%s24570_s4 + $0x20c] ss:$16 sps:$4 sm:$0xff]  }
 0x1ff   : > { %2205 = vmatmul.mubr.bf16.vlgmr.msra.gmra.mrb[12].mxu0 %v19768_v9  ;;  %5708 = vmatprep.subr.bf16.mxu1 %v18165_v18  ;;  %v1206_v18 = vlaneseq }
 0x200   : > { %5381 = vmatpush1.bf16.msra.mxu0 %v18160_v15  ;;  %v18255_v15 = vld [vmem:[%s24570_s4 + $0x1ec] ss:$16 sps:$4 sm:$0xff]  }
 0x201   : > { %5382 = vmatprep.subr.bf16.mxu0 %v18168_v16  ;;  %2246 = vmatmul.mubr.bf16.vlgmr.msra.gmra.mrb[12].mxu1 %v19768_v9  ;;  %v18186_v9 = vld [vmem:[%s24570_s4 + $0x84] ss:$16 sps:$4 sm:$0xff]   ;;  %v18253_v16 = vld [vmem:[%s24570_s4 + $0x1e8] ss:$16 sps:$4 sm:$0xff]  }
 0x202   : > { %5709 = vmatpush1.bf16.msra.mxu1 %v18163_v21 }
 0x203   : > { %5710 = vmatprep.subr.bf16.mxu1 %v18171_v23 }
 0x204   : > { %5383 = vmatpush1.bf16.msra.mxu0 %v18166_v19  ;;  %v20258_v19 = vshrl.u32 %v1206_v18, 7  ;;  %v18307_v18 = vld [vmem:[%s24570_s4 + $0x308] ss:$16 sps:$4 sm:$0xff]  }
 0x205   : > { %5384 = vmatprep.subr.bf16.mxu0 %v18174_v22  ;;  %v20266_v22 = vld [vmem:[%s24569_s3] sm:$0xff] }
 0x206   : > { %5711 = vmatpush1.bf16.msra.mxu1 %v18169_v26  ;;  %v20261_v21 = vsub.s32 0, %v20258_v19  ;;  %v20269_v23 = vsub.s32 1, %v20258_v19 }
 0x207   : > { %5712 = vmatprep.subr.bf16.mxu1 %v18177_v28 }
 0x208   : > { %5385 = vmatpush1.bf16.msra.mxu0 %v18172_v24  ;;  %24600 = vst [vmem:[#allocation7_spill] sm:$0xff] %v20261_v21  ;;  %24601 = vst [vmem:[#allocation8_spill] sm:$0xff] %v20269_v23  ;;  %v1209_v24 = vrot.slane %v20266_v22, %v20261_v21  ;;  %v1213_v26 = vrot.slane %v20266_v22, %v20269_v23 }
 0x209   : > { %5386 = vmatprep.subr.bf16.mxu0 %v18180_v27 }
 0x20a   : > { %5713 = vmatpush1.bf16.msra.mxu1 %v18175_v30  ;;  %v20276_v30 = vsub.s32 3, %v20258_v19 }
 0x20b   : > { %5714 = vmatprep.subr.bf16.mxu1 %v18183_v31 }
 0x20c   : > { %5387 = vmatpush1.bf16.msra.mxu0 %v18178_v29  ;;  %24602 = vst [vmem:[#allocation9_spill] sm:$0xff] %v20276_v30 }
 0x20d   : > { %5388 = vmatprep.subr.bf16.mxu0 %v18186_v9 }
 0x20e   : > { %5715 = vmatpush1.bf16.msra.mxu1 %v18181_v34 }
 0x20f   : > { %5716 = vmatprep.subr.bf16.mxu1 %v18189_v36  ;;  %v18256_v36 = vld [vmem:[%s24570_s4 + $0x200] ss:$16 sps:$4 sm:$0xff]  }
 0x210   : > { %5389 = vmatpush1.bf16.msra.mxu0 %v18184_v33 }
 0x211   : > { %5390 = vmatprep.subr.bf16.mxu0 %v18192_v35 }
 0x212   : > { %5717 = vmatpush1.bf16.msra.mxu1 %v18187_v38  ;;  %v1221_v38 = vrot.slane %v20266_v22, %v20276_v30 }
 0x213   : > { %5718 = vmatprep.subr.bf16.mxu1 %v18195_v39 }
 0x214   : > { %5391 = vmatpush1.bf16.msra.mxu0 %v18190_v49  ;;  %v18259_v49 = vld [vmem:[%s24570_s4 + $0x208] ss:$16 sps:$4 sm:$0xff]  }
 0x215   : > { %5392 = vmatprep.subr.bf16.mxu0 %v18198_v53 }
 0x216   : > { %5719 = vmatpush1.bf16.msra.mxu1 %v18193_v40  ;;  %v18267_v40 = vld [vmem:[%s24570_s4 + $0x22c] ss:$16 sps:$4 sm:$0xff]  }
 0x217   : > { %5720 = vmatprep.subr.bf16.mxu1 %v18201_v1 }
 0x218   : > { %5393 = vmatpush1.bf16.msra.mxu0 %v18196_v60  ;;  %v18264_v60 = vld [vmem:[%s24570_s4 + $0x224] ss:$16 sps:$4 sm:$0xff]  }
 0x219   : > { %5394 = vmatprep.subr.bf16.mxu0 %v18204_v41 }
 0x21a   : > { %5721 = vmatpush1.bf16.msra.mxu1 %v18199_v43 }
 0x21b   : > { %5722 = vmatprep.subr.bf16.mxu1 %v18207_v45  ;;  %v18265_v45 = vld [vmem:[%s24570_s4 + $0x228] ss:$16 sps:$4 sm:$0xff]  }
 0x21c   : > { %5395 = vmatpush1.bf16.msra.mxu0 %v18202_v42 }
 0x21d   : > { %5396 = vmatprep.subr.bf16.mxu0 %v18210_v8  ;;  %v18262_v8 = vld [vmem:[%s24570_s4 + $0x220] ss:$16 sps:$4 sm:$0xff]  }
 0x21e   : > { %5723 = vmatpush1.bf16.msra.mxu1 %v18205_v13  ;;  %v18270_v13 = vld [vmem:[%s24570_s4 + $0x244] ss:$16 sps:$4 sm:$0xff]  }
 0x21f   : > { %5724 = vmatprep.subr.bf16.mxu1 %v18213_v20 }
 0x220   : > { %5397 = vmatpush1.bf16.msra.mxu0 %v18208_v46 }
 0x221   : > { %5398 = vmatprep.subr.bf16.mxu0 %v18216_v47  ;;  %v18273_v47 = vld [vmem:[%s24570_s4 + $0x24c] ss:$16 sps:$4 sm:$0xff]  }
 0x222   : > { %5725 = vmatpush1.bf16.msra.mxu1 %v18211_v51  ;;  %v18268_v51 = vld [vmem:[%s24570_s4 + $0x240] ss:$16 sps:$4 sm:$0xff]  }
 0x223   : > { %5726 = vmatprep.subr.bf16.mxu1 %v18219_v52  ;;  %v18276_v52 = vld [vmem:[%s24570_s4 + $0x264] ss:$16 sps:$4 sm:$0xff]  }
 0x224   : > { %5399 = vmatpush1.bf16.msra.mxu0 %v18214_v48 }
 0x225   : > { %5400 = vmatprep.subr.bf16.mxu0 %v18222_v25  ;;  %v18271_v25 = vld [vmem:[%s24570_s4 + $0x248] ss:$16 sps:$4 sm:$0xff]  }
 0x226   : > { %5727 = vmatpush1.bf16.msra.mxu1 %v18217_v32  ;;  %v18274_v32 = vld [vmem:[%s24570_s4 + $0x260] ss:$16 sps:$4 sm:$0xff]  }
 0x227   : > { %5728 = vmatprep.subr.bf16.mxu1 %v18225_v56  ;;  %v18282_v56 = vld [vmem:[%s24570_s4 + $0x284] ss:$16 sps:$4 sm:$0xff]  }
 0x228   : > { %5401 = vmatpush1.bf16.msra.mxu0 %v18220_v54  ;;  %v18279_v54 = vld [vmem:[%s24570_s4 + $0x26c] ss:$16 sps:$4 sm:$0xff]  }
 0x229   : > { %5402 = vmatprep.subr.bf16.mxu0 %v18228_v55  ;;  %v18277_v55 = vld [vmem:[%s24570_s4 + $0x268] ss:$16 sps:$4 sm:$0xff]  }
 0x22a   : > { %5729 = vmatpush1.bf16.msra.mxu1 %v18223_v57  ;;  %v18280_v57 = vld [vmem:[%s24570_s4 + $0x280] ss:$16 sps:$4 sm:$0xff]  }
 0x22b   : > { %5730 = vmatprep.subr.bf16.mxu1 %v18231_v50  ;;  %v18288_v50 = vld [vmem:[%s24570_s4 + $0x2a4] ss:$16 sps:$4 sm:$0xff]  }
 0x22c   : > { %5403 = vmatpush1.bf16.msra.mxu0 %v18226_v37  ;;  %v18285_v37 = vld [vmem:[%s24570_s4 + $0x28c] ss:$16 sps:$4 sm:$0xff]  }
 0x22d   : > { %5404 = vmatprep.subr.bf16.mxu0 %v18234_v44  ;;  %v18283_v44 = vld [vmem:[%s24570_s4 + $0x288] ss:$16 sps:$4 sm:$0xff]  }
 0x22e   : > { %5731 = vmatpush1.bf16.msra.mxu1 %v18229_v58  ;;  %v18286_v58 = vld [vmem:[%s24570_s4 + $0x2a0] ss:$16 sps:$4 sm:$0xff]  }
 0x22f   : > { %5732 = vmatprep.subr.bf16.mxu1 %v18237_v62  ;;  %v18294_v62 = vld [vmem:[%s24570_s4 + $0x2c4] ss:$16 sps:$4 sm:$0xff]  }
 0x230   : > { %5405 = vmatpush1.bf16.msra.mxu0 %v18232_v59  ;;  %v18291_v59 = vld [vmem:[%s24570_s4 + $0x2ac] ss:$16 sps:$4 sm:$0xff]  }
 0x231   : > { %5406 = vmatprep.subr.bf16.mxu0 %v18240_v61  ;;  %v18289_v61 = vld [vmem:[%s24570_s4 + $0x2a8] ss:$16 sps:$4 sm:$0xff]  }
 0x232   : > { %5733 = vmatpush1.bf16.msra.mxu1 %v18235_v0  ;;  %v18292_v0 = vld [vmem:[%s24570_s4 + $0x2c0] ss:$16 sps:$4 sm:$0xff]  }
 0x233   : > { %5734 = vmatprep.subr.bf16.mxu1 %v18243_v4  ;;  %v18300_v4 = vld [vmem:[%s24570_s4 + $0x2e4] ss:$16 sps:$4 sm:$0xff]  }
 0x234   : > { %5407 = vmatpush1.bf16.msra.mxu0 %v18238_v63  ;;  %v18297_v63 = vld [vmem:[%s24570_s4 + $0x2cc] ss:$16 sps:$4 sm:$0xff]  }
 0x235   : > { %5408 = vmatprep.subr.bf16.mxu0 %v18246_v2  ;;  %v18295_v2 = vld [vmem:[%s24570_s4 + $0x2c8] ss:$16 sps:$4 sm:$0xff]  }
 0x236   : > { %5735 = vmatpush1.bf16.msra.mxu1 %v18241_v6 }
 0x237   : > { %5736 = vmatprep.subr.bf16.mxu1 %v18249_v10  ;;  %v18298_v10 = vld [vmem:[%s24570_s4 + $0x2e0] ss:$16 sps:$4 sm:$0xff]  }
 0x238   : > { %5409 = vmatpush1.bf16.msra.mxu0 %v18244_v5  ;;  %v18303_v5 = vld [vmem:[%s24570_s4 + $0x2ec] ss:$16 sps:$4 sm:$0xff]  }
 0x239   : > { %5410 = vmatprep.subr.bf16.mxu0 %v18252_v7 }
 0x23a   : > { %5737 = vmatpush1.bf16.msra.mxu1 %v18247_v14  ;;  %v18306_v14 = vld [vmem:[%s24570_s4 + $0x304] ss:$16 sps:$4 sm:$0xff]  }
 0x23b   : > { %5738 = vmatprep.subr.bf16.mxu1 %v18255_v15  ;;  %v18309_v15 = vld [vmem:[%s24570_s4 + $0x30c] ss:$16 sps:$4 sm:$0xff]  }
 0x23c   : > { %5411 = vmatpush1.bf16.msra.mxu0 %v18250_v11  ;;  %v18301_v11 = vld [vmem:[%s24570_s4 + $0x2e8] ss:$16 sps:$4 sm:$0xff]  }
 0x23d   : > { %5421 = vmatprep.subr.bf16.mxu0 %v18258_v12 }
 0x23e   : > { %5739 = vmatpush1.bf16.msra.mxu1 %v18253_v16 }
 0x23f   : > { %5749 = vmatprep.subr.bf16.mxu1 %v18261_v17  ;;  %v18304_v17 = vld [vmem:[%s24570_s4 + $0x300] ss:$16 sps:$4 sm:$0xff]  }
 0x272   : > { %v1960_v27 = vpop.f32.mrb[0].mxu0  ;;  %v20292_v41 = vpop.f32.mrb[0].mxu1 }
 0x273   : > { %v1961_v28 = vadd.f32 %v1960_v27, %v1209_v24  ;;  %v1962_v29 = vpop.f32.mrb[1].mxu0  ;;  %v2003_v1 = vpop.f32.mrb[1].mxu1  ;;  %v18312_v24 = vld [vmem:[%s24570_s4 + $0x324] ss:$16 sps:$4 sm:$0xff]  }
 0x274   : > { %v1963_v9 = vadd.f32 %v1962_v29, %v1213_v26  ;;  %v1964_v31 = vpop.f32.mrb[2].mxu0  ;;  %v2004_v42 = vadd.f32 %v2003_v1, %v1221_v38  ;;  %v2005_v43 = vpop.f32.mrb[2].mxu1  ;;  %v18315_v26 = vld [vmem:[%s24570_s4 + $0x32c] ss:$16 sps:$4 sm:$0xff]   ;;  %v18324_v38 = vld [vmem:[%s24570_s4 + $0x364] ss:$16 sps:$4 sm:$0xff]  }
 0x275   : > { %v2254_v33 = vmax.f32 %v1961_v28, 0.0  ;;  %v1965_v34 = vpop.f32.mrb[3].mxu0  ;;  %v2006_v46 = vpop.f32.mrb[3].mxu1  ;;  %v18313_v31 = vld [vmem:[%s24570_s4 + $0x328] ss:$16 sps:$4 sm:$0xff]  }
 0x276   : > { %v2255_v35 = vmax.f32 %v1963_v9, 0.0  ;;  %v2257_v20 = vmax.f32 %v2004_v42, 0.0  ;;  %v18310_v9 = vld [vmem:[%s24570_s4 + $0x320] ss:$16 sps:$4 sm:$0xff]   ;;  %v18318_v34 = vld [vmem:[%s24570_s4 + $0x344] ss:$16 sps:$4 sm:$0xff]  }
 0x277   : > { %v2270_v39 = vpack.c.bf16 %v2254_v33, %v2254_v33  ;;  %v18333_v1 = vld [vmem:[%s24570_s4 + $0x38c] ss:$16 sps:$4 sm:$0xff]   ;;  %v20435_v42 = vsub.s32 2, %v20258_v19  ;;  %v18328_v43 = vld [vmem:[%s24570_s4 + $0x380] ss:$16 sps:$4 sm:$0xff]  }
 0x278   : > { %v2271_v53 = vpack.c.bf16 %v2255_v35, %v2255_v35  ;;  %v2273_v48 = vpack.c.bf16 %v2257_v20, %v2257_v20  ;;  %v18321_v35 = vld [vmem:[%s24570_s4 + $0x34c] ss:$16 sps:$4 sm:$0xff]   ;;  %v18334_v20 = vld [vmem:[%s24570_s4 + $0x3a0] ss:$16 sps:$4 sm:$0xff]  }
 0x279   : > { %24603 = vst [vmem:[#allocation10_spill] sm:$0xff] %v20435_v42  ;;  %v18339_v46 = vld [vmem:[%s24570_s4 + $0x3ac] ss:$16 sps:$4 sm:$0xff]  }
 0x27a   : > { %5412 = vmatprep.mubr.bf16.mxu0 %v2271_v53  ;;  %5740 = vmatprep.mubr.bf16.mxu1 %v2271_v53  ;;  %v18327_v53 = vld [vmem:[%s24570_s4 + $0x36c] ss:$16 sps:$4 sm:$0xff]  }
 0x27b   : > { %5413 = vmatmul.mubr.bf16.vlgmr.msra.gmra.mrb[16].mxu0 %v2270_v39  ;;  %5741 = vmatmul.mubr.bf16.vlgmr.msra.gmra.mrb[16].mxu1 %v2270_v39  ;;  %v18322_v39 = vld [vmem:[%s24570_s4 + $0x360] ss:$16 sps:$4 sm:$0xff]  }
 0x27c   : > { %5422 = vmatpush1.bf16.msra.mxu0 %v18256_v36  ;;  %5750 = vmatpush1.bf16.msra.mxu1 %v18259_v49  ;;  %v18316_v36 = vld [vmem:[%s24570_s4 + $0x340] ss:$16 sps:$4 sm:$0xff]   ;;  %v18319_v49 = vld [vmem:[%s24570_s4 + $0x348] ss:$16 sps:$4 sm:$0xff]  }
 0x27d   : > { %5423 = vmatprep.subr.bf16.mxu0 %v18264_v60  ;;  %5751 = vmatprep.subr.bf16.mxu1 %v18267_v40  ;;  %v18325_v60 = vld [vmem:[%s24570_s4 + $0x368] ss:$16 sps:$4 sm:$0xff]   ;;  %v18330_v40 = vld [vmem:[%s24570_s4 + $0x384] ss:$16 sps:$4 sm:$0xff]  }
 0x27e   : > { %5453 = vmatprep.mubr.bf16.mxu0 %v2273_v48  ;;  %5781 = vmatprep.mubr.bf16.mxu1 %v2273_v48  ;;  %v18337_v48 = vld [vmem:[%s24570_s4 + $0x3a8] ss:$16 sps:$4 sm:$0xff]  }
 0x280   : > { %5424 = vmatpush1.bf16.msra.mxu0 %v18262_v8  ;;  %5752 = vmatpush1.bf16.msra.mxu1 %v18265_v45  ;;  %v18331_v8 = vld [vmem:[%s24570_s4 + $0x388] ss:$16 sps:$4 sm:$0xff]   ;;  %v18336_v45 = vld [vmem:[%s24570_s4 + $0x3a4] ss:$16 sps:$4 sm:$0xff]  }
 0x281   : > { %5425 = vmatprep.subr.bf16.mxu0 %v18270_v13  ;;  %5753 = vmatprep.subr.bf16.mxu1 %v18273_v47  ;;  %v20450_v13 = vsub.s32 5, %v20258_v19  ;;  %v1217_v47 = vrot.slane %v20266_v22, %v20435_v42 }
 0x284   : > { %5426 = vmatpush1.bf16.msra.mxu0 %v18268_v51  ;;  %5754 = vmatpush1.bf16.msra.mxu1 %v18271_v25  ;;  %v18342_v51 = vld [vmem:[%s24570_s4 + $0x3c4] ss:$16 sps:$4 sm:$0xff]   ;;  %v18345_v25 = vld [vmem:[%s24570_s4 + $0x3cc] ss:$16 sps:$4 sm:$0xff]  }
 0x285   : > { %5427 = vmatprep.subr.bf16.mxu0 %v18276_v52  ;;  %5755 = vmatprep.subr.bf16.mxu1 %v18279_v54  ;;  %v1229_v52 = vrot.slane %v20266_v22, %v20450_v13  ;;  %v2002_v54 = vadd.f32 %v20292_v41, %v1217_v47  ;;  %v18351_v22 = vld [vmem:[%s24570_s4 + $0x3ec] ss:$16 sps:$4 sm:$0xff]   ;;  %v18396_v47 = vld [vmem:[%s24570_s4 + $0x4e4] ss:$16 sps:$4 sm:$0xff]  }
 0x288   : > { %5428 = vmatpush1.bf16.msra.mxu0 %v18274_v32  ;;  %5756 = vmatpush1.bf16.msra.mxu1 %v18277_v55  ;;  %v18340_v32 = vld [vmem:[%s24570_s4 + $0x3c0] ss:$16 sps:$4 sm:$0xff]   ;;  %v18343_v55 = vld [vmem:[%s24570_s4 + $0x3c8] ss:$16 sps:$4 sm:$0xff]  }
 0x289   : > { %5429 = vmatprep.subr.bf16.mxu0 %v18282_v56  ;;  %5757 = vmatprep.subr.bf16.mxu1 %v18285_v37  ;;  %v18348_v56 = vld [vmem:[%s24570_s4 + $0x3e4] ss:$16 sps:$4 sm:$0xff]  }
 0x28c   : > { %5430 = vmatpush1.bf16.msra.mxu0 %v18280_v57  ;;  %5758 = vmatpush1.bf16.msra.mxu1 %v18283_v44  ;;  %v2256_v57 = vmax.f32 %v2002_v54, 0.0 }
 0x28d   : > { %5431 = vmatprep.subr.bf16.mxu0 %v18288_v50  ;;  %5759 = vmatprep.subr.bf16.mxu1 %v18291_v59  ;;  %v18346_v50 = vld [vmem:[%s24570_s4 + $0x3e0] ss:$16 sps:$4 sm:$0xff]   ;;  %v18349_v59 = vld [vmem:[%s24570_s4 + $0x3e8] ss:$16 sps:$4 sm:$0xff]  }
 0x290   : > { %5432 = vmatpush1.bf16.msra.mxu0 %v18286_v58  ;;  %5760 = vmatpush1.bf16.msra.mxu1 %v18289_v61  ;;  %v18354_v61 = vld [vmem:[%s24570_s4 + $0x404] ss:$16 sps:$4 sm:$0xff]  }
 0x291   : > { %5433 = vmatprep.subr.bf16.mxu0 %v18294_v62  ;;  %5761 = vmatprep.subr.bf16.mxu1 %v18297_v63  ;;  %v18357_v62 = vld [vmem:[%s24570_s4 + $0x40c] ss:$16 sps:$4 sm:$0xff]  }
 0x292   : > { %v20366_v6 = vpop.f32.mrb[4].mxu0 }
 0x293   : > { %v20368_v7 = vpop.f32.mrb[5].mxu0 }
 0x294   : > { %5434 = vmatpush1.bf16.msra.mxu0 %v18292_v0  ;;  %5762 = vmatpush1.bf16.msra.mxu1 %v18295_v2  ;;  %v2046_v12 = vpop.f32.mrb[6].mxu0  ;;  %v20394_v27 = vpop.f32.mrb[4].mxu1  ;;  %v2045_v41 = vadd.f32 %v20368_v7, %v1229_v52  ;;  %v18352_v0 = vld [vmem:[%s24570_s4 + $0x400] ss:$16 sps:$4 sm:$0xff]   ;;  %v18355_v2 = vld [vmem:[%s24570_s4 + $0x408] ss:$16 sps:$4 sm:$0xff]  }
 0x295   : > { %5435 = vmatprep.subr.bf16.mxu0 %v18300_v4  ;;  %5763 = vmatprep.subr.bf16.mxu1 %v18303_v5  ;;  %v2047_v16 = vpop.f32.mrb[7].mxu0  ;;  %v20396_v28 = vpop.f32.mrb[5].mxu1  ;;  %v2272_v5 = vpack.c.bf16 %v2256_v57, %v2256_v57  ;;  %v18360_v7 = vld [vmem:[%s24570_s4 + $0x424] ss:$16 sps:$4 sm:$0xff]   ;;  %v18358_v12 = vld [vmem:[%s24570_s4 + $0x420] ss:$16 sps:$4 sm:$0xff]  }
 0x296   : > { %v2087_v29 = vpop.f32.mrb[6].mxu1  ;;  %v2259_v4 = vmax.f32 %v2045_v41, 0.0  ;;  %v18403_v41 = vld [vmem:[%s24570_s4 + $0x508] ss:$16 sps:$4 sm:$0xff]   ;;  %v18408_v57 = vld [vmem:[%s24570_s4 + $0x524] ss:$16 sps:$4 sm:$0xff]  }
 0x297   : > { %v2088_v33 = vpop.f32.mrb[7].mxu1  ;;  %v18364_v29 = vld [vmem:[%s24570_s4 + $0x440] ss:$16 sps:$4 sm:$0xff]  }
 0x298   : > { %5436 = vmatpush1.bf16.msra.mxu0 %v18298_v10  ;;  %5764 = vmatpush1.bf16.msra.mxu1 %v18301_v11  ;;  %v18363_v10 = vld [vmem:[%s24570_s4 + $0x42c] ss:$16 sps:$4 sm:$0xff]  }
 0x299   : > { %5437 = vmatprep.subr.bf16.mxu0 %v18306_v14  ;;  %5765 = vmatprep.subr.bf16.mxu1 %v18309_v15  ;;  %v18361_v14 = vld [vmem:[%s24570_s4 + $0x428] ss:$16 sps:$4 sm:$0xff]   ;;  %v2275_v15 = vpack.c.bf16 %v2259_v4, %v2259_v4  ;;  %v18375_v33 = vld [vmem:[%s24570_s4 + $0x46c] ss:$16 sps:$4 sm:$0xff]  }
 0x29a   : > { %v18417_v4 = vld [vmem:[%s24570_s4 + $0x54c] ss:$16 sps:$4 sm:$0xff]  }
 0x29c   : > { %5438 = vmatpush1.bf16.msra.mxu0 %v18304_v17  ;;  %5766 = vmatpush1.bf16.msra.mxu1 %v18307_v18 }
 0x29d   : > { %5439 = vmatprep.subr.bf16.mxu0 %v18312_v24  ;;  %5767 = vmatprep.subr.bf16.mxu1 %v18315_v26  ;;  %v18366_v24 = vld [vmem:[%s24570_s4 + $0x444] ss:$16 sps:$4 sm:$0xff]   ;;  %v18369_v26 = vld [vmem:[%s24570_s4 + $0x44c] ss:$16 sps:$4 sm:$0xff]  }
 0x2a0   : > { %5440 = vmatpush1.bf16.msra.mxu0 %v18310_v9  ;;  %5768 = vmatpush1.bf16.msra.mxu1 %v18313_v31  ;;  %v18367_v9 = vld [vmem:[%s24570_s4 + $0x448] ss:$16 sps:$4 sm:$0xff]   ;;  %v18372_v31 = vld [vmem:[%s24570_s4 + $0x464] ss:$16 sps:$4 sm:$0xff]  }
 0x2a1   : > { %5441 = vmatprep.subr.bf16.mxu0 %v18318_v34  ;;  %5769 = vmatprep.subr.bf16.mxu1 %v18321_v35  ;;  %v18370_v34 = vld [vmem:[%s24570_s4 + $0x460] ss:$16 sps:$4 sm:$0xff]   ;;  %v18373_v35 = vld [vmem:[%s24570_s4 + $0x468] ss:$16 sps:$4 sm:$0xff]  }
 0x2a4   : > { %5442 = vmatpush1.bf16.msra.mxu0 %v18316_v36  ;;  %5770 = vmatpush1.bf16.msra.mxu1 %v18319_v49  ;;  %v18378_v36 = vld [vmem:[%s24570_s4 + $0x484] ss:$16 sps:$4 sm:$0xff]   ;;  %v18381_v49 = vld [vmem:[%s24570_s4 + $0x48c] ss:$16 sps:$4 sm:$0xff]  }
 0x2a5   : > { %5443 = vmatprep.subr.bf16.mxu0 %v18324_v38  ;;  %5771 = vmatprep.subr.bf16.mxu1 %v18327_v53  ;;  %v18376_v38 = vld [vmem:[%s24570_s4 + $0x480] ss:$16 sps:$4 sm:$0xff]   ;;  %v18379_v53 = vld [vmem:[%s24570_s4 + $0x488] ss:$16 sps:$4 sm:$0xff]  }
 0x2a8   : > { %5444 = vmatpush1.bf16.msra.mxu0 %v18322_v39  ;;  %5772 = vmatpush1.bf16.msra.mxu1 %v18325_v60  ;;  %v18384_v39 = vld [vmem:[%s24570_s4 + $0x4a4] ss:$16 sps:$4 sm:$0xff]   ;;  %v18387_v60 = vld [vmem:[%s24570_s4 + $0x4ac] ss:$16 sps:$4 sm:$0xff]  }
 0x2a9   : > { %5445 = vmatprep.subr.bf16.mxu0 %v18330_v40  ;;  %5773 = vmatprep.subr.bf16.mxu1 %v18333_v1  ;;  %v18382_v40 = vld [vmem:[%s24570_s4 + $0x4a0] ss:$16 sps:$4 sm:$0xff]   ;;  %v18385_v1 = vld [vmem:[%s24570_s4 + $0x4a8] ss:$16 sps:$4 sm:$0xff]  }
 0x2ac   : > { %5446 = vmatpush1.bf16.msra.mxu0 %v18328_v43  ;;  %5774 = vmatpush1.bf16.msra.mxu1 %v18331_v8  ;;  %v18390_v43 = vld [vmem:[%s24570_s4 + $0x4c4] ss:$16 sps:$4 sm:$0xff]   ;;  %v18393_v8 = vld [vmem:[%s24570_s4 + $0x4cc] ss:$16 sps:$4 sm:$0xff]  }
 0x2ad   : > { %5447 = vmatprep.subr.bf16.mxu0 %v18336_v45  ;;  %5775 = vmatprep.subr.bf16.mxu1 %v18339_v46  ;;  %v18388_v45 = vld [vmem:[%s24570_s4 + $0x4c0] ss:$16 sps:$4 sm:$0xff]   ;;  %v18391_v46 = vld [vmem:[%s24570_s4 + $0x4c8] ss:$16 sps:$4 sm:$0xff]  }
 0x2b0   : > { %5448 = vmatpush1.bf16.msra.mxu0 %v18334_v20  ;;  %5776 = vmatpush1.bf16.msra.mxu1 %v18337_v48  ;;  %v18399_v20 = vld [vmem:[%s24570_s4 + $0x4ec] ss:$16 sps:$4 sm:$0xff]   ;;  %v18394_v48 = vld [vmem:[%s24570_s4 + $0x4e0] ss:$16 sps:$4 sm:$0xff]  }
 0x2b1   : > { %5449 = vmatprep.subr.bf16.mxu0 %v18342_v51  ;;  %5777 = vmatprep.subr.bf16.mxu1 %v18345_v25  ;;  %v18397_v51 = vld [vmem:[%s24570_s4 + $0x4e8] ss:$16 sps:$4 sm:$0xff]  }
 0x2b2   : > { %v20482_v37 = vpop.f32.mrb[8].mxu0 }
 0x2b3   : > { %v20484_v44 = vpop.f32.mrb[9].mxu0 }
 0x2b4   : > { %5450 = vmatpush1.bf16.msra.mxu0 %v18340_v32  ;;  %5778 = vmatpush1.bf16.msra.mxu1 %v18343_v55  ;;  %v2128_v58 = vpop.f32.mrb[10].mxu0  ;;  %v20510_v11 = vpop.f32.mrb[8].mxu1  ;;  %v18402_v32 = vld [vmem:[%s24570_s4 + $0x504] ss:$16 sps:$4 sm:$0xff]   ;;  %v18405_v55 = vld [vmem:[%s24570_s4 + $0x50c] ss:$16 sps:$4 sm:$0xff]  }
 0x2b5   : > { %5451 = vmatprep.subr.bf16.mxu0 %v18348_v56  ;;  %5779 = vmatprep.subr.bf16.mxu1 %v18351_v22  ;;  %v2129_v63 = vpop.f32.mrb[11].mxu0  ;;  %v20518_v16 = vpop.f32.mrb[9].mxu1  ;;  %v18400_v22 = vld [vmem:[%s24570_s4 + $0x500] ss:$16 sps:$4 sm:$0xff]  }
 0x2b6   : > { %v2169_v17 = vpop.f32.mrb[10].mxu1  ;;  %v18406_v58 = vld [vmem:[%s24570_s4 + $0x520] ss:$16 sps:$4 sm:$0xff]  }
 0x2b7   : > { %v2170_v18 = vpop.f32.mrb[11].mxu1  ;;  %v18426_v17 = vld [vmem:[%s24570_s4 + $0x584] ss:$16 sps:$4 sm:$0xff]  }
 0x2b8   : > { %5452 = vmatpush1.bf16.msra.mxu0 %v18346_v50  ;;  %5780 = vmatpush1.bf16.msra.mxu1 %v18349_v59  ;;  %v18411_v50 = vld [vmem:[%s24570_s4 + $0x52c] ss:$16 sps:$4 sm:$0xff]  }
 0x2b9   : > { %5462 = vmatprep.subr.bf16.mxu0 %v18354_v61  ;;  %5790 = vmatprep.subr.bf16.mxu1 %v18357_v62  ;;  %v18409_v61 = vld [vmem:[%s24570_s4 + $0x528] ss:$16 sps:$4 sm:$0xff]   ;;  %v18429_v18 = vld [vmem:[%s24570_s4 + $0x58c] ss:$16 sps:$4 sm:$0xff]  }
 0x2bb   : > { %5454 = vmatmul.mubr.bf16.vlgmr.msra.gmra.mrb[16].mxu0 %v2272_v5  ;;  %5782 = vmatmul.mubr.bf16.vlgmr.msra.gmra.mrb[16].mxu1 %v2272_v5  ;;  %v18412_v5 = vld [vmem:[%s24570_s4 + $0x540] ss:$16 sps:$4 sm:$0xff]  }
 0x2bc   : > { %5463 = vmatpush1.bf16.msra.mxu0 %v18352_v0  ;;  %5791 = vmatpush1.bf16.msra.mxu1 %v18355_v2  ;;  %v18414_v2 = vld [vmem:[%s24570_s4 + $0x544] ss:$16 sps:$4 sm:$0xff]  }
 0x2bd   : > { %5464 = vmatprep.subr.bf16.mxu0 %v18360_v7  ;;  %5792 = vmatprep.subr.bf16.mxu1 %v18363_v10  ;;  %v18415_v7 = vld [vmem:[%s24570_s4 + $0x548] ss:$16 sps:$4 sm:$0xff]   ;;  %v18420_v10 = vld [vmem:[%s24570_s4 + $0x564] ss:$16 sps:$4 sm:$0xff]  }
 0x2be   : > { %5494 = vmatprep.mubr.bf16.mxu0 %v2275_v15  ;;  %5822 = vmatprep.mubr.bf16.mxu1 %v2275_v15  ;;  %v18421_v15 = vld [vmem:[%s24570_s4 + $0x568] ss:$16 sps:$4 sm:$0xff]  }
 0x2c0   : > { %5465 = vmatpush1.bf16.msra.mxu0 %v18358_v12  ;;  %5793 = vmatpush1.bf16.msra.mxu1 %v18361_v14  ;;  %v18423_v12 = vld [vmem:[%s24570_s4 + $0x56c] ss:$16 sps:$4 sm:$0xff]   ;;  %v18418_v14 = vld [vmem:[%s24570_s4 + $0x560] ss:$16 sps:$4 sm:$0xff]  }
 0x2c1   : > { %5466 = vmatprep.subr.bf16.mxu0 %v18366_v24  ;;  %5794 = vmatprep.subr.bf16.mxu1 %v18369_v26  ;;  %v18424_v24 = vld [vmem:[%s24570_s4 + $0x580] ss:$16 sps:$4 sm:$0xff]   ;;  %v18427_v26 = vld [vmem:[%s24570_s4 + $0x588] ss:$16 sps:$4 sm:$0xff]  }
 0x2c4   : > { %5467 = vmatpush1.bf16.msra.mxu0 %v18364_v29  ;;  %5795 = vmatpush1.bf16.msra.mxu1 %v18367_v9  ;;  %v20661_v29 = vsub.s32 4, %v20258_v19  ;;  %v18432_v9 = vld [vmem:[%s24570_s4 + $0x5a4] ss:$16 sps:$4 sm:$0xff]  }
 0x2c5   : > { %5468 = vmatprep.subr.bf16.mxu0 %v18372_v31  ;;  %5796 = vmatprep.subr.bf16.mxu1 %v18375_v33  ;;  %v18435_v31 = vld [vmem:[%s24570_s4 + $0x5ac] ss:$16 sps:$4 sm:$0xff]   ;;  %v18430_v33 = vld [vmem:[%s24570_s4 + $0x5a0] ss:$16 sps:$4 sm:$0xff]  }
 0x2c8   : > { %5469 = vmatpush1.bf16.msra.mxu0 %v18370_v34  ;;  %5797 = vmatpush1.bf16.msra.mxu1 %v18373_v35  ;;  %v18433_v34 = vld [vmem:[%s24570_s4 + $0x5a8] ss:$16 sps:$4 sm:$0xff]   ;;  %v20676_v35 = vsub.s32 7, %v20258_v19 }
 0x2c9   : > { %5470 = vmatprep.subr.bf16.mxu0 %v18378_v36  ;;  %5798 = vmatprep.subr.bf16.mxu1 %v18381_v49  ;;  %v20681_v36 = vld [vmem:[%s24569_s3] sm:$0xff] }
 0x2ca   : > { %v1225_v49 = vrot.slane %v20681_v36, %v20661_v29 }
 0x2cc   : > { %5471 = vmatpush1.bf16.msra.mxu0 %v18376_v38  ;;  %5799 = vmatpush1.bf16.msra.mxu1 %v18379_v53  ;;  %v18438_v38 = vld [vmem:[%s24570_s4 + $0x5c4] ss:$16 sps:$4 sm:$0xff]   ;;  %v18441_v53 = vld [vmem:[%s24570_s4 + $0x5cc] ss:$16 sps:$4 sm:$0xff]  }
 0x2cd   : > { %5472 = vmatprep.subr.bf16.mxu0 %v18384_v39  ;;  %5800 = vmatprep.subr.bf16.mxu1 %v18387_v60  ;;  %v18436_v39 = vld [vmem:[%s24570_s4 + $0x5c0] ss:$16 sps:$4 sm:$0xff]   ;;  %v18439_v60 = vld [vmem:[%s24570_s4 + $0x5c8] ss:$16 sps:$4 sm:$0xff]  }
 0x2d0   : > { %5473 = vmatpush1.bf16.msra.mxu0 %v18382_v40  ;;  %5801 = vmatpush1.bf16.msra.mxu1 %v18385_v1  ;;  %v1237_v40 = vrot.slane %v20681_v36, %v20676_v35  ;;  %v2043_v1 = vadd.f32 %v20366_v6, %v1225_v49  ;;  %v18495_v49 = vld [vmem:[%s24570_s4 + $0x6ec] ss:$16 sps:$4 sm:$0xff]  }
 0x2d1   : > { %5474 = vmatprep.subr.bf16.mxu0 %v18390_v43  ;;  %5802 = vmatprep.subr.bf16.mxu1 %v18393_v8  ;;  %v18444_v43 = vld [vmem:[%s24570_s4 + $0x5e4] ss:$16 sps:$4 sm:$0xff]   ;;  %v18447_v8 = vld [vmem:[%s24570_s4 + $0x5ec] ss:$16 sps:$4 sm:$0xff]  }
 0x2d2   : > { %v20592_v25 = vpop.f32.mrb[12].mxu0  ;;  %v2086_v6 = vadd.f32 %v20396_v28, %v1237_v40  ;;  %v18451_v28 = vld [vmem:[%s24570_s4 + $0x608] ss:$16 sps:$4 sm:$0xff]   ;;  %v18496_v40 = vld [vmem:[%s24570_s4 + $0x700] ss:$16 sps:$4 sm:$0xff]  }
 0x2d3   : > { %v20594_v52 = vpop.f32.mrb[13].mxu0 }
 0x2d4   : > { %5475 = vmatpush1.bf16.msra.mxu0 %v18388_v45  ;;  %5803 = vmatpush1.bf16.msra.mxu1 %v18391_v46  ;;  %v2210_v54 = vpop.f32.mrb[14].mxu0  ;;  %v20614_v59 = vpop.f32.mrb[12].mxu1  ;;  %v18442_v45 = vld [vmem:[%s24570_s4 + $0x5e0] ss:$16 sps:$4 sm:$0xff]   ;;  %v18445_v46 = vld [vmem:[%s24570_s4 + $0x5e8] ss:$16 sps:$4 sm:$0xff]  }
 0x2d5   : > { %5476 = vmatprep.subr.bf16.mxu0 %v18396_v47  ;;  %5804 = vmatprep.subr.bf16.mxu1 %v18399_v20  ;;  %v2211_v56 = vpop.f32.mrb[15].mxu0  ;;  %v20622_v62 = vpop.f32.mrb[13].mxu1  ;;  %v2258_v47 = vmax.f32 %v2043_v1, 0.0  ;;  %v18450_v20 = vld [vmem:[%s24570_s4 + $0x604] ss:$16 sps:$4 sm:$0xff]   ;;  %v2261_v54 = vmax.f32 %v2086_v6, 0.0 }
 0x2d6   : > { %v2251_v63 = vpop.f32.mrb[14].mxu1  ;;  %v18499_v1 = vld [vmem:[%s24570_s4 + $0x708] ss:$16 sps:$4 sm:$0xff]   ;;  %v18510_v6 = vld [vmem:[%s24570_s4 + $0x744] ss:$16 sps:$4 sm:$0xff]  }
 0x2d7   : > { %v2252_v0 = vpop.f32.mrb[15].mxu1  ;;  %v2274_v56 = vpack.c.bf16 %v2258_v47, %v2258_v47  ;;  %v18463_v63 = vld [vmem:[%s24570_s4 + $0x648] ss:$16 sps:$4 sm:$0xff]   ;;  %v18513_v47 = vld [vmem:[%s24570_s4 + $0x74c] ss:$16 sps:$4 sm:$0xff]  }
 0x2d8   : > { %5477 = vmatpush1.bf16.msra.mxu0 %v18394_v48  ;;  %5805 = vmatpush1.bf16.msra.mxu1 %v18397_v51  ;;  %v18453_v48 = vld [vmem:[%s24570_s4 + $0x60c] ss:$16 sps:$4 sm:$0xff]   ;;  %v18448_v51 = vld [vmem:[%s24570_s4 + $0x600] ss:$16 sps:$4 sm:$0xff]   ;;  %v18468_v0 = vld [vmem:[%s24570_s4 + $0x664] ss:$16 sps:$4 sm:$0xff]  }
 0x2d9   : > { %5478 = vmatprep.subr.bf16.mxu0 %v18402_v32  ;;  %5806 = vmatprep.subr.bf16.mxu1 %v18405_v55  ;;  %v18456_v32 = vld [vmem:[%s24570_s4 + $0x624] ss:$16 sps:$4 sm:$0xff]   ;;  %v18459_v55 = vld [vmem:[%s24570_s4 + $0x62c] ss:$16 sps:$4 sm:$0xff]  }
 0x2dc   : > { %5479 = vmatpush1.bf16.msra.mxu0 %v18400_v22  ;;  %5807 = vmatpush1.bf16.msra.mxu1 %v18403_v41  ;;  %v18454_v22 = vld [vmem:[%s24570_s4 + $0x620] ss:$16 sps:$4 sm:$0xff]   ;;  %v18457_v41 = vld [vmem:[%s24570_s4 + $0x628] ss:$16 sps:$4 sm:$0xff]  }
 0x2dd   : > { %5480 = vmatprep.subr.bf16.mxu0 %v18408_v57  ;;  %5808 = vmatprep.subr.bf16.mxu1 %v18411_v50  ;;  %v2277_v57 = vpack.c.bf16 %v2261_v54, %v2261_v54  ;;  %v18462_v50 = vld [vmem:[%s24570_s4 + $0x644] ss:$16 sps:$4 sm:$0xff]   ;;  %v18514_v54 = vld [vmem:[%s24570_s4 + $0x760] ss:$16 sps:$4 sm:$0xff]  }
 0x2e0   : > { %5481 = vmatpush1.bf16.msra.mxu0 %v18406_v58  ;;  %5809 = vmatpush1.bf16.msra.mxu1 %v18409_v61  ;;  %v18465_v58 = vld [vmem:[%s24570_s4 + $0x64c] ss:$16 sps:$4 sm:$0xff]   ;;  %v18460_v61 = vld [vmem:[%s24570_s4 + $0x640] ss:$16 sps:$4 sm:$0xff]  }
 0x2e1   : > { %5482 = vmatprep.subr.bf16.mxu0 %v18414_v2  ;;  %5810 = vmatprep.subr.bf16.mxu1 %v18417_v4  ;;  %v18471_v2 = vld [vmem:[%s24570_s4 + $0x66c] ss:$16 sps:$4 sm:$0xff]   ;;  %v18466_v4 = vld [vmem:[%s24570_s4 + $0x660] ss:$16 sps:$4 sm:$0xff]  }
 0x2e4   : > { %5483 = vmatpush1.bf16.msra.mxu0 %v18412_v5  ;;  %5811 = vmatpush1.bf16.msra.mxu1 %v18415_v7  ;;  %v18469_v5 = vld [vmem:[%s24570_s4 + $0x668] ss:$16 sps:$4 sm:$0xff]   ;;  %v18474_v7 = vld [vmem:[%s24570_s4 + $0x684] ss:$16 sps:$4 sm:$0xff]  }
 0x2e5   : > { %5484 = vmatprep.subr.bf16.mxu0 %v18420_v10  ;;  %5812 = vmatprep.subr.bf16.mxu1 %v18423_v12  ;;  %v18477_v10 = vld [vmem:[%s24570_s4 + $0x68c] ss:$16 sps:$4 sm:$0xff]   ;;  %v18472_v12 = vld [vmem:[%s24570_s4 + $0x680] ss:$16 sps:$4 sm:$0xff]  }
 0x2e8   : > { %5485 = vmatpush1.bf16.msra.mxu0 %v18418_v14  ;;  %5813 = vmatpush1.bf16.msra.mxu1 %v18421_v15  ;;  %v18475_v14 = vld [vmem:[%s24570_s4 + $0x688] ss:$16 sps:$4 sm:$0xff]   ;;  %v18480_v15 = vld [vmem:[%s24570_s4 + $0x6a4] ss:$16 sps:$4 sm:$0xff]  }
 0x2e9   : > { %5486 = vmatprep.subr.bf16.mxu0 %v18426_v17  ;;  %5814 = vmatprep.subr.bf16.mxu1 %v18429_v18  ;;  %v18483_v17 = vld [vmem:[%s24570_s4 + $0x6ac] ss:$16 sps:$4 sm:$0xff]   ;;  %v18478_v18 = vld [vmem:[%s24570_s4 + $0x6a0] ss:$16 sps:$4 sm:$0xff]  }
 0x2ec   : > { %5487 = vmatpush1.bf16.msra.mxu0 %v18424_v24  ;;  %5815 = vmatpush1.bf16.msra.mxu1 %v18427_v26  ;;  %v18481_v24 = vld [vmem:[%s24570_s4 + $0x6a8] ss:$16 sps:$4 sm:$0xff]   ;;  %v18486_v26 = vld [vmem:[%s24570_s4 + $0x6c4] ss:$16 sps:$4 sm:$0xff]  }
 0x2ed   : > { %5488 = vmatprep.subr.bf16.mxu0 %v18432_v9  ;;  %5816 = vmatprep.subr.bf16.mxu1 %v18435_v31  ;;  %v18489_v9 = vld [vmem:[%s24570_s4 + $0x6cc] ss:$16 sps:$4 sm:$0xff]   ;;  %v18484_v31 = vld [vmem:[%s24570_s4 + $0x6c0] ss:$16 sps:$4 sm:$0xff]  }
 0x2f0   : > { %5489 = vmatpush1.bf16.msra.mxu0 %v18430_v33  ;;  %5817 = vmatpush1.bf16.msra.mxu1 %v18433_v34  ;;  %v18487_v33 = vld [vmem:[%s24570_s4 + $0x6c8] ss:$16 sps:$4 sm:$0xff]   ;;  %v18492_v34 = vld [vmem:[%s24570_s4 + $0x6e4] ss:$16 sps:$4 sm:$0xff]  }
 0x2f1   : > { %5490 = vmatprep.subr.bf16.mxu0 %v18438_v38  ;;  %5818 = vmatprep.subr.bf16.mxu1 %v18441_v53  ;;  %v18490_v38 = vld [vmem:[%s24570_s4 + $0x6e0] ss:$16 sps:$4 sm:$0xff]   ;;  %v18493_v53 = vld [vmem:[%s24570_s4 + $0x6e8] ss:$16 sps:$4 sm:$0xff]  }
 0x2f4   : > { %5491 = vmatpush1.bf16.msra.mxu0 %v18436_v39  ;;  %5819 = vmatpush1.bf16.msra.mxu1 %v18439_v60  ;;  %v18498_v39 = vld [vmem:[%s24570_s4 + $0x704] ss:$16 sps:$4 sm:$0xff]   ;;  %v18501_v60 = vld [vmem:[%s24570_s4 + $0x70c] ss:$16 sps:$4 sm:$0xff]  }
 0x2f5   : > { %5492 = vmatprep.subr.bf16.mxu0 %v18444_v43  ;;  %5820 = vmatprep.subr.bf16.mxu1 %v18447_v8  ;;  %v18504_v43 = vld [vmem:[%s24570_s4 + $0x724] ss:$16 sps:$4 sm:$0xff]   ;;  %v18507_v8 = vld [vmem:[%s24570_s4 + $0x72c] ss:$16 sps:$4 sm:$0xff]  }
 0x2f8   : > { %5493 = vmatpush1.bf16.msra.mxu0 %v18442_v45  ;;  %5821 = vmatpush1.bf16.msra.mxu1 %v18445_v46  ;;  %v18502_v45 = vld [vmem:[%s24570_s4 + $0x720] ss:$16 sps:$4 sm:$0xff]   ;;  %v18505_v46 = vld [vmem:[%s24570_s4 + $0x728] ss:$16 sps:$4 sm:$0xff]  }
 0x2f9   : > { %5503 = vmatprep.subr.bf16.mxu0 %v18450_v20  ;;  %5831 = vmatprep.subr.bf16.mxu1 %v18453_v48  ;;  %v18508_v20 = vld [vmem:[%s24570_s4 + $0x740] ss:$16 sps:$4 sm:$0xff]   ;;  %v18511_v48 = vld [vmem:[%s24570_s4 + $0x748] ss:$16 sps:$4 sm:$0xff]  }
 0x2fb   : > { %5495 = vmatmul.mubr.bf16.vlgmr.msra.gmra.mrb[16].mxu0 %v2274_v56  ;;  %5823 = vmatmul.mubr.bf16.vlgmr.msra.gmra.mrb[16].mxu1 %v2274_v56  ;;  %v18525_v56 = vld [vmem:[%s24570_s4 + $0x78c] ss:$16 sps:$4 sm:$0xff]  }
 0x2fc   : > { %5504 = vmatpush1.bf16.msra.mxu0 %v18448_v51  ;;  %5832 = vmatpush1.bf16.msra.mxu1 %v18451_v28  ;;  %v18516_v51 = vld [vmem:[%s24570_s4 + $0x764] ss:$16 sps:$4 sm:$0xff]   ;;  %v18519_v28 = vld [vmem:[%s24570_s4 + $0x76c] ss:$16 sps:$4 sm:$0xff]  }
 0x2fd   : > { %5505 = vmatprep.subr.bf16.mxu0 %v18456_v32  ;;  %5833 = vmatprep.subr.bf16.mxu1 %v18459_v55  ;;  %v18517_v32 = vld [vmem:[%s24570_s4 + $0x768] ss:$16 sps:$4 sm:$0xff]   ;;  %v18522_v55 = vld [vmem:[%s24570_s4 + $0x784] ss:$16 sps:$4 sm:$0xff]  }
 0x2fe   : > { %5535 = vmatprep.mubr.bf16.mxu0 %v2277_v57  ;;  %5863 = vmatprep.mubr.bf16.mxu1 %v2277_v57  ;;  %v20872_v57 = vld [vmem:[%s24569_s3 + $0x8] sm:$0xff] }
 0x300   : > { %5506 = vmatpush1.bf16.msra.mxu0 %v18454_v22  ;;  %5834 = vmatpush1.bf16.msra.mxu1 %v18457_v41  ;;  %v18520_v22 = vld [vmem:[%s24570_s4 + $0x780] ss:$16 sps:$4 sm:$0xff]   ;;  %v18523_v41 = vld [vmem:[%s24570_s4 + $0x788] ss:$16 sps:$4 sm:$0xff]  }
 0x301   : > { %5507 = vmatprep.subr.bf16.mxu0 %v18462_v50  ;;  %5835 = vmatprep.subr.bf16.mxu1 %v18465_v58  ;;  %v20875_v50 = vsub.s32 6, %v20258_v19  ;;  %v18528_v58 = vld [vmem:[%s24570_s4 + $0x7a4] ss:$16 sps:$4 sm:$0xff]  }
 0x304   : > { %5508 = vmatpush1.bf16.msra.mxu0 %v18460_v61  ;;  %5836 = vmatpush1.bf16.msra.mxu1 %v18463_v63  ;;  %v18531_v61 = vld [vmem:[%s24570_s4 + $0x7ac] ss:$16 sps:$4 sm:$0xff]   ;;  %v18526_v63 = vld [vmem:[%s24570_s4 + $0x7a0] ss:$16 sps:$4 sm:$0xff]  }
 0x305   : > { %5509 = vmatprep.subr.bf16.mxu0 %v18468_v0  ;;  %5837 = vmatprep.subr.bf16.mxu1 %v18471_v2  ;;  %v18529_v0 = vld [vmem:[%s24570_s4 + $0x7a8] ss:$16 sps:$4 sm:$0xff]   ;;  %v1245_v2 = vrot.slane %v20872_v57, %v20269_v23 }
 0x308   : > { %5510 = vmatpush1.bf16.msra.mxu0 %v18466_v4  ;;  %5838 = vmatpush1.bf16.msra.mxu1 %v18469_v5  ;;  %v1233_v4 = vrot.slane %v20681_v36, %v20875_v50  ;;  %v18534_v5 = vld [vmem:[%s24570_s4 + $0x7c4] ss:$16 sps:$4 sm:$0xff]   ;;  %v2127_v36 = vadd.f32 %v20484_v44, %v1245_v2  ;;  %v18541_v44 = vld [vmem:[%s24570_s4 + $0x7e8] ss:$16 sps:$4 sm:$0xff]   ;;  %v18586_v2 = vld [vmem:[%s24570_s4 + $0x8e0] ss:$16 sps:$4 sm:$0xff]  }
 0x309   : > { %5511 = vmatprep.subr.bf16.mxu0 %v18474_v7  ;;  %5839 = vmatprep.subr.bf16.mxu1 %v18477_v10  ;;  %v18537_v7 = vld [vmem:[%s24570_s4 + $0x7cc] ss:$16 sps:$4 sm:$0xff]   ;;  %v18532_v10 = vld [vmem:[%s24570_s4 + $0x7c0] ss:$16 sps:$4 sm:$0xff]  }
 0x30c   : > { %5512 = vmatpush1.bf16.msra.mxu0 %v18472_v12  ;;  %5840 = vmatpush1.bf16.msra.mxu1 %v18475_v14  ;;  %v18535_v12 = vld [vmem:[%s24570_s4 + $0x7c8] ss:$16 sps:$4 sm:$0xff]   ;;  %v2084_v14 = vadd.f32 %v20394_v27, %v1233_v4  ;;  %v2263_v27 = vmax.f32 %v2127_v36, 0.0  ;;  %v18600_v36 = vld [vmem:[%s24570_s4 + $0x924] ss:$16 sps:$4 sm:$0xff]  }
 0x30d   : > { %5513 = vmatprep.subr.bf16.mxu0 %v18480_v15  ;;  %5841 = vmatprep.subr.bf16.mxu1 %v18483_v17  ;;  %v18540_v15 = vld [vmem:[%s24570_s4 + $0x7e4] ss:$16 sps:$4 sm:$0xff]   ;;  %v18543_v17 = vld [vmem:[%s24570_s4 + $0x7ec] ss:$16 sps:$4 sm:$0xff]   ;;  %v18589_v4 = vld [vmem:[%s24570_s4 + $0x8e8] ss:$16 sps:$4 sm:$0xff]  }
 0x310   : > { %5514 = vmatpush1.bf16.msra.mxu0 %v18478_v18  ;;  %5842 = vmatpush1.bf16.msra.mxu1 %v18481_v24  ;;  %v18538_v18 = vld [vmem:[%s24570_s4 + $0x7e0] ss:$16 sps:$4 sm:$0xff]   ;;  %v2260_v24 = vmax.f32 %v2084_v14, 0.0  ;;  %v18603_v14 = vld [vmem:[%s24570_s4 + $0x92c] ss:$16 sps:$4 sm:$0xff]  }
 0x311   : > { %5515 = vmatprep.subr.bf16.mxu0 %v18486_v26  ;;  %5843 = vmatprep.subr.bf16.mxu1 %v18489_v9  ;;  %v18546_v26 = vld [vmem:[%s24570_s4 + $0x804] ss:$16 sps:$4 sm:$0xff]   ;;  %v18549_v9 = vld [vmem:[%s24570_s4 + $0x80c] ss:$16 sps:$4 sm:$0xff]  }
 0x314   : > { %5516 = vmatpush1.bf16.msra.mxu0 %v18484_v31  ;;  %5844 = vmatpush1.bf16.msra.mxu1 %v18487_v33  ;;  %v18544_v31 = vld [vmem:[%s24570_s4 + $0x800] ss:$16 sps:$4 sm:$0xff]   ;;  %v18547_v33 = vld [vmem:[%s24570_s4 + $0x808] ss:$16 sps:$4 sm:$0xff]  }
 0x315   : > { %5517 = vmatprep.subr.bf16.mxu0 %v18492_v34  ;;  %5845 = vmatprep.subr.bf16.mxu1 %v18495_v49  ;;  %v18552_v34 = vld [vmem:[%s24570_s4 + $0x824] ss:$16 sps:$4 sm:$0xff]   ;;  %v18555_v49 = vld [vmem:[%s24570_s4 + $0x82c] ss:$16 sps:$4 sm:$0xff]  }
 0x318   : > { %5518 = vmatpush1.bf16.msra.mxu0 %v18490_v38  ;;  %5846 = vmatpush1.bf16.msra.mxu1 %v18493_v53  ;;  %v2276_v38 = vpack.c.bf16 %v2260_v24, %v2260_v24  ;;  %v2279_v53 = vpack.c.bf16 %v2263_v27, %v2263_v27  ;;  %v18604_v27 = vld [vmem:[%s24570_s4 + $0x940] ss:$16 sps:$4 sm:$0xff]   ;;  %v18607_v24 = vld [vmem:[%s24570_s4 + $0x948] ss:$16 sps:$4 sm:$0xff]  }
 0x319   : > { %5519 = vmatprep.subr.bf16.mxu0 %v18498_v39  ;;  %5847 = vmatprep.subr.bf16.mxu1 %v18501_v60  ;;  %v18550_v39 = vld [vmem:[%s24570_s4 + $0x820] ss:$16 sps:$4 sm:$0xff]   ;;  %v18553_v60 = vld [vmem:[%s24570_s4 + $0x828] ss:$16 sps:$4 sm:$0xff]  }
 0x31c   : > { %5520 = vmatpush1.bf16.msra.mxu0 %v18496_v40  ;;  %5848 = vmatpush1.bf16.msra.mxu1 %v18499_v1  ;;  %v18558_v40 = vld [vmem:[%s24570_s4 + $0x844] ss:$16 sps:$4 sm:$0xff]   ;;  %v18561_v1 = vld [vmem:[%s24570_s4 + $0x84c] ss:$16 sps:$4 sm:$0xff]  }
 0x31d   : > { %5521 = vmatprep.subr.bf16.mxu0 %v18504_v43  ;;  %5849 = vmatprep.subr.bf16.mxu1 %v18507_v8  ;;  %v18556_v43 = vld [vmem:[%s24570_s4 + $0x840] ss:$16 sps:$4 sm:$0xff]   ;;  %v18559_v8 = vld [vmem:[%s24570_s4 + $0x848] ss:$16 sps:$4 sm:$0xff]  }
 0x320   : > { %5522 = vmatpush1.bf16.msra.mxu0 %v18502_v45  ;;  %5850 = vmatpush1.bf16.msra.mxu1 %v18505_v46  ;;  %v18564_v45 = vld [vmem:[%s24570_s4 + $0x864] ss:$16 sps:$4 sm:$0xff]   ;;  %v18567_v46 = vld [vmem:[%s24570_s4 + $0x86c] ss:$16 sps:$4 sm:$0xff]  }
 0x321   : > { %5523 = vmatprep.subr.bf16.mxu0 %v18510_v6  ;;  %5851 = vmatprep.subr.bf16.mxu1 %v18513_v47  ;;  %v18562_v6 = vld [vmem:[%s24570_s4 + $0x860] ss:$16 sps:$4 sm:$0xff]   ;;  %v18565_v47 = vld [vmem:[%s24570_s4 + $0x868] ss:$16 sps:$4 sm:$0xff]  }
 0x324   : > { %5524 = vmatpush1.bf16.msra.mxu0 %v18508_v20  ;;  %5852 = vmatpush1.bf16.msra.mxu1 %v18511_v48  ;;  %v18570_v20 = vld [vmem:[%s24570_s4 + $0x884] ss:$16 sps:$4 sm:$0xff]   ;;  %v18573_v48 = vld [vmem:[%s24570_s4 + $0x88c] ss:$16 sps:$4 sm:$0xff]  }
 0x325   : > { %5525 = vmatprep.subr.bf16.mxu0 %v18516_v51  ;;  %5853 = vmatprep.subr.bf16.mxu1 %v18519_v28  ;;  %v18568_v51 = vld [vmem:[%s24570_s4 + $0x880] ss:$16 sps:$4 sm:$0xff]   ;;  %v18571_v28 = vld [vmem:[%s24570_s4 + $0x888] ss:$16 sps:$4 sm:$0xff]  }
 0x328   : > { %5526 = vmatpush1.bf16.msra.mxu0 %v18514_v54  ;;  %5854 = vmatpush1.bf16.msra.mxu1 %v18517_v32  ;;  %v18576_v54 = vld [vmem:[%s24570_s4 + $0x8a4] ss:$16 sps:$4 sm:$0xff]   ;;  %v18579_v32 = vld [vmem:[%s24570_s4 + $0x8ac] ss:$16 sps:$4 sm:$0xff]  }
 0x329   : > { %5527 = vmatprep.subr.bf16.mxu0 %v18522_v55  ;;  %5855 = vmatprep.subr.bf16.mxu1 %v18525_v56  ;;  %v18574_v55 = vld [vmem:[%s24570_s4 + $0x8a0] ss:$16 sps:$4 sm:$0xff]   ;;  %v18577_v56 = vld [vmem:[%s24570_s4 + $0x8a8] ss:$16 sps:$4 sm:$0xff]  }
 0x32c   : > { %5528 = vmatpush1.bf16.msra.mxu0 %v18520_v22  ;;  %5856 = vmatpush1.bf16.msra.mxu1 %v18523_v41  ;;  %v18582_v22 = vld [vmem:[%s24570_s4 + $0x8c4] ss:$16 sps:$4 sm:$0xff]   ;;  %v18585_v41 = vld [vmem:[%s24570_s4 + $0x8cc] ss:$16 sps:$4 sm:$0xff]  }
 0x32d   : > { %5529 = vmatprep.subr.bf16.mxu0 %v18528_v58  ;;  %5857 = vmatprep.subr.bf16.mxu1 %v18531_v61  ;;  %v18580_v58 = vld [vmem:[%s24570_s4 + $0x8c0] ss:$16 sps:$4 sm:$0xff]   ;;  %v18583_v61 = vld [vmem:[%s24570_s4 + $0x8c8] ss:$16 sps:$4 sm:$0xff]  }
 0x330   : > { %5530 = vmatpush1.bf16.msra.mxu0 %v18526_v63  ;;  %5858 = vmatpush1.bf16.msra.mxu1 %v18529_v0  ;;  %v18588_v63 = vld [vmem:[%s24570_s4 + $0x8e4] ss:$16 sps:$4 sm:$0xff]   ;;  %v18591_v0 = vld [vmem:[%s24570_s4 + $0x8ec] ss:$16 sps:$4 sm:$0xff]  }
 0x331   : > { %5531 = vmatprep.subr.bf16.mxu0 %v18534_v5  ;;  %5859 = vmatprep.subr.bf16.mxu1 %v18537_v7  ;;  %v18594_v5 = vld [vmem:[%s24570_s4 + $0x904] ss:$16 sps:$4 sm:$0xff]   ;;  %v18597_v7 = vld [vmem:[%s24570_s4 + $0x90c] ss:$16 sps:$4 sm:$0xff]  }
 0x334   : > { %5532 = vmatpush1.bf16.msra.mxu0 %v18532_v10  ;;  %5860 = vmatpush1.bf16.msra.mxu1 %v18535_v12  ;;  %v18592_v10 = vld [vmem:[%s24570_s4 + $0x900] ss:$16 sps:$4 sm:$0xff]   ;;  %v18595_v12 = vld [vmem:[%s24570_s4 + $0x908] ss:$16 sps:$4 sm:$0xff]  }
 0x335   : > { %5533 = vmatprep.subr.bf16.mxu0 %v18540_v15  ;;  %5861 = vmatprep.subr.bf16.mxu1 %v18543_v17  ;;  %v18598_v15 = vld [vmem:[%s24570_s4 + $0x920] ss:$16 sps:$4 sm:$0xff]   ;;  %v18601_v17 = vld [vmem:[%s24570_s4 + $0x928] ss:$16 sps:$4 sm:$0xff]  }
 0x338   : > { %5534 = vmatpush1.bf16.msra.mxu0 %v18538_v18  ;;  %5862 = vmatpush1.bf16.msra.mxu1 %v18541_v44  ;;  %v18606_v18 = vld [vmem:[%s24570_s4 + $0x944] ss:$16 sps:$4 sm:$0xff]   ;;  %v18609_v44 = vld [vmem:[%s24570_s4 + $0x94c] ss:$16 sps:$4 sm:$0xff]  }
 0x339   : > { %5544 = vmatprep.subr.bf16.mxu0 %v18546_v26  ;;  %5872 = vmatprep.subr.bf16.mxu1 %v18549_v9  ;;  %v18612_v26 = vld [vmem:[%s24570_s4 + $0x964] ss:$16 sps:$4 sm:$0xff]   ;;  %v18615_v9 = vld [vmem:[%s24570_s4 + $0x96c] ss:$16 sps:$4 sm:$0xff]  }
 0x33b   : > { %5536 = vmatmul.mubr.bf16.vlgmr.msra.gmra.mrb[16].mxu0 %v2276_v38  ;;  %5864 = vmatmul.mubr.bf16.vlgmr.msra.gmra.mrb[16].mxu1 %v2276_v38  ;;  %v18616_v38 = vld [vmem:[%s24570_s4 + $0x980] ss:$16 sps:$4 sm:$0xff]  }
 0x33c   : > { %5545 = vmatpush1.bf16.msra.mxu0 %v18544_v31  ;;  %5576 = vmatprep.mubr.bf16.mxu0 %v2279_v53  ;;  %v18610_v31 = vld [vmem:[%s24570_s4 + $0x960] ss:$16 sps:$4 sm:$0xff]  }
 0x33d   : > { %5873 = vmatpush1.bf16.msra.mxu1 %v18547_v33  ;;  %5904 = vmatprep.mubr.bf16.mxu1 %v2279_v53  ;;  %v18613_v33 = vld [vmem:[%s24570_s4 + $0x968] ss:$16 sps:$4 sm:$0xff]  }
 0x33e   : > { %5546 = vmatprep.subr.bf16.mxu0 %v18552_v34  ;;  %5874 = vmatprep.subr.bf16.mxu1 %v18555_v49  ;;  %v18618_v34 = vld [vmem:[%s24570_s4 + $0x984] ss:$16 sps:$4 sm:$0xff]   ;;  %v18621_v49 = vld [vmem:[%s24570_s4 + $0x98c] ss:$16 sps:$4 sm:$0xff]   ;;  %v18619_v53 = vld [vmem:[%s24570_s4 + $0x988] ss:$16 sps:$4 sm:$0xff]  }
 0x340   : > { %5547 = vmatpush1.bf16.msra.mxu0 %v18550_v39  ;;  %v18624_v39 = vld [vmem:[%s24570_s4 + $0x9a4] ss:$16 sps:$4 sm:$0xff]  }
 0x341   : > { %5875 = vmatpush1.bf16.msra.mxu1 %v18553_v60  ;;  %5548 = vmatprep.subr.bf16.mxu0 %v18558_v40  ;;  %v18627_v60 = vld [vmem:[%s24570_s4 + $0x9ac] ss:$16 sps:$4 sm:$0xff]   ;;  %v18622_v40 = vld [vmem:[%s24570_s4 + $0x9a0] ss:$16 sps:$4 sm:$0xff]  }
 0x342   : > { %5876 = vmatprep.subr.bf16.mxu1 %v18561_v1  ;;  %v1241_v1 = vrot.slane %v20872_v57, %v20261_v21 }
 0x344   : > { %5549 = vmatpush1.bf16.msra.mxu0 %v18556_v43  ;;  %v18625_v43 = vld [vmem:[%s24570_s4 + $0x9a8] ss:$16 sps:$4 sm:$0xff]  }
 0x345   : > { %5877 = vmatpush1.bf16.msra.mxu1 %v18559_v8  ;;  %5550 = vmatprep.subr.bf16.mxu0 %v18564_v45  ;;  %v18630_v8 = vld [vmem:[%s24570_s4 + $0x9c4] ss:$16 sps:$4 sm:$0xff]   ;;  %v18633_v45 = vld [vmem:[%s24570_s4 + $0x9cc] ss:$16 sps:$4 sm:$0xff]  }
 0x346   : > { %5878 = vmatprep.subr.bf16.mxu1 %v18567_v46  ;;  %v1253_v46 = vrot.slane %v20872_v57, %v20276_v30 }
 0x348   : > { %5551 = vmatpush1.bf16.msra.mxu0 %v18562_v6  ;;  %v18628_v6 = vld [vmem:[%s24570_s4 + $0x9c0] ss:$16 sps:$4 sm:$0xff]  }
 0x349   : > { %5879 = vmatpush1.bf16.msra.mxu1 %v18565_v47  ;;  %5552 = vmatprep.subr.bf16.mxu0 %v18570_v20  ;;  %v2125_v47 = vadd.f32 %v20482_v37, %v1241_v1  ;;  %v18631_v20 = vld [vmem:[%s24570_s4 + $0x9c8] ss:$16 sps:$4 sm:$0xff]   ;;  %v18634_v37 = vld [vmem:[%s24570_s4 + $0x9e0] ss:$16 sps:$4 sm:$0xff]  }
 0x34a   : > { %5880 = vmatprep.subr.bf16.mxu1 %v18573_v48  ;;  %v18636_v48 = vld [vmem:[%s24570_s4 + $0x9e4] ss:$16 sps:$4 sm:$0xff]   ;;  %v18685_v1 = vld [vmem:[%s24570_s4 + $0xae8] ss:$16 sps:$4 sm:$0xff]  }
 0x34c   : > { %5553 = vmatpush1.bf16.msra.mxu0 %v18568_v51  ;;  %v18639_v51 = vld [vmem:[%s24570_s4 + $0x9ec] ss:$16 sps:$4 sm:$0xff]  }
 0x34d   : > { %5881 = vmatpush1.bf16.msra.mxu1 %v18571_v28  ;;  %5554 = vmatprep.subr.bf16.mxu0 %v18576_v54  ;;  %v2168_v28 = vadd.f32 %v20518_v16, %v1253_v46  ;;  %v2262_v54 = vmax.f32 %v2125_v47, 0.0  ;;  %v18645_v16 = vld [vmem:[%s24570_s4 + $0xa0c] ss:$16 sps:$4 sm:$0xff]   ;;  %v18691_v46 = vld [vmem:[%s24570_s4 + $0xb08] ss:$16 sps:$4 sm:$0xff]  }
 0x34e   : > { %5882 = vmatprep.subr.bf16.mxu1 %v18579_v32  ;;  %v18637_v32 = vld [vmem:[%s24570_s4 + $0x9e8] ss:$16 sps:$4 sm:$0xff]   ;;  %v18699_v47 = vld [vmem:[%s24570_s4 + $0xb2c] ss:$16 sps:$4 sm:$0xff]  }
 0x350   : > { %5555 = vmatpush1.bf16.msra.mxu0 %v18574_v55  ;;  %v18642_v55 = vld [vmem:[%s24570_s4 + $0xa04] ss:$16 sps:$4 sm:$0xff]  }
 0x351   : > { %5883 = vmatpush1.bf16.msra.mxu1 %v18577_v56  ;;  %5556 = vmatprep.subr.bf16.mxu0 %v18582_v22  ;;  %v2265_v56 = vmax.f32 %v2168_v28, 0.0  ;;  %v18640_v22 = vld [vmem:[%s24570_s4 + $0xa00] ss:$16 sps:$4 sm:$0xff]   ;;  %v18705_v28 = vld [vmem:[%s24570_s4 + $0xb4c] ss:$16 sps:$4 sm:$0xff]  }
 0x352   : > { %5884 = vmatprep.subr.bf16.mxu1 %v18585_v41  ;;  %v2278_v41 = vpack.c.bf16 %v2262_v54, %v2262_v54  ;;  %v18703_v54 = vld [vmem:[%s24570_s4 + $0xb48] ss:$16 sps:$4 sm:$0xff]  }
 0x354   : > { %5557 = vmatpush1.bf16.msra.mxu0 %v18580_v58  ;;  %v18643_v58 = vld [vmem:[%s24570_s4 + $0xa08] ss:$16 sps:$4 sm:$0xff]  }
 0x355   : > { %5885 = vmatpush1.bf16.msra.mxu1 %v18583_v61  ;;  %5558 = vmatprep.subr.bf16.mxu0 %v18588_v63  ;;  %v18648_v61 = vld [vmem:[%s24570_s4 + $0xa24] ss:$16 sps:$4 sm:$0xff]   ;;  %v2281_v63 = vpack.c.bf16 %v2265_v56, %v2265_v56  ;;  %v18709_v56 = vld [vmem:[%s24570_s4 + $0xb68] ss:$16 sps:$4 sm:$0xff]  }
 0x356   : > { %5886 = vmatprep.subr.bf16.mxu1 %v18591_v0  ;;  %v18651_v0 = vld [vmem:[%s24570_s4 + $0xa2c] ss:$16 sps:$4 sm:$0xff]  }
 0x358   : > { %5559 = vmatpush1.bf16.msra.mxu0 %v18586_v2  ;;  %v18646_v2 = vld [vmem:[%s24570_s4 + $0xa20] ss:$16 sps:$4 sm:$0xff]  }
 0x359   : > { %5887 = vmatpush1.bf16.msra.mxu1 %v18589_v4  ;;  %5560 = vmatprep.subr.bf16.mxu0 %v18594_v5  ;;  %v18649_v4 = vld [vmem:[%s24570_s4 + $0xa28] ss:$16 sps:$4 sm:$0xff]   ;;  %v18654_v5 = vld [vmem:[%s24570_s4 + $0xa44] ss:$16 sps:$4 sm:$0xff]  }
 0x35a   : > { %5888 = vmatprep.subr.bf16.mxu1 %v18597_v7  ;;  %v18657_v7 = vld [vmem:[%s24570_s4 + $0xa4c] ss:$16 sps:$4 sm:$0xff]  }
 0x35c   : > { %5561 = vmatpush1.bf16.msra.mxu0 %v18592_v10  ;;  %v18652_v10 = vld [vmem:[%s24570_s4 + $0xa40] ss:$16 sps:$4 sm:$0xff]  }
 0x35d   : > { %5889 = vmatpush1.bf16.msra.mxu1 %v18595_v12  ;;  %5562 = vmatprep.subr.bf16.mxu0 %v18600_v36  ;;  %v18655_v12 = vld [vmem:[%s24570_s4 + $0xa48] ss:$16 sps:$4 sm:$0xff]   ;;  %v18660_v36 = vld [vmem:[%s24570_s4 + $0xa64] ss:$16 sps:$4 sm:$0xff]  }
 0x35e   : > { %5890 = vmatprep.subr.bf16.mxu1 %v18603_v14  ;;  %v18663_v14 = vld [vmem:[%s24570_s4 + $0xa6c] ss:$16 sps:$4 sm:$0xff]  }
 0x360   : > { %5563 = vmatpush1.bf16.msra.mxu0 %v18598_v15  ;;  %v18658_v15 = vld [vmem:[%s24570_s4 + $0xa60] ss:$16 sps:$4 sm:$0xff]  }
 0x361   : > { %5891 = vmatpush1.bf16.msra.mxu1 %v18601_v17  ;;  %5564 = vmatprep.subr.bf16.mxu0 %v18606_v18  ;;  %v18661_v17 = vld [vmem:[%s24570_s4 + $0xa68] ss:$16 sps:$4 sm:$0xff]   ;;  %v18666_v18 = vld [vmem:[%s24570_s4 + $0xa84] ss:$16 sps:$4 sm:$0xff]  }
 0x362   : > { %5892 = vmatprep.subr.bf16.mxu1 %v18609_v44  ;;  %v18669_v44 = vld [vmem:[%s24570_s4 + $0xa8c] ss:$16 sps:$4 sm:$0xff]  }
 0x364   : > { %5565 = vmatpush1.bf16.msra.mxu0 %v18604_v27  ;;  %v18664_v27 = vld [vmem:[%s24570_s4 + $0xa80] ss:$16 sps:$4 sm:$0xff]  }
 0x365   : > { %5893 = vmatpush1.bf16.msra.mxu1 %v18607_v24  ;;  %5566 = vmatprep.subr.bf16.mxu0 %v18612_v26  ;;  %v18667_v24 = vld [vmem:[%s24570_s4 + $0xa88] ss:$16 sps:$4 sm:$0xff]   ;;  %v18672_v26 = vld [vmem:[%s24570_s4 + $0xaa4] ss:$16 sps:$4 sm:$0xff]  }
 0x366   : > { %5894 = vmatprep.subr.bf16.mxu1 %v18615_v9  ;;  %v18675_v9 = vld [vmem:[%s24570_s4 + $0xaac] ss:$16 sps:$4 sm:$0xff]  }
 0x368   : > { %5567 = vmatpush1.bf16.msra.mxu0 %v18610_v31  ;;  %v18670_v31 = vld [vmem:[%s24570_s4 + $0xaa0] ss:$16 sps:$4 sm:$0xff]  }
 0x369   : > { %5895 = vmatpush1.bf16.msra.mxu1 %v18613_v33  ;;  %5568 = vmatprep.subr.bf16.mxu0 %v18618_v34  ;;  %v18673_v33 = vld [vmem:[%s24570_s4 + $0xaa8] ss:$16 sps:$4 sm:$0xff]   ;;  %v18678_v34 = vld [vmem:[%s24570_s4 + $0xac4] ss:$16 sps:$4 sm:$0xff]  }
 0x36a   : > { %5896 = vmatprep.subr.bf16.mxu1 %v18621_v49  ;;  %v18681_v49 = vld [vmem:[%s24570_s4 + $0xacc] ss:$16 sps:$4 sm:$0xff]  }
 0x36c   : > { %5569 = vmatpush1.bf16.msra.mxu0 %v18616_v38  ;;  %v18676_v38 = vld [vmem:[%s24570_s4 + $0xac0] ss:$16 sps:$4 sm:$0xff]  }
 0x36d   : > { %5897 = vmatpush1.bf16.msra.mxu1 %v18619_v53  ;;  %5570 = vmatprep.subr.bf16.mxu0 %v18624_v39  ;;  %v18679_v53 = vld [vmem:[%s24570_s4 + $0xac8] ss:$16 sps:$4 sm:$0xff]   ;;  %v18684_v39 = vld [vmem:[%s24570_s4 + $0xae4] ss:$16 sps:$4 sm:$0xff]  }
 0x36e   : > { %5898 = vmatprep.subr.bf16.mxu1 %v18627_v60  ;;  %v18687_v60 = vld [vmem:[%s24570_s4 + $0xaec] ss:$16 sps:$4 sm:$0xff]  }
 0x370   : > { %5571 = vmatpush1.bf16.msra.mxu0 %v18622_v40  ;;  %v18682_v40 = vld [vmem:[%s24570_s4 + $0xae0] ss:$16 sps:$4 sm:$0xff]  }
 0x371   : > { %5899 = vmatpush1.bf16.msra.mxu1 %v18625_v43  ;;  %5572 = vmatprep.subr.bf16.mxu0 %v18630_v8  ;;  %v18690_v43 = vld [vmem:[%s24570_s4 + $0xb04] ss:$16 sps:$4 sm:$0xff]   ;;  %v18693_v8 = vld [vmem:[%s24570_s4 + $0xb0c] ss:$16 sps:$4 sm:$0xff]  }
 0x372   : > { %5900 = vmatprep.subr.bf16.mxu1 %v18633_v45  ;;  %v18688_v45 = vld [vmem:[%s24570_s4 + $0xb00] ss:$16 sps:$4 sm:$0xff]  }
 0x374   : > { %5573 = vmatpush1.bf16.msra.mxu0 %v18628_v6  ;;  %v18696_v6 = vld [vmem:[%s24570_s4 + $0xb24] ss:$16 sps:$4 sm:$0xff]  }
 0x375   : > { %5901 = vmatpush1.bf16.msra.mxu1 %v18631_v20  ;;  %5574 = vmatprep.subr.bf16.mxu0 %v18636_v48  ;;  %v18694_v20 = vld [vmem:[%s24570_s4 + $0xb20] ss:$16 sps:$4 sm:$0xff]   ;;  %v18697_v48 = vld [vmem:[%s24570_s4 + $0xb28] ss:$16 sps:$4 sm:$0xff]  }
 0x376   : > { %5902 = vmatprep.subr.bf16.mxu1 %v18639_v51  ;;  %v18702_v51 = vld [vmem:[%s24570_s4 + $0xb44] ss:$16 sps:$4 sm:$0xff]  }
 0x378   : > { %5575 = vmatpush1.bf16.msra.mxu0 %v18634_v37  ;;  %v18700_v37 = vld [vmem:[%s24570_s4 + $0xb40] ss:$16 sps:$4 sm:$0xff]  }
 0x379   : > { %5903 = vmatpush1.bf16.msra.mxu1 %v18637_v32  ;;  %5585 = vmatprep.subr.bf16.mxu0 %v18642_v55  ;;  %v18708_v32 = vld [vmem:[%s24570_s4 + $0xb64] ss:$16 sps:$4 sm:$0xff]   ;;  %v18711_v55 = vld [vmem:[%s24570_s4 + $0xb6c] ss:$16 sps:$4 sm:$0xff]  }
 0x37a   : > { %5913 = vmatprep.subr.bf16.mxu1 %v18645_v16  ;;  %v18706_v16 = vld [vmem:[%s24570_s4 + $0xb60] ss:$16 sps:$4 sm:$0xff]  }
 0x37b   : > { %5577 = vmatmul.mubr.bf16.vlgmr.msra.gmra.mrb[16].mxu0 %v2278_v41 }
 0x37c   : > { %5905 = vmatmul.mubr.bf16.vlgmr.msra.gmra.mrb[16].mxu1 %v2278_v41  ;;  %5586 = vmatpush1.bf16.msra.mxu0 %v18640_v22  ;;  %v18714_v22 = vld [vmem:[%s24570_s4 + $0xb84] ss:$16 sps:$4 sm:$0xff]   ;;  %v18717_v41 = vld [vmem:[%s24570_s4 + $0xb8c] ss:$16 sps:$4 sm:$0xff]  }
 0x37d   : > { %5617 = vmatprep.mubr.bf16.mxu0 %v2281_v63  ;;  %5914 = vmatpush1.bf16.msra.mxu1 %v18643_v58  ;;  %v18712_v58 = vld [vmem:[%s24570_s4 + $0xb80] ss:$16 sps:$4 sm:$0xff]  }
 0x37e   : > { %5945 = vmatprep.mubr.bf16.mxu1 %v2281_v63  ;;  %5587 = vmatprep.subr.bf16.mxu0 %v18648_v61  ;;  %v18715_v61 = vld [vmem:[%s24570_s4 + $0xb88] ss:$16 sps:$4 sm:$0xff]   ;;  %v18720_v63 = vld [vmem:[%s24570_s4 + $0xba4] ss:$16 sps:$4 sm:$0xff]  }
 0x37f   : > { %5915 = vmatprep.subr.bf16.mxu1 %v18651_v0  ;;  %v18723_v0 = vld [vmem:[%s24570_s4 + $0xbac] ss:$16 sps:$4 sm:$0xff]  }
 0x380   : > { %5588 = vmatpush1.bf16.msra.mxu0 %v18646_v2  ;;  %v18718_v2 = vld [vmem:[%s24570_s4 + $0xba0] ss:$16 sps:$4 sm:$0xff]  }
 0x381   : > { %5916 = vmatpush1.bf16.msra.mxu1 %v18649_v4  ;;  %5589 = vmatprep.subr.bf16.mxu0 %v18654_v5  ;;  %v1249_v4 = vrot.slane %v20872_v57, %v20435_v42  ;;  %v18721_v5 = vld [vmem:[%s24570_s4 + $0xba8] ss:$16 sps:$4 sm:$0xff]  }
 0x382   : > { %5917 = vmatprep.subr.bf16.mxu1 %v18657_v7  ;;  %v18726_v7 = vld [vmem:[%s24570_s4 + $0xbc4] ss:$16 sps:$4 sm:$0xff]  }
 0x384   : > { %5590 = vmatpush1.bf16.msra.mxu0 %v18652_v10  ;;  %v18729_v10 = vld [vmem:[%s24570_s4 + $0xbcc] ss:$16 sps:$4 sm:$0xff]  }
 0x385   : > { %5918 = vmatpush1.bf16.msra.mxu1 %v18655_v12  ;;  %5591 = vmatprep.subr.bf16.mxu0 %v18660_v36  ;;  %v1261_v12 = vrot.slane %v20872_v57, %v20450_v13  ;;  %v18724_v36 = vld [vmem:[%s24570_s4 + $0xbc0] ss:$16 sps:$4 sm:$0xff]  }
 0x386   : > { %5919 = vmatprep.subr.bf16.mxu1 %v18663_v14  ;;  %v2166_v14 = vadd.f32 %v20510_v11, %v1249_v4  ;;  %v18730_v11 = vld [vmem:[%s24570_s4 + $0xbe0] ss:$16 sps:$4 sm:$0xff]   ;;  %v18789_v4 = vld [vmem:[%s24570_s4 + $0xd0c] ss:$16 sps:$4 sm:$0xff]  }
 0x388   : > { %5592 = vmatpush1.bf16.msra.mxu0 %v18658_v15  ;;  %v18727_v15 = vld [vmem:[%s24570_s4 + $0xbc8] ss:$16 sps:$4 sm:$0xff]  }
 0x389   : > { %5920 = vmatpush1.bf16.msra.mxu1 %v18661_v17  ;;  %5593 = vmatprep.subr.bf16.mxu0 %v18666_v18  ;;  %v18732_v17 = vld [vmem:[%s24570_s4 + $0xbe4] ss:$16 sps:$4 sm:$0xff]   ;;  %v18735_v18 = vld [vmem:[%s24570_s4 + $0xbec] ss:$16 sps:$4 sm:$0xff]  }
 0x38a   : > { %5921 = vmatprep.subr.bf16.mxu1 %v18669_v44  ;;  %v2209_v44 = vadd.f32 %v20594_v52, %v1261_v12  ;;  %v18741_v52 = vld [vmem:[%s24570_s4 + $0xc0c] ss:$16 sps:$4 sm:$0xff]  }
 0x38b   : > { %v18795_v12 = vld [vmem:[%s24570_s4 + $0xd2c] ss:$16 sps:$4 sm:$0xff]  }
 0x38c   : > { %5594 = vmatpush1.bf16.msra.mxu0 %v18664_v27  ;;  %v2264_v27 = vmax.f32 %v2166_v14, 0.0  ;;  %v18793_v14 = vld [vmem:[%s24570_s4 + $0xd28] ss:$16 sps:$4 sm:$0xff]  }
 0x38d   : > { %5922 = vmatpush1.bf16.msra.mxu1 %v18667_v24  ;;  %5595 = vmatprep.subr.bf16.mxu0 %v18672_v26  ;;  %v18733_v24 = vld [vmem:[%s24570_s4 + $0xbe8] ss:$16 sps:$4 sm:$0xff]   ;;  %v18738_v26 = vld [vmem:[%s24570_s4 + $0xc04] ss:$16 sps:$4 sm:$0xff]  }
 0x38e   : > { %5923 = vmatprep.subr.bf16.mxu1 %v18675_v9  ;;  %v2267_v9 = vmax.f32 %v2209_v44, 0.0  ;;  %v18799_v44 = vld [vmem:[%s24570_s4 + $0xd48] ss:$16 sps:$4 sm:$0xff]  }
 0x390   : > { %5596 = vmatpush1.bf16.msra.mxu0 %v18670_v31  ;;  %v18736_v31 = vld [vmem:[%s24570_s4 + $0xc00] ss:$16 sps:$4 sm:$0xff]  }
 0x391   : > { %5924 = vmatpush1.bf16.msra.mxu1 %v18673_v33  ;;  %5597 = vmatprep.subr.bf16.mxu0 %v18678_v34  ;;  %v2280_v33 = vpack.c.bf16 %v2264_v27, %v2264_v27  ;;  %v18739_v34 = vld [vmem:[%s24570_s4 + $0xc08] ss:$16 sps:$4 sm:$0xff]   ;;  %v18807_v27 = vld [vmem:[%s24570_s4 + $0xd6c] ss:$16 sps:$4 sm:$0xff]  }
 0x392   : > { %5925 = vmatprep.subr.bf16.mxu1 %v18681_v49  ;;  %v18744_v49 = vld [vmem:[%s24570_s4 + $0xc24] ss:$16 sps:$4 sm:$0xff]  }
 0x394   : > { %5598 = vmatpush1.bf16.msra.mxu0 %v18676_v38  ;;  %v2283_v38 = vpack.c.bf16 %v2267_v9, %v2267_v9  ;;  %v18813_v9 = vld [vmem:[%s24570_s4 + $0xd8c] ss:$16 sps:$4 sm:$0xff]  }
 0x395   : > { %5926 = vmatpush1.bf16.msra.mxu1 %v18679_v53  ;;  %5599 = vmatprep.subr.bf16.mxu0 %v18684_v39  ;;  %v18747_v53 = vld [vmem:[%s24570_s4 + $0xc2c] ss:$16 sps:$4 sm:$0xff]   ;;  %v18742_v39 = vld [vmem:[%s24570_s4 + $0xc20] ss:$16 sps:$4 sm:$0xff]  }
 0x396   : > { %5927 = vmatprep.subr.bf16.mxu1 %v18687_v60  ;;  %v18745_v60 = vld [vmem:[%s24570_s4 + $0xc28] ss:$16 sps:$4 sm:$0xff]  }
 0x398   : > { %5600 = vmatpush1.bf16.msra.mxu0 %v18682_v40  ;;  %v18750_v40 = vld [vmem:[%s24570_s4 + $0xc44] ss:$16 sps:$4 sm:$0xff]  }
 0x399   : > { %5928 = vmatpush1.bf16.msra.mxu1 %v18685_v1  ;;  %5601 = vmatprep.subr.bf16.mxu0 %v18690_v43  ;;  %v18753_v1 = vld [vmem:[%s24570_s4 + $0xc4c] ss:$16 sps:$4 sm:$0xff]   ;;  %v18748_v43 = vld [vmem:[%s24570_s4 + $0xc40] ss:$16 sps:$4 sm:$0xff]  }
 0x39a   : > { %5929 = vmatprep.subr.bf16.mxu1 %v18693_v8  ;;  %v18751_v8 = vld [vmem:[%s24570_s4 + $0xc48] ss:$16 sps:$4 sm:$0xff]  }
 0x39c   : > { %5602 = vmatpush1.bf16.msra.mxu0 %v18688_v45  ;;  %v18756_v45 = vld [vmem:[%s24570_s4 + $0xc64] ss:$16 sps:$4 sm:$0xff]  }
 0x39d   : > { %5930 = vmatpush1.bf16.msra.mxu1 %v18691_v46  ;;  %5603 = vmatprep.subr.bf16.mxu0 %v18696_v6  ;;  %v18759_v46 = vld [vmem:[%s24570_s4 + $0xc6c] ss:$16 sps:$4 sm:$0xff]   ;;  %v18754_v6 = vld [vmem:[%s24570_s4 + $0xc60] ss:$16 sps:$4 sm:$0xff]  }
 0x39e   : > { %5931 = vmatprep.subr.bf16.mxu1 %v18699_v47  ;;  %v18757_v47 = vld [vmem:[%s24570_s4 + $0xc68] ss:$16 sps:$4 sm:$0xff]  }
 0x3a0   : > { %5604 = vmatpush1.bf16.msra.mxu0 %v18694_v20  ;;  %v18762_v20 = vld [vmem:[%s24570_s4 + $0xc84] ss:$16 sps:$4 sm:$0xff]  }
 0x3a1   : > { %5932 = vmatpush1.bf16.msra.mxu1 %v18697_v48  ;;  %5605 = vmatprep.subr.bf16.mxu0 %v18702_v51  ;;  %v18765_v48 = vld [vmem:[%s24570_s4 + $0xc8c] ss:$16 sps:$4 sm:$0xff]   ;;  %v18760_v51 = vld [vmem:[%s24570_s4 + $0xc80] ss:$16 sps:$4 sm:$0xff]  }
 0x3a2   : > { %5933 = vmatprep.subr.bf16.mxu1 %v18705_v28  ;;  %v18763_v28 = vld [vmem:[%s24570_s4 + $0xc88] ss:$16 sps:$4 sm:$0xff]  }
 0x3a4   : > { %5606 = vmatpush1.bf16.msra.mxu0 %v18700_v37  ;;  %v18768_v37 = vld [vmem:[%s24570_s4 + $0xca4] ss:$16 sps:$4 sm:$0xff]  }
 0x3a5   : > { %5934 = vmatpush1.bf16.msra.mxu1 %v18703_v54  ;;  %5607 = vmatprep.subr.bf16.mxu0 %v18708_v32  ;;  %v18771_v54 = vld [vmem:[%s24570_s4 + $0xcac] ss:$16 sps:$4 sm:$0xff]   ;;  %v18766_v32 = vld [vmem:[%s24570_s4 + $0xca0] ss:$16 sps:$4 sm:$0xff]  }
 0x3a6   : > { %5935 = vmatprep.subr.bf16.mxu1 %v18711_v55  ;;  %v18769_v55 = vld [vmem:[%s24570_s4 + $0xca8] ss:$16 sps:$4 sm:$0xff]  }
 0x3a8   : > { %5608 = vmatpush1.bf16.msra.mxu0 %v18706_v16  ;;  %v18774_v16 = vld [vmem:[%s24570_s4 + $0xcc4] ss:$16 sps:$4 sm:$0xff]  }
 0x3a9   : > { %5936 = vmatpush1.bf16.msra.mxu1 %v18709_v56  ;;  %5609 = vmatprep.subr.bf16.mxu0 %v18714_v22  ;;  %v18777_v56 = vld [vmem:[%s24570_s4 + $0xccc] ss:$16 sps:$4 sm:$0xff]   ;;  %v18772_v22 = vld [vmem:[%s24570_s4 + $0xcc0] ss:$16 sps:$4 sm:$0xff]  }
 0x3aa   : > { %5937 = vmatprep.subr.bf16.mxu1 %v18717_v41  ;;  %v18775_v41 = vld [vmem:[%s24570_s4 + $0xcc8] ss:$16 sps:$4 sm:$0xff]  }
 0x3ac   : > { %5610 = vmatpush1.bf16.msra.mxu0 %v18712_v58  ;;  %v18780_v58 = vld [vmem:[%s24570_s4 + $0xce4] ss:$16 sps:$4 sm:$0xff]  }
 0x3ad   : > { %5938 = vmatpush1.bf16.msra.mxu1 %v18715_v61  ;;  %5611 = vmatprep.subr.bf16.mxu0 %v18720_v63  ;;  %v18783_v61 = vld [vmem:[%s24570_s4 + $0xcec] ss:$16 sps:$4 sm:$0xff]   ;;  %v18778_v63 = vld [vmem:[%s24570_s4 + $0xce0] ss:$16 sps:$4 sm:$0xff]  }
 0x3ae   : > { %5939 = vmatprep.subr.bf16.mxu1 %v18723_v0  ;;  %v18781_v0 = vld [vmem:[%s24570_s4 + $0xce8] ss:$16 sps:$4 sm:$0xff]  }
 0x3b0   : > { %5612 = vmatpush1.bf16.msra.mxu0 %v18718_v2  ;;  %v18786_v2 = vld [vmem:[%s24570_s4 + $0xd04] ss:$16 sps:$4 sm:$0xff]  }
 0x3b1   : > { %5940 = vmatpush1.bf16.msra.mxu1 %v18721_v5  ;;  %5613 = vmatprep.subr.bf16.mxu0 %v18726_v7  ;;  %v18784_v5 = vld [vmem:[%s24570_s4 + $0xd00] ss:$16 sps:$4 sm:$0xff]   ;;  %v18787_v7 = vld [vmem:[%s24570_s4 + $0xd08] ss:$16 sps:$4 sm:$0xff]  }
 0x3b2   : > { %5941 = vmatprep.subr.bf16.mxu1 %v18729_v10  ;;  %v18792_v10 = vld [vmem:[%s24570_s4 + $0xd24] ss:$16 sps:$4 sm:$0xff]  }
 0x3b4   : > { %5614 = vmatpush1.bf16.msra.mxu0 %v18724_v36  ;;  %v18790_v36 = vld [vmem:[%s24570_s4 + $0xd20] ss:$16 sps:$4 sm:$0xff]  }
 0x3b5   : > { %5942 = vmatpush1.bf16.msra.mxu1 %v18727_v15  ;;  %5615 = vmatprep.subr.bf16.mxu0 %v18732_v17  ;;  %v18798_v15 = vld [vmem:[%s24570_s4 + $0xd44] ss:$16 sps:$4 sm:$0xff]   ;;  %v18801_v17 = vld [vmem:[%s24570_s4 + $0xd4c] ss:$16 sps:$4 sm:$0xff]  }
 0x3b6   : > { %5943 = vmatprep.subr.bf16.mxu1 %v18735_v18  ;;  %v18796_v18 = vld [vmem:[%s24570_s4 + $0xd40] ss:$16 sps:$4 sm:$0xff]  }
 0x3b8   : > { %5616 = vmatpush1.bf16.msra.mxu0 %v18730_v11  ;;  %v18804_v11 = vld [vmem:[%s24570_s4 + $0xd64] ss:$16 sps:$4 sm:$0xff]  }
 0x3b9   : > { %5944 = vmatpush1.bf16.msra.mxu1 %v18733_v24  ;;  %5626 = vmatprep.subr.bf16.mxu0 %v18738_v26  ;;  %v18802_v24 = vld [vmem:[%s24570_s4 + $0xd60] ss:$16 sps:$4 sm:$0xff]   ;;  %v18805_v26 = vld [vmem:[%s24570_s4 + $0xd68] ss:$16 sps:$4 sm:$0xff]  }
 0x3ba   : > { %5954 = vmatprep.subr.bf16.mxu1 %v18741_v52  ;;  %v18810_v52 = vld [vmem:[%s24570_s4 + $0xd84] ss:$16 sps:$4 sm:$0xff]  }
 0x3bb   : > { %5618 = vmatmul.mubr.bf16.vlgmr.msra.gmra.mrb[16].mxu0 %v2280_v33 }
 0x3bc   : > { %5946 = vmatmul.mubr.bf16.vlgmr.msra.gmra.mrb[16].mxu1 %v2280_v33  ;;  %5627 = vmatpush1.bf16.msra.mxu0 %v18736_v31  ;;  %v18808_v31 = vld [vmem:[%s24570_s4 + $0xd80] ss:$16 sps:$4 sm:$0xff]   ;;  %v18811_v33 = vld [vmem:[%s24570_s4 + $0xd88] ss:$16 sps:$4 sm:$0xff]  }
 0x3bd   : > { %5658 = vmatprep.mubr.bf16.mxu0 %v2283_v38  ;;  %5955 = vmatpush1.bf16.msra.mxu1 %v18739_v34  ;;  %v18816_v34 = vld [vmem:[%s24570_s4 + $0xda4] ss:$16 sps:$4 sm:$0xff]  }
 0x3be   : > { %5986 = vmatprep.mubr.bf16.mxu1 %v2283_v38  ;;  %5628 = vmatprep.subr.bf16.mxu0 %v18744_v49  ;;  %v18819_v49 = vld [vmem:[%s24570_s4 + $0xdac] ss:$16 sps:$4 sm:$0xff]   ;;  %v18814_v38 = vld [vmem:[%s24570_s4 + $0xda0] ss:$16 sps:$4 sm:$0xff]  }
 0x3bf   : > { %5956 = vmatprep.subr.bf16.mxu1 %v18747_v53  ;;  %v1257_v53 = vrot.slane %v20872_v57, %v20661_v29 }
 0x3c0   : > { %5629 = vmatpush1.bf16.msra.mxu0 %v18742_v39  ;;  %v18817_v39 = vld [vmem:[%s24570_s4 + $0xda8] ss:$16 sps:$4 sm:$0xff]  }
 0x3c1   : > { %5957 = vmatpush1.bf16.msra.mxu1 %v18745_v60  ;;  %5630 = vmatprep.subr.bf16.mxu0 %v18750_v40  ;;  %v18822_v60 = vld [vmem:[%s24570_s4 + $0xdc4] ss:$16 sps:$4 sm:$0xff]   ;;  %v18825_v40 = vld [vmem:[%s24570_s4 + $0xdcc] ss:$16 sps:$4 sm:$0xff]  }
 0x3c2   : > { %5958 = vmatprep.subr.bf16.mxu1 %v18753_v1  ;;  %v1269_v1 = vrot.slane %v20872_v57, %v20676_v35  ;;  %v18831_v57 = vld [vmem:[%s24570_s4 + $0xdec] ss:$16 sps:$4 sm:$0xff]  }
 0x3c4   : > { %5631 = vmatpush1.bf16.msra.mxu0 %v18748_v43  ;;  %v18820_v43 = vld [vmem:[%s24570_s4 + $0xdc0] ss:$16 sps:$4 sm:$0xff]  }
 0x3c5   : > { %5959 = vmatpush1.bf16.msra.mxu1 %v18751_v8  ;;  %5632 = vmatprep.subr.bf16.mxu0 %v18756_v45  ;;  %v2207_v8 = vadd.f32 %v20592_v25, %v1257_v53  ;;  %v18823_v45 = vld [vmem:[%s24570_s4 + $0xdc8] ss:$16 sps:$4 sm:$0xff]   ;;  %v18826_v25 = vld [vmem:[%s24570_s4 + $0xde0] ss:$16 sps:$4 sm:$0xff]   ;;  %v18888_v53 = vld [vmem:[%s24570_s4 + $0xf24] ss:$16 sps:$4 sm:$0xff]  }
 0x3c6   : > { %5960 = vmatprep.subr.bf16.mxu1 %v18759_v46  ;;  %v18828_v46 = vld [vmem:[%s24570_s4 + $0xde4] ss:$16 sps:$4 sm:$0xff]  }
 0x3c8   : > { %5633 = vmatpush1.bf16.msra.mxu0 %v18754_v6  ;;  %v2250_v6 = vadd.f32 %v20622_v62, %v1269_v1  ;;  %v18837_v62 = vld [vmem:[%s24570_s4 + $0xe0c] ss:$16 sps:$4 sm:$0xff]   ;;  %v18894_v1 = vld [vmem:[%s24570_s4 + $0xf44] ss:$16 sps:$4 sm:$0xff]  }
 0x3c9   : > { %5961 = vmatpush1.bf16.msra.mxu1 %v18757_v47  ;;  %5634 = vmatprep.subr.bf16.mxu0 %v18762_v20  ;;  %v2266_v47 = vmax.f32 %v2207_v8, 0.0  ;;  %v18829_v20 = vld [vmem:[%s24570_s4 + $0xde8] ss:$16 sps:$4 sm:$0xff]   ;;  %v18892_v8 = vld [vmem:[%s24570_s4 + $0xf40] ss:$16 sps:$4 sm:$0xff]  }
 0x3ca   : > { %5962 = vmatprep.subr.bf16.mxu1 %v18765_v48  ;;  %v18834_v48 = vld [vmem:[%s24570_s4 + $0xe04] ss:$16 sps:$4 sm:$0xff]  }
 0x3cc   : > { %5635 = vmatpush1.bf16.msra.mxu0 %v18760_v51  ;;  %v2269_v51 = vmax.f32 %v2250_v6, 0.0  ;;  %v18898_v6 = vld [vmem:[%s24570_s4 + $0xf60] ss:$16 sps:$4 sm:$0xff]  }
 0x3cd   : > { %5963 = vmatpush1.bf16.msra.mxu1 %v18763_v28  ;;  %5636 = vmatprep.subr.bf16.mxu0 %v18768_v37  ;;  %v18832_v28 = vld [vmem:[%s24570_s4 + $0xe00] ss:$16 sps:$4 sm:$0xff]   ;;  %v2282_v37 = vpack.c.bf16 %v2266_v47, %v2266_v47  ;;  %v18906_v47 = vld [vmem:[%s24570_s4 + $0xf84] ss:$16 sps:$4 sm:$0xff]  }
 0x3ce   : > { %5964 = vmatprep.subr.bf16.mxu1 %v18771_v54  ;;  %v18835_v54 = vld [vmem:[%s24570_s4 + $0xe08] ss:$16 sps:$4 sm:$0xff]  }
 0x3d0   : > { %5637 = vmatpush1.bf16.msra.mxu0 %v18766_v32  ;;  %v18840_v32 = vld [vmem:[%s24570_s4 + $0xe24] ss:$16 sps:$4 sm:$0xff]  }
 0x3d1   : > { %5965 = vmatpush1.bf16.msra.mxu1 %v18769_v55  ;;  %5638 = vmatprep.subr.bf16.mxu0 %v18774_v16  ;;  %v2285_v55 = vpack.c.bf16 %v2269_v51, %v2269_v51  ;;  %v18843_v16 = vld [vmem:[%s24570_s4 + $0xe2c] ss:$16 sps:$4 sm:$0xff]   ;;  %v18912_v51 = vld [vmem:[%s24570_s4 + $0xfa4] ss:$16 sps:$4 sm:$0xff]  }
 0x3d2   : > { %5966 = vmatprep.subr.bf16.mxu1 %v18777_v56  ;;  %v18838_v56 = vld [vmem:[%s24570_s4 + $0xe20] ss:$16 sps:$4 sm:$0xff]  }
 0x3d4   : > { %5639 = vmatpush1.bf16.msra.mxu0 %v18772_v22  ;;  %v18841_v22 = vld [vmem:[%s24570_s4 + $0xe28] ss:$16 sps:$4 sm:$0xff]  }
 0x3d5   : > { %5967 = vmatpush1.bf16.msra.mxu1 %v18775_v41  ;;  %5640 = vmatprep.subr.bf16.mxu0 %v18780_v58  ;;  %v18846_v41 = vld [vmem:[%s24570_s4 + $0xe44] ss:$16 sps:$4 sm:$0xff]   ;;  %v18849_v58 = vld [vmem:[%s24570_s4 + $0xe4c] ss:$16 sps:$4 sm:$0xff]  }
 0x3d6   : > { %5968 = vmatprep.subr.bf16.mxu1 %v18783_v61  ;;  %v18844_v61 = vld [vmem:[%s24570_s4 + $0xe40] ss:$16 sps:$4 sm:$0xff]  }
 0x3d8   : > { %5641 = vmatpush1.bf16.msra.mxu0 %v18778_v63  ;;  %v18847_v63 = vld [vmem:[%s24570_s4 + $0xe48] ss:$16 sps:$4 sm:$0xff]  }
 0x3d9   : > { %5969 = vmatpush1.bf16.msra.mxu1 %v18781_v0  ;;  %5642 = vmatprep.subr.bf16.mxu0 %v18786_v2  ;;  %v18852_v0 = vld [vmem:[%s24570_s4 + $0xe64] ss:$16 sps:$4 sm:$0xff]   ;;  %v18855_v2 = vld [vmem:[%s24570_s4 + $0xe6c] ss:$16 sps:$4 sm:$0xff]  }
 0x3da   : > { %5970 = vmatprep.subr.bf16.mxu1 %v18789_v4  ;;  %v18850_v4 = vld [vmem:[%s24570_s4 + $0xe60] ss:$16 sps:$4 sm:$0xff]  }
 0x3dc   : > { %5643 = vmatpush1.bf16.msra.mxu0 %v18784_v5  ;;  %v18853_v5 = vld [vmem:[%s24570_s4 + $0xe68] ss:$16 sps:$4 sm:$0xff]  }
 0x3dd   : > { %5971 = vmatpush1.bf16.msra.mxu1 %v18787_v7  ;;  %5644 = vmatprep.subr.bf16.mxu0 %v18792_v10  ;;  %v18858_v7 = vld [vmem:[%s24570_s4 + $0xe84] ss:$16 sps:$4 sm:$0xff]   ;;  %v18861_v10 = vld [vmem:[%s24570_s4 + $0xe8c] ss:$16 sps:$4 sm:$0xff]  }
 0x3de   : > { %5972 = vmatprep.subr.bf16.mxu1 %v18795_v12  ;;  %v18856_v12 = vld [vmem:[%s24570_s4 + $0xe80] ss:$16 sps:$4 sm:$0xff]  }
 0x3e0   : > { %5645 = vmatpush1.bf16.msra.mxu0 %v18790_v36  ;;  %v18859_v36 = vld [vmem:[%s24570_s4 + $0xe88] ss:$16 sps:$4 sm:$0xff]  }
 0x3e1   : > { %5973 = vmatpush1.bf16.msra.mxu1 %v18793_v14  ;;  %5646 = vmatprep.subr.bf16.mxu0 %v18798_v15  ;;  %v18864_v14 = vld [vmem:[%s24570_s4 + $0xea4] ss:$16 sps:$4 sm:$0xff]   ;;  %v18867_v15 = vld [vmem:[%s24570_s4 + $0xeac] ss:$16 sps:$4 sm:$0xff]  }
 0x3e2   : > { %5974 = vmatprep.subr.bf16.mxu1 %v18801_v17  ;;  %v18862_v17 = vld [vmem:[%s24570_s4 + $0xea0] ss:$16 sps:$4 sm:$0xff]  }
 0x3e4   : > { %5647 = vmatpush1.bf16.msra.mxu0 %v18796_v18  ;;  %v18865_v18 = vld [vmem:[%s24570_s4 + $0xea8] ss:$16 sps:$4 sm:$0xff]  }
 0x3e5   : > { %5975 = vmatpush1.bf16.msra.mxu1 %v18799_v44  ;;  %5648 = vmatprep.subr.bf16.mxu0 %v18804_v11  ;;  %v18870_v44 = vld [vmem:[%s24570_s4 + $0xec4] ss:$16 sps:$4 sm:$0xff]   ;;  %v18873_v11 = vld [vmem:[%s24570_s4 + $0xecc] ss:$16 sps:$4 sm:$0xff]  }
 0x3e6   : > { %5976 = vmatprep.subr.bf16.mxu1 %v18807_v27  ;;  %v18868_v27 = vld [vmem:[%s24570_s4 + $0xec0] ss:$16 sps:$4 sm:$0xff]  }
 0x3e8   : > { %5649 = vmatpush1.bf16.msra.mxu0 %v18802_v24  ;;  %v18871_v24 = vld [vmem:[%s24570_s4 + $0xec8] ss:$16 sps:$4 sm:$0xff]  }
 0x3e9   : > { %5977 = vmatpush1.bf16.msra.mxu1 %v18805_v26  ;;  %5650 = vmatprep.subr.bf16.mxu0 %v18810_v52  ;;  %v18876_v26 = vld [vmem:[%s24570_s4 + $0xee4] ss:$16 sps:$4 sm:$0xff]   ;;  %v18879_v52 = vld [vmem:[%s24570_s4 + $0xeec] ss:$16 sps:$4 sm:$0xff]  }
 0x3ea   : > { %5978 = vmatprep.subr.bf16.mxu1 %v18813_v9  ;;  %v18874_v9 = vld [vmem:[%s24570_s4 + $0xee0] ss:$16 sps:$4 sm:$0xff]  }
 0x3ec   : > { %5651 = vmatpush1.bf16.msra.mxu0 %v18808_v31  ;;  %v18877_v31 = vld [vmem:[%s24570_s4 + $0xee8] ss:$16 sps:$4 sm:$0xff]  }
 0x3ed   : > { %5979 = vmatpush1.bf16.msra.mxu1 %v18811_v33  ;;  %5652 = vmatprep.subr.bf16.mxu0 %v18816_v34  ;;  %v18882_v33 = vld [vmem:[%s24570_s4 + $0xf04] ss:$16 sps:$4 sm:$0xff]   ;;  %v18885_v34 = vld [vmem:[%s24570_s4 + $0xf0c] ss:$16 sps:$4 sm:$0xff]  }
 0x3ee   : > { %5980 = vmatprep.subr.bf16.mxu1 %v18819_v49  ;;  %v18880_v49 = vld [vmem:[%s24570_s4 + $0xf00] ss:$16 sps:$4 sm:$0xff]  }
 0x3f0   : > { %5653 = vmatpush1.bf16.msra.mxu0 %v18814_v38  ;;  %v18883_v38 = vld [vmem:[%s24570_s4 + $0xf08] ss:$16 sps:$4 sm:$0xff]  }
 0x3f1   : > { %5981 = vmatpush1.bf16.msra.mxu1 %v18817_v39  ;;  %5654 = vmatprep.subr.bf16.mxu0 %v18822_v60  ;;  %v18891_v39 = vld [vmem:[%s24570_s4 + $0xf2c] ss:$16 sps:$4 sm:$0xff]   ;;  %v18886_v60 = vld [vmem:[%s24570_s4 + $0xf20] ss:$16 sps:$4 sm:$0xff]  }
 0x3f2   : > { %5982 = vmatprep.subr.bf16.mxu1 %v18825_v40  ;;  %v18889_v40 = vld [vmem:[%s24570_s4 + $0xf28] ss:$16 sps:$4 sm:$0xff]  }
 0x3f4   : > { %5655 = vmatpush1.bf16.msra.mxu0 %v18820_v43  ;;  %v18897_v43 = vld [vmem:[%s24570_s4 + $0xf4c] ss:$16 sps:$4 sm:$0xff]  }
 0x3f5   : > { %5983 = vmatpush1.bf16.msra.mxu1 %v18823_v45  ;;  %5656 = vmatprep.subr.bf16.mxu0 %v18828_v46  ;;  %v18895_v45 = vld [vmem:[%s24570_s4 + $0xf48] ss:$16 sps:$4 sm:$0xff]   ;;  %v18900_v46 = vld [vmem:[%s24570_s4 + $0xf64] ss:$16 sps:$4 sm:$0xff]  }
 0x3f6   : > { %5984 = vmatprep.subr.bf16.mxu1 %v18831_v57  ;;  %v18903_v57 = vld [vmem:[%s24570_s4 + $0xf6c] ss:$16 sps:$4 sm:$0xff]  }
 0x3f8   : > { %5657 = vmatpush1.bf16.msra.mxu0 %v18826_v25  ;;  %v18901_v25 = vld [vmem:[%s24570_s4 + $0xf68] ss:$16 sps:$4 sm:$0xff]  }
 0x3f9   : > { %5985 = vmatpush1.bf16.msra.mxu1 %v18829_v20  ;;  %5667 = vmatprep.subr.bf16.mxu0 %v18834_v48  ;;  %v18909_v20 = vld [vmem:[%s24570_s4 + $0xf8c] ss:$16 sps:$4 sm:$0xff]   ;;  %v18904_v48 = vld [vmem:[%s24570_s4 + $0xf80] ss:$16 sps:$4 sm:$0xff]  }
 0x3fa   : > { %5995 = vmatprep.subr.bf16.mxu1 %v18837_v62  ;;  %v18907_v62 = vld [vmem:[%s24570_s4 + $0xf88] ss:$16 sps:$4 sm:$0xff]  }
 0x3fb   : > { %5659 = vmatmul.mubr.bf16.vlgmr.msra.gmra.mrb[16].mxu0 %v2282_v37 }
 0x3fc   : > { %5987 = vmatmul.mubr.bf16.vlgmr.msra.gmra.mrb[16].mxu1 %v2282_v37  ;;  %5668 = vmatpush1.bf16.msra.mxu0 %v18832_v28  ;;  %v18915_v28 = vld [vmem:[%s24570_s4 + $0xfac] ss:$16 sps:$4 sm:$0xff]   ;;  %v18910_v37 = vld [vmem:[%s24570_s4 + $0xfa0] ss:$16 sps:$4 sm:$0xff]  }
 0x3fd   : > { %5699 = vmatprep.mubr.bf16.mxu0 %v2285_v55  ;;  %5996 = vmatpush1.bf16.msra.mxu1 %v18835_v54  ;;  %v19377_v54 = vld [vmem:[%s24569_s3 + $0x8] sm:$0xff] }
 0x3fe   : > { %6027 = vmatprep.mubr.bf16.mxu1 %v2285_v55  ;;  %5669 = vmatprep.subr.bf16.mxu0 %v18840_v32  ;;  %v1265_v32 = vrot.slane %v19377_v54, %v20875_v50  ;;  %v18913_v55 = vld [vmem:[%s24570_s4 + $0xfa8] ss:$16 sps:$4 sm:$0xff]   ;;  %v18990_v54 = vld [vmem:[%s24572_s6 + $0x144] ss:$16 sps:$4 sm:$0xff]  }
 0x3ff   : > { %5997 = vmatprep.subr.bf16.mxu1 %v18843_v16  ;;  %v18918_v16 = vld [vmem:[%s24570_s4 + $0xfc4] ss:$16 sps:$4 sm:$0xff]  }
 0x400   : > { %5670 = vmatpush1.bf16.msra.mxu0 %v18838_v56  ;;  %v18921_v56 = vld [vmem:[%s24570_s4 + $0xfcc] ss:$16 sps:$4 sm:$0xff]  }
 0x401   : > { %5998 = vmatpush1.bf16.msra.mxu1 %v18841_v22  ;;  %5671 = vmatprep.subr.bf16.mxu0 %v18846_v41  ;;  %v18916_v22 = vld [vmem:[%s24570_s4 + $0xfc0] ss:$16 sps:$4 sm:$0xff]   ;;  %v2248_v41 = vadd.f32 %v20614_v59, %v1265_v32  ;;  %v18993_v32 = vld [vmem:[%s24572_s6 + $0x14c] ss:$16 sps:$4 sm:$0xff]  }
 0x402   : > { %5999 = vmatprep.subr.bf16.mxu1 %v18849_v58  ;;  %v18919_v58 = vld [vmem:[%s24570_s4 + $0xfc8] ss:$16 sps:$4 sm:$0xff]   ;;  %v18922_v59 = vld [vmem:[%s24570_s4 + $0xfe0] ss:$16 sps:$4 sm:$0xff]  }
 0x404   : > { %5672 = vmatpush1.bf16.msra.mxu0 %v18844_v61  ;;  %v18924_v61 = vld [vmem:[%s24570_s4 + $0xfe4] ss:$16 sps:$4 sm:$0xff]  }
 0x405   : > { %6000 = vmatpush1.bf16.msra.mxu1 %v18847_v63  ;;  %5673 = vmatprep.subr.bf16.mxu0 %v18852_v0  ;;  %v18927_v63 = vld [vmem:[%s24570_s4 + $0xfec] ss:$16 sps:$4 sm:$0xff]   ;;  %v2268_v0 = vmax.f32 %v2248_v41, 0.0  ;;  %v18994_v41 = vld [vmem:[%s24572_s6 + $0x160] ss:$16 sps:$4 sm:$0xff]  }
 0x406   : > { %6001 = vmatprep.subr.bf16.mxu1 %v18855_v2  ;;  %v18925_v2 = vld [vmem:[%s24570_s4 + $0xfe8] ss:$16 sps:$4 sm:$0xff]  }
 0x408   : > { %5674 = vmatpush1.bf16.msra.mxu0 %v18850_v4  ;;  %v18930_v4 = vld [vmem:[%s24572_s6 + $0x4] ss:$16 sps:$4 sm:$0xff]  }
 0x409   : > { %6002 = vmatpush1.bf16.msra.mxu1 %v18853_v5  ;;  %5675 = vmatprep.subr.bf16.mxu0 %v18858_v7  ;;  %v18933_v5 = vld [vmem:[%s24572_s6 + $0xc] ss:$16 sps:$4 sm:$0xff]   ;;  %v18928_v7 = vld [vmem:[%s24572_s6] ss:$16 sps:$4 sm:$0xff]  }
 0x40a   : > { %6003 = vmatprep.subr.bf16.mxu1 %v18861_v10  ;;  %v2284_v10 = vpack.c.bf16 %v2268_v0, %v2268_v0  ;;  %v19003_v0 = vld [vmem:[%s24572_s6 + $0x188] ss:$16 sps:$4 sm:$0xff]  }
 0x40c   : > { %5676 = vmatpush1.bf16.msra.mxu0 %v18856_v12  ;;  %v18931_v12 = vld [vmem:[%s24572_s6 + $0x8] ss:$16 sps:$4 sm:$0xff]  }
 0x40d   : > { %6004 = vmatpush1.bf16.msra.mxu1 %v18859_v36  ;;  %5677 = vmatprep.subr.bf16.mxu0 %v18864_v14  ;;  %v18936_v36 = vld [vmem:[%s24572_s6 + $0x24] ss:$16 sps:$4 sm:$0xff]   ;;  %v18939_v14 = vld [vmem:[%s24572_s6 + $0x2c] ss:$16 sps:$4 sm:$0xff]  }
 0x40e   : > { %6005 = vmatprep.subr.bf16.mxu1 %v18867_v15  ;;  %v18934_v15 = vld [vmem:[%s24572_s6 + $0x20] ss:$16 sps:$4 sm:$0xff]  }
 0x410   : > { %5678 = vmatpush1.bf16.msra.mxu0 %v18862_v17  ;;  %v18937_v17 = vld [vmem:[%s24572_s6 + $0x28] ss:$16 sps:$4 sm:$0xff]  }
 0x411   : > { %6006 = vmatpush1.bf16.msra.mxu1 %v18865_v18  ;;  %5679 = vmatprep.subr.bf16.mxu0 %v18870_v44  ;;  %v18942_v18 = vld [vmem:[%s24572_s6 + $0x44] ss:$16 sps:$4 sm:$0xff]   ;;  %v18945_v44 = vld [vmem:[%s24572_s6 + $0x4c] ss:$16 sps:$4 sm:$0xff]  }
 0x412   : > { %6007 = vmatprep.subr.bf16.mxu1 %v18873_v11  ;;  %v18940_v11 = vld [vmem:[%s24572_s6 + $0x40] ss:$16 sps:$4 sm:$0xff]  }
 0x414   : > { %5680 = vmatpush1.bf16.msra.mxu0 %v18868_v27  ;;  %v18943_v27 = vld [vmem:[%s24572_s6 + $0x48] ss:$16 sps:$4 sm:$0xff]  }
 0x415   : > { %6008 = vmatpush1.bf16.msra.mxu1 %v18871_v24  ;;  %5681 = vmatprep.subr.bf16.mxu0 %v18876_v26  ;;  %v18948_v24 = vld [vmem:[%s24572_s6 + $0x64] ss:$16 sps:$4 sm:$0xff]   ;;  %v18951_v26 = vld [vmem:[%s24572_s6 + $0x6c] ss:$16 sps:$4 sm:$0xff]  }
 0x416   : > { %6009 = vmatprep.subr.bf16.mxu1 %v18879_v52  ;;  %v18946_v52 = vld [vmem:[%s24572_s6 + $0x60] ss:$16 sps:$4 sm:$0xff]  }
 0x418   : > { %5682 = vmatpush1.bf16.msra.mxu0 %v18874_v9  ;;  %v18949_v9 = vld [vmem:[%s24572_s6 + $0x68] ss:$16 sps:$4 sm:$0xff]  }
 0x419   : > { %6010 = vmatpush1.bf16.msra.mxu1 %v18877_v31  ;;  %5683 = vmatprep.subr.bf16.mxu0 %v18882_v33  ;;  %v18954_v31 = vld [vmem:[%s24572_s6 + $0x84] ss:$16 sps:$4 sm:$0xff]   ;;  %v18957_v33 = vld [vmem:[%s24572_s6 + $0x8c] ss:$16 sps:$4 sm:$0xff]  }
 0x41a   : > { %6011 = vmatprep.subr.bf16.mxu1 %v18885_v34  ;;  %v18952_v34 = vld [vmem:[%s24572_s6 + $0x80] ss:$16 sps:$4 sm:$0xff]  }
 0x41c   : > { %5684 = vmatpush1.bf16.msra.mxu0 %v18880_v49  ;;  %v18955_v49 = vld [vmem:[%s24572_s6 + $0x88] ss:$16 sps:$4 sm:$0xff]  }
 0x41d   : > { %6012 = vmatpush1.bf16.msra.mxu1 %v18883_v38  ;;  %5685 = vmatprep.subr.bf16.mxu0 %v18888_v53  ;;  %v18960_v38 = vld [vmem:[%s24572_s6 + $0xa4] ss:$16 sps:$4 sm:$0xff]   ;;  %v18963_v53 = vld [vmem:[%s24572_s6 + $0xac] ss:$16 sps:$4 sm:$0xff]  }
 0x41e   : > { %6013 = vmatprep.subr.bf16.mxu1 %v18891_v39  ;;  %v18958_v39 = vld [vmem:[%s24572_s6 + $0xa0] ss:$16 sps:$4 sm:$0xff]  }
 0x420   : > { %5686 = vmatpush1.bf16.msra.mxu0 %v18886_v60  ;;  %v18961_v60 = vld [vmem:[%s24572_s6 + $0xa8] ss:$16 sps:$4 sm:$0xff]  }
 0x421   : > { %6014 = vmatpush1.bf16.msra.mxu1 %v18889_v40  ;;  %5687 = vmatprep.subr.bf16.mxu0 %v18894_v1  ;;  %v18966_v40 = vld [vmem:[%s24572_s6 + $0xc4] ss:$16 sps:$4 sm:$0xff]   ;;  %v18969_v1 = vld [vmem:[%s24572_s6 + $0xcc] ss:$16 sps:$4 sm:$0xff]  }
 0x422   : > { %6015 = vmatprep.subr.bf16.mxu1 %v18897_v43  ;;  %v18964_v43 = vld [vmem:[%s24572_s6 + $0xc0] ss:$16 sps:$4 sm:$0xff]  }
 0x424   : > { %5688 = vmatpush1.bf16.msra.mxu0 %v18892_v8  ;;  %v18967_v8 = vld [vmem:[%s24572_s6 + $0xc8] ss:$16 sps:$4 sm:$0xff]  }
 0x425   : > { %6016 = vmatpush1.bf16.msra.mxu1 %v18895_v45  ;;  %5689 = vmatprep.subr.bf16.mxu0 %v18900_v46  ;;  %v18972_v45 = vld [vmem:[%s24572_s6 + $0xe4] ss:$16 sps:$4 sm:$0xff]   ;;  %v18975_v46 = vld [vmem:[%s24572_s6 + $0xec] ss:$16 sps:$4 sm:$0xff]  }
 0x426   : > { %6017 = vmatprep.subr.bf16.mxu1 %v18903_v57  ;;  %v18970_v57 = vld [vmem:[%s24572_s6 + $0xe0] ss:$16 sps:$4 sm:$0xff]  }
 0x428   : > { %5690 = vmatpush1.bf16.msra.mxu0 %v18898_v6  ;;  %v18973_v6 = vld [vmem:[%s24572_s6 + $0xe8] ss:$16 sps:$4 sm:$0xff]  }
 0x429   : > { %6018 = vmatpush1.bf16.msra.mxu1 %v18901_v25  ;;  %5691 = vmatprep.subr.bf16.mxu0 %v18906_v47  ;;  %v18978_v25 = vld [vmem:[%s24572_s6 + $0x104] ss:$16 sps:$4 sm:$0xff]   ;;  %v18981_v47 = vld [vmem:[%s24572_s6 + $0x10c] ss:$16 sps:$4 sm:$0xff]  }
 0x42a   : > { %6019 = vmatprep.subr.bf16.mxu1 %v18909_v20  ;;  %v18976_v20 = vld [vmem:[%s24572_s6 + $0x100] ss:$16 sps:$4 sm:$0xff]  }
 0x42c   : > { %5692 = vmatpush1.bf16.msra.mxu0 %v18904_v48  ;;  %v18979_v48 = vld [vmem:[%s24572_s6 + $0x108] ss:$16 sps:$4 sm:$0xff]  }
 0x42d   : > { %6020 = vmatpush1.bf16.msra.mxu1 %v18907_v62  ;;  %5693 = vmatprep.subr.bf16.mxu0 %v18912_v51  ;;  %v18984_v62 = vld [vmem:[%s24572_s6 + $0x124] ss:$16 sps:$4 sm:$0xff]   ;;  %v18987_v51 = vld [vmem:[%s24572_s6 + $0x12c] ss:$16 sps:$4 sm:$0xff]  }
 0x42e   : > { %6021 = vmatprep.subr.bf16.mxu1 %v18915_v28  ;;  %v18982_v28 = vld [vmem:[%s24572_s6 + $0x120] ss:$16 sps:$4 sm:$0xff]  }
 0x430   : > { %5694 = vmatpush1.bf16.msra.mxu0 %v18910_v37  ;;  %v18985_v37 = vld [vmem:[%s24572_s6 + $0x128] ss:$16 sps:$4 sm:$0xff]  }
 0x431   : > { %6022 = vmatpush1.bf16.msra.mxu1 %v18913_v55  ;;  %5695 = vmatprep.subr.bf16.mxu0 %v18918_v16  ;;  %v18988_v55 = vld [vmem:[%s24572_s6 + $0x140] ss:$16 sps:$4 sm:$0xff]   ;;  %v18991_v16 = vld [vmem:[%s24572_s6 + $0x148] ss:$16 sps:$4 sm:$0xff]  }
 0x432   : > { %6023 = vmatprep.subr.bf16.mxu1 %v18921_v56  ;;  %v18996_v56 = vld [vmem:[%s24572_s6 + $0x164] ss:$16 sps:$4 sm:$0xff]  }
 0x434   : > { %5696 = vmatpush1.bf16.msra.mxu0 %v18916_v22  ;;  %v18999_v22 = vld [vmem:[%s24572_s6 + $0x16c] ss:$16 sps:$4 sm:$0xff]  }
 0x435   : > { %6024 = vmatpush1.bf16.msra.mxu1 %v18919_v58  ;;  %5697 = vmatprep.subr.bf16.mxu0 %v18924_v61  ;;  %v18997_v58 = vld [vmem:[%s24572_s6 + $0x168] ss:$16 sps:$4 sm:$0xff]   ;;  %v19002_v61 = vld [vmem:[%s24572_s6 + $0x184] ss:$16 sps:$4 sm:$0xff]  }
 0x436   : > { %6025 = vmatprep.subr.bf16.mxu1 %v18927_v63  ;;  %v19005_v63 = vld [vmem:[%s24572_s6 + $0x18c] ss:$16 sps:$4 sm:$0xff]  }
 0x438   : > { %5698 = vmatpush1.bf16.msra.mxu0 %v18922_v59  ;;  %v19000_v59 = vld [vmem:[%s24572_s6 + $0x180] ss:$16 sps:$4 sm:$0xff]  }
 0x439   : > { %6026 = vmatpush1.bf16.msra.mxu1 %v18925_v2  ;;  %6842 = vmatprep.subr.bf16.mxu0 %v18930_v4  ;;  %v19008_v2 = vld [vmem:[%s24572_s6 + $0x1a4] ss:$16 sps:$4 sm:$0xff]   ;;  %v19011_v4 = vld [vmem:[%s24572_s6 + $0x1ac] ss:$16 sps:$4 sm:$0xff]  }
 0x43a   : > { %6924 = vmatprep.subr.bf16.mxu1 %v18933_v5  ;;  %v19006_v5 = vld [vmem:[%s24572_s6 + $0x1a0] ss:$16 sps:$4 sm:$0xff]  }
 0x43b   : > { %5700 = vmatmul.mubr.bf16.vlgmr.msra.gmra.mrb[16].mxu0 %v2284_v10 }
 0x43c   : > { %6028 = vmatmul.mubr.bf16.vlgmr.msra.gmra.mrb[16].mxu1 %v2284_v10  ;;  %6843 = vmatpush1.bf16.msra.mxu0 %v18928_v7  ;;  %v19009_v7 = vld [vmem:[%s24572_s6 + $0x1a8] ss:$16 sps:$4 sm:$0xff]   ;;  %v19014_v10 = vld [vmem:[%s24572_s6 + $0x1c4] ss:$16 sps:$4 sm:$0xff]  }
 0x43d   : > { %6925 = vmatpush1.bf16.msra.mxu1 %v18931_v12  ;;  %6844 = vmatprep.subr.bf16.mxu0 %v18936_v36  ;;  %v19017_v12 = vld [vmem:[%s24572_s6 + $0x1cc] ss:$16 sps:$4 sm:$0xff]   ;;  %v19012_v36 = vld [vmem:[%s24572_s6 + $0x1c0] ss:$16 sps:$4 sm:$0xff]  }
 0x43e   : > { %6926 = vmatprep.subr.bf16.mxu1 %v18939_v14  ;;  %v19015_v14 = vld [vmem:[%s24572_s6 + $0x1c8] ss:$16 sps:$4 sm:$0xff]  }
 0x440   : > { %6845 = vmatpush1.bf16.msra.mxu0 %v18934_v15  ;;  %v19020_v15 = vld [vmem:[%s24572_s6 + $0x1e4] ss:$16 sps:$4 sm:$0xff]  }
 0x441   : > { %6927 = vmatpush1.bf16.msra.mxu1 %v18937_v17  ;;  %6846 = vmatprep.subr.bf16.mxu0 %v18942_v18  ;;  %v19023_v17 = vld [vmem:[%s24572_s6 + $0x1ec] ss:$16 sps:$4 sm:$0xff]   ;;  %v19018_v18 = vld [vmem:[%s24572_s6 + $0x1e0] ss:$16 sps:$4 sm:$0xff]  }
 0x442   : > { %6928 = vmatprep.subr.bf16.mxu1 %v18945_v44  ;;  %v19021_v44 = vld [vmem:[%s24572_s6 + $0x1e8] ss:$16 sps:$4 sm:$0xff]  }
 0x444   : > { %6847 = vmatpush1.bf16.msra.mxu0 %v18940_v11  ;;  %v19026_v11 = vld [vmem:[%s24572_s6 + $0x204] ss:$16 sps:$4 sm:$0xff]  }
 0x445   : > { %6929 = vmatpush1.bf16.msra.mxu1 %v18943_v27  ;;  %6848 = vmatprep.subr.bf16.mxu0 %v18948_v24  ;;  %v19029_v27 = vld [vmem:[%s24572_s6 + $0x20c] ss:$16 sps:$4 sm:$0xff]   ;;  %v21911_v24 = vld [vmem:[%s24571_s5] sm:$0xf] }
 0x446   : > { %6930 = vmatprep.subr.bf16.mxu1 %v18951_v26  ;;  %v2803_v26 = vrot.slane %v21911_v24, %v20261_v21 }
 0x448   : > { %6849 = vmatpush1.bf16.msra.mxu0 %v18946_v52  ;;  %v2807_v52 = vrot.slane %v21911_v24, %v20269_v23 }
 0x449   : > { %6931 = vmatpush1.bf16.msra.mxu1 %v18949_v9  ;;  %6850 = vmatprep.subr.bf16.mxu0 %v18954_v31  ;;  %v2815_v9 = vrot.slane %v21911_v24, %v20276_v30 }
 0x44a   : > { %6932 = vmatprep.subr.bf16.mxu1 %v18957_v33 }
 0x44c   : > { %6851 = vmatpush1.bf16.msra.mxu0 %v18952_v34 }
 0x44d   : > { %6933 = vmatpush1.bf16.msra.mxu1 %v18955_v49  ;;  %6852 = vmatprep.subr.bf16.mxu0 %v18960_v38 }
 0x44e   : > { %6934 = vmatprep.subr.bf16.mxu1 %v18963_v53 }
 0x450   : > { %6853 = vmatpush1.bf16.msra.mxu0 %v18958_v39 }
 0x451   : > { %6935 = vmatpush1.bf16.msra.mxu1 %v18961_v60  ;;  %6854 = vmatprep.subr.bf16.mxu0 %v18966_v40 }
 0x452   : > { %6936 = vmatprep.subr.bf16.mxu1 %v18969_v1 }
 0x454   : > { %6855 = vmatpush1.bf16.msra.mxu0 %v18964_v43 }
 0x455   : > { %6937 = vmatpush1.bf16.msra.mxu1 %v18967_v8  ;;  %6856 = vmatprep.subr.bf16.mxu0 %v18972_v45 }
 0x456   : > { %6938 = vmatprep.subr.bf16.mxu1 %v18975_v46 }
 0x458   : > { %6857 = vmatpush1.bf16.msra.mxu0 %v18970_v57 }
 0x459   : > { %6939 = vmatpush1.bf16.msra.mxu1 %v18973_v6  ;;  %6858 = vmatprep.subr.bf16.mxu0 %v18978_v25  ;;  %v19024_v6 = vld [vmem:[%s24572_s6 + $0x200] ss:$16 sps:$4 sm:$0xff]   ;;  %v19027_v25 = vld [vmem:[%s24572_s6 + $0x208] ss:$16 sps:$4 sm:$0xff]  }
 0x45a   : > { %6940 = vmatprep.subr.bf16.mxu1 %v18981_v47 }
 0x45c   : > { %6859 = vmatpush1.bf16.msra.mxu0 %v18976_v20  ;;  %v19032_v20 = vld [vmem:[%s24572_s6 + $0x224] ss:$16 sps:$4 sm:$0xff]  }
 0x45d   : > { %6941 = vmatpush1.bf16.msra.mxu1 %v18979_v48  ;;  %6860 = vmatprep.subr.bf16.mxu0 %v18984_v62  ;;  %v19035_v48 = vld [vmem:[%s24572_s6 + $0x22c] ss:$16 sps:$4 sm:$0xff]  }
 0x45e   : > { %6942 = vmatprep.subr.bf16.mxu1 %v18987_v51  ;;  %v19030_v51 = vld [vmem:[%s24572_s6 + $0x220] ss:$16 sps:$4 sm:$0xff]  }
 0x460   : > { %6861 = vmatpush1.bf16.msra.mxu0 %v18982_v28  ;;  %v19033_v28 = vld [vmem:[%s24572_s6 + $0x228] ss:$16 sps:$4 sm:$0xff]  }
 0x461   : > { %6943 = vmatpush1.bf16.msra.mxu1 %v18985_v37  ;;  %6862 = vmatprep.subr.bf16.mxu0 %v18990_v54  ;;  %v19038_v37 = vld [vmem:[%s24572_s6 + $0x244] ss:$16 sps:$4 sm:$0xff]   ;;  %v19041_v54 = vld [vmem:[%s24572_s6 + $0x24c] ss:$16 sps:$4 sm:$0xff]  }
 0x462   : > { %6944 = vmatprep.subr.bf16.mxu1 %v18993_v32  ;;  %v19036_v32 = vld [vmem:[%s24572_s6 + $0x240] ss:$16 sps:$4 sm:$0xff]  }
 0x464   : > { %6863 = vmatpush1.bf16.msra.mxu0 %v18988_v55  ;;  %v19039_v55 = vld [vmem:[%s24572_s6 + $0x248] ss:$16 sps:$4 sm:$0xff]  }
 0x465   : > { %6945 = vmatpush1.bf16.msra.mxu1 %v18991_v16  ;;  %6864 = vmatprep.subr.bf16.mxu0 %v18996_v56  ;;  %v19044_v16 = vld [vmem:[%s24572_s6 + $0x264] ss:$16 sps:$4 sm:$0xff]   ;;  %v19047_v56 = vld [vmem:[%s24572_s6 + $0x26c] ss:$16 sps:$4 sm:$0xff]  }
 0x466   : > { %6946 = vmatprep.subr.bf16.mxu1 %v18999_v22  ;;  %v19042_v22 = vld [vmem:[%s24572_s6 + $0x260] ss:$16 sps:$4 sm:$0xff]  }
 0x468   : > { %6865 = vmatpush1.bf16.msra.mxu0 %v18994_v41  ;;  %v19045_v41 = vld [vmem:[%s24572_s6 + $0x268] ss:$16 sps:$4 sm:$0xff]  }
 0x469   : > { %6947 = vmatpush1.bf16.msra.mxu1 %v18997_v58  ;;  %6866 = vmatprep.subr.bf16.mxu0 %v19002_v61  ;;  %v19050_v58 = vld [vmem:[%s24572_s6 + $0x284] ss:$16 sps:$4 sm:$0xff]   ;;  %v19053_v61 = vld [vmem:[%s24572_s6 + $0x28c] ss:$16 sps:$4 sm:$0xff]  }
 0x46a   : > { %6948 = vmatprep.subr.bf16.mxu1 %v19005_v63  ;;  %v19048_v63 = vld [vmem:[%s24572_s6 + $0x280] ss:$16 sps:$4 sm:$0xff]  }
 0x46c   : > { %6867 = vmatpush1.bf16.msra.mxu0 %v19000_v59  ;;  %v19051_v59 = vld [vmem:[%s24572_s6 + $0x288] ss:$16 sps:$4 sm:$0xff]  }
 0x46d   : > { %6949 = vmatpush1.bf16.msra.mxu1 %v19003_v0  ;;  %6868 = vmatprep.subr.bf16.mxu0 %v19008_v2  ;;  %v19056_v0 = vld [vmem:[%s24572_s6 + $0x2a4] ss:$16 sps:$4 sm:$0xff]   ;;  %v19059_v2 = vld [vmem:[%s24572_s6 + $0x2ac] ss:$16 sps:$4 sm:$0xff]  }
 0x46e   : > { %6950 = vmatprep.subr.bf16.mxu1 %v19011_v4  ;;  %v19054_v4 = vld [vmem:[%s24572_s6 + $0x2a0] ss:$16 sps:$4 sm:$0xff]  }
 0x470   : > { %6869 = vmatpush1.bf16.msra.mxu0 %v19006_v5  ;;  %v19057_v5 = vld [vmem:[%s24572_s6 + $0x2a8] ss:$16 sps:$4 sm:$0xff]  }
 0x471   : > { %6951 = vmatpush1.bf16.msra.mxu1 %v19009_v7  ;;  %6870 = vmatprep.subr.bf16.mxu0 %v19014_v10  ;;  %v19062_v7 = vld [vmem:[%s24572_s6 + $0x2c4] ss:$16 sps:$4 sm:$0xff]   ;;  %v19065_v10 = vld [vmem:[%s24572_s6 + $0x2cc] ss:$16 sps:$4 sm:$0xff]  }
 0x472   : > { %6952 = vmatprep.subr.bf16.mxu1 %v19017_v12  ;;  %v19060_v12 = vld [vmem:[%s24572_s6 + $0x2c0] ss:$16 sps:$4 sm:$0xff]  }
 0x474   : > { %6871 = vmatpush1.bf16.msra.mxu0 %v19012_v36  ;;  %v19063_v36 = vld [vmem:[%s24572_s6 + $0x2c8] ss:$16 sps:$4 sm:$0xff]  }
 0x475   : > { %6953 = vmatpush1.bf16.msra.mxu1 %v19015_v14  ;;  %6872 = vmatprep.subr.bf16.mxu0 %v19020_v15  ;;  %v19068_v14 = vld [vmem:[%s24572_s6 + $0x2e4] ss:$16 sps:$4 sm:$0xff]   ;;  %v19071_v15 = vld [vmem:[%s24572_s6 + $0x2ec] ss:$16 sps:$4 sm:$0xff]  }
 0x476   : > { %6954 = vmatprep.subr.bf16.mxu1 %v19023_v17  ;;  %v19066_v17 = vld [vmem:[%s24572_s6 + $0x2e0] ss:$16 sps:$4 sm:$0xff]  }
 0x478   : > { %6873 = vmatpush1.bf16.msra.mxu0 %v19018_v18  ;;  %v19069_v18 = vld [vmem:[%s24572_s6 + $0x2e8] ss:$16 sps:$4 sm:$0xff]  }
 0x479   : > { %6955 = vmatpush1.bf16.msra.mxu1 %v19021_v44  ;;  %6883 = vmatprep.subr.bf16.mxu0 %v19026_v11  ;;  %v19074_v44 = vld [vmem:[%s24572_s6 + $0x304] ss:$16 sps:$4 sm:$0xff]   ;;  %v19077_v11 = vld [vmem:[%s24572_s6 + $0x30c] ss:$16 sps:$4 sm:$0xff]  }
 0x47a   : > { %6965 = vmatprep.subr.bf16.mxu1 %v19029_v27  ;;  %v19072_v27 = vld [vmem:[%s24572_s6 + $0x300] ss:$16 sps:$4 sm:$0xff]  }
 0x50e   : > { %v5701_v31 = vpop.f32.mrb[16].mxu0 }
 0x50f   : > { %v17936_v33 = vadd.f32 %v5701_v31, %v2803_v26  ;;  %v21919_v34 = vpop.f32.mrb[16].mxu1  ;;  %v5703_v49 = vpop.f32.mrb[17].mxu0  ;;  %v19075_v26 = vld [vmem:[%s24572_s6 + $0x308] ss:$16 sps:$4 sm:$0xff]   ;;  %v19078_v31 = vld [vmem:[%s24572_s6 + $0x320] ss:$16 sps:$4 sm:$0xff]  }
 0x510   : > { %v17937_v38 = vadd.f32 %v5703_v49, %v2807_v52  ;;  %v6031_v53 = vpop.f32.mrb[17].mxu1  ;;  %v5705_v39 = vpop.f32.mrb[18].mxu0  ;;  %v19080_v52 = vld [vmem:[%s24572_s6 + $0x324] ss:$16 sps:$4 sm:$0xff]  }
 0x511   : > { %v21921_v60 = vpack.c.bf16 %v17936_v33, %v17936_v33  ;;  %v17939_v40 = vadd.f32 %v6031_v53, %v2815_v9  ;;  %v6033_v1 = vpop.f32.mrb[18].mxu1  ;;  %v5706_v43 = vpop.f32.mrb[19].mxu0  ;;  %v19083_v9 = vld [vmem:[%s24572_s6 + $0x32c] ss:$16 sps:$4 sm:$0xff]   ;;  %v19081_v33 = vld [vmem:[%s24572_s6 + $0x328] ss:$16 sps:$4 sm:$0xff]  }
 0x512   : > { %v21923_v8 = vpack.c.bf16 %v17937_v38, %v17937_v38  ;;  %v6034_v45 = vpop.f32.mrb[19].mxu1  ;;  %v19086_v49 = vld [vmem:[%s24572_s6 + $0x344] ss:$16 sps:$4 sm:$0xff]   ;;  %v19089_v38 = vld [vmem:[%s24572_s6 + $0x34c] ss:$16 sps:$4 sm:$0xff]  }
 0x513   : > { %v21925_v46 = vpack.c.bf16 %v17939_v40, %v17939_v40  ;;  %v6194_v47 = vrot.slane %v21921_v60, 1  ;;  %v19084_v53 = vld [vmem:[%s24572_s6 + $0x340] ss:$16 sps:$4 sm:$0xff]   ;;  %v19087_v39 = vld [vmem:[%s24572_s6 + $0x348] ss:$16 sps:$4 sm:$0xff]  }
 0x514   : > { %v6195_v57 = vrot.slane %v21923_v8, 1  ;;  %v19092_v40 = vld [vmem:[%s24572_s6 + $0x364] ss:$16 sps:$4 sm:$0xff]   ;;  %v19095_v1 = vld [vmem:[%s24572_s6 + $0x36c] ss:$16 sps:$4 sm:$0xff]  }
 0x515   : > { %v6197_v62 = vrot.slane %v21925_v46, 1  ;;  %v19090_v43 = vld [vmem:[%s24572_s6 + $0x360] ss:$16 sps:$4 sm:$0xff]   ;;  %v19093_v45 = vld [vmem:[%s24572_s6 + $0x368] ss:$16 sps:$4 sm:$0xff]  }
 0x516   : > { %6874 = vmatprep.mubr.bf16.mxu0 %v6195_v57  ;;  %6956 = vmatprep.mubr.bf16.mxu1 %v6195_v57  ;;  %v19098_v57 = vld [vmem:[%s24572_s6 + $0x384] ss:$16 sps:$4 sm:$0xff]  }
 0x517   : > { %6875 = vmatmul.mubr.bf16.vlgmr.msra.gmra.mrb[20].mxu0 %v6194_v47  ;;  %6957 = vmatmul.mubr.bf16.vlgmr.msra.gmra.mrb[20].mxu1 %v6194_v47  ;;  %v19099_v47 = vld [vmem:[%s24572_s6 + $0x388] ss:$16 sps:$4 sm:$0xff]  }
 0x518   : > { %6884 = vmatpush1.bf16.msra.mxu0 %v19024_v6  ;;  %6966 = vmatpush1.bf16.msra.mxu1 %v19027_v25  ;;  %v19101_v6 = vld [vmem:[%s24572_s6 + $0x38c] ss:$16 sps:$4 sm:$0xff]   ;;  %v19096_v25 = vld [vmem:[%s24572_s6 + $0x380] ss:$16 sps:$4 sm:$0xff]  }
 0x519   : > { %6915 = vmatprep.mubr.bf16.mxu0 %v6197_v62  ;;  %6997 = vmatprep.mubr.bf16.mxu1 %v6197_v62  ;;  %v19102_v62 = vld [vmem:[%s24572_s6 + $0x3a0] ss:$16 sps:$4 sm:$0xff]  }
 0x51a   : > { %6885 = vmatprep.subr.bf16.mxu0 %v19032_v20  ;;  %6967 = vmatprep.subr.bf16.mxu1 %v19035_v48  ;;  %v19104_v20 = vld [vmem:[%s24572_s6 + $0x3a4] ss:$16 sps:$4 sm:$0xff]   ;;  %v19107_v48 = vld [vmem:[%s24572_s6 + $0x3ac] ss:$16 sps:$4 sm:$0xff]  }
 0x51c   : > { %6886 = vmatpush1.bf16.msra.mxu0 %v19030_v51  ;;  %6968 = vmatpush1.bf16.msra.mxu1 %v19033_v28  ;;  %v19105_v51 = vld [vmem:[%s24572_s6 + $0x3a8] ss:$16 sps:$4 sm:$0xff]   ;;  %v2811_v28 = vrot.slane %v21911_v24, %v20435_v42 }
 0x51d   : > { %6887 = vmatprep.subr.bf16.mxu0 %v19038_v37  ;;  %6969 = vmatprep.subr.bf16.mxu1 %v19041_v54  ;;  %v19110_v37 = vld [vmem:[%s24572_s6 + $0x3c4] ss:$16 sps:$4 sm:$0xff]   ;;  %v19113_v54 = vld [vmem:[%s24572_s6 + $0x3cc] ss:$16 sps:$4 sm:$0xff]   ;;  %v19111_v24 = vld [vmem:[%s24572_s6 + $0x3c8] ss:$16 sps:$4 sm:$0xff]  }
 0x520   : > { %6888 = vmatpush1.bf16.msra.mxu0 %v19036_v32  ;;  %6970 = vmatpush1.bf16.msra.mxu1 %v19039_v55  ;;  %v19108_v32 = vld [vmem:[%s24572_s6 + $0x3c0] ss:$16 sps:$4 sm:$0xff]   ;;  %v17938_v55 = vadd.f32 %v21919_v34, %v2811_v28  ;;  %v7011_v34 = vld [vmem:[%s24574_s8 + $0x8] sm:$0xff] }
 0x521   : > { %6889 = vmatprep.subr.bf16.mxu0 %v19044_v16  ;;  %6971 = vmatprep.subr.bf16.mxu1 %v19047_v56  ;;  %v19116_v16 = vld [vmem:[%s24572_s6 + $0x3e4] ss:$16 sps:$4 sm:$0xff]   ;;  %v19119_v56 = vld [vmem:[%s24572_s6 + $0x3ec] ss:$16 sps:$4 sm:$0xff]  }
 0x522   : > { %v7054_v28 = vld [vmem:[%s24574_s8 + $0x160] sm:$0xff] }
 0x524   : > { %6890 = vmatpush1.bf16.msra.mxu0 %v19042_v22  ;;  %6972 = vmatpush1.bf16.msra.mxu1 %v19045_v41  ;;  %v7010_v22 = vld [vmem:[%s24574_s8] sm:$0xff] }
 0x525   : > { %6891 = vmatprep.subr.bf16.mxu0 %v19050_v58  ;;  %6973 = vmatprep.subr.bf16.mxu1 %v19053_v61  ;;  %v7014_v41 = vld [vmem:[%s24574_s8 + $0x20] sm:$0xff]  ;;  %v7015_v58 = vld [vmem:[%s24574_s8 + $0x28] sm:$0xff] }
 0x526   : > { %v19114_v61 = vld [vmem:[%s24572_s6 + $0x3e0] ss:$16 sps:$4 sm:$0xff]  }
 0x528   : > { %6892 = vmatpush1.bf16.msra.mxu0 %v19048_v63  ;;  %6974 = vmatpush1.bf16.msra.mxu1 %v19051_v59  ;;  %v19117_v63 = vld [vmem:[%s24572_s6 + $0x3e8] ss:$16 sps:$4 sm:$0xff]   ;;  %v22131_v59 = vpack.c.bf16 %v17938_v55, %v17938_v55 }
 0x529   : > { %6893 = vmatprep.subr.bf16.mxu0 %v19056_v0  ;;  %6975 = vmatprep.subr.bf16.mxu1 %v19059_v2  ;;  %v17153_v0 = vcombine.high %v7010_v22, %v7014_v41  ;;  %v17155_v2 = vcombine.high %v7011_v34, %v7015_v58 }
 0x52c   : > { %6894 = vmatpush1.bf16.msra.mxu0 %v19054_v4  ;;  %6976 = vmatpush1.bf16.msra.mxu1 %v19057_v5  ;;  %v7018_v4 = vld [vmem:[%s24574_s8 + $0x40] sm:$0xff] }
 0x52d   : > { %6895 = vmatprep.subr.bf16.mxu0 %v19062_v7  ;;  %6977 = vmatprep.subr.bf16.mxu1 %v19065_v10  ;;  %v7022_v5 = vld [vmem:[%s24574_s8 + $0x60] sm:$0xff]  ;;  %v7019_v7 = vld [vmem:[%s24574_s8 + $0x48] sm:$0xff] }
 0x52e   : > { %v7023_v10 = vld [vmem:[%s24574_s8 + $0x68] sm:$0xff] }
 0x530   : > { %6896 = vmatpush1.bf16.msra.mxu0 %v19060_v12  ;;  %6978 = vmatpush1.bf16.msra.mxu1 %v19063_v36  ;;  %v17152_v12 = vcombine.low %v7010_v22, %v7014_v41  ;;  %v6196_v36 = vrot.slane %v22131_v59, 1  ;;  %v7062_v22 = vld [vmem:[%s24574_s8 + $0x1a0] sm:$0xff]  ;;  %v7059_v41 = vld [vmem:[%s24574_s8 + $0x188] sm:$0xff] }
 0x531   : > { %6897 = vmatprep.subr.bf16.mxu0 %v19068_v14  ;;  %6979 = vmatprep.subr.bf16.mxu1 %v19071_v15  ;;  %v17154_v14 = vcombine.low %v7011_v34, %v7015_v58  ;;  %v17161_v15 = vcombine.high %v7018_v4, %v7022_v5  ;;  %v7063_v34 = vld [vmem:[%s24574_s8 + $0x1a8] sm:$0xff] }
 0x534   : > { %6898 = vmatpush1.bf16.msra.mxu0 %v19066_v17  ;;  %6980 = vmatpush1.bf16.msra.mxu1 %v19069_v18  ;;  %v17163_v17 = vcombine.high %v7019_v7, %v7023_v10  ;;  %v7026_v18 = vld [vmem:[%s24574_s8 + $0x80] sm:$0xff] }
 0x535   : > { %6899 = vmatprep.subr.bf16.mxu0 %v19074_v44  ;;  %6981 = vmatprep.subr.bf16.mxu1 %v19077_v11  ;;  %v7030_v44 = vld [vmem:[%s24574_s8 + $0xa0] sm:$0xff]  ;;  %v7027_v11 = vld [vmem:[%s24574_s8 + $0x88] sm:$0xff] }
 0x538   : > { %6900 = vmatpush1.bf16.msra.mxu0 %v19072_v27  ;;  %6982 = vmatpush1.bf16.msra.mxu1 %v19075_v26  ;;  %v7031_v27 = vld [vmem:[%s24574_s8 + $0xa8] sm:$0xff]  ;;  %v17160_v26 = vcombine.low %v7018_v4, %v7022_v5  ;;  %v7070_v4 = vld [vmem:[%s24574_s8 + $0x1e0] sm:$0xff] }
 0x539   : > { %6901 = vmatprep.subr.bf16.mxu0 %v19080_v52  ;;  %6983 = vmatprep.subr.bf16.mxu1 %v19083_v9  ;;  %v17162_v52 = vcombine.low %v7019_v7, %v7023_v10  ;;  %v17169_v9 = vcombine.high %v7026_v18, %v7030_v44  ;;  %v7067_v5 = vld [vmem:[%s24574_s8 + $0x1c8] sm:$0xff] }
 0x53a   : > { %v7071_v7 = vld [vmem:[%s24574_s8 + $0x1e8] sm:$0xff] }
 0x53c   : > { %6902 = vmatpush1.bf16.msra.mxu0 %v19078_v31  ;;  %6984 = vmatpush1.bf16.msra.mxu1 %v19081_v33  ;;  %v17171_v31 = vcombine.high %v7027_v11, %v7031_v27  ;;  %v7034_v33 = vld [vmem:[%s24574_s8 + $0xc0] sm:$0xff] }
 0x53d   : > { %6903 = vmatprep.subr.bf16.mxu0 %v19086_v49  ;;  %6985 = vmatprep.subr.bf16.mxu1 %v19089_v38  ;;  %v7038_v49 = vld [vmem:[%s24574_s8 + $0xe0] sm:$0xff]  ;;  %v7035_v38 = vld [vmem:[%s24574_s8 + $0xc8] sm:$0xff] }
 0x540   : > { %6904 = vmatpush1.bf16.msra.mxu0 %v19084_v53  ;;  %6986 = vmatpush1.bf16.msra.mxu1 %v19087_v39  ;;  %v7039_v53 = vld [vmem:[%s24574_s8 + $0xe8] sm:$0xff]  ;;  %v17168_v39 = vcombine.low %v7026_v18, %v7030_v44 }
 0x541   : > { %6905 = vmatprep.subr.bf16.mxu0 %v19092_v40  ;;  %6987 = vmatprep.subr.bf16.mxu1 %v19095_v1  ;;  %v17170_v40 = vcombine.low %v7027_v11, %v7031_v27  ;;  %v17177_v1 = vcombine.high %v7034_v33, %v7038_v49  ;;  %v7075_v18 = vld [vmem:[%s24574_s8 + $0x208] sm:$0xff]  ;;  %v17210_v27 = vcombine.low %v7067_v5, %v7071_v7 }
 0x542   : > { %v7079_v44 = vld [vmem:[%s24574_s8 + $0x228] sm:$0xff] }
 0x544   : > { %6906 = vmatpush1.bf16.msra.mxu0 %v19090_v43  ;;  %6988 = vmatpush1.bf16.msra.mxu1 %v19093_v45  ;;  %v17179_v43 = vcombine.high %v7035_v38, %v7039_v53  ;;  %v7042_v45 = vld [vmem:[%s24574_s8 + $0x100] sm:$0xff] }
 0x545   : > { %6907 = vmatprep.subr.bf16.mxu0 %v19098_v57  ;;  %6989 = vmatprep.subr.bf16.mxu1 %v19101_v6  ;;  %v7046_v57 = vld [vmem:[%s24574_s8 + $0x120] sm:$0xff]  ;;  %v7043_v6 = vld [vmem:[%s24574_s8 + $0x108] sm:$0xff] }
 0x548   : > { %6908 = vmatpush1.bf16.msra.mxu0 %v19096_v25  ;;  %6990 = vmatpush1.bf16.msra.mxu1 %v19099_v47  ;;  %v7047_v25 = vld [vmem:[%s24574_s8 + $0x128] sm:$0xff]  ;;  %v17176_v47 = vcombine.low %v7034_v33, %v7038_v49 }
 0x549   : > { %6909 = vmatprep.subr.bf16.mxu0 %v19104_v20  ;;  %6991 = vmatprep.subr.bf16.mxu1 %v19107_v48  ;;  %v17178_v20 = vcombine.low %v7035_v38, %v7039_v53  ;;  %v17185_v48 = vcombine.high %v7042_v45, %v7046_v57  ;;  %v7083_v33 = vld [vmem:[%s24574_s8 + $0x248] sm:$0xff]  ;;  %v17218_v53 = vcombine.low %v7075_v18, %v7079_v44 }
 0x54a   : > { %v7087_v49 = vld [vmem:[%s24574_s8 + $0x268] sm:$0xff] }
 0x54c   : > { %6910 = vmatpush1.bf16.msra.mxu0 %v19102_v62  ;;  %6992 = vmatpush1.bf16.msra.mxu1 %v19105_v51  ;;  %v17187_v62 = vcombine.high %v7043_v6, %v7047_v25  ;;  %v7050_v51 = vld [vmem:[%s24574_s8 + $0x140] sm:$0xff] }
 0x54d   : > { %6911 = vmatprep.subr.bf16.mxu0 %v19110_v37  ;;  %6993 = vmatprep.subr.bf16.mxu1 %v19113_v54  ;;  %v7051_v37 = vld [vmem:[%s24574_s8 + $0x148] sm:$0xff]  ;;  %v17193_v55 = vcombine.high %v7050_v51, %v7054_v28  ;;  %v17192_v58 = vcombine.low %v7050_v51, %v7054_v28 }
 0x54e   : > { %v7055_v54 = vld [vmem:[%s24574_s8 + $0x168] sm:$0xff] }
 0x54f   : > { %v7099_v51 = vld [vmem:[%s24574_s8 + $0x2c8] sm:$0xff] }
 0x550   : > { %6912 = vmatpush1.bf16.msra.mxu0 %v19108_v32  ;;  %6994 = vmatpush1.bf16.msra.mxu1 %v19111_v24  ;;  %v17184_v32 = vcombine.low %v7042_v45, %v7046_v57  ;;  %v17186_v24 = vcombine.low %v7043_v6, %v7047_v25  ;;  %v7091_v45 = vld [vmem:[%s24574_s8 + $0x288] sm:$0xff]  ;;  %v17226_v25 = vcombine.low %v7083_v33, %v7087_v49 }
 0x551   : > { %6913 = vmatprep.subr.bf16.mxu0 %v19116_v16  ;;  %6995 = vmatprep.subr.bf16.mxu1 %v19119_v56  ;;  %v17195_v16 = vcombine.high %v7051_v37, %v7055_v54  ;;  %v7058_v56 = vld [vmem:[%s24574_s8 + $0x180] sm:$0xff]  ;;  %v7095_v57 = vld [vmem:[%s24574_s8 + $0x2a8] sm:$0xff] }
 0x552   : > { %v17200_v10 = vcombine.low %v7058_v56, %v7062_v22  ;;  %v7103_v28 = vld [vmem:[%s24574_s8 + $0x2e8] sm:$0xff] }
 0x554   : > { %6914 = vmatpush1.bf16.msra.mxu0 %v19114_v61  ;;  %6996 = vmatpush1.bf16.msra.mxu1 %v19117_v63  ;;  %v17194_v61 = vcombine.low %v7051_v37, %v7055_v54  ;;  %v17201_v63 = vcombine.high %v7058_v56, %v7062_v22  ;;  %v17234_v54 = vcombine.low %v7091_v45, %v7095_v57  ;;  %v7107_v56 = vld [vmem:[%s24574_s8 + $0x308] sm:$0xff] }
 0x555   : > { %8588 = vmatprep.subr.bf16.mxu0 %v17153_v0  ;;  %8670 = vmatprep.subr.bf16.mxu1 %v17155_v2  ;;  %v17203_v0 = vcombine.high %v7059_v41, %v7063_v34  ;;  %v7066_v2 = vld [vmem:[%s24574_s8 + $0x1c0] sm:$0xff]  ;;  %v7111_v22 = vld [vmem:[%s24574_s8 + $0x328] sm:$0xff] }
 0x556   : > { %v17208_v11 = vcombine.low %v7066_v2, %v7070_v4 }
 0x557   : > { %6916 = vmatmul.mubr.bf16.vlgmr.msra.gmra.mrb[20].mxu0 %v6196_v36  ;;  %6998 = vmatmul.mubr.bf16.vlgmr.msra.gmra.mrb[20].mxu1 %v6196_v36  ;;  %v17209_v36 = vcombine.high %v7066_v2, %v7070_v4  ;;  %v7115_v2 = vld [vmem:[%s24574_s8 + $0x348] sm:$0xff] }
 0x558   : > { %8589 = vmatpush1.bf16.msra.mxu0 %v17152_v12  ;;  %8620 = vmatprep.mubr.bf16.mxu0 %v21923_v8  ;;  %v17202_v12 = vcombine.low %v7059_v41, %v7063_v34  ;;  %v17242_v34 = vcombine.low %v7099_v51, %v7103_v28  ;;  %v7119_v4 = vld [vmem:[%s24574_s8 + $0x368] sm:$0xff] }
 0x559   : > { %8671 = vmatpush1.bf16.msra.mxu1 %v17154_v14  ;;  %8702 = vmatprep.mubr.bf16.mxu1 %v21923_v8  ;;  %v17211_v14 = vcombine.high %v7067_v5, %v7071_v7  ;;  %v17250_v7 = vcombine.low %v7107_v56, %v7111_v22 }
 0x55a   : > { %8590 = vmatprep.subr.bf16.mxu0 %v17161_v15  ;;  %8672 = vmatprep.subr.bf16.mxu1 %v17163_v17  ;;  %v7074_v15 = vld [vmem:[%s24574_s8 + $0x200] sm:$0xff] }
 0x55b   : > { %v7078_v17 = vld [vmem:[%s24574_s8 + $0x220] sm:$0xff] }
 0x55c   : > { %8591 = vmatpush1.bf16.msra.mxu0 %v17160_v26  ;;  %v17217_v26 = vcombine.high %v7074_v15, %v7078_v17  ;;  %v17216_v38 = vcombine.low %v7074_v15, %v7078_v17  ;;  %v7123_v15 = vld [vmem:[%s24574_s8 + $0x388] sm:$0xff] }
 0x55d   : > { %8673 = vmatpush1.bf16.msra.mxu1 %v17162_v52  ;;  %8592 = vmatprep.subr.bf16.mxu0 %v17169_v9  ;;  %v17219_v52 = vcombine.high %v7075_v18, %v7079_v44  ;;  %v7082_v9 = vld [vmem:[%s24574_s8 + $0x240] sm:$0xff]  ;;  %v7127_v17 = vld [vmem:[%s24574_s8 + $0x3a8] sm:$0xff]  ;;  %v17258_v44 = vcombine.low %v7115_v2, %v7119_v4 }
 0x55e   : > { %8674 = vmatprep.subr.bf16.mxu1 %v17171_v31  ;;  %v7086_v31 = vld [vmem:[%s24574_s8 + $0x260] sm:$0xff] }
 0x55f   : > { %v17224_v6 = vcombine.low %v7082_v9, %v7086_v31 }
 0x560   : > { %8593 = vmatpush1.bf16.msra.mxu0 %v17168_v39  ;;  %v17225_v39 = vcombine.high %v7082_v9, %v7086_v31  ;;  %v7131_v9 = vld [vmem:[%s24574_s8 + $0x3c8] sm:$0xff] }
 0x561   : > { %8675 = vmatpush1.bf16.msra.mxu1 %v17170_v40  ;;  %8594 = vmatprep.subr.bf16.mxu0 %v17177_v1  ;;  %v17227_v40 = vcombine.high %v7083_v33, %v7087_v49  ;;  %v7090_v1 = vld [vmem:[%s24574_s8 + $0x280] sm:$0xff]  ;;  %v7135_v31 = vld [vmem:[%s24574_s8 + $0x3e8] sm:$0xff]  ;;  %v17266_v49 = vcombine.low %v7123_v15, %v7127_v17 }
 0x562   : > { %8676 = vmatprep.subr.bf16.mxu1 %v17179_v43  ;;  %v7094_v43 = vld [vmem:[%s24574_s8 + $0x2a0] sm:$0xff] }
 0x563   : > { %v17232_v37 = vcombine.low %v7090_v1, %v7094_v43 }
 0x564   : > { %8595 = vmatpush1.bf16.msra.mxu0 %v17176_v47  ;;  %v17233_v47 = vcombine.high %v7090_v1, %v7094_v43  ;;  %v7139_v1 = vld [vmem:[%s24574_s8 + $0x408] sm:$0xff] }
 0x565   : > { %8677 = vmatpush1.bf16.msra.mxu1 %v17178_v20  ;;  %8596 = vmatprep.subr.bf16.mxu0 %v17185_v48  ;;  %v17235_v20 = vcombine.high %v7091_v45, %v7095_v57  ;;  %v7098_v48 = vld [vmem:[%s24574_s8 + $0x2c0] sm:$0xff]  ;;  %v7143_v43 = vld [vmem:[%s24574_s8 + $0x428] sm:$0xff]  ;;  %v17274_v57 = vcombine.low %v7131_v9, %v7135_v31 }
 0x566   : > { %8678 = vmatprep.subr.bf16.mxu1 %v17187_v62  ;;  %v7102_v62 = vld [vmem:[%s24574_s8 + $0x2e0] sm:$0xff] }
 0x567   : > { %v17240_v41 = vcombine.low %v7098_v48, %v7102_v62 }
 0x568   : > { %8597 = vmatpush1.bf16.msra.mxu0 %v17184_v32  ;;  %v17241_v32 = vcombine.high %v7098_v48, %v7102_v62  ;;  %v7147_v62 = vld [vmem:[%s24574_s8 + $0x448] sm:$0xff] }
 0x569   : > { %8679 = vmatpush1.bf16.msra.mxu1 %v17186_v24  ;;  %8598 = vmatprep.subr.bf16.mxu0 %v17193_v55  ;;  %v17243_v24 = vcombine.high %v7099_v51, %v7103_v28  ;;  %v7106_v55 = vld [vmem:[%s24574_s8 + $0x300] sm:$0xff]  ;;  %v7151_v51 = vld [vmem:[%s24574_s8 + $0x468] sm:$0xff]  ;;  %v17282_v28 = vcombine.low %v7139_v1, %v7143_v43 }
 0x56a   : > { %8680 = vmatprep.subr.bf16.mxu1 %v17195_v16  ;;  %v7110_v16 = vld [vmem:[%s24574_s8 + $0x320] sm:$0xff] }
 0x56b   : > { %v17248_v5 = vcombine.low %v7106_v55, %v7110_v16 }
 0x56c   : > { %8599 = vmatpush1.bf16.msra.mxu0 %v17192_v58  ;;  %v17249_v58 = vcombine.high %v7106_v55, %v7110_v16  ;;  %v7155_v55 = vld [vmem:[%s24574_s8 + $0x488] sm:$0xff] }
 0x56d   : > { %8681 = vmatpush1.bf16.msra.mxu1 %v17194_v61  ;;  %8600 = vmatprep.subr.bf16.mxu0 %v17201_v63  ;;  %v17251_v61 = vcombine.high %v7107_v56, %v7111_v22  ;;  %v7114_v63 = vld [vmem:[%s24574_s8 + $0x340] sm:$0xff]  ;;  %v7159_v16 = vld [vmem:[%s24574_s8 + $0x4a8] sm:$0xff]  ;;  %v17290_v22 = vcombine.low %v7147_v62, %v7151_v51 }
 0x56e   : > { %8682 = vmatprep.subr.bf16.mxu1 %v17203_v0  ;;  %v7118_v0 = vld [vmem:[%s24574_s8 + $0x360] sm:$0xff] }
 0x56f   : > { %v17256_v18 = vcombine.low %v7114_v63, %v7118_v0 }
 0x570   : > { %8601 = vmatpush1.bf16.msra.mxu0 %v17200_v10  ;;  %v17257_v10 = vcombine.high %v7114_v63, %v7118_v0  ;;  %v7163_v63 = vld [vmem:[%s24574_s8 + $0x4c8] sm:$0xff] }
 0x571   : > { %8683 = vmatpush1.bf16.msra.mxu1 %v17202_v12  ;;  %8602 = vmatprep.subr.bf16.mxu0 %v17209_v36  ;;  %v17259_v12 = vcombine.high %v7115_v2, %v7119_v4  ;;  %v7122_v36 = vld [vmem:[%s24574_s8 + $0x380] sm:$0xff]  ;;  %v7167_v0 = vld [vmem:[%s24574_s8 + $0x4e8] sm:$0xff]  ;;  %v17298_v4 = vcombine.low %v7155_v55, %v7159_v16 }
 0x572   : > { %8684 = vmatprep.subr.bf16.mxu1 %v17211_v14  ;;  %v7126_v14 = vld [vmem:[%s24574_s8 + $0x3a0] sm:$0xff] }
 0x573   : > { %v17264_v33 = vcombine.low %v7122_v36, %v7126_v14 }
 0x574   : > { %8603 = vmatpush1.bf16.msra.mxu0 %v17208_v11  ;;  %v17265_v11 = vcombine.high %v7122_v36, %v7126_v14  ;;  %v7171_v36 = vld [vmem:[%s24574_s8 + $0x508] sm:$0xff] }
 0x575   : > { %8685 = vmatpush1.bf16.msra.mxu1 %v17210_v27  ;;  %8604 = vmatprep.subr.bf16.mxu0 %v17217_v26  ;;  %v17267_v27 = vcombine.high %v7123_v15, %v7127_v17  ;;  %v7130_v26 = vld [vmem:[%s24574_s8 + $0x3c0] sm:$0xff]  ;;  %v7175_v14 = vld [vmem:[%s24574_s8 + $0x528] sm:$0xff]  ;;  %v17306_v17 = vcombine.low %v7163_v63, %v7167_v0 }
 0x576   : > { %8686 = vmatprep.subr.bf16.mxu1 %v17219_v52  ;;  %v7134_v52 = vld [vmem:[%s24574_s8 + $0x3e0] sm:$0xff] }
 0x577   : > { %v17272_v45 = vcombine.low %v7130_v26, %v7134_v52 }
 0x578   : > { %8605 = vmatpush1.bf16.msra.mxu0 %v17216_v38  ;;  %v17273_v38 = vcombine.high %v7130_v26, %v7134_v52  ;;  %v7179_v26 = vld [vmem:[%s24574_s8 + $0x548] sm:$0xff] }
 0x579   : > { %8687 = vmatpush1.bf16.msra.mxu1 %v17218_v53  ;;  %8606 = vmatprep.subr.bf16.mxu0 %v17225_v39  ;;  %v17275_v53 = vcombine.high %v7131_v9, %v7135_v31  ;;  %v7138_v39 = vld [vmem:[%s24574_s8 + $0x400] sm:$0xff]  ;;  %v7183_v52 = vld [vmem:[%s24574_s8 + $0x568] sm:$0xff]  ;;  %v17314_v31 = vcombine.low %v7171_v36, %v7175_v14 }
 0x57a   : > { %8688 = vmatprep.subr.bf16.mxu1 %v17227_v40  ;;  %v7142_v40 = vld [vmem:[%s24574_s8 + $0x420] sm:$0xff] }
 0x57b   : > { %v17280_v48 = vcombine.low %v7138_v39, %v7142_v40 }
 0x57c   : > { %8607 = vmatpush1.bf16.msra.mxu0 %v17224_v6  ;;  %v17281_v6 = vcombine.high %v7138_v39, %v7142_v40  ;;  %v7187_v39 = vld [vmem:[%s24574_s8 + $0x588] sm:$0xff] }
 0x57d   : > { %8689 = vmatpush1.bf16.msra.mxu1 %v17226_v25  ;;  %8608 = vmatprep.subr.bf16.mxu0 %v17233_v47  ;;  %v17283_v25 = vcombine.high %v7139_v1, %v7143_v43  ;;  %v7146_v47 = vld [vmem:[%s24574_s8 + $0x440] sm:$0xff]  ;;  %v7191_v40 = vld [vmem:[%s24574_s8 + $0x5a8] sm:$0xff]  ;;  %v17322_v43 = vcombine.low %v7179_v26, %v7183_v52 }
 0x57e   : > { %8690 = vmatprep.subr.bf16.mxu1 %v17235_v20  ;;  %v7150_v20 = vld [vmem:[%s24574_s8 + $0x460] sm:$0xff] }
 0x57f   : > { %v17288_v56 = vcombine.low %v7146_v47, %v7150_v20 }
 0x580   : > { %8609 = vmatpush1.bf16.msra.mxu0 %v17232_v37  ;;  %v17289_v37 = vcombine.high %v7146_v47, %v7150_v20  ;;  %v7195_v47 = vld [vmem:[%s24574_s8 + $0x5c8] sm:$0xff] }
 0x581   : > { %8691 = vmatpush1.bf16.msra.mxu1 %v17234_v54  ;;  %8610 = vmatprep.subr.bf16.mxu0 %v17241_v32  ;;  %v7154_v54 = vld [vmem:[%s24574_s8 + $0x480] sm:$0xff]  ;;  %v7199_v20 = vld [vmem:[%s24574_s8 + $0x5e8] sm:$0xff] }
 0x582   : > { %8692 = vmatprep.subr.bf16.mxu1 %v17243_v24  ;;  %v7158_v32 = vld [vmem:[%s24574_s8 + $0x4a0] sm:$0xff]  ;;  %v17291_v24 = vcombine.high %v7147_v62, %v7151_v51  ;;  %v17330_v62 = vcombine.low %v7187_v39, %v7191_v40 }
 0x583   : > { %v17296_v2 = vcombine.low %v7154_v54, %v7158_v32 }
 0x584   : > { %8611 = vmatpush1.bf16.msra.mxu0 %v17240_v41  ;;  %v17297_v41 = vcombine.high %v7154_v54, %v7158_v32  ;;  %v7206_v54 = vld [vmem:[%s24574_s8 + $0x620] sm:$0xff]  ;;  %v7203_v32 = vld [vmem:[%s24574_s8 + $0x608] sm:$0xff] }
 0x585   : > { %8693 = vmatpush1.bf16.msra.mxu1 %v17242_v34  ;;  %8612 = vmatprep.subr.bf16.mxu0 %v17249_v58  ;;  %v17299_v34 = vcombine.high %v7155_v55, %v7159_v16  ;;  %v7162_v58 = vld [vmem:[%s24574_s8 + $0x4c0] sm:$0xff]  ;;  %v17338_v16 = vcombine.low %v7195_v47, %v7199_v20 }
 0x586   : > { %8694 = vmatprep.subr.bf16.mxu1 %v17251_v61  ;;  %v7166_v61 = vld [vmem:[%s24574_s8 + $0x4e0] sm:$0xff] }
 0x587   : > { %v17304_v15 = vcombine.low %v7162_v58, %v7166_v61 }
 0x588   : > { %8613 = vmatpush1.bf16.msra.mxu0 %v17248_v5  ;;  %v17305_v5 = vcombine.high %v7162_v58, %v7166_v61  ;;  %v7211_v58 = vld [vmem:[%s24574_s8 + $0x648] sm:$0xff] }
 0x589   : > { %8695 = vmatpush1.bf16.msra.mxu1 %v17250_v7  ;;  %8614 = vmatprep.subr.bf16.mxu0 %v17257_v10  ;;  %v17307_v7 = vcombine.high %v7163_v63, %v7167_v0  ;;  %v7170_v10 = vld [vmem:[%s24574_s8 + $0x500] sm:$0xff]  ;;  %v7215_v61 = vld [vmem:[%s24574_s8 + $0x668] sm:$0xff] }
 0x58a   : > { %8696 = vmatprep.subr.bf16.mxu1 %v17259_v12  ;;  %v7174_v12 = vld [vmem:[%s24574_s8 + $0x520] sm:$0xff] }
 0x58b   : > { %v17312_v9 = vcombine.low %v7170_v10, %v7174_v12 }
 0x58c   : > { %8615 = vmatpush1.bf16.msra.mxu0 %v17256_v18  ;;  %v17313_v18 = vcombine.high %v7170_v10, %v7174_v12  ;;  %v7219_v10 = vld [vmem:[%s24574_s8 + $0x688] sm:$0xff] }
 0x58d   : > { %8697 = vmatpush1.bf16.msra.mxu1 %v17258_v44  ;;  %8616 = vmatprep.subr.bf16.mxu0 %v17265_v11  ;;  %v17315_v44 = vcombine.high %v7171_v36, %v7175_v14  ;;  %v7178_v11 = vld [vmem:[%s24574_s8 + $0x540] sm:$0xff]  ;;  %v7223_v12 = vld [vmem:[%s24574_s8 + $0x6a8] sm:$0xff]  ;;  %v17354_v14 = vcombine.low %v7211_v58, %v7215_v61 }
 0x58e   : > { %8698 = vmatprep.subr.bf16.mxu1 %v17267_v27  ;;  %v7182_v27 = vld [vmem:[%s24574_s8 + $0x560] sm:$0xff] }
 0x58f   : > { %v17320_v1 = vcombine.low %v7178_v11, %v7182_v27 }
 0x590   : > { %8617 = vmatpush1.bf16.msra.mxu0 %v17264_v33  ;;  %v17321_v33 = vcombine.high %v7178_v11, %v7182_v27  ;;  %v7227_v11 = vld [vmem:[%s24574_s8 + $0x6c8] sm:$0xff] }
 0x591   : > { %8699 = vmatpush1.bf16.msra.mxu1 %v17266_v49  ;;  %8618 = vmatprep.subr.bf16.mxu0 %v17273_v38  ;;  %v17323_v49 = vcombine.high %v7179_v26, %v7183_v52  ;;  %v7186_v38 = vld [vmem:[%s24574_s8 + $0x580] sm:$0xff]  ;;  %v7231_v27 = vld [vmem:[%s24574_s8 + $0x6e8] sm:$0xff]  ;;  %v17362_v52 = vcombine.low %v7219_v10, %v7223_v12 }
 0x592   : > { %8700 = vmatprep.subr.bf16.mxu1 %v17275_v53  ;;  %v7190_v53 = vld [vmem:[%s24574_s8 + $0x5a0] sm:$0xff] }
 0x594   : > { %8619 = vmatpush1.bf16.msra.mxu0 %v17272_v45  ;;  %v17329_v45 = vcombine.high %v7186_v38, %v7190_v53 }
 0x595   : > { %8701 = vmatpush1.bf16.msra.mxu1 %v17274_v57  ;;  %8629 = vmatprep.subr.bf16.mxu0 %v17281_v6  ;;  %v17331_v57 = vcombine.high %v7187_v39, %v7191_v40  ;;  %v7194_v6 = vld [vmem:[%s24574_s8 + $0x5c0] sm:$0xff]  ;;  %v17370_v40 = vcombine.low %v7227_v11, %v7231_v27 }
 0x596   : > { %8711 = vmatprep.subr.bf16.mxu1 %v17283_v25  ;;  %v7198_v25 = vld [vmem:[%s24574_s8 + $0x5e0] sm:$0xff] }
 0x597   : > { %8621 = vmatmul.mubr.bf16.vlgmr.msra.gmra.mrb[24].mxu0 %v21921_v60  ;;  %v17337_v51 = vcombine.high %v7194_v6, %v7198_v25  ;;  %v17336_v55 = vcombine.low %v7194_v6, %v7198_v25  ;;  %v7243_v6 = vld [vmem:[%s24574_s8 + $0x748] sm:$0xff] }
 0x598   : > { %8703 = vmatmul.mubr.bf16.vlgmr.msra.gmra.mrb[24].mxu1 %v21921_v60  ;;  %8630 = vmatpush1.bf16.msra.mxu0 %v17280_v48  ;;  %v17328_v48 = vcombine.low %v7186_v38, %v7190_v53  ;;  %v7235_v38 = vld [vmem:[%s24574_s8 + $0x708] sm:$0xff] }
 0x599   : > { %8661 = vmatprep.mubr.bf16.mxu0 %v21925_v46  ;;  %8712 = vmatpush1.bf16.msra.mxu1 %v17282_v28  ;;  %v17339_v28 = vcombine.high %v7195_v47, %v7199_v20  ;;  %v7239_v53 = vld [vmem:[%s24574_s8 + $0x728] sm:$0xff] }
 0x59a   : > { %8743 = vmatprep.mubr.bf16.mxu1 %v21925_v46  ;;  %8631 = vmatprep.subr.bf16.mxu0 %v17289_v37  ;;  %v7202_v37 = vld [vmem:[%s24574_s8 + $0x600] sm:$0xff]  ;;  %v7247_v25 = vld [vmem:[%s24574_s8 + $0x768] sm:$0xff]  ;;  %v17378_v20 = vcombine.low %v7235_v38, %v7239_v53 }
 0x59b   : > { %8713 = vmatprep.subr.bf16.mxu1 %v17291_v24  ;;  %v7207_v24 = vld [vmem:[%s24574_s8 + $0x628] sm:$0xff]  ;;  %v17344_v63 = vcombine.low %v7202_v37, %v7206_v54 }
 0x59c   : > { %8632 = vmatpush1.bf16.msra.mxu0 %v17288_v56  ;;  %v17345_v56 = vcombine.high %v7202_v37, %v7206_v54  ;;  %v17346_v0 = vcombine.low %v7203_v32, %v7207_v24  ;;  %v7251_v37 = vld [vmem:[%s24574_s8 + $0x788] sm:$0xff] }
 0x59d   : > { %8714 = vmatpush1.bf16.msra.mxu1 %v17290_v22  ;;  %8633 = vmatprep.subr.bf16.mxu0 %v17297_v41  ;;  %v17347_v22 = vcombine.high %v7203_v32, %v7207_v24  ;;  %v7210_v41 = vld [vmem:[%s24574_s8 + $0x640] sm:$0xff]  ;;  %v7255_v54 = vld [vmem:[%s24574_s8 + $0x7a8] sm:$0xff]  ;;  %v17386_v24 = vcombine.low %v7243_v6, %v7247_v25 }
 0x59e   : > { %8715 = vmatprep.subr.bf16.mxu1 %v17299_v34  ;;  %v7214_v34 = vld [vmem:[%s24574_s8 + $0x660] sm:$0xff] }
 0x59f   : > { %v17352_v36 = vcombine.low %v7210_v41, %v7214_v34 }
 0x5a0   : > { %8634 = vmatpush1.bf16.msra.mxu0 %v17296_v2  ;;  %v17353_v2 = vcombine.high %v7210_v41, %v7214_v34  ;;  %v7259_v41 = vld [vmem:[%s24574_s8 + $0x7c8] sm:$0xff] }
 0x5a1   : > { %8716 = vmatpush1.bf16.msra.mxu1 %v17298_v4  ;;  %8635 = vmatprep.subr.bf16.mxu0 %v17305_v5  ;;  %v17355_v4 = vcombine.high %v7211_v58, %v7215_v61  ;;  %v7218_v5 = vld [vmem:[%s24574_s8 + $0x680] sm:$0xff]  ;;  %v7263_v34 = vld [vmem:[%s24574_s8 + $0x7e8] sm:$0xff]  ;;  %v17394_v61 = vcombine.low %v7251_v37, %v7255_v54 }
 0x5a2   : > { %8717 = vmatprep.subr.bf16.mxu1 %v17307_v7  ;;  %v7222_v7 = vld [vmem:[%s24574_s8 + $0x6a0] sm:$0xff] }
 0x5a3   : > { %v17360_v26 = vcombine.low %v7218_v5, %v7222_v7 }
 0x5a4   : > { %8636 = vmatpush1.bf16.msra.mxu0 %v17304_v15  ;;  %v17361_v15 = vcombine.high %v7218_v5, %v7222_v7  ;;  %v7013_v5 = vld [vmem:[%s24574_s8 + $0x18] sm:$0xff] }
 0x5a5   : > { %8718 = vmatpush1.bf16.msra.mxu1 %v17306_v17  ;;  %8637 = vmatprep.subr.bf16.mxu0 %v17313_v18  ;;  %v17363_v17 = vcombine.high %v7219_v10, %v7223_v12  ;;  %v7226_v18 = vld [vmem:[%s24574_s8 + $0x6c0] sm:$0xff]  ;;  %v7017_v7 = vld [vmem:[%s24574_s8 + $0x38] sm:$0xff]  ;;  %v17402_v12 = vcombine.low %v7259_v41, %v7263_v34 }
 0x5a6   : > { %8719 = vmatprep.subr.bf16.mxu1 %v17315_v44  ;;  %v7230_v44 = vld [vmem:[%s24574_s8 + $0x6e0] sm:$0xff] }
 0x5a7   : > { %v17368_v39 = vcombine.low %v7226_v18, %v7230_v44 }
 0x5a8   : > { %8638 = vmatpush1.bf16.msra.mxu0 %v17312_v9  ;;  %v17369_v9 = vcombine.high %v7226_v18, %v7230_v44  ;;  %v7021_v44 = vld [vmem:[%s24574_s8 + $0x58] sm:$0xff] }
 0x5a9   : > { %8720 = vmatpush1.bf16.msra.mxu1 %v17314_v31  ;;  %8639 = vmatprep.subr.bf16.mxu0 %v17321_v33  ;;  %v17371_v31 = vcombine.high %v7227_v11, %v7231_v27  ;;  %v7234_v33 = vld [vmem:[%s24574_s8 + $0x700] sm:$0xff]  ;;  %v7025_v11 = vld [vmem:[%s24574_s8 + $0x78] sm:$0xff]  ;;  %v17158_v27 = vcombine.low %v7013_v5, %v7017_v7 }
 0x5aa   : > { %8721 = vmatprep.subr.bf16.mxu1 %v17323_v49  ;;  %v7238_v49 = vld [vmem:[%s24574_s8 + $0x720] sm:$0xff] }
 0x5ab   : > { %v17376_v47 = vcombine.low %v7234_v33, %v7238_v49 }
 0x5ac   : > { %8640 = vmatpush1.bf16.msra.mxu0 %v17320_v1  ;;  %v17377_v1 = vcombine.high %v7234_v33, %v7238_v49  ;;  %v7029_v33 = vld [vmem:[%s24574_s8 + $0x98] sm:$0xff] }
 0x5ad   : > { %8722 = vmatpush1.bf16.msra.mxu1 %v17322_v43  ;;  %8641 = vmatprep.subr.bf16.mxu0 %v17329_v45  ;;  %v17379_v43 = vcombine.high %v7235_v38, %v7239_v53  ;;  %v7242_v45 = vld [vmem:[%s24574_s8 + $0x740] sm:$0xff]  ;;  %v7033_v49 = vld [vmem:[%s24574_s8 + $0xb8] sm:$0xff]  ;;  %v17166_v53 = vcombine.low %v7021_v44, %v7025_v11 }
 0x5ae   : > { %8723 = vmatprep.subr.bf16.mxu1 %v17331_v57  ;;  %v7246_v57 = vld [vmem:[%s24574_s8 + $0x760] sm:$0xff] }
 0x5af   : > { %v17384_v32 = vcombine.low %v7242_v45, %v7246_v57 }
 0x5b0   : > { %8642 = vmatpush1.bf16.msra.mxu0 %v17328_v48  ;;  %v17385_v48 = vcombine.high %v7242_v45, %v7246_v57  ;;  %v7037_v45 = vld [vmem:[%s24574_s8 + $0xd8] sm:$0xff] }
 0x5b1   : > { %8724 = vmatpush1.bf16.msra.mxu1 %v17330_v62  ;;  %8643 = vmatprep.subr.bf16.mxu0 %v17337_v51  ;;  %v17387_v62 = vcombine.high %v7243_v6, %v7247_v25  ;;  %v7250_v51 = vld [vmem:[%s24574_s8 + $0x780] sm:$0xff]  ;;  %v7041_v57 = vld [vmem:[%s24574_s8 + $0xf8] sm:$0xff]  ;;  %v17174_v6 = vcombine.low %v7029_v33, %v7033_v49 }
 0x5b2   : > { %8725 = vmatprep.subr.bf16.mxu1 %v17339_v28  ;;  %v7254_v28 = vld [vmem:[%s24574_s8 + $0x7a0] sm:$0xff] }
 0x5b3   : > { %v17392_v58 = vcombine.low %v7250_v51, %v7254_v28 }
 0x5b4   : > { %8644 = vmatpush1.bf16.msra.mxu0 %v17336_v55  ;;  %v17393_v55 = vcombine.high %v7250_v51, %v7254_v28  ;;  %v7049_v51 = vld [vmem:[%s24574_s8 + $0x138] sm:$0xff] }
 0x5b5   : > { %8726 = vmatpush1.bf16.msra.mxu1 %v17338_v16  ;;  %8645 = vmatprep.subr.bf16.mxu0 %v17345_v56  ;;  %v17395_v16 = vcombine.high %v7251_v37, %v7255_v54  ;;  %v7258_v56 = vld [vmem:[%s24574_s8 + $0x7c0] sm:$0xff]  ;;  %v17182_v37 = vcombine.low %v7037_v45, %v7041_v57 }
 0x5b6   : > { %8727 = vmatprep.subr.bf16.mxu1 %v17347_v22  ;;  %v7262_v22 = vld [vmem:[%s24574_s8 + $0x7e0] sm:$0xff] }
 0x5b7   : > { %v17400_v10 = vcombine.low %v7258_v56, %v7262_v22 }
 0x5b8   : > { %8646 = vmatpush1.bf16.msra.mxu0 %v17344_v63  ;;  %v17401_v63 = vcombine.high %v7258_v56, %v7262_v22  ;;  %v7057_v56 = vld [vmem:[%s24574_s8 + $0x178] sm:$0xff] }
 0x5b9   : > { %8728 = vmatpush1.bf16.msra.mxu1 %v17346_v0  ;;  %8647 = vmatprep.subr.bf16.mxu0 %v17353_v2  ;;  %v17403_v0 = vcombine.high %v7259_v41, %v7263_v34  ;;  %v7012_v2 = vld [vmem:[%s24574_s8 + $0x10] sm:$0xff] }
 0x5ba   : > { %8729 = vmatprep.subr.bf16.mxu1 %v17355_v4  ;;  %v7016_v4 = vld [vmem:[%s24574_s8 + $0x30] sm:$0xff] }
 0x5bb   : > { %v17156_v18 = vcombine.low %v7012_v2, %v7016_v4 }
 0x5bc   : > { %8648 = vmatpush1.bf16.msra.mxu0 %v17352_v36  ;;  %v17157_v36 = vcombine.high %v7012_v2, %v7016_v4  ;;  %v7065_v2 = vld [vmem:[%s24574_s8 + $0x1b8] sm:$0xff] }
 0x5bd   : > { %8730 = vmatpush1.bf16.msra.mxu1 %v17354_v14  ;;  %8649 = vmatprep.subr.bf16.mxu0 %v17361_v15  ;;  %v17159_v14 = vcombine.high %v7013_v5, %v7017_v7  ;;  %v7020_v15 = vld [vmem:[%s24574_s8 + $0x50] sm:$0xff] }
 0x5be   : > { %8731 = vmatprep.subr.bf16.mxu1 %v17363_v17  ;;  %v7024_v17 = vld [vmem:[%s24574_s8 + $0x70] sm:$0xff] }
 0x5bf   : > { %v17164_v38 = vcombine.low %v7020_v15, %v7024_v17 }
 0x5c0   : > { %8650 = vmatpush1.bf16.msra.mxu0 %v17360_v26  ;;  %v17165_v26 = vcombine.high %v7020_v15, %v7024_v17  ;;  %v7073_v15 = vld [vmem:[%s24574_s8 + $0x1f8] sm:$0xff] }
 0x5c1   : > { %8732 = vmatpush1.bf16.msra.mxu1 %v17362_v52  ;;  %8651 = vmatprep.subr.bf16.mxu0 %v17369_v9  ;;  %v7028_v52 = vld [vmem:[%s24574_s8 + $0x90] sm:$0xff] }
 0x5c2   : > { %8733 = vmatprep.subr.bf16.mxu1 %v17371_v31  ;;  %v7032_v9 = vld [vmem:[%s24574_s8 + $0xb0] sm:$0xff]  ;;  %v17167_v31 = vcombine.high %v7021_v44, %v7025_v11 }
 0x5c4   : > { %8652 = vmatpush1.bf16.msra.mxu0 %v17368_v39  ;;  %v17173_v39 = vcombine.high %v7028_v52, %v7032_v9 }
 0x5c5   : > { %8734 = vmatpush1.bf16.msra.mxu1 %v17370_v40  ;;  %8653 = vmatprep.subr.bf16.mxu0 %v17377_v1  ;;  %v17175_v40 = vcombine.high %v7029_v33, %v7033_v49  ;;  %v7036_v1 = vld [vmem:[%s24574_s8 + $0xd0] sm:$0xff] }
 0x5c6   : > { %8735 = vmatprep.subr.bf16.mxu1 %v17379_v43  ;;  %v7040_v43 = vld [vmem:[%s24574_s8 + $0xf0] sm:$0xff] }
 0x5c7   : > { %v17181_v25 = vcombine.high %v7036_v1, %v7040_v43  ;;  %v17180_v28 = vcombine.low %v7036_v1, %v7040_v43  ;;  %v7089_v1 = vld [vmem:[%s24574_s8 + $0x278] sm:$0xff] }
 0x5c8   : > { %8654 = vmatpush1.bf16.msra.mxu0 %v17376_v47  ;;  %v17183_v47 = vcombine.high %v7037_v45, %v7041_v57 }
 0x5c9   : > { %8736 = vmatpush1.bf16.msra.mxu1 %v17378_v20  ;;  %8655 = vmatprep.subr.bf16.mxu0 %v17385_v48  ;;  %v7044_v20 = vld [vmem:[%s24574_s8 + $0x110] sm:$0xff] }
 0x5ca   : > { %8737 = vmatprep.subr.bf16.mxu1 %v17387_v62  ;;  %v7048_v48 = vld [vmem:[%s24574_s8 + $0x130] sm:$0xff]  ;;  %v7045_v62 = vld [vmem:[%s24574_s8 + $0x118] sm:$0xff] }
 0x5cb   : > { %v17189_v54 = vcombine.high %v7044_v20, %v7048_v48  ;;  %v17188_v22 = vcombine.low %v7044_v20, %v7048_v48  ;;  %v17190_v41 = vcombine.low %v7045_v62, %v7049_v51  ;;  %v7097_v20 = vld [vmem:[%s24574_s8 + $0x2b8] sm:$0xff] }
 0x5cc   : > { %8656 = vmatpush1.bf16.msra.mxu0 %v17384_v32  ;;  %v17191_v32 = vcombine.high %v7045_v62, %v7049_v51 }
 0x5cd   : > { %8738 = vmatpush1.bf16.msra.mxu1 %v17386_v24  ;;  %8657 = vmatprep.subr.bf16.mxu0 %v17393_v55  ;;  %v7052_v24 = vld [vmem:[%s24574_s8 + $0x150] sm:$0xff] }
 0x5ce   : > { %8739 = vmatprep.subr.bf16.mxu1 %v17395_v16  ;;  %v7056_v55 = vld [vmem:[%s24574_s8 + $0x170] sm:$0xff]  ;;  %v7053_v16 = vld [vmem:[%s24574_s8 + $0x158] sm:$0xff] }
 0x5cf   : > { %v17197_v34 = vcombine.high %v7052_v24, %v7056_v55  ;;  %v17196_v4 = vcombine.low %v7052_v24, %v7056_v55  ;;  %v17198_v5 = vcombine.low %v7053_v16, %v7057_v56  ;;  %v7105_v24 = vld [vmem:[%s24574_s8 + $0x2f8] sm:$0xff] }
 0x5d0   : > { %8658 = vmatpush1.bf16.msra.mxu0 %v17392_v58  ;;  %v17199_v58 = vcombine.high %v7053_v16, %v7057_v56 }
 0x5d1   : > { %8740 = vmatpush1.bf16.msra.mxu1 %v17394_v61  ;;  %8659 = vmatprep.subr.bf16.mxu0 %v17401_v63  ;;  %v7060_v61 = vld [vmem:[%s24574_s8 + $0x190] sm:$0xff] }
 0x5d2   : > { %8741 = vmatprep.subr.bf16.mxu1 %v17403_v0  ;;  %v7064_v63 = vld [vmem:[%s24574_s8 + $0x1b0] sm:$0xff]  ;;  %v7061_v0 = vld [vmem:[%s24574_s8 + $0x198] sm:$0xff] }
 0x5d3   : > { %v17205_v7 = vcombine.high %v7060_v61, %v7064_v63  ;;  %v17204_v17 = vcombine.low %v7060_v61, %v7064_v63  ;;  %v7113_v61 = vld [vmem:[%s24574_s8 + $0x338] sm:$0xff] }
 0x5d4   : > { %8660 = vmatpush1.bf16.msra.mxu0 %v17400_v10  ;;  %v17207_v10 = vcombine.high %v7061_v0, %v7065_v2 }
 0x5d5   : > { %8742 = vmatpush1.bf16.msra.mxu1 %v17402_v12  ;;  %8752 = vmatprep.subr.bf16.mxu0 %v17157_v36  ;;  %v7068_v12 = vld [vmem:[%s24574_s8 + $0x1d0] sm:$0xff] }
 0x5d6   : > { %8834 = vmatprep.subr.bf16.mxu1 %v17159_v14  ;;  %v7072_v36 = vld [vmem:[%s24574_s8 + $0x1f0] sm:$0xff]  ;;  %v7069_v14 = vld [vmem:[%s24574_s8 + $0x1d8] sm:$0xff] }
 0x5d7   : > { %8662 = vmatmul.mubr.bf16.vlgmr.msra.gmra.mrb[24].mxu0 %v22131_v59  ;;  %v17213_v44 = vcombine.high %v7068_v12, %v7072_v36  ;;  %v17215_v11 = vcombine.high %v7069_v14, %v7073_v15  ;;  %v17214_v33 = vcombine.low %v7069_v14, %v7073_v15 }
 0x5d8   : > { %8744 = vmatmul.mubr.bf16.vlgmr.msra.gmra.mrb[24].mxu1 %v22131_v59  ;;  %8753 = vmatpush1.bf16.msra.mxu0 %v17156_v18  ;;  %v17206_v18 = vcombine.low %v7061_v0, %v7065_v2 }
 0x5d9   : > { %8784 = vmatprep.mubr.bf16.mxu0 %v21923_v8  ;;  %8835 = vmatpush1.bf16.msra.mxu1 %v17158_v27  ;;  %v7076_v27 = vld [vmem:[%s24574_s8 + $0x210] sm:$0xff] }
 0x5da   : > { %8866 = vmatprep.mubr.bf16.mxu1 %v21923_v8  ;;  %8754 = vmatprep.subr.bf16.mxu0 %v17165_v26  ;;  %v17172_v8 = vcombine.low %v7028_v52, %v7032_v9  ;;  %v7080_v26 = vld [vmem:[%s24574_s8 + $0x230] sm:$0xff]  ;;  %v7077_v52 = vld [vmem:[%s24574_s8 + $0x218] sm:$0xff] }
 0x5db   : > { %8836 = vmatprep.subr.bf16.mxu1 %v17167_v31  ;;  %v7081_v9 = vld [vmem:[%s24574_s8 + $0x238] sm:$0xff]  ;;  %v17212_v31 = vcombine.low %v7068_v12, %v7072_v36  ;;  %v17221_v49 = vcombine.high %v7076_v27, %v7080_v26  ;;  %v17220_v43 = vcombine.low %v7076_v27, %v7080_v26 }
 0x5dc   : > { %8755 = vmatpush1.bf16.msra.mxu0 %v17164_v38  ;;  %v17223_v38 = vcombine.high %v7077_v52, %v7081_v9  ;;  %v17222_v45 = vcombine.low %v7077_v52, %v7081_v9  ;;  %v7121_v12 = vld [vmem:[%s24574_s8 + $0x378] sm:$0xff] }
 0x5dd   : > { %8837 = vmatpush1.bf16.msra.mxu1 %v17166_v53  ;;  %8756 = vmatprep.subr.bf16.mxu0 %v17173_v39  ;;  %v7084_v53 = vld [vmem:[%s24574_s8 + $0x250] sm:$0xff]  ;;  %v7129_v27 = vld [vmem:[%s24574_s8 + $0x3b8] sm:$0xff] }
 0x5de   : > { %8838 = vmatprep.subr.bf16.mxu1 %v17175_v40  ;;  %v7088_v39 = vld [vmem:[%s24574_s8 + $0x270] sm:$0xff]  ;;  %v7085_v40 = vld [vmem:[%s24574_s8 + $0x258] sm:$0xff] }
 0x5df   : > { %v17229_v57 = vcombine.high %v7084_v53, %v7088_v39  ;;  %v17228_v48 = vcombine.low %v7084_v53, %v7088_v39  ;;  %v17230_v62 = vcombine.low %v7085_v40, %v7089_v1  ;;  %v7137_v53 = vld [vmem:[%s24574_s8 + $0x3f8] sm:$0xff] }
 0x5e0   : > { %8757 = vmatpush1.bf16.msra.mxu0 %v17172_v8  ;;  %v17231_v8 = vcombine.high %v7085_v40, %v7089_v1 }
 0x5e1   : > { %8839 = vmatpush1.bf16.msra.mxu1 %v17174_v6  ;;  %8758 = vmatprep.subr.bf16.mxu0 %v17181_v25  ;;  %v7092_v6 = vld [vmem:[%s24574_s8 + $0x290] sm:$0xff] }
 0x5e2   : > { %8840 = vmatprep.subr.bf16.mxu1 %v17183_v47  ;;  %v7096_v25 = vld [vmem:[%s24574_s8 + $0x2b0] sm:$0xff]  ;;  %v7093_v47 = vld [vmem:[%s24574_s8 + $0x298] sm:$0xff] }
 0x5e3   : > { %v17237_v51 = vcombine.high %v7092_v6, %v7096_v25  ;;  %v17236_v55 = vcombine.low %v7092_v6, %v7096_v25  ;;  %v17238_v16 = vcombine.low %v7093_v47, %v7097_v20  ;;  %v7145_v6 = vld [vmem:[%s24574_s8 + $0x438] sm:$0xff] }
 0x5e4   : > { %8759 = vmatpush1.bf16.msra.mxu0 %v17180_v28  ;;  %v17239_v28 = vcombine.high %v7093_v47, %v7097_v20 }
 0x5e5   : > { %8841 = vmatpush1.bf16.msra.mxu1 %v17182_v37  ;;  %8760 = vmatprep.subr.bf16.mxu0 %v17189_v54  ;;  %v7100_v37 = vld [vmem:[%s24574_s8 + $0x2d0] sm:$0xff] }
 0x5e6   : > { %8842 = vmatprep.subr.bf16.mxu1 %v17191_v32  ;;  %v7104_v54 = vld [vmem:[%s24574_s8 + $0x2f0] sm:$0xff]  ;;  %v7101_v32 = vld [vmem:[%s24574_s8 + $0x2d8] sm:$0xff] }
 0x5e7   : > { %v17245_v56 = vcombine.high %v7100_v37, %v7104_v54  ;;  %v17244_v63 = vcombine.low %v7100_v37, %v7104_v54  ;;  %v17246_v0 = vcombine.low %v7101_v32, %v7105_v24  ;;  %v7149_v37 = vld [vmem:[%s24574_s8 + $0x458] sm:$0xff] }
 0x5e8   : > { %8761 = vmatpush1.bf16.msra.mxu0 %v17188_v22  ;;  %v17247_v22 = vcombine.high %v7101_v32, %v7105_v24  ;;  %v7153_v54 = vld [vmem:[%s24574_s8 + $0x478] sm:$0xff] }
 0x5e9   : > { %8843 = vmatpush1.bf16.msra.mxu1 %v17190_v41  ;;  %8762 = vmatprep.subr.bf16.mxu0 %v17197_v34  ;;  %v7108_v41 = vld [vmem:[%s24574_s8 + $0x310] sm:$0xff] }
 0x5ea   : > { %8844 = vmatprep.subr.bf16.mxu1 %v17199_v58  ;;  %v7112_v34 = vld [vmem:[%s24574_s8 + $0x330] sm:$0xff]  ;;  %v7109_v58 = vld [vmem:[%s24574_s8 + $0x318] sm:$0xff] }
 0x5eb   : > { %v17253_v2 = vcombine.high %v7108_v41, %v7112_v34  ;;  %v17252_v36 = vcombine.low %v7108_v41, %v7112_v34  ;;  %v17254_v14 = vcombine.low %v7109_v58, %v7113_v61  ;;  %v7161_v41 = vld [vmem:[%s24574_s8 + $0x4b8] sm:$0xff] }
 0x5ec   : > { %8763 = vmatpush1.bf16.msra.mxu0 %v17196_v4  ;;  %v17255_v4 = vcombine.high %v7109_v58, %v7113_v61  ;;  %v17294_v58 = vcombine.low %v7149_v37, %v7153_v54 }
 0x5ed   : > { %8845 = vmatpush1.bf16.msra.mxu1 %v17198_v5  ;;  %8764 = vmatprep.subr.bf16.mxu0 %v17205_v7  ;;  %v7116_v5 = vld [vmem:[%s24574_s8 + $0x350] sm:$0xff] }
 0x5ee   : > { %8846 = vmatprep.subr.bf16.mxu1 %v17207_v10  ;;  %v7120_v7 = vld [vmem:[%s24574_s8 + $0x370] sm:$0xff]  ;;  %v7117_v10 = vld [vmem:[%s24574_s8 + $0x358] sm:$0xff] }
 0x5ef   : > { %v17261_v15 = vcombine.high %v7116_v5, %v7120_v7  ;;  %v17260_v26 = vcombine.low %v7116_v5, %v7120_v7  ;;  %v17262_v52 = vcombine.low %v7117_v10, %v7121_v12 }
 0x5f0   : > { %8765 = vmatpush1.bf16.msra.mxu0 %v17204_v17  ;;  %v17263_v17 = vcombine.high %v7117_v10, %v7121_v12  ;;  %v7172_v12 = vld [vmem:[%s24574_s8 + $0x510] sm:$0xff] }
 0x5f1   : > { %8847 = vmatpush1.bf16.msra.mxu1 %v17206_v18  ;;  %8766 = vmatprep.subr.bf16.mxu0 %v17213_v44  ;;  %v7124_v18 = vld [vmem:[%s24574_s8 + $0x390] sm:$0xff] }
 0x5f2   : > { %8848 = vmatprep.subr.bf16.mxu1 %v17215_v11  ;;  %v7128_v44 = vld [vmem:[%s24574_s8 + $0x3b0] sm:$0xff]  ;;  %v7125_v11 = vld [vmem:[%s24574_s8 + $0x398] sm:$0xff] }
 0x5f3   : > { %v17269_v9 = vcombine.high %v7124_v18, %v7128_v44  ;;  %v17268_v39 = vcombine.low %v7124_v18, %v7128_v44  ;;  %v17270_v40 = vcombine.low %v7125_v11, %v7129_v27 }
 0x5f4   : > { %8767 = vmatpush1.bf16.msra.mxu0 %v17212_v31  ;;  %v17271_v31 = vcombine.high %v7125_v11, %v7129_v27  ;;  %v7180_v27 = vld [vmem:[%s24574_s8 + $0x550] sm:$0xff] }
 0x5f5   : > { %8849 = vmatpush1.bf16.msra.mxu1 %v17214_v33  ;;  %8768 = vmatprep.subr.bf16.mxu0 %v17221_v49  ;;  %v7132_v33 = vld [vmem:[%s24574_s8 + $0x3d0] sm:$0xff] }
 0x5f6   : > { %8850 = vmatprep.subr.bf16.mxu1 %v17223_v38  ;;  %v7136_v49 = vld [vmem:[%s24574_s8 + $0x3f0] sm:$0xff]  ;;  %v7133_v38 = vld [vmem:[%s24574_s8 + $0x3d8] sm:$0xff] }
 0x5f7   : > { %v17277_v1 = vcombine.high %v7132_v33, %v7136_v49  ;;  %v17276_v25 = vcombine.low %v7132_v33, %v7136_v49  ;;  %v17278_v47 = vcombine.low %v7133_v38, %v7137_v53  ;;  %v6168_v33 = vld [vmem:[%s24573_s7] sm:$0xf] }
 0x5f8   : > { %8769 = vmatpush1.bf16.msra.mxu0 %v17220_v43  ;;  %v17279_v43 = vcombine.high %v7133_v38, %v7137_v53 }
 0x5f9   : > { %8851 = vmatpush1.bf16.msra.mxu1 %v17222_v45  ;;  %8770 = vmatprep.subr.bf16.mxu0 %v17229_v57  ;;  %v7140_v45 = vld [vmem:[%s24574_s8 + $0x410] sm:$0xff] }
 0x5fa   : > { %8852 = vmatprep.subr.bf16.mxu1 %v17231_v8  ;;  %v7144_v57 = vld [vmem:[%s24574_s8 + $0x430] sm:$0xff]  ;;  %v7141_v8 = vld [vmem:[%s24574_s8 + $0x418] sm:$0xff] }
 0x5fb   : > { %v17285_v20 = vcombine.high %v7140_v45, %v7144_v57  ;;  %v17286_v32 = vcombine.low %v7141_v8, %v7145_v6 }
 0x5fc   : > { %8771 = vmatpush1.bf16.msra.mxu0 %v17228_v48  ;;  %v17287_v48 = vcombine.high %v7141_v8, %v7145_v6  ;;  %v6177_v8 = vrot.slane %v6168_v33, %v20269_v23  ;;  %v6185_v6 = vrot.slane %v6168_v33, %v20276_v30 }
 0x5fd   : > { %8853 = vmatpush1.bf16.msra.mxu1 %v17230_v62  ;;  %8772 = vmatprep.subr.bf16.mxu0 %v17237_v51  ;;  %v7148_v62 = vld [vmem:[%s24574_s8 + $0x450] sm:$0xff] }
 0x5fe   : > { %8854 = vmatprep.subr.bf16.mxu1 %v17239_v28  ;;  %v7152_v51 = vld [vmem:[%s24574_s8 + $0x470] sm:$0xff]  ;;  %v17284_v28 = vcombine.low %v7140_v45, %v7144_v57  ;;  %v7189_v45 = vld [vmem:[%s24574_s8 + $0x598] sm:$0xff] }
 0x5ff   : > { %v17293_v24 = vcombine.high %v7148_v62, %v7152_v51  ;;  %v17292_v34 = vcombine.low %v7148_v62, %v7152_v51  ;;  %v7193_v57 = vld [vmem:[%s24574_s8 + $0x5b8] sm:$0xff] }
 0x600   : > { %8773 = vmatpush1.bf16.msra.mxu0 %v17236_v55  ;;  %v7156_v55 = vld [vmem:[%s24574_s8 + $0x490] sm:$0xff]  ;;  %v17335_v51 = vcombine.high %v7189_v45, %v7193_v57 }
 0x601   : > { %8855 = vmatpush1.bf16.msra.mxu1 %v17238_v16  ;;  %8774 = vmatprep.subr.bf16.mxu0 %v17245_v56  ;;  %v7160_v16 = vld [vmem:[%s24574_s8 + $0x4b0] sm:$0xff]  ;;  %v17295_v56 = vcombine.high %v7149_v37, %v7153_v54 }
 0x602   : > { %8856 = vmatprep.subr.bf16.mxu1 %v17247_v22  ;;  %v7157_v22 = vld [vmem:[%s24574_s8 + $0x498] sm:$0xff]  ;;  %v17301_v61 = vcombine.high %v7156_v55, %v7160_v16  ;;  %v7200_v37 = vld [vmem:[%s24574_s8 + $0x5f0] sm:$0xff] }
 0x603   : > { %v17302_v5 = vcombine.low %v7157_v22, %v7161_v41 }
 0x604   : > { %8775 = vmatpush1.bf16.msra.mxu0 %v17244_v63  ;;  %v17303_v63 = vcombine.high %v7157_v22, %v7161_v41 }
 0x605   : > { %8857 = vmatpush1.bf16.msra.mxu1 %v17246_v0  ;;  %8776 = vmatprep.subr.bf16.mxu0 %v17253_v2  ;;  %v7164_v0 = vld [vmem:[%s24574_s8 + $0x4d0] sm:$0xff] }
 0x606   : > { %8858 = vmatprep.subr.bf16.mxu1 %v17255_v4  ;;  %v7168_v2 = vld [vmem:[%s24574_s8 + $0x4f0] sm:$0xff]  ;;  %v7169_v4 = vld [vmem:[%s24574_s8 + $0x4f8] sm:$0xff] }
 0x607   : > { %v17309_v7 = vcombine.high %v7164_v0, %v7168_v2 }
 0x608   : > { %8777 = vmatpush1.bf16.msra.mxu0 %v17252_v36  ;;  %v7176_v36 = vld [vmem:[%s24574_s8 + $0x530] sm:$0xff] }
 0x609   : > { %8859 = vmatpush1.bf16.msra.mxu1 %v17254_v14  ;;  %8778 = vmatprep.subr.bf16.mxu0 %v17261_v15  ;;  %v7173_v14 = vld [vmem:[%s24574_s8 + $0x518] sm:$0xff]  ;;  %v17317_v44 = vcombine.high %v7172_v12, %v7176_v36 }
 0x60a   : > { %8860 = vmatprep.subr.bf16.mxu1 %v17263_v17  ;;  %v7177_v15 = vld [vmem:[%s24574_s8 + $0x538] sm:$0xff]  ;;  %v17308_v17 = vcombine.low %v7164_v0, %v7168_v2 }
 0x60b   : > { %v17319_v11 = vcombine.high %v7173_v14, %v7177_v15  ;;  %v17318_v49 = vcombine.low %v7173_v14, %v7177_v15  ;;  %v7205_v14 = vld [vmem:[%s24574_s8 + $0x618] sm:$0xff] }
 0x60c   : > { %8779 = vmatpush1.bf16.msra.mxu0 %v17260_v26  ;;  %v7184_v26 = vld [vmem:[%s24574_s8 + $0x570] sm:$0xff]  ;;  %v7209_v15 = vld [vmem:[%s24574_s8 + $0x638] sm:$0xff] }
 0x60d   : > { %8861 = vmatpush1.bf16.msra.mxu1 %v17262_v52  ;;  %8780 = vmatprep.subr.bf16.mxu0 %v17269_v9  ;;  %v7181_v52 = vld [vmem:[%s24574_s8 + $0x558] sm:$0xff]  ;;  %v17325_v38 = vcombine.high %v7180_v27, %v7184_v26 }
 0x60e   : > { %8862 = vmatprep.subr.bf16.mxu1 %v17271_v31  ;;  %v7185_v9 = vld [vmem:[%s24574_s8 + $0x578] sm:$0xff]  ;;  %v17316_v31 = vcombine.low %v7172_v12, %v7176_v36  ;;  %v7204_v12 = vld [vmem:[%s24574_s8 + $0x610] sm:$0xff] }
 0x60f   : > { %v17327_v53 = vcombine.high %v7181_v52, %v7185_v9  ;;  %v7208_v36 = vld [vmem:[%s24574_s8 + $0x630] sm:$0xff] }
 0x610   : > { %8781 = vmatpush1.bf16.msra.mxu0 %v17268_v39  ;;  %v7188_v39 = vld [vmem:[%s24574_s8 + $0x590] sm:$0xff] }
 0x611   : > { %8863 = vmatpush1.bf16.msra.mxu1 %v17270_v40  ;;  %8782 = vmatprep.subr.bf16.mxu0 %v17277_v1  ;;  %v7192_v40 = vld [vmem:[%s24574_s8 + $0x5b0] sm:$0xff]  ;;  %v6173_v1 = vrot.slane %v6168_v33, %v20261_v21 }
 0x612   : > { %8864 = vmatprep.subr.bf16.mxu1 %v17279_v43  ;;  %v6181_v43 = vrot.slane %v6168_v33, %v20435_v42  ;;  %v7217_v33 = vld [vmem:[%s24574_s8 + $0x678] sm:$0xff] }
 0x614   : > { %8783 = vmatpush1.bf16.msra.mxu0 %v17276_v25  ;;  %v17324_v25 = vcombine.low %v7180_v27, %v7184_v26  ;;  %v17349_v27 = vcombine.high %v7204_v12, %v7208_v36  ;;  %v17351_v26 = vcombine.high %v7205_v14, %v7209_v15 }
 0x615   : > { %8865 = vmatpush1.bf16.msra.mxu1 %v17278_v47  ;;  %8793 = vmatprep.subr.bf16.mxu0 %v17285_v20  ;;  %v17326_v47 = vcombine.low %v7181_v52, %v7185_v9  ;;  %v17333_v20 = vcombine.high %v7188_v39, %v7192_v40  ;;  %v7212_v52 = vld [vmem:[%s24574_s8 + $0x650] sm:$0xff] }
 0x616   : > { %8875 = vmatprep.subr.bf16.mxu1 %v17287_v48  ;;  %v7216_v9 = vld [vmem:[%s24574_s8 + $0x670] sm:$0xff] }
 0x617   : > { %8785 = vmatmul.mubr.bf16.vlgmr.msra.gmra.mrb[28].mxu0 %v21921_v60 }
 0x618   : > { %8867 = vmatmul.mubr.bf16.vlgmr.msra.gmra.mrb[28].mxu1 %v21921_v60  ;;  %8794 = vmatpush1.bf16.msra.mxu0 %v17284_v28  ;;  %v7165_v60 = vld [vmem:[%s24574_s8 + $0x4d8] sm:$0xff]  ;;  %v7196_v28 = vld [vmem:[%s24574_s8 + $0x5d0] sm:$0xff] }
 0x619   : > { %8825 = vmatprep.mubr.bf16.mxu0 %v21925_v46  ;;  %8876 = vmatpush1.bf16.msra.mxu1 %v17286_v32  ;;  %v17311_v10 = vcombine.high %v7165_v60, %v7169_v4  ;;  %v17310_v18 = vcombine.low %v7165_v60, %v7169_v4  ;;  %v17334_v4 = vcombine.low %v7189_v45, %v7193_v57  ;;  %v7225_v45 = vld [vmem:[%s24574_s8 + $0x6b8] sm:$0xff] }
 0x61a   : > { %8907 = vmatprep.mubr.bf16.mxu1 %v21925_v46  ;;  %8795 = vmatprep.subr.bf16.mxu0 %v17293_v24  ;;  %v17300_v46 = vcombine.low %v7156_v55, %v7160_v16  ;;  %v7197_v16 = vld [vmem:[%s24574_s8 + $0x5d8] sm:$0xff]  ;;  %v17356_v57 = vcombine.low %v7212_v52, %v7216_v9 }
 0x61b   : > { %8877 = vmatprep.subr.bf16.mxu1 %v17295_v56  ;;  %v7201_v56 = vld [vmem:[%s24574_s8 + $0x5f8] sm:$0xff] }
 0x61c   : > { %8796 = vmatpush1.bf16.msra.mxu0 %v17292_v34 }
 0x61d   : > { %8878 = vmatpush1.bf16.msra.mxu1 %v17294_v58  ;;  %8797 = vmatprep.subr.bf16.mxu0 %v17301_v61  ;;  %v17332_v61 = vcombine.low %v7188_v39, %v7192_v40  ;;  %v7220_v40 = vld [vmem:[%s24574_s8 + $0x690] sm:$0xff] }
 0x61e   : > { %8879 = vmatprep.subr.bf16.mxu1 %v17303_v63 }
 0x620   : > { %8798 = vmatpush1.bf16.msra.mxu0 %v17300_v46  ;;  %v17341_v46 = vcombine.high %v7196_v28, %v7200_v37 }
 0x621   : > { %8880 = vmatpush1.bf16.msra.mxu1 %v17302_v5  ;;  %8799 = vmatprep.subr.bf16.mxu0 %v17309_v7 }
 0x622   : > { %8881 = vmatprep.subr.bf16.mxu1 %v17311_v10  ;;  %v17343_v10 = vcombine.high %v7197_v16, %v7201_v56 }
 0x624   : > { %8800 = vmatpush1.bf16.msra.mxu0 %v17308_v17 }
 0x625   : > { %8882 = vmatpush1.bf16.msra.mxu1 %v17310_v18  ;;  %8801 = vmatprep.subr.bf16.mxu0 %v17317_v44  ;;  %v17340_v44 = vcombine.low %v7196_v28, %v7200_v37 }
 0x626   : > { %8883 = vmatprep.subr.bf16.mxu1 %v17319_v11  ;;  %v17342_v11 = vcombine.low %v7197_v16, %v7201_v56  ;;  %v7241_v16 = vld [vmem:[%s24574_s8 + $0x738] sm:$0xff] }
 0x628   : > { %8802 = vmatpush1.bf16.msra.mxu0 %v17316_v31  ;;  %v7213_v31 = vld [vmem:[%s24574_s8 + $0x658] sm:$0xff] }
 0x629   : > { %8884 = vmatpush1.bf16.msra.mxu1 %v17318_v49  ;;  %8803 = vmatprep.subr.bf16.mxu0 %v17325_v38  ;;  %v17348_v49 = vcombine.low %v7204_v12, %v7208_v36  ;;  %v17350_v38 = vcombine.low %v7205_v14, %v7209_v15  ;;  %v17359_v39 = vcombine.high %v7213_v31, %v7217_v33  ;;  %v7252_v36 = vld [vmem:[%s24574_s8 + $0x790] sm:$0xff]  ;;  %v7253_v15 = vld [vmem:[%s24574_s8 + $0x798] sm:$0xff] }
 0x62a   : > { %v6917_v48 = vpop.f32.mrb[20].mxu0  ;;  %v6999_v62 = vpop.f32.mrb[20].mxu1  ;;  %8885 = vmatprep.subr.bf16.mxu1 %v17327_v53  ;;  %v17357_v53 = vcombine.high %v7212_v52, %v7216_v9  ;;  %v7256_v14 = vld [vmem:[%s24574_s8 + $0x7b0] sm:$0xff] }
 0x62b   : > { %v17940_v54 = vadd.f32 %v6917_v48, %v6173_v1  ;;  %v17942_v32 = vadd.f32 %v6999_v62, %v6181_v43  ;;  %v6919_v24 = vpop.f32.mrb[21].mxu0  ;;  %v7001_v55 = vpop.f32.mrb[21].mxu1  ;;  %v7224_v1 = vld [vmem:[%s24574_s8 + $0x6b0] sm:$0xff]  ;;  %v7221_v43 = vld [vmem:[%s24574_s8 + $0x698] sm:$0xff] }
 0x62c   : > { %v17941_v22 = vadd.f32 %v6919_v24, %v6177_v8  ;;  %v17943_v41 = vadd.f32 %v7001_v55, %v6185_v6  ;;  %v6921_v34 = vpop.f32.mrb[22].mxu0  ;;  %v7003_v58 = vpop.f32.mrb[22].mxu1  ;;  %8804 = vmatpush1.bf16.msra.mxu0 %v17324_v25  ;;  %v17358_v8 = vcombine.low %v7213_v31, %v7217_v33  ;;  %v17365_v6 = vcombine.high %v7220_v40, %v7224_v1  ;;  %v7229_v48 = vld [vmem:[%s24574_s8 + $0x6d8] sm:$0xff]  ;;  %v7240_v24 = vld [vmem:[%s24574_s8 + $0x730] sm:$0xff] }
 0x62d   : > { %v22815_v63 = vmul.f32 0.125, %v17940_v54  ;;  %v22817_v0 = vmul.f32 0.125, %v17942_v32  ;;  %8886 = vmatpush1.bf16.msra.mxu1 %v17326_v47  ;;  %v6922_v2 = vpop.f32.mrb[23].mxu0  ;;  %v7004_v60 = vpop.f32.mrb[23].mxu1  ;;  %8805 = vmatprep.subr.bf16.mxu0 %v17333_v20  ;;  %v17367_v25 = vcombine.high %v7221_v43, %v7225_v45  ;;  %v7228_v47 = vld [vmem:[%s24574_s8 + $0x6d0] sm:$0xff]  ;;  %v7233_v62 = vld [vmem:[%s24574_s8 + $0x6f8] sm:$0xff]  ;;  %v17366_v28 = vcombine.low %v7221_v43, %v7225_v45 }
 0x62e   : > { %v22819_v5 = vmul.f32 0.125, %v17941_v22  ;;  %v22821_v7 = vmul.f32 0.125, %v17943_v41  ;;  %8887 = vmatprep.subr.bf16.mxu1 %v17335_v51  ;;  %v7232_v20 = vld [vmem:[%s24574_s8 + $0x6f0] sm:$0xff]  ;;  %v17364_v51 = vcombine.low %v7220_v40, %v7224_v1  ;;  %v17375_v54 = vcombine.high %v7229_v48, %v7233_v62  ;;  %v7237_v55 = vld [vmem:[%s24574_s8 + $0x718] sm:$0xff] }
 0x62f   : > { %8917 = vrot.lane.b32.xlu0 %v22815_v63, %s19436_s29  ;;  %v17373_v37 = vcombine.high %v7228_v47, %v7232_v20  ;;  %v7236_v32 = vld [vmem:[%s24574_s8 + $0x710] sm:$0xff]  ;;  %v17372_v56 = vcombine.low %v7228_v47, %v7232_v20  ;;  %v17374_v22 = vcombine.low %v7229_v48, %v7233_v62  ;;  %v17383_v34 = vcombine.high %v7237_v55, %v7241_v16  ;;  %v7245_v2 = vld [vmem:[%s24574_s8 + $0x758] sm:$0xff] }
 0x630   : > { %v8932_v17 = vcombine.low %v22815_v63, %v22819_v5  ;;  %v8948_v18 = vcombine.low %v22817_v0, %v22821_v7  ;;  %8806 = vmatpush1.bf16.msra.mxu0 %v17332_v61  ;;  %8921 = vrot.lane.b32.xlu1 %v22819_v5, %s19436_s29  ;;  %v17381_v41 = vcombine.high %v7236_v32, %v7240_v24  ;;  %v7244_v58 = vld [vmem:[%s24574_s8 + $0x750] sm:$0xff]  ;;  %v7249_v60 = vld [vmem:[%s24574_s8 + $0x778] sm:$0xff]  ;;  %v19437_v45 = vmov 1983009808  }
 0x631   : > { %8888 = vmatpush1.bf16.msra.mxu1 %v17334_v4  ;;  %8807 = vmatprep.subr.bf16.mxu0 %v17341_v46  ;;  %v7248_v61 = vld [vmem:[%s24574_s8 + $0x770] sm:$0xff]  ;;  %v17380_v4 = vcombine.low %v7236_v32, %v7240_v24  ;;  %v17382_v46 = vcombine.low %v7237_v55, %v7241_v16  ;;  %v17391_v12 = vcombine.high %v7245_v2, %v7249_v60  ;;  %v7261_v33 = vld [vmem:[%s24574_s8 + $0x7d8] sm:$0xff] }
 0x632   : > { %8889 = vmatprep.subr.bf16.mxu1 %v17343_v10  ;;  %v17389_v10 = vcombine.high %v7244_v58, %v7248_v61  ;;  %v7260_v9 = vld [vmem:[%s24574_s8 + $0x7d0] sm:$0xff] }
 0x633   : > { %8925 = vrot.lane.b32.xlu0 %v22817_v0, %s19436_s29  ;;  %v7264_v31 = vld [vmem:[%s24574_s8 + $0x7f0] sm:$0xff] }
 0x634   : > { %8808 = vmatpush1.bf16.msra.mxu0 %v17340_v44  ;;  %8929 = vrot.lane.b32.xlu1 %v22821_v7, %s19436_s29  ;;  %v7257_v44 = vld [vmem:[%s24574_s8 + $0x7b8] sm:$0xff]  ;;  %v17404_v1 = vcombine.low %v7260_v9, %v7264_v31 }
 0x635   : > { %8890 = vmatpush1.bf16.msra.mxu1 %v17342_v11  ;;  %8809 = vmatprep.subr.bf16.mxu0 %v17349_v27  ;;  %v17388_v11 = vcombine.low %v7244_v58, %v7248_v61  ;;  %v17390_v27 = vcombine.low %v7245_v2, %v7249_v60  ;;  %v17399_v52 = vcombine.high %v7253_v15, %v7257_v44 }
 0x636   : > { %8891 = vmatprep.subr.bf16.mxu1 %v17351_v26  ;;  %v17397_v26 = vcombine.high %v7252_v36, %v7256_v14 }
 0x638   : > { %8810 = vmatpush1.bf16.msra.mxu0 %v17348_v49  ;;  %v7265_v49 = vld [vmem:[%s24574_s8 + $0x7f8] sm:$0xff] }
 0x639   : > { %8892 = vmatpush1.bf16.msra.mxu1 %v17350_v38  ;;  %8811 = vmatprep.subr.bf16.mxu0 %v17357_v53  ;;  %v17396_v38 = vcombine.low %v7252_v36, %v7256_v14  ;;  %v17398_v53 = vcombine.low %v7253_v15, %v7257_v44  ;;  %v17407_v40 = vcombine.high %v7261_v33, %v7265_v49 }
 0x63a   : > { %8893 = vmatprep.subr.bf16.mxu1 %v17359_v39  ;;  %v17405_v39 = vcombine.high %v7260_v9, %v7264_v31  ;;  %v17406_v43 = vcombine.low %v7261_v33, %v7265_v49 }
 0x63c   : > { %8812 = vmatpush1.bf16.msra.mxu0 %v17356_v57  ;;  %v8934_v57 = vunpack.c.l.s4 %v19437_v45 }
 0x63d   : > { %8894 = vmatpush1.bf16.msra.mxu1 %v17358_v8  ;;  %8813 = vmatprep.subr.bf16.mxu0 %v17365_v6  ;;  %v19438_v6 = vmov 1934713408  }
 0x63e   : > { %8895 = vmatprep.subr.bf16.mxu1 %v17367_v25  ;;  %v8935_v8 = vunpack.c.0.s8 %v8934_v57  ;;  %v8966_v25 = vunpack.c.l.s4 %v19438_v6 }
 0x640   : > { %8814 = vmatpush1.bf16.msra.mxu0 %v17364_v51  ;;  %v22934_v48 = vsub.s32 %v8935_v8, %v20258_v19  ;;  %v8967_v51 = vunpack.c.0.s8 %v8966_v25 }
 0x641   : > { %8896 = vmatpush1.bf16.msra.mxu1 %v17366_v28  ;;  %8815 = vmatprep.subr.bf16.mxu0 %v17373_v37  ;;  %v22939_v28 = vld [vmem:[%s24575_s9] sm:$0xff] }
 0x642   : > { %8897 = vmatprep.subr.bf16.mxu1 %v17375_v54  ;;  %v8939_v32 = vrot.slane %v8932_v17, %v22934_v48  ;;  %v7271_v55 = vrot.slane %v22939_v28, %v20261_v21  ;;  %v22949_v16 = vsub.s32 %v8967_v51, %v20258_v19  ;;  %v7283_v17 = vrot.slane %v22939_v28, %v20276_v30 }
 0x644   : > { %8816 = vmatpush1.bf16.msra.mxu0 %v17372_v56  ;;  %v7279_v56 = vrot.slane %v22939_v28, %v20435_v42 }
 0x645   : > { %8898 = vmatpush1.bf16.msra.mxu1 %v17374_v22  ;;  %8817 = vmatprep.subr.bf16.mxu0 %v17381_v41  ;;  %v7275_v22 = vrot.slane %v22939_v28, %v20269_v23  ;;  %v8955_v41 = vrot.slane %v8948_v18, %v22934_v48 }
 0x646   : > { %8899 = vmatprep.subr.bf16.mxu1 %v17383_v34 }
 0x648   : > { %8818 = vmatpush1.bf16.msra.mxu0 %v17380_v4 }
 0x649   : > { %8900 = vmatpush1.bf16.msra.mxu1 %v17382_v46  ;;  %8819 = vmatprep.subr.bf16.mxu0 %v17389_v10 }
 0x64a   : > { %8901 = vmatprep.subr.bf16.mxu1 %v17391_v12 }
 0x64c   : > { %8820 = vmatpush1.bf16.msra.mxu0 %v17388_v11 }
 0x64d   : > { %8902 = vmatpush1.bf16.msra.mxu1 %v17390_v27  ;;  %8821 = vmatprep.subr.bf16.mxu0 %v17397_v26 }
 0x64e   : > { %8903 = vmatprep.subr.bf16.mxu1 %v17399_v52 }
 0x650   : > { %8822 = vmatpush1.bf16.msra.mxu0 %v17396_v38 }
 0x651   : > { %8904 = vmatpush1.bf16.msra.mxu1 %v17398_v53  ;;  %8823 = vmatprep.subr.bf16.mxu0 %v17405_v39 }
 0x652   : > { %8905 = vmatprep.subr.bf16.mxu1 %v17407_v40 }
 0x654   : > { %8824 = vmatpush1.bf16.msra.mxu0 %v17404_v1 }
 0x655   : > { %8906 = vmatpush1.bf16.msra.mxu1 %v17406_v43 }
 0x657   : > { %8826 = vmatmul.mubr.bf16.vlgmr.msra.gmra.mrb[28].mxu0 %v22131_v59 }
 0x658   : > { %8908 = vmatmul.mubr.bf16.vlgmr.msra.gmra.mrb[28].mxu1 %v22131_v59 }
 0x6a1   : > { %v8918_v47 = vpop.permute.xlu0 %8917 }
 0x6a2   : > { %v8922_v20 = vpop.permute.xlu1 %8921 }
 0x6a3   : > { %v8940_v62 = vcombine.low %v8918_v47, %v8922_v20 }
 0x6a5   : > { %v8947_v37 = vrot.slane %v8940_v62, %v22934_v48  ;;  %v8926_v59 = vpop.permute.xlu0 %8925 }
 0x6a6   : > { %v8930_v54 = vpop.permute.xlu1 %8929 }
 0x6a7   : > { %v8956_v24 = vcombine.low %v8926_v59, %v8930_v54  ;;  %v8964_v63 = vcombine.low %v8939_v32, %v8947_v37 }
 0x6a9   : > { %v8963_v5 = vrot.slane %v8956_v24, %v22934_v48  ;;  %v8971_v12 = vrot.slane %v8964_v63, %v22949_v16 }
 0x6aa   : > { %v8663_v34 = vpop.f32.mrb[24].mxu0 }
 0x6ab   : > { %v8972_v19 = vcombine.low %v8955_v41, %v8963_v5  ;;  %v17944_v58 = vadd.f32 %v8663_v34, %v7271_v55  ;;  %v8745_v61 = vpop.f32.mrb[24].mxu1  ;;  %v8665_v2 = vpop.f32.mrb[25].mxu0 }
 0x6ac   : > { %v17946_v60 = vadd.f32 %v8745_v61, %v7279_v56  ;;  %v17945_v4 = vadd.f32 %v8665_v2, %v7275_v22  ;;  %v8747_v46 = vpop.f32.mrb[25].mxu1  ;;  %v8667_v10 = vpop.f32.mrb[26].mxu0 }
 0x6ad   : > { %v8979_v0 = vrot.slane %v8972_v19, %v22949_v16  ;;  %v17947_v7 = vadd.f32 %v8747_v46, %v7283_v17  ;;  %v8749_v18 = vpop.f32.mrb[26].mxu1  ;;  %v8668_v36 = vpop.f32.mrb[27].mxu0  ;;  %8983 = vrot.lane.b32.xlu0 %v17944_v58, %s19436_s29 }
 0x6ae   : > { %v8998_v14 = vcombine.low %v17944_v58, %v17945_v4  ;;  %v8750_v15 = vpop.f32.mrb[27].mxu1  ;;  %8991 = vrot.lane.b32.xlu1 %v17946_v60, %s19436_s29 }
 0x6af   : > { %v8980_v44 = vcombine.low %v8971_v12, %v8979_v0  ;;  %v8981_v11 = vcombine.high %v8971_v12, %v8979_v0  ;;  %v9014_v27 = vcombine.low %v17946_v60, %v17947_v7 }
 0x6b0   : > { %v9005_v61 = vrot.slane %v8998_v14, %v22934_v48 }
 0x6b1   : > { %v9118_v26 = vpack.c.bf16 %v8980_v44, %v8980_v44  ;;  %v9143_v52 = vpack.c.bf16 %v8981_v11, %v8981_v11  ;;  %8987 = vrot.lane.b32.xlu0 %v17945_v4, %s19436_s29  ;;  %v9021_v60 = vrot.slane %v9014_v27, %v22934_v48 }
 0x6b2   : > { %8995 = vrot.lane.b32.xlu1 %v17947_v7, %s19436_s29 }
 0x6b3   : > { %v9125_v9 = vrot.slane %v9118_v26, %v22934_v48  ;;  %v9150_v31 = vrot.slane %v9143_v52, %v22934_v48 }
 0x6b5   : > { %v9126_v33 = vcombine.high %v9125_v9, %v24581_v3  ;;  %v22972_v49 = vrot.slane %v9125_v9, %v22949_v16  ;;  %v9151_v38 = vcombine.high %v9150_v31, %v24581_v3  ;;  %v22976_v53 = vrot.slane %v9150_v31, %v22949_v16 }
 0x6b7   : > { %v22979_v39 = vrot.slane %v9126_v33, %v22949_v16  ;;  %v22982_v40 = vrot.slane %v9151_v38, %v22949_v16  ;;  %v9171_v43 = vshrl.u32 %v22972_v49, 16  ;;  %v9172_v45 = vshrl.u32 %v22976_v53, 16 }
 0x6b8   : > { %v22990_v57 = vcombine.high %v22972_v49, %v24581_v3  ;;  %v22994_v8 = vcombine.high %v22976_v53, %v24581_v3 }
 0x6b9   : > { %v9183_v25 = vshrl.u32 %v22979_v39, 16  ;;  %v9184_v47 = vshrl.u32 %v22982_v40, 16  ;;  %v23002_v20 = vcombine.high %v22979_v39, %v24581_v3  ;;  %v23004_v62 = vpack.i.b16 %v9172_v45, %v9171_v43 }
 0x6ba   : > { %v9177_v37 = vshrl.u32 %v22990_v57, 16  ;;  %v9178_v59 = vshrl.u32 %v22994_v8, 16  ;;  %v23014_v32 = vcombine.high %v22982_v40, %v24581_v3 }
 0x6bb   : > { %24604 = vst [vmem:[#allocation11_spill] sm:$0xff] %v23002_v20  ;;  %v23010_v54 = vpack.i.b16 %v9184_v47, %v9183_v25  ;;  %v9189_v24 = vshrl.u32 %v23002_v20, 16 }
 0x6bc   : > { %24606 = vst [vmem:[#allocation13_spill] sm:$0xff] %v23014_v32  ;;  %v23017_v55 = vpack.i.b16 %v9178_v59, %v9177_v37  ;;  %v9190_v22 = vshrl.u32 %v23014_v32, 16  ;;  %v23041_v59 = vpack.i.b16 %v24581_v3, %v24581_v3  ;;  %v24615_v32 = vmov 0.0  }
 0x6bd   : > { %24605 = vst [vmem:[#allocation12_spill] sm:$0xff] %v23010_v54 }
 0x6be   : > { %v23022_v41 = vpack.i.b16 %v9190_v22, %v9189_v24  ;;  %24608 = vst [vmem:[#allocation15_spill] sm:$0xff] %v23041_v59 }
 0x6c0   : > { %24607 = vst [vmem:[#allocation14_spill] sm:$0xff] %v23022_v41 }
 0x71f   : > { %v8984_v63 = vpop.permute.xlu0 %8983 }
 0x720   : > { %v8992_v5 = vpop.permute.xlu1 %8991 }
 0x723   : > { %v8988_v17 = vpop.permute.xlu0 %8987 }
 0x724   : > { %v8996_v34 = vpop.permute.xlu1 %8995  ;;  %v9006_v19 = vcombine.low %v8984_v63, %v8988_v17 }
 0x725   : > { %v9022_v58 = vcombine.low %v8992_v5, %v8996_v34 }
 0x726   : > { %v9013_v2 = vrot.slane %v9006_v19, %v22934_v48 }
 0x727   : > { %v9029_v4 = vrot.slane %v9022_v58, %v22934_v48 }
 0x728   : > { %v9030_v46 = vcombine.low %v9005_v61, %v9013_v2 }
 0x729   : > { %v9038_v10 = vcombine.low %v9021_v60, %v9029_v4 }
 0x72a   : > { %v23028_v12 = vpop.f32.mrb[28].mxu0  ;;  %v9037_v0 = vrot.slane %v9030_v46, %v22949_v16 }
 0x72b   : > { %v23031_v7 = vpop.f32.mrb[28].mxu1  ;;  %v23033_v18 = vpop.f32.mrb[29].mxu0  ;;  %v9045_v36 = vrot.slane %v9038_v10, %v22949_v16 }
 0x72c   : > { %v23036_v15 = vpop.f32.mrb[29].mxu1  ;;  %v8831_v14 = vpop.f32.mrb[30].mxu0 }
 0x72d   : > { %v8913_v44 = vpop.f32.mrb[30].mxu1  ;;  %v8832_v11 = vpop.f32.mrb[31].mxu0  ;;  %v9047_v27 = vcombine.high %v9037_v0, %v9045_v36  ;;  %v9046_v26 = vcombine.low %v9037_v0, %v9045_v36 }
 0x72e   : > { %v8914_v52 = vpop.f32.mrb[31].mxu1 }
 0x72f   : > { %v9049_v9 = vpack.c.bf16 %v9047_v27, %v9047_v27  ;;  %v9048_v31 = vpack.c.bf16 %v9046_v26, %v9046_v26 }
 0x731   : > { %9208 = vxpose.xlu1.c.b16.start.end [1/1] (short) (narrow) %v9049_v9, 64  ;;  %9192 = vxpose.xlu0.c.b16.start.end [1/1] (short) (narrow) %v9048_v31, 64 }
 0x797   : > { %v9216_v33 = vpop.trf.xlu1  ;;  %v9200_v38 = vpop.trf.xlu0 }
 0x798   : > { %v9229_v43 = vshrl.u32 %v9216_v33, 16  ;;  %v9226_v45 = vpack.i.b16 %v9216_v33, %v9200_v38  ;;  %v9228_v25 = vshrl.u32 %v9200_v38, 16 }
 0x79a   : > { %v9269_v47 = vrot.slane %v9226_v45, %v22934_v48  ;;  %v9230_v37 = vpack.i.b16 %v9229_v43, %v9228_v25  ;;  %v9262_v17 = vcombine.high %v9226_v45, %v23041_v59 }
 0x79b   : > { %v9217_v0 = vpop.trf.xlu1  ;;  %v9201_v36 = vpop.trf.xlu0 }
 0x79c   : > { %v9284_v24 = vrot.slane %v9269_v47, %v22949_v16  ;;  %v9318_v22 = vrot.slane %v9230_v37, %v22934_v48  ;;  %v9277_v5 = vcombine.high %v9269_v47, %v24581_v3  ;;  %v9276_v58 = vrot.slane %v9262_v17, %v22934_v48 }
 0x79d   : > { %v9311_v60 = vcombine.high %v9230_v37, %v23041_v59  ;;  %v9240_v11 = vpack.i.b16 %v9217_v0, %v9201_v36  ;;  %v9243_v26 = vshrl.u32 %v9217_v0, 16  ;;  %v9242_v52 = vshrl.u32 %v9201_v36, 16 }
 0x79e   : > { %9654 = vxpose.xlu0.c.b16.start.end [1/1] (short) (narrow) %v9284_v24, 16  ;;  %v9333_v63 = vrot.slane %v9318_v22, %v22949_v16  ;;  %v9307_v34 = vcombine.high %v9284_v24, %v24581_v3  ;;  %v9291_v19 = vrot.slane %v9277_v5, %v22949_v16  ;;  %v9326_v2 = vcombine.high %v9318_v22, %v24581_v3 }
 0x79f   : > { %v9299_v4 = vrot.slane %v9276_v58, %v22949_v16  ;;  %v9325_v10 = vrot.slane %v9311_v60, %v22934_v48  ;;  %v9292_v9 = vcombine.high %v9276_v58, %v24581_v3  ;;  %v9367_v33 = vrot.slane %v9240_v11, %v22934_v48 }
 0x7a0   : > { %9670 = vxpose.xlu1.c.b16.start.end [1/1] (short) (narrow) %v9333_v63, 16  ;;  %v9356_v61 = vcombine.high %v9333_v63, %v24581_v3  ;;  %v9340_v46 = vrot.slane %v9326_v2, %v22949_v16  ;;  %v9308_v14 = vcombine.high %v9291_v19, %v24581_v3  ;;  %v9244_v43 = vpack.i.b16 %v9243_v26, %v9242_v52 }
 0x7a1   : > { %v9348_v44 = vrot.slane %v9325_v10, %v22949_v16  ;;  %v9309_v27 = vcombine.high %v9299_v4, %v24581_v3  ;;  %v9306_v38 = vrot.slane %v9292_v9, %v22949_v16  ;;  %v9382_v25 = vrot.slane %v9367_v33, %v22949_v16 }
 0x7a2   : > { %9686 = vxpose.xlu0.c.b16.start.end [1/1] (short) (narrow) %v9307_v34, 16  ;;  %v9357_v31 = vcombine.high %v9340_v46, %v24581_v3  ;;  %v9341_v47 = vcombine.high %v9325_v10, %v24581_v3  ;;  %v9416_v37 = vrot.slane %v9244_v43, %v22934_v48  ;;  %v24586_v24 = vmov 0.0  }
 0x7a3   : > { %v9358_v45 = vcombine.high %v9348_v44, %v24581_v3  ;;  %17740 = vmatprep.subr.bf16.mxu0 %v24586_v24  ;;  %17752 = vmatprep.subr.bf16.mxu1 %v24586_v24  ;;  %v9310_v63 = vcombine.high %v9306_v38, %v24581_v3  ;;  %v9405_v17 = vcombine.high %v9382_v25, %v24581_v3 }
 0x7a4   : > { %9718 = vxpose.xlu1.c.b16.start.end [1/1] (short) (narrow) %v9291_v19, 16  ;;  %v9355_v22 = vrot.slane %v9341_v47, %v22949_v16  ;;  %v9431_v5 = vrot.slane %v9416_v37, %v22949_v16  ;;  %v9375_v34 = vcombine.high %v9367_v33, %v24581_v3  ;;  %v9360_v19 = vcombine.high %v9240_v11, %v23041_v59 }
 0x7a5   : > { %17748 = vmatprep.mubr.msk.bf16.mxu0 %vm19440_vm4, %v24586_v24  ;;  %17760 = vmatprep.mubr.msk.bf16.mxu1 %vm19440_vm4, %v24586_v24 }
 0x7a6   : > { %9702 = vxpose.xlu0.c.b16.start.end [1/1] (short) (narrow) %v9356_v61, 16  ;;  %v9359_v58 = vcombine.high %v9355_v22, %v24581_v3  ;;  %v9389_v61 = vrot.slane %v9375_v34, %v22949_v16  ;;  %v9374_v2 = vrot.slane %v9360_v19, %v22934_v48  ;;  %v9454_v60 = vcombine.high %v9431_v5, %v24581_v3 }
 0x7a8   : > { %9782 = vxpose.xlu1.c.b16.start.end [1/1] (short) (narrow) %v9299_v4, 16  ;;  %v9424_v4 = vcombine.high %v9416_v37, %v24581_v3  ;;  %v9397_v10 = vrot.slane %v9374_v2, %v22949_v16  ;;  %v9406_v11 = vcombine.high %v9389_v61, %v24581_v3  ;;  %v9390_v33 = vcombine.high %v9374_v2, %v24581_v3 }
 0x7aa   : > { %9734 = vxpose.xlu0.c.b16.start.end [1/1] (short) (narrow) %v9340_v46, 16  ;;  %v9409_v46 = vcombine.high %v9244_v43, %v23041_v59  ;;  %v9438_v0 = vrot.slane %v9424_v4, %v22949_v16  ;;  %v9407_v52 = vcombine.high %v9397_v10, %v24581_v3 }
 0x7ac   : > { %9750 = vxpose.xlu1.c.b16.start.end [1/1] (short) (narrow) %v9308_v14, 16  ;;  %v9423_v36 = vrot.slane %v9409_v46, %v22934_v48  ;;  %v9218_v14 = vpop.trf.xlu1 }
 0x7ad   : > { %v9251_v9 = vshrl.u32 %v9218_v14, 16 }
 0x7ae   : > { %9798 = vxpose.xlu0.c.b16.start.end [1/1] (short) (narrow) %v9348_v44, 16  ;;  %v9202_v44 = vpop.trf.xlu0 }
 0x7af   : > { %v9248_v26 = vpack.i.b16 %v9218_v14, %v9202_v44 }
 0x7b0   : > { %9814 = vxpose.xlu1.c.b16.start.end [1/1] (short) (narrow) %v9309_v27, 16  ;;  %v9446_v27 = vrot.slane %v9423_v36, %v22949_v16 }
 0x7b1   : > { %v9465_v43 = vrot.slane %v9248_v26, %v22934_v48 }
 0x7b2   : > { %9766 = vxpose.xlu0.c.b16.start.end [1/1] (short) (narrow) %v9357_v31, 16  ;;  %v9250_v31 = vshrl.u32 %v9202_v44, 16  ;;  %v9456_v47 = vcombine.high %v9446_v27, %v24581_v3 }
 0x7b3   : > { %v9480_v37 = vrot.slane %v9465_v43, %v22949_v16 }
 0x7b4   : > { %9846 = vxpose.xlu1.c.b16.start.end [1/1] (short) (narrow) %v9306_v38, 16  ;;  %v9455_v38 = vcombine.high %v9438_v0, %v24581_v3 }
 0x7b5   : > { %v9503_v19 = vcombine.high %v9480_v37, %v24581_v3 }
 0x7b6   : > { %9830 = vxpose.xlu0.c.b16.start.end [1/1] (short) (narrow) %v9358_v45, 16  ;;  %v9404_v45 = vrot.slane %v9390_v33, %v22949_v16 }
 0x7b8   : > { %9910 = vxpose.xlu1.c.b16.start.end [1/1] (short) (narrow) %v9382_v25, 16  ;;  %v9252_v25 = vpack.i.b16 %v9251_v9, %v9250_v31 }
 0x7ba   : > { %9862 = vxpose.xlu0.c.b16.start.end [1/1] (short) (narrow) %v9355_v22, 16  ;;  %v9439_v22 = vcombine.high %v9423_v36, %v24581_v3 }
 0x7bc   : > { %9878 = vxpose.xlu1.c.b16.start.end [1/1] (short) (narrow) %v9310_v63, 16  ;;  %v9514_v63 = vrot.slane %v9252_v25, %v22934_v48 }
 0x7be   : > { %9926 = vxpose.xlu0.c.b16.start.end [1/1] (short) (narrow) %v9431_v5, 16  ;;  %v9453_v5 = vrot.slane %v9439_v22, %v22949_v16  ;;  %v9529_v34 = vrot.slane %v9514_v63, %v22949_v16 }
 0x7c0   : > { %9942 = vxpose.xlu1.c.b16.start.end [1/1] (short) (narrow) %v9405_v17, 16  ;;  %v9408_v17 = vcombine.high %v9404_v45, %v24581_v3  ;;  %v9457_v2 = vcombine.high %v9453_v5, %v24581_v3  ;;  %v9552_v46 = vcombine.high %v9529_v34, %v24581_v3 }
 0x7c2   : > { %9894 = vxpose.xlu0.c.b16.start.end [1/1] (short) (narrow) %v9359_v58, 16  ;;  %v9473_v58 = vcombine.high %v9465_v43, %v24581_v3 }
 0x7c4   : > { %9974 = vxpose.xlu1.c.b16.start.end [1/1] (short) (narrow) %v9389_v61, 16  ;;  %v9458_v61 = vcombine.high %v9248_v26, %v23041_v59 }
 0x7c6   : > { %9958 = vxpose.xlu0.c.b16.start.end [1/1] (short) (narrow) %v9454_v60, 16  ;;  %v9487_v60 = vrot.slane %v9473_v58, %v22949_v16  ;;  %v9472_v4 = vrot.slane %v9458_v61, %v22934_v48 }
 0x7c8   : > { %10038 = vxpose.xlu1.c.b16.start.end [1/1] (short) (narrow) %v9397_v10, 16  ;;  %v9522_v10 = vcombine.high %v9514_v63, %v24581_v3  ;;  %v9495_v36 = vrot.slane %v9472_v4, %v22949_v16  ;;  %v9504_v26 = vcombine.high %v9487_v60, %v24581_v3  ;;  %v9488_v43 = vcombine.high %v9472_v4, %v24581_v3 }
 0x7ca   : > { %9990 = vxpose.xlu0.c.b16.start.end [1/1] (short) (narrow) %v9438_v0, 16  ;;  %v9507_v0 = vcombine.high %v9252_v25, %v23041_v59  ;;  %v9536_v14 = vrot.slane %v9522_v10, %v22949_v16  ;;  %v9505_v31 = vcombine.high %v9495_v36, %v24581_v3 }
 0x7cc   : > { %10006 = vxpose.xlu1.c.b16.start.end [1/1] (short) (narrow) %v9406_v11, 16  ;;  %v9521_v44 = vrot.slane %v9507_v0, %v22934_v48  ;;  %v9219_v11 = vpop.trf.xlu1 }
 0x7cd   : > { %v9259_v33 = vshrl.u32 %v9219_v11, 16 }
 0x7ce   : > { %10054 = vxpose.xlu0.c.b16.start.end [1/1] (short) (narrow) %v9446_v27, 16  ;;  %v9203_v27 = vpop.trf.xlu0 }
 0x7cf   : > { %v9256_v9 = vpack.i.b16 %v9219_v11, %v9203_v27 }
 0x7d0   : > { %10070 = vxpose.xlu1.c.b16.start.end [1/1] (short) (narrow) %v9407_v52, 16  ;;  %v9544_v52 = vrot.slane %v9521_v44, %v22949_v16 }
 0x7d1   : > { %v9563_v25 = vrot.slane %v9256_v9, %v22934_v48 }
 0x7d2   : > { %10022 = vxpose.xlu0.c.b16.start.end [1/1] (short) (narrow) %v9455_v38, 16  ;;  %v9258_v38 = vshrl.u32 %v9203_v27, 16  ;;  %v9554_v22 = vcombine.high %v9544_v52, %v24581_v3 }
 0x7d3   : > { %v9578_v63 = vrot.slane %v9563_v25, %v22949_v16 }
 0x7d4   : > { %10102 = vxpose.xlu1.c.b16.start.end [1/1] (short) (narrow) %v9404_v45, 16  ;;  %v9553_v45 = vcombine.high %v9536_v14, %v24581_v3 }
 0x7d5   : > { %v9601_v61 = vcombine.high %v9578_v63, %v24581_v3 }
 0x7d6   : > { %10086 = vxpose.xlu0.c.b16.start.end [1/1] (short) (narrow) %v9456_v47, 16  ;;  %v9502_v47 = vrot.slane %v9488_v43, %v22949_v16 }
 0x7d8   : > { %10166 = vxpose.xlu1.c.b16.start.end [1/1] (short) (narrow) %v9480_v37, 16  ;;  %v9260_v37 = vpack.i.b16 %v9259_v33, %v9258_v38 }
 0x7da   : > { %10118 = vxpose.xlu0.c.b16.start.end [1/1] (short) (narrow) %v9453_v5, 16  ;;  %v9537_v5 = vcombine.high %v9521_v44, %v24581_v3  ;;  %v9605_v44 = vcombine.high %v9260_v37, %v23041_v59 }
 0x7dc   : > { %10134 = vxpose.xlu1.c.b16.start.end [1/1] (short) (narrow) %v9408_v17, 16  ;;  %v9612_v17 = vrot.slane %v9260_v37, %v22934_v48 }
 0x7de   : > { %10182 = vxpose.xlu0.c.b16.start.end [1/1] (short) (narrow) %v9529_v34, 16  ;;  %v9551_v34 = vrot.slane %v9537_v5, %v22949_v16  ;;  %v9627_v58 = vrot.slane %v9612_v17, %v22949_v16 }
 0x7e0   : > { %10198 = vxpose.xlu1.c.b16.start.end [1/1] (short) (narrow) %v9503_v19, 16  ;;  %v9506_v19 = vcombine.high %v9502_v47, %v24581_v3  ;;  %v9555_v4 = vcombine.high %v9551_v34, %v24581_v3 }
 0x7e2   : > { %10150 = vxpose.xlu0.c.b16.start.end [1/1] (short) (narrow) %v9457_v2, 16  ;;  %v9571_v2 = vcombine.high %v9563_v25, %v24581_v3 }
 0x7e4   : > { %10230 = vxpose.xlu1.c.b16.start.end [1/1] (short) (narrow) %v9487_v60, 16  ;;  %v9556_v60 = vcombine.high %v9256_v9, %v23041_v59  ;;  %v9619_v9 = vrot.slane %v9605_v44, %v22934_v48 }
 0x7e6   : > { %10214 = vxpose.xlu0.c.b16.start.end [1/1] (short) (narrow) %v9552_v46, 16  ;;  %v9585_v46 = vrot.slane %v9571_v2, %v22949_v16  ;;  %v9570_v10 = vrot.slane %v9556_v60, %v22934_v48  ;;  %v9642_v43 = vrot.slane %v9619_v9, %v22949_v16  ;;  %v9635_v2 = vcombine.high %v9619_v9, %v24581_v3 }
 0x7e8   : > { %10294 = vxpose.xlu1.c.b16.start.end [1/1] (short) (narrow) %v9495_v36, 16  ;;  %v9650_v36 = vcombine.high %v9627_v58, %v24581_v3  ;;  %v9593_v27 = vrot.slane %v9570_v10, %v22949_v16  ;;  %v9602_v33 = vcombine.high %v9585_v46, %v24581_v3  ;;  %v9649_v44 = vrot.slane %v9635_v2, %v22949_v16 }
 0x7ea   : > { %10246 = vxpose.xlu0.c.b16.start.end [1/1] (short) (narrow) %v9536_v14, 16  ;;  %v9620_v14 = vcombine.high %v9612_v17, %v24581_v3  ;;  %v9603_v25 = vcombine.high %v9593_v27, %v24581_v3 }
 0x7ec   : > { %10262 = vxpose.xlu1.c.b16.start.end [1/1] (short) (narrow) %v9504_v26, 16 }
 0x7ee   : > { %10310 = vxpose.xlu0.c.b16.start.end [1/1] (short) (narrow) %v9544_v52, 16  ;;  %v9634_v52 = vrot.slane %v9620_v14, %v22949_v16 }
 0x7f0   : > { %10326 = vxpose.xlu1.c.b16.start.end [1/1] (short) (narrow) %v9505_v31, 16 }
 0x7f2   : > { %10278 = vxpose.xlu0.c.b16.start.end [1/1] (short) (narrow) %v9553_v45, 16 }
 0x7f4   : > { %10358 = vxpose.xlu1.c.b16.start.end [1/1] (short) (narrow) %v9502_v47, 16  ;;  %v9586_v47 = vcombine.high %v9570_v10, %v24581_v3 }
 0x7f6   : > { %10342 = vxpose.xlu0.c.b16.start.end [1/1] (short) (narrow) %v9554_v22, 16  ;;  %v9600_v17 = vrot.slane %v9586_v47, %v22949_v16  ;;  %v7291_v47 = vrot.slane %v22939_v28, %v20450_v13 }
 0x7f8   : > { %10422 = vxpose.xlu1.c.b16.start.end [1/1] (short) (narrow) %v9578_v63, 16  ;;  %v9651_v63 = vcombine.high %v9634_v52, %v24581_v3  ;;  %v9604_v10 = vcombine.high %v9600_v17, %v24581_v3 }
 0x7fa   : > { %10374 = vxpose.xlu0.c.b16.start.end [1/1] (short) (narrow) %v9551_v34, 16 }
 0x7fc   : > { %10390 = vxpose.xlu1.c.b16.start.end [1/1] (short) (narrow) %v9506_v19, 16 }
 0x7fe   : > { %10438 = vxpose.xlu0.c.b16.start.end [1/1] (short) (narrow) %v9627_v58, 16 }
 0x800   : > { %10454 = vxpose.xlu1.c.b16.start.end [1/1] (short) (narrow) %v9601_v61, 16  ;;  %v9652_v61 = vcombine.high %v9642_v43, %v24581_v3 }
 0x802   : > { %10406 = vxpose.xlu0.c.b16.start.end [1/1] (short) (narrow) %v9555_v4, 16  ;;  %v7287_v4 = vrot.slane %v22939_v28, %v20661_v29 }
 0x804   : > { %10486 = vxpose.xlu1.c.b16.start.end [1/1] (short) (narrow) %v9585_v46, 16  ;;  %v9662_v0 = vpop.trf.xlu0 }
 0x806   : > { %v9678_v11 = vpop.trf.xlu1  ;;  %10470 = vxpose.xlu0.c.b16.start.end [1/1] (short) (narrow) %v9650_v36, 16 }
 0x808   : > { %10550 = vxpose.xlu1.c.b16.start.end [1/1] (short) (narrow) %v9593_v27, 16  ;;  %v9694_v26 = vpop.trf.xlu0 }
 0x80a   : > { %v9726_v31 = vpop.trf.xlu1  ;;  %10502 = vxpose.xlu0.c.b16.start.end [1/1] (short) (narrow) %v9634_v52, 16  ;;  %v7295_v52 = vrot.slane %v22939_v28, %v20875_v50 }
 0x80b   : > { %v10678_v37 = vcombine.low %v9662_v0, %v9726_v31 }
 0x80c   : > { %10518 = vxpose.xlu1.c.b16.start.end [1/1] (short) (narrow) %v9602_v33, 16  ;;  %v9710_v38 = vpop.trf.xlu0  ;;  %v9653_v33 = vcombine.high %v9649_v44, %v24581_v3 }
 0x80d   : > { %v10685_v34 = vrot.slane %v10678_v37, %v22934_v48 }
 0x80e   : > { %v9790_v45 = vpop.trf.xlu1  ;;  %10566 = vxpose.xlu0.c.b16.start.end [1/1] (short) (narrow) %v9642_v43, 16 }
 0x810   : > { %10582 = vxpose.xlu1.c.b16.start.end [1/1] (short) (narrow) %v9603_v25, 16  ;;  %v9742_v22 = vpop.trf.xlu0 }
 0x811   : > { %v10746_v0 = vcombine.low %v9678_v11, %v9742_v22 }
 0x812   : > { %v9758_v5 = vpop.trf.xlu1  ;;  %10534 = vxpose.xlu0.c.b16.start.end [1/1] (short) (narrow) %v9651_v63, 16 }
 0x813   : > { %v10686_v19 = vcombine.low %v9694_v26, %v9758_v5  ;;  %v23156_v26 = vadd.f32 %v23028_v12, %v7287_v4  ;;  %v10753_v29 = vrot.slane %v10746_v0, %v22934_v48  ;;  %v7299_v12 = vrot.slane %v22939_v28, %v20676_v35 }
 0x814   : > { %10614 = vxpose.xlu1.c.b16.start.end [1/1] (short) (narrow) %v9600_v17, 16  ;;  %v9806_v58 = vpop.trf.xlu0  ;;  %v23182_v35 = vadd.f32 %v23033_v18, %v7291_v47 }
 0x815   : > { %v10693_v60 = vrot.slane %v10686_v19, %v22934_v48  ;;  %v23175_v22 = vadd.f32 %v23036_v15, %v7299_v12 }
 0x816   : > { %v9822_v46 = vpop.trf.xlu1  ;;  %10598 = vxpose.xlu0.c.b16.start.end [1/1] (short) (narrow) %v9652_v61, 16 }
 0x817   : > { %v10711_v36 = vcombine.high %v10685_v34, %v10693_v60  ;;  %v10710_v17 = vcombine.low %v10685_v34, %v10693_v60 }
 0x818   : > { %10646 = vxpose.xlu1.c.b16.start.end [1/1] (short) (narrow) %v9604_v10, 16  ;;  %v9774_v14 = vpop.trf.xlu0 }
 0x819   : > { %v10754_v27 = vcombine.low %v9710_v38, %v9774_v14  ;;  %v23166_v38 = vadd.f32 %v23031_v7, %v7295_v52  ;;  %v10718_v4 = vrot.slane %v10710_v17, %v22949_v16  ;;  %v10725_v34 = vrot.slane %v10711_v36, %v22949_v16 }
 0x81a   : > { %v9854_v9 = vpop.trf.xlu1  ;;  %10630 = vxpose.xlu0.c.b16.start.end [1/1] (short) (narrow) %v9649_v44, 16 }
 0x81b   : > { %v10761_v31 = vrot.slane %v10754_v27, %v22934_v48  ;;  %v10694_v37 = vcombine.low %v9790_v45, %v9854_v9 }
 0x81c   : > { %9051 = vrot.lane.b32.xlu1 %v23156_v26, %s19436_s29  ;;  %v9838_v11 = vpop.trf.xlu0 }
 0x81d   : > { %v10779_v43 = vcombine.high %v10753_v29, %v10761_v31  ;;  %v10701_v19 = vrot.slane %v10694_v37, %v22934_v48  ;;  %v10778_v0 = vcombine.low %v10753_v29, %v10761_v31 }
 0x81e   : > { %v9918_v50 = vpop.trf.xlu1  ;;  %10662 = vxpose.xlu0.c.b16.start.end [1/1] (short) (narrow) %v9653_v33, 16 }
 0x81f   : > { %v10786_v36 = vrot.slane %v10778_v0, %v22949_v16  ;;  %v10793_v29 = vrot.slane %v10779_v43, %v22949_v16 }
 0x820   : > { %9059 = vrot.lane.b32.xlu1 %v23166_v38, %s19436_s29  ;;  %v9870_v25 = vpop.trf.xlu0 }
 0x821   : > { %v10762_v28 = vcombine.low %v9806_v58, %v9870_v25 }
 0x822   : > { %v9886_v63 = vpop.trf.xlu1 }
 0x823   : > { %v10702_v5 = vcombine.low %v9822_v46, %v9886_v63  ;;  %v10769_v14 = vrot.slane %v10762_v28, %v22934_v48 }
 0x824   : > { %9063 = vrot.lane.b32.xlu1 %v23175_v22, %s19436_s29  ;;  %v23179_v7 = vpop.trf.xlu0 }
 0x825   : > { %v10709_v61 = vrot.slane %v10702_v5, %v22934_v48 }
 0x826   : > { %v9950_v13 = vpop.trf.xlu1 }
 0x827   : > { %v10726_v45 = vcombine.low %v10701_v19, %v10709_v61  ;;  %v10727_v15 = vcombine.high %v10701_v19, %v10709_v61  ;;  %9055 = vrot.lane.b32.xlu0 %v23182_v35, %s19436_s29 }
 0x828   : > { %v9902_v2 = vpop.trf.xlu0 }
 0x829   : > { %v10734_v46 = vrot.slane %v10726_v45, %v22949_v16  ;;  %v10741_v18 = vrot.slane %v10727_v15, %v22949_v16  ;;  %v10770_v10 = vcombine.low %v9838_v11, %v9902_v2 }
 0x82a   : > { %v9982_v60 = vpop.trf.xlu1 }
 0x82b   : > { %v10777_v58 = vrot.slane %v10770_v10, %v22934_v48  ;;  %v23194_v44 = vcombine.high %v10718_v4, %v10734_v46  ;;  %v23196_v52 = vcombine.low %v10725_v34, %v10741_v18  ;;  %v23198_v9 = vcombine.high %v10725_v34, %v10741_v18 }
 0x82c   : > { %v9966_v27 = vpop.trf.xlu0  ;;  %v10814_v25 = vcombine.low %v9918_v50, %v9982_v60  ;;  %v10742_v11 = vcombine.low %v10718_v4, %v10734_v46 }
 0x82d   : > { %24609 = vst [vmem:[#allocation16_spill] sm:$0xff] %v23198_v9  ;;  %v10794_v33 = vcombine.low %v10769_v14, %v10777_v58  ;;  %v10795_v12 = vcombine.high %v10769_v14, %v10777_v58  ;;  %v11234_v45 = vshrl.u32 %v23194_v44, 16  ;;  %v11242_v15 = vshrl.u32 %v23196_v52, 16 }
 0x82e   : > { %v10046_v47 = vpop.trf.xlu1  ;;  %v10821_v5 = vrot.slane %v10814_v25, %v22934_v48  ;;  %v11226_v50 = vshrl.u32 %v10742_v11, 16  ;;  %v11250_v18 = vshrl.u32 %v23198_v9, 16 }
 0x82f   : > { %v10802_v31 = vrot.slane %v10794_v33, %v22949_v16  ;;  %v10809_v37 = vrot.slane %v10795_v12, %v22949_v16 }
 0x830   : > { %v9998_v63 = vpop.trf.xlu0 }
 0x831   : > { %v10810_v17 = vcombine.low %v10786_v36, %v10802_v31  ;;  %v23205_v19 = vcombine.high %v10786_v36, %v10802_v31  ;;  %v23207_v61 = vcombine.low %v10793_v29, %v10809_v37  ;;  %v23211_v2 = vcombine.high %v10793_v29, %v10809_v37 }
 0x832   : > { %v10014_v28 = vpop.trf.xlu1  ;;  %v10882_v29 = vcombine.low %v23179_v7, %v9998_v63 }
 0x833   : > { %24610 = vst [vmem:[#allocation17_spill] sm:$0xff] %v23211_v2  ;;  %v10822_v43 = vcombine.low %v9950_v13, %v10014_v28  ;;  %v11224_v4 = vpack.i.b16 %v10810_v17, %v10742_v11  ;;  %v11227_v46 = vshrl.u32 %v10810_v17, 16  ;;  %v11235_v60 = vshrl.u32 %v23205_v19, 16 }
 0x834   : > { %v10062_v10 = vpop.trf.xlu0  ;;  %v11243_v14 = vshrl.u32 %v23207_v61, 16  ;;  %v11251_v12 = vshrl.u32 %v23211_v2, 16 }
 0x835   : > { %v10829_v58 = vrot.slane %v10822_v43, %v22934_v48  ;;  %17741 = vmatpush3.bf16.msra.mxu0 %v11224_v4  ;;  %v11228_v33 = vpack.i.b16 %v11227_v46, %v11226_v50  ;;  %v23225_v11 = vpack.i.b16 %v11235_v60, %v11234_v45  ;;  %v10889_v43 = vrot.slane %v10882_v29, %v22934_v48 }
 0x836   : > { %v10078_v25 = vpop.trf.xlu1  ;;  %17742 = vmatprep.subr.bf16.mxu0 %v24586_v24  ;;  %v23227_v36 = vpack.i.b16 %v11243_v14, %v11242_v15  ;;  %v23230_v37 = vpack.i.b16 %v11251_v12, %v11250_v18 }
 0x837   : > { %v10847_v31 = vcombine.high %v10821_v5, %v10829_v58  ;;  %17753 = vmatpush3.bf16.msra.mxu1 %v11228_v33  ;;  %v10846_v18 = vcombine.low %v10821_v5, %v10829_v58 }
 0x838   : > { %24611 = vst [vmem:[#allocation18_spill] sm:$0xff] %v23230_v37  ;;  %v10030_v17 = vpop.trf.xlu0  ;;  %17754 = vmatprep.subr.bf16.mxu1 %v24586_v24 }
 0x839   : > { %v10890_v28 = vcombine.low %v9966_v27, %v10030_v17  ;;  %v10854_v13 = vrot.slane %v10846_v18, %v22949_v16 }
 0x83a   : > { %v10110_v50 = vpop.trf.xlu1 }
 0x83b   : > { %v10897_v4 = vrot.slane %v10890_v28, %v22934_v48  ;;  %v10830_v14 = vcombine.low %v10046_v47, %v10110_v50  ;;  %v10861_v50 = vrot.slane %v10847_v31, %v22949_v16 }
 0x83c   : > { %v10094_v46 = vpop.trf.xlu0 }
 0x83d   : > { %v10915_v45 = vcombine.high %v10889_v43, %v10897_v4  ;;  %v10837_v12 = vrot.slane %v10830_v14, %v22934_v48  ;;  %v10914_v58 = vcombine.low %v10889_v43, %v10897_v4 }
 0x83e   : > { %v23235_v60 = vpop.trf.xlu1 }
 0x83f   : > { %v10929_v31 = vrot.slane %v10915_v45, %v22949_v16 }
 0x840   : > { %v10126_v15 = vpop.trf.xlu0 }
 0x841   : > { %v10898_v29 = vcombine.low %v10062_v10, %v10126_v15 }
 0x842   : > { %v10142_v7 = vpop.trf.xlu1 }
 0x843   : > { %v10838_v63 = vcombine.low %v10078_v25, %v10142_v7  ;;  %v10905_v14 = vrot.slane %v10898_v29, %v22934_v48 }
 0x844   : > { %v23237_v33 = vpop.trf.xlu0 }
 0x845   : > { %v10845_v27 = vrot.slane %v10838_v63, %v22934_v48 }
 0x846   : > { %v23241_v17 = vpop.trf.xlu1 }
 0x847   : > { %v10862_v3 = vcombine.low %v10837_v12, %v10845_v27  ;;  %v10863_v28 = vcombine.high %v10837_v12, %v10845_v27 }
 0x848   : > { %v10158_v56 = vpop.trf.xlu0 }
 0x849   : > { %v10870_v6 = vrot.slane %v10862_v3, %v22949_v16  ;;  %v10877_v47 = vrot.slane %v10863_v28, %v22949_v16  ;;  %v10906_v25 = vcombine.low %v10094_v46, %v10158_v56  ;;  %v10922_v56 = vrot.slane %v10914_v58, %v22949_v16 }
 0x84a   : > { %v10238_v5 = vpop.trf.xlu1 }
 0x84b   : > { %v10913_v7 = vrot.slane %v10906_v25, %v22934_v48  ;;  %v23249_v63 = vcombine.high %v10854_v13, %v10870_v6  ;;  %v23251_v15 = vcombine.low %v10861_v50, %v10877_v47  ;;  %v23253_v12 = vcombine.high %v10861_v50, %v10877_v47 }
 0x84c   : > { %v10222_v10 = vpop.trf.xlu0  ;;  %v10878_v28 = vcombine.low %v10854_v13, %v10870_v6 }
 0x84d   : > { %24612 = vst [vmem:[#allocation19_spill] sm:$0xff] %v23253_v12  ;;  %v10930_v18 = vcombine.low %v10905_v14, %v10913_v7  ;;  %v10931_v3 = vcombine.high %v10905_v14, %v10913_v7  ;;  %v11266_v13 = vshrl.u32 %v23249_v63, 16  ;;  %v11274_v45 = vshrl.u32 %v23251_v15, 16 }
 0x84e   : > { %v10302_v27 = vpop.trf.xlu1  ;;  %v11258_v50 = vshrl.u32 %v10878_v28, 16 }
 0x84f   : > { %v10938_v43 = vrot.slane %v10930_v18, %v22949_v16  ;;  %v10945_v4 = vrot.slane %v10931_v3, %v22949_v16 }
 0x850   : > { %v10254_v46 = vpop.trf.xlu0 }
 0x851   : > { %v10946_v29 = vcombine.low %v10922_v56, %v10938_v43  ;;  %v23259_v25 = vcombine.high %v10922_v56, %v10938_v43  ;;  %v23261_v0 = vcombine.low %v10929_v31, %v10945_v4  ;;  %v23263_v51 = vcombine.high %v10929_v31, %v10945_v4 }
 0x852   : > { %v10270_v47 = vpop.trf.xlu1  ;;  %v11282_v43 = vshrl.u32 %v23253_v12, 16 }
 0x853   : > { %24613 = vst [vmem:[#allocation20_spill] sm:$0xff] %v23263_v51  ;;  %v11256_v14 = vpack.i.b16 %v10946_v29, %v10878_v28  ;;  %v11259_v6 = vshrl.u32 %v10946_v29, 16  ;;  %v11267_v18 = vshrl.u32 %v23259_v25, 16  ;;  %v11275_v56 = vshrl.u32 %v23261_v0, 16 }
 0x854   : > { %v10318_v58 = vpop.trf.xlu0  ;;  %v11283_v4 = vshrl.u32 %v23263_v51, 16  ;;  %v10958_v30 = vcombine.low %v23241_v17, %v10270_v47 }
 0x855   : > { %17743 = vmatpush3.bf16.msra.mxu0 %v11256_v14  ;;  %v11260_v31 = vpack.i.b16 %v11259_v6, %v11258_v50  ;;  %v23278_v7 = vpack.i.b16 %v11267_v18, %v11266_v13  ;;  %v23280_v34 = vpack.i.b16 %v11275_v56, %v11274_v45  ;;  %v10950_v13 = vcombine.low %v23235_v60, %v10238_v5 }
 0x856   : > { %v10334_v29 = vpop.trf.xlu1  ;;  %17744 = vmatprep.subr.bf16.mxu0 %v24586_v24  ;;  %v23282_v3 = vpack.i.b16 %v11283_v4, %v11282_v43  ;;  %v23291_v43 = vrot.slane %v10958_v30, %v22934_v48 }
 0x857   : > { %17755 = vmatpush3.bf16.msra.mxu1 %v11260_v31  ;;  %v11018_v31 = vcombine.low %v23237_v33, %v10254_v46  ;;  %v23300_v17 = vrot.slane %v10950_v13, %v22934_v48 }
 0x858   : > { %24614 = vst [vmem:[#allocation21_spill] sm:$0xff] %v23282_v3  ;;  %v10286_v1 = vpop.trf.xlu0  ;;  %17756 = vmatprep.subr.bf16.mxu1 %v24586_v24 }
 0x859   : > { %v11026_v18 = vcombine.low %v10222_v10, %v10286_v1  ;;  %v23308_v30 = vrot.slane %v11018_v31, %v22934_v48 }
 0x85a   : > { %v10366_v50 = vpop.trf.xlu1 }
 0x85b   : > { %v10966_v23 = vcombine.low %v10302_v27, %v10366_v50  ;;  %v23303_v60 = vrot.slane %v11026_v18, %v22934_v48 }
 0x85c   : > { %v10350_v14 = vpop.trf.xlu0 }
 0x85d   : > { %v23294_v4 = vrot.slane %v10966_v23, %v22934_v48  ;;  %v10982_v23 = vcombine.low %v23300_v17, %v23291_v43  ;;  %v11050_v27 = vcombine.low %v23308_v30, %v23303_v60 }
 0x85e   : > { %v23285_v6 = vpop.trf.xlu1 }
 0x85f   : > { %v11058_v13 = vrot.slane %v11050_v27, %v22949_v16 }
 0x860   : > { %v10382_v28 = vpop.trf.xlu0 }
 0x862   : > { %v10398_v42 = vpop.trf.xlu1 }
 0x863   : > { %v10974_v45 = vcombine.low %v10334_v29, %v10398_v42  ;;  %v11034_v42 = vcombine.low %v10318_v58, %v10382_v28  ;;  %v23324_v29 = vrot.slane %v10982_v23, %v22949_v16 }
 0x864   : > { %v10446_v56 = vpop.trf.xlu0 }
 0x865   : > { %v23297_v24 = vrot.slane %v10974_v45, %v22934_v48  ;;  %v23315_v46 = vrot.slane %v11034_v42, %v22934_v48 }
 0x866   : > { %v10462_v21 = vpop.trf.xlu1 }
 0x867   : > { %v10998_v1 = vcombine.low %v23294_v4, %v23297_v24 }
 0x868   : > { %v10414_v33 = vpop.trf.xlu0 }
 0x869   : > { %v11042_v5 = vcombine.low %v10350_v14, %v10414_v33  ;;  %v23318_v47 = vrot.slane %v10998_v1, %v22949_v16 }
 0x86a   : > { %v10494_v10 = vpop.trf.xlu1 }
 0x86b   : > { %v23321_v58 = vrot.slane %v11042_v5, %v22934_v48  ;;  %v11014_v45 = vcombine.low %v23324_v29, %v23318_v47  ;;  %v11086_v54 = vcombine.low %v23285_v6, %v10494_v10 }
 0x86c   : > { %v10478_v28 = vpop.trf.xlu0 }
 0x86d   : > { %v11066_v50 = vcombine.low %v23315_v46, %v23321_v58  ;;  %v11290_v5 = vshrl.u32 %v11014_v45, 16 }
 0x86e   : > { %v10558_v14 = vpop.trf.xlu1 }
 0x86f   : > { %v11074_v18 = vrot.slane %v11066_v50, %v22949_v16 }
 0x870   : > { %v10510_v31 = vpop.trf.xlu0 }
 0x871   : > { %v11082_v42 = vcombine.low %v11058_v13, %v11074_v18 }
 0x872   : > { %v10526_v1 = vpop.trf.xlu1 }
 0x873   : > { %v11288_v33 = vpack.i.b16 %v11082_v42, %v11014_v45  ;;  %v11291_v59 = vshrl.u32 %v11082_v42, 16  ;;  %v11094_v51 = vcombine.low %v10462_v21, %v10526_v1 }
 0x874   : > { %v10574_v41 = vpop.trf.xlu0 }
 0x875   : > { %17745 = vmatpush3.bf16.msra.mxu0 %v11288_v33  ;;  %v11292_v23 = vpack.i.b16 %v11291_v59, %v11290_v5  ;;  %v11154_v33 = vcombine.low %v10446_v56, %v10510_v31  ;;  %v23339_v5 = vrot.slane %v11094_v51, %v22934_v48 }
 0x876   : > { %v10590_v20 = vpop.trf.xlu1  ;;  %17746 = vmatprep.subr.bf16.mxu0 %v24615_v32 }
 0x877   : > { %17757 = vmatpush3.bf16.msra.mxu1 %v11292_v23 }
 0x878   : > { %v10542_v3 = vpop.trf.xlu0  ;;  %17758 = vmatprep.subr.bf16.mxu1 %v24615_v32 }
 0x879   : > { %v11162_v9 = vcombine.low %v10478_v28, %v10542_v3 }
 0x87a   : > { %v10622_v27 = vpop.trf.xlu1 }
 0x87b   : > { %v11102_v50 = vcombine.low %v10558_v14, %v10622_v27  ;;  %v23345_v14 = vrot.slane %v11086_v54, %v22934_v48  ;;  %v23348_v21 = vrot.slane %v11162_v9, %v22934_v48 }
 0x87c   : > { %v10606_v12 = vpop.trf.xlu0 }
 0x87d   : > { %v23336_v45 = vrot.slane %v11102_v50, %v22934_v48  ;;  %v11118_v51 = vcombine.low %v23345_v14, %v23339_v5 }
 0x87e   : > { %v10654_v37 = vpop.trf.xlu1 }
 0x87f   : > { %v11110_v42 = vcombine.low %v10590_v20, %v10654_v37  ;;  %v23353_v20 = vrot.slane %v11154_v33, %v22934_v48  ;;  %v11126_v10 = vrot.slane %v11118_v51, %v22949_v16  ;;  %v24617_v51 = vpack.i.b16 %v23205_v19, %v23194_v44 }
 0x880   : > { %v10638_v59 = vpop.trf.xlu0  ;;  %v9066_v44 = vcombine.low %v23156_v26, %v23182_v35 }
 0x881   : > { %v23342_v23 = vrot.slane %v11110_v42, %v22934_v48  ;;  %v11170_v2 = vcombine.low %v10574_v41, %v10638_v59  ;;  %v11186_v54 = vcombine.low %v23353_v20, %v23348_v21 }
 0x883   : > { %v11134_v3 = vcombine.low %v23336_v45, %v23342_v23  ;;  %v23358_v37 = vrot.slane %v11170_v2, %v22934_v48  ;;  %v11194_v31 = vrot.slane %v11186_v54, %v22949_v16  ;;  %v9082_v54 = vcombine.low %v23166_v38, %v23175_v22 }
 0x884   : > { %v10670_v6 = vpop.trf.xlu0 }
 0x885   : > { %v11178_v41 = vcombine.low %v10606_v12, %v10670_v6  ;;  %v11142_v9 = vrot.slane %v11134_v3, %v22949_v16  ;;  %v24616_v6 = vpack.i.b16 %v22976_v53, %v22972_v49  ;;  %v11015_v53 = vcombine.high %v23324_v29, %v23318_v47 }
 0x887   : > { %v23364_v56 = vrot.slane %v11178_v41, %v22934_v48  ;;  %v11150_v2 = vcombine.low %v11126_v10, %v11142_v9  ;;  %v11083_v41 = vcombine.high %v11058_v13, %v11074_v18  ;;  %v9089_v13 = vrot.slane %v9082_v54, %v22934_v48 }
 0x888   : > { %v11298_v26 = vshrl.u32 %v11015_v53, 16  ;;  %v11151_v35 = vcombine.high %v11126_v10, %v11142_v9  ;;  %v9073_v18 = vrot.slane %v9066_v44, %v22934_v48  ;;  %v10999_v9 = vcombine.high %v23294_v4, %v23297_v24  ;;  %v24624_v44 = vld [vmem:[#allocation16_spill] sm:$0xff] }
 0x889   : > { %v11202_v28 = vcombine.low %v23358_v37, %v23364_v56  ;;  %v11322_v42 = vshrl.u32 %v11150_v2, 16  ;;  %v11299_v19 = vshrl.u32 %v11083_v41, 16  ;;  %v11296_v29 = vpack.i.b16 %v11083_v41, %v11015_v53  ;;  %v24623_v53 = vld [vmem:[#allocation17_spill] sm:$0xff] }
 0x88b   : > { %v11210_v1 = vrot.slane %v11202_v28, %v22949_v16 }
 0x88d   : > { %v11218_v27 = vcombine.low %v11194_v31, %v11210_v1 }
 0x88e   : > { %v9052_v12 = vpop.permute.xlu1 %9051 }
 0x88f   : > { %v11320_v50 = vpack.i.b16 %v11218_v27, %v11150_v2  ;;  %v11323_v59 = vshrl.u32 %v11218_v27, 16 }
 0x891   : > { %17747 = vmatpush3.bf16.msra.mxu0 %v11320_v50  ;;  %v11324_v33 = vpack.i.b16 %v11323_v59, %v11322_v42 }
 0x892   : > { %v9060_v3 = vpop.permute.xlu1 %9059  ;;  %17764 = vmatprep.subr.bf16.mxu0 %v24615_v32 }
 0x893   : > { %17759 = vmatpush3.bf16.msra.mxu1 %v11324_v33  ;;  %v11013_v33 = vrot.slane %v10999_v9, %v22949_v16  ;;  %v24633_v9 = vld [vmem:[#allocation11_spill] sm:$0xff] }
 0x894   : > { %17749 = vmatmul.mubr.msk.bf16.vlgmr.msra.gmra.mrb[32].mxu0 %vm11350_vm5, %v24616_v6  ;;  %17776 = vmatprep.subr.bf16.mxu1 %v24615_v32 }
 0x895   : > { %17765 = vmatpush3.bf16.msra.mxu0 %v24617_v51  ;;  %17772 = vmatprep.mubr.msk.bf16.mxu0 %vm19440_vm4, %v24615_v32  ;;  %v24620_v51 = vpack.i.b16 %v23207_v61, %v23196_v52 }
 0x896   : > { %v9064_v28 = vpop.permute.xlu1 %9063  ;;  %17761 = vmatmul.mubr.msk.bf16.vlgmr.msra.gmra.mrb[32].mxu1 %vm11350_vm5, %v23004_v62  ;;  %17766 = vmatprep.subr.bf16.mxu0 %v24615_v32  ;;  %v24618_v62 = vpack.i.b16 %v23259_v25, %v23249_v63  ;;  %v11300_v63 = vpack.i.b16 %v11299_v19, %v11298_v26  ;;  %v24627_v19 = vld [vmem:[#allocation18_spill] sm:$0xff] }
 0x897   : > { %v9090_v49 = vcombine.low %v9060_v3, %v9064_v28  ;;  %17777 = vmatpush3.bf16.msra.mxu1 %v23225_v11  ;;  %17784 = vmatprep.mubr.msk.bf16.mxu1 %vm19440_vm4, %v24615_v32  ;;  %v11219_v11 = vcombine.high %v11194_v31, %v11210_v1  ;;  %v11067_v31 = vcombine.high %v23315_v46, %v23321_v58 }
 0x898   : > { %17778 = vmatprep.subr.bf16.mxu1 %v24615_v32  ;;  %v10983_v46 = vcombine.high %v23300_v17, %v23291_v43  ;;  %v11187_v3 = vcombine.high %v23353_v20, %v23348_v21  ;;  %v11135_v43 = vcombine.high %v23336_v45, %v23342_v23  ;;  %v24619_v17 = vpack.i.b16 %v22994_v8, %v22990_v57 }
 0x899   : > { %v9097_v38 = vrot.slane %v9090_v49, %v22934_v48  ;;  %v9056_v22 = vpop.permute.xlu0 %9055  ;;  %17767 = vmatpush3.bf16.msra.mxu0 %v24618_v62  ;;  %v11331_v25 = vshrl.u32 %v11219_v11, 16  ;;  %v11328_v10 = vpack.i.b16 %v11219_v11, %v11151_v35  ;;  %v11081_v59 = vrot.slane %v11067_v31, %v22949_v16  ;;  %v24626_v62 = vld [vmem:[#allocation12_spill] sm:$0xff]  ;;  %v24629_v11 = vld [vmem:[#allocation19_spill] sm:$0xff] }
 0x89a   : > { %v9074_v47 = vcombine.low %v9052_v12, %v9056_v22  ;;  %17768 = vmatprep.subr.bf16.mxu0 %v24615_v32  ;;  %v11330_v12 = vshrl.u32 %v11151_v35, 16  ;;  %v10997_v6 = vrot.slane %v10983_v46, %v22949_v16  ;;  %v11119_v45 = vcombine.high %v23345_v14, %v23339_v5  ;;  %v24631_v35 = vld [vmem:[#allocation21_spill] sm:$0xff] }
 0x89b   : > { %17779 = vmatpush3.bf16.msra.mxu1 %v23278_v7  ;;  %v9106_v2 = vcombine.low %v9089_v13, %v9097_v38  ;;  %v11051_v7 = vcombine.high %v23308_v30, %v23303_v60  ;;  %v11203_v60 = vcombine.high %v23358_v37, %v23364_v56  ;;  %v11201_v23 = vrot.slane %v11187_v3, %v22949_v16  ;;  %v24636_v3 = vld [vmem:[#allocation15_spill] sm:$0xff] }
 0x89c   : > { %v9081_v27 = vrot.slane %v9074_v47, %v22934_v48  ;;  %17780 = vmatprep.subr.bf16.mxu1 %v24615_v32  ;;  %v11332_v58 = vpack.i.b16 %v11331_v25, %v11330_v12  ;;  %v11149_v52 = vrot.slane %v11135_v43, %v22949_v16  ;;  %v11016_v61 = vcombine.low %v10997_v6, %v11013_v33  ;;  %v24635_v12 = vld [vmem:[#allocation14_spill] sm:$0xff] }
 0x89d   : > { %17769 = vmatpush3.bf16.msra.mxu0 %v11296_v29  ;;  %v9113_v42 = vrot.slane %v9106_v2, %v22949_v16  ;;  %v11065_v30 = vrot.slane %v11051_v7, %v22949_v16  ;;  %v11217_v57 = vrot.slane %v11203_v60, %v22949_v16  ;;  %v24621_v5 = vpack.i.b16 %v23261_v0, %v23251_v15  ;;  %v24632_v7 = vld [vmem:[#allocation13_spill] sm:$0xff] }
 0x89e   : > { %v9098_v1 = vcombine.low %v9073_v18, %v9081_v27  ;;  %17770 = vmatprep.subr.bf16.mxu0 %v24615_v32  ;;  %v24625_v38 = vpack.i.b16 %v24623_v53, %v24624_v44 }
 0x89f   : > { %17781 = vmatpush3.bf16.msra.mxu1 %v11300_v63  ;;  %v11084_v8 = vcombine.low %v11065_v30, %v11081_v59  ;;  %v11220_v21 = vcombine.low %v11201_v23, %v11217_v57  ;;  %v11085_v22 = vcombine.high %v11065_v30, %v11081_v59  ;;  %v11221_v29 = vcombine.high %v11201_v23, %v11217_v57 }
 0x8a0   : > { %17782 = vmatprep.subr.bf16.mxu1 %v24615_v32  ;;  %v9105_v50 = vrot.slane %v9098_v1, %v22949_v16 }
 0x8a1   : > { %17771 = vmatpush3.bf16.msra.mxu0 %v11328_v10  ;;  %v11307_v14 = vshrl.u32 %v11084_v8, 16  ;;  %v11304_v20 = vpack.i.b16 %v11084_v8, %v11016_v61  ;;  %v11339_v0 = vshrl.u32 %v11220_v21, 16  ;;  %v11315_v47 = vshrl.u32 %v11085_v22, 16 }
 0x8a2   : > { %17788 = vmatprep.subr.bf16.mxu0 %v24615_v32  ;;  %v9115_v24 = vcombine.high %v9105_v50, %v9113_v42  ;;  %v9114_v4 = vcombine.low %v9105_v50, %v9113_v42  ;;  %v11347_v63 = vshrl.u32 %v11221_v29, 16  ;;  %v24634_v10 = vpack.i.b16 %v24632_v7, %v24633_v9 }
 0x8a3   : > { %17783 = vmatpush3.bf16.msra.mxu1 %v11332_v58 }
 0x8a4   : > { %17773 = vmatmul.mubr.msk.bf16.vlgmr.msra.gmra.mrb[36].mxu0 %vm11350_vm5, %v24619_v17  ;;  %v9117_v37 = vpack.c.bf16 %v9115_v24, %v9115_v24  ;;  %v9116_v56 = vpack.c.bf16 %v9114_v4, %v9114_v4  ;;  %17800 = vmatprep.subr.bf16.mxu1 %v24615_v32  ;;  %v24637_v17 = vmov 0  }
 0x8a5   : > { %17789 = vmatpush3.bf16.msra.mxu0 %v24620_v51  ;;  %17796 = vmatprep.mubr.msk.bf16.mxu0 %vm19440_vm4, %v24615_v32 }
 0x8a6   : > { %11808 = vxpose.xlu0.c.b16.start.end [1/1] (short) (narrow) %v9117_v37, 64  ;;  %11792 = vxpose.xlu1.c.b16.start.end [1/1] (short) (narrow) %v9116_v56, 64 }
 0x8a7   : > { %17785 = vmatmul.mubr.msk.bf16.vlgmr.msra.gmra.mrb[36].mxu1 %vm11350_vm5, %v23017_v55  ;;  %17790 = vmatprep.subr.bf16.mxu0 %v24615_v32  ;;  %v11133_v55 = vrot.slane %v11119_v45, %v22949_v16 }
 0x8a8   : > { %17801 = vmatpush3.bf16.msra.mxu1 %v23227_v36  ;;  %17808 = vmatprep.mubr.msk.bf16.mxu1 %vm19440_vm4, %v24615_v32  ;;  %v11306_v36 = vshrl.u32 %v11016_v61, 16 }
 0x8a9   : > { %17791 = vmatpush3.bf16.msra.mxu0 %v24621_v5  ;;  %17802 = vmatprep.subr.bf16.mxu1 %v24615_v32  ;;  %v11152_v41 = vcombine.low %v11133_v55, %v11149_v52  ;;  %v11153_v2 = vcombine.high %v11133_v55, %v11149_v52 }
 0x8aa   : > { %17792 = vmatprep.subr.bf16.mxu0 %v24615_v32  ;;  %v11308_v54 = vpack.i.b16 %v11307_v14, %v11306_v36 }
 0x8ab   : > { %v11336_v15 = vpack.i.b16 %v11220_v21, %v11152_v41  ;;  %v11338_v28 = vshrl.u32 %v11152_v41, 16  ;;  %v11344_v25 = vpack.i.b16 %v11221_v29, %v11153_v2  ;;  %v11346_v31 = vshrl.u32 %v11153_v2, 16 }
 0x8ac   : > { %17803 = vmatpush3.bf16.msra.mxu1 %v23280_v34  ;;  %v24622_v34 = vpack.i.b16 %v22982_v40, %v22979_v39  ;;  %v11017_v39 = vcombine.high %v10997_v6, %v11013_v33  ;;  %v24628_v40 = vld [vmem:[#allocation20_spill] sm:$0xff] }
 0x8ad   : > { %17793 = vmatpush3.bf16.msra.mxu0 %v11304_v20  ;;  %17804 = vmatprep.subr.bf16.mxu1 %v24615_v32  ;;  %v11340_v49 = vpack.i.b16 %v11339_v0, %v11338_v28  ;;  %v24630_v13 = vpack.i.b16 %v24628_v40, %v24629_v11  ;;  %v11348_v1 = vpack.i.b16 %v11347_v63, %v11346_v31 }
 0x8ae   : > { %17794 = vmatprep.subr.bf16.mxu0 %v24615_v32  ;;  %v11312_v26 = vpack.i.b16 %v11085_v22, %v11017_v39  ;;  %v11314_v18 = vshrl.u32 %v11017_v39, 16 }
 0x8b0   : > { %17805 = vmatpush3.bf16.msra.mxu1 %v11308_v54  ;;  %v11316_v27 = vpack.i.b16 %v11315_v47, %v11314_v18 }
 0x8b1   : > { %17795 = vmatpush3.bf16.msra.mxu0 %v11336_v15  ;;  %17806 = vmatprep.subr.bf16.mxu1 %v24615_v32 }
 0x8b2   : > { %17812 = vmatprep.subr.bf16.mxu0 %v24615_v32 }
 0x8b4   : > { %17807 = vmatpush3.bf16.msra.mxu1 %v11340_v49  ;;  %17797 = vmatmul.mubr.msk.bf16.vlgmr.msra.gmra.mrb[40].mxu0 %vm11350_vm5, %v24622_v34 }
 0x8b5   : > { %17813 = vmatpush3.bf16.msra.mxu0 %v24625_v38  ;;  %17824 = vmatprep.subr.bf16.mxu1 %v24615_v32 }
 0x8b6   : > { %17814 = vmatprep.subr.bf16.mxu0 %v24615_v32  ;;  %17820 = vmatprep.mubr.msk.bf16.mxu0 %vm19440_vm4, %v24615_v32 }
 0x8b7   : > { %17809 = vmatmul.mubr.msk.bf16.vlgmr.msra.gmra.mrb[40].mxu1 %vm11350_vm5, %v24626_v62 }
 0x8b8   : > { %17825 = vmatpush3.bf16.msra.mxu1 %v24627_v19  ;;  %17832 = vmatprep.mubr.msk.bf16.mxu1 %vm19440_vm4, %v24615_v32 }
 0x8b9   : > { %17815 = vmatpush3.bf16.msra.mxu0 %v24630_v13  ;;  %17826 = vmatprep.subr.bf16.mxu1 %v24615_v32 }
 0x8ba   : > { %17816 = vmatprep.subr.bf16.mxu0 %v24615_v32 }
 0x8bc   : > { %17827 = vmatpush3.bf16.msra.mxu1 %v24631_v35 }
 0x8bd   : > { %17817 = vmatpush3.bf16.msra.mxu0 %v11312_v26  ;;  %17828 = vmatprep.subr.bf16.mxu1 %v24615_v32 }
 0x8be   : > { %17818 = vmatprep.subr.bf16.mxu0 %v24615_v32 }
 0x8c0   : > { %17829 = vmatpush3.bf16.msra.mxu1 %v11316_v27 }
 0x8c1   : > { %17819 = vmatpush3.bf16.msra.mxu0 %v11344_v25  ;;  %17830 = vmatprep.subr.bf16.mxu1 %v24615_v32 }
 0x8c4   : > { %17831 = vmatpush3.bf16.msra.mxu1 %v11348_v1  ;;  %17821 = vmatmul.mubr.msk.bf16.vlgmr.msra.gmra.mrb[44].mxu0 %vm11350_vm5, %v24634_v10 }
 0x8c7   : > { %17833 = vmatmul.mubr.msk.bf16.vlgmr.msra.gmra.mrb[44].mxu1 %vm11350_vm5, %v24635_v12 }
 0x90c   : > { %v11816_v50 = vpop.trf.xlu0  ;;  %v11800_v42 = vpop.trf.xlu1 }
 0x90d   : > { %v11829_v46 = vshrl.u32 %v11816_v50, 16  ;;  %v11826_v58 = vpack.i.b16 %v11816_v50, %v11800_v42  ;;  %v11828_v59 = vshrl.u32 %v11800_v42, 16 }
 0x90f   : > { %v11830_v60 = vpack.i.b16 %v11829_v46, %v11828_v59  ;;  %v11863_v24 = vrot.slane %v11826_v58, %v22934_v48  ;;  %v11856_v43 = vcombine.high %v11826_v58, %v24636_v3 }
 0x910   : > { %v11817_v5 = vpop.trf.xlu0  ;;  %v11801_v55 = vpop.trf.xlu1 }
 0x911   : > { %v11878_v4 = vrot.slane %v11863_v24, %v22949_v16  ;;  %v11912_v30 = vrot.slane %v11830_v60, %v22934_v48  ;;  %v11871_v56 = vcombine.high %v11863_v24, %v24637_v17  ;;  %v11905_v6 = vcombine.high %v11830_v60, %v24636_v3 }
 0x912   : > { %v11870_v57 = vrot.slane %v11856_v43, %v22934_v48  ;;  %v11837_v20 = vshrl.u32 %v11817_v5, 16  ;;  %v11836_v36 = vshrl.u32 %v11801_v55, 16  ;;  %v11834_v54 = vpack.i.b16 %v11817_v5, %v11801_v55 }
 0x913   : > { %12248 = vxpose.xlu1.c.b16.start.end [1/1] (short) (narrow) %v11878_v4, 16  ;;  %v11927_v33 = vrot.slane %v11912_v30, %v22949_v16  ;;  %v11901_v37 = vcombine.high %v11878_v4, %v24637_v17  ;;  %v11920_v45 = vcombine.high %v11912_v30, %v24637_v17  ;;  %v11885_v8 = vrot.slane %v11871_v56, %v22949_v16 }
 0x914   : > { %v11919_v52 = vrot.slane %v11905_v6, %v22934_v48  ;;  %v11893_v61 = vrot.slane %v11870_v57, %v22949_v16  ;;  %v11838_v15 = vpack.i.b16 %v11837_v20, %v11836_v36  ;;  %v11886_v28 = vcombine.high %v11870_v57, %v24637_v17  ;;  %v11818_v31 = vpop.trf.xlu0  ;;  %v11802_v1 = vpop.trf.xlu1 }
 0x915   : > { %12264 = vxpose.xlu0.c.b16.start.end [1/1] (short) (narrow) %v11927_v33, 16  ;;  %v11950_v51 = vcombine.high %v11927_v33, %v24637_v17  ;;  %v11934_v23 = vrot.slane %v11920_v45, %v22949_v16  ;;  %v11902_v21 = vcombine.high %v11885_v8, %v24637_v17  ;;  %v11961_v49 = vrot.slane %v11834_v54, %v22934_v48 }
 0x916   : > { %v11942_v14 = vrot.slane %v11919_v52, %v22949_v16  ;;  %v11903_v0 = vcombine.high %v11893_v61, %v24637_v17  ;;  %v11935_v53 = vcombine.high %v11919_v52, %v24637_v17  ;;  %v12010_v44 = vrot.slane %v11838_v15, %v22934_v48 }
 0x917   : > { %12280 = vxpose.xlu1.c.b16.start.end [1/1] (short) (narrow) %v11901_v37, 16  ;;  %v11951_v41 = vcombine.high %v11934_v23, %v24637_v17  ;;  %v11900_v38 = vrot.slane %v11886_v28, %v22949_v16  ;;  %v11976_v62 = vrot.slane %v11961_v49, %v22949_v16  ;;  %v11954_v11 = vcombine.high %v11834_v54, %v24636_v3 }
 0x918   : > { %v11952_v34 = vcombine.high %v11942_v14, %v24637_v17  ;;  %v11949_v22 = vrot.slane %v11935_v53, %v22949_v16  ;;  %v12025_v19 = vrot.slane %v12010_v44, %v22949_v16  ;;  %v11969_v13 = vcombine.high %v11961_v49, %v24637_v17  ;;  %v11819_v36 = vpop.trf.xlu0 }
 0x919   : > { %12296 = vxpose.xlu0.c.b16.start.end [1/1] (short) (narrow) %v11950_v51, 16  ;;  %v11904_v39 = vcombine.high %v11900_v38, %v24637_v17  ;;  %v11999_v47 = vcombine.high %v11976_v62, %v24637_v17  ;;  %v12003_v29 = vcombine.high %v11838_v15, %v24636_v3  ;;  %v12018_v35 = vcombine.high %v12010_v44, %v24637_v17 }
 0x91a   : > { %v11953_v40 = vcombine.high %v11949_v22, %v24637_v17  ;;  %v12048_v26 = vcombine.high %v12025_v19, %v24637_v17  ;;  %v11968_v18 = vrot.slane %v11954_v11, %v22934_v48  ;;  %v11983_v2 = vrot.slane %v11969_v13, %v22949_v16 }
 0x91b   : > { %12312 = vxpose.xlu1.c.b16.start.end [1/1] (short) (narrow) %v11885_v8, 16  ;;  %v12032_v27 = vrot.slane %v12018_v35, %v22949_v16  ;;  %v12017_v63 = vrot.slane %v12003_v29, %v22934_v48  ;;  %v11845_v10 = vshrl.u32 %v11818_v31, 16  ;;  %v11844_v12 = vshrl.u32 %v11802_v1, 16 }
 0x91c   : > { %v11991_v25 = vrot.slane %v11968_v18, %v22949_v16  ;;  %v12000_v9 = vcombine.high %v11983_v2, %v24637_v17  ;;  %v11842_v42 = vpack.i.b16 %v11818_v31, %v11802_v1  ;;  %v11984_v59 = vcombine.high %v11968_v18, %v24637_v17 }
 0x91d   : > { %12328 = vxpose.xlu0.c.b16.start.end [1/1] (short) (narrow) %v11934_v23, 16  ;;  %v12040_v7 = vrot.slane %v12017_v63, %v22949_v16  ;;  %v12049_v50 = vcombine.high %v12032_v27, %v24637_v17  ;;  %v11846_v58 = vpack.i.b16 %v11845_v10, %v11844_v12  ;;  %v12033_v4 = vcombine.high %v12017_v63, %v24637_v17 }
 0x91e   : > { %v12001_v46 = vcombine.high %v11991_v25, %v24637_v17  ;;  %v12059_v60 = vrot.slane %v11842_v42, %v22934_v48  ;;  %v11998_v33 = vrot.slane %v11984_v59, %v22949_v16  ;;  %v12052_v45 = vcombine.high %v11842_v42, %v24636_v3 }
 0x91f   : > { %12376 = vxpose.xlu1.c.b16.start.end [1/1] (short) (narrow) %v11893_v61, 16  ;;  %v12050_v24 = vcombine.high %v12040_v7, %v24637_v17  ;;  %v12108_v30 = vrot.slane %v11846_v58, %v22934_v48  ;;  %v12047_v43 = vrot.slane %v12033_v4, %v22949_v16  ;;  %v12101_v23 = vcombine.high %v11846_v58, %v24636_v3 }
 0x920   : > { %v12074_v37 = vrot.slane %v12059_v60, %v22949_v16  ;;  %v12002_v6 = vcombine.high %v11998_v33, %v24637_v17  ;;  %v12067_v57 = vcombine.high %v12059_v60, %v24637_v17  ;;  %v12066_v5 = vrot.slane %v12052_v45, %v22934_v48 }
 0x921   : > { %12392 = vxpose.xlu0.c.b16.start.end [1/1] (short) (narrow) %v11942_v14, 16  ;;  %v12123_v56 = vrot.slane %v12108_v30, %v22949_v16  ;;  %v12051_v51 = vcombine.high %v12047_v43, %v24637_v17  ;;  %v12116_v61 = vcombine.high %v12108_v30, %v24637_v17  ;;  %v11853_v15 = vshrl.u32 %v11819_v36, 16 }
 0x922   : > { %v12097_v8 = vcombine.high %v12074_v37, %v24637_v17  ;;  %v12081_v55 = vrot.slane %v12067_v57, %v22949_v16  ;;  %v12089_v20 = vrot.slane %v12066_v5, %v22949_v16 }
 0x923   : > { %12344 = vxpose.xlu1.c.b16.start.end [1/1] (short) (narrow) %v11902_v21, 16  ;;  %v12146_v52 = vcombine.high %v12123_v56, %v24637_v17  ;;  %v12130_v14 = vrot.slane %v12116_v61, %v22949_v16  ;;  %v12115_v21 = vrot.slane %v12101_v23, %v22934_v48 }
 0x924   : > { %v12099_v53 = vcombine.high %v12089_v20, %v24637_v17 }
 0x925   : > { %12360 = vxpose.xlu0.c.b16.start.end [1/1] (short) (narrow) %v11951_v41, 16  ;;  %v11803_v41 = vpop.trf.xlu1  ;;  %v12138_v54 = vrot.slane %v12115_v21, %v22949_v16  ;;  %v12147_v49 = vcombine.high %v12130_v14, %v24637_v17 }
 0x926   : > { %v11852_v28 = vshrl.u32 %v11803_v41, 16 }
 0x927   : > { %12408 = vxpose.xlu1.c.b16.start.end [1/1] (short) (narrow) %v11903_v0, 16  ;;  %v12098_v0 = vcombine.high %v12081_v55, %v24637_v17 }
 0x928   : > { %v11854_v44 = vpack.i.b16 %v11853_v15, %v11852_v28 }
 0x929   : > { %12424 = vxpose.xlu0.c.b16.start.end [1/1] (short) (narrow) %v11952_v34, 16  ;;  %v11850_v34 = vpack.i.b16 %v11819_v36, %v11803_v41 }
 0x92a   : > { %v12206_v11 = vrot.slane %v11854_v44, %v22934_v48  ;;  %v12199_v12 = vcombine.high %v11854_v44, %v24636_v3 }
 0x92b   : > { %12440 = vxpose.xlu1.c.b16.start.end [1/1] (short) (narrow) %v11900_v38, 16  ;;  %v12082_v38 = vcombine.high %v12066_v5, %v24637_v17 }
 0x92d   : > { %12456 = vxpose.xlu0.c.b16.start.end [1/1] (short) (narrow) %v11949_v22, 16  ;;  %v12096_v29 = vrot.slane %v12082_v38, %v22949_v16 }
 0x92f   : > { %12504 = vxpose.xlu1.c.b16.start.end [1/1] (short) (narrow) %v11976_v62, 16  ;;  %v12157_v62 = vrot.slane %v11850_v34, %v22934_v48  ;;  %v12100_v31 = vcombine.high %v12096_v29, %v24637_v17 }
 0x931   : > { %12520 = vxpose.xlu0.c.b16.start.end [1/1] (short) (narrow) %v12025_v19, 16  ;;  %v12148_v19 = vcombine.high %v12138_v54, %v24637_v17 }
 0x933   : > { %12472 = vxpose.xlu1.c.b16.start.end [1/1] (short) (narrow) %v11904_v39, 16  ;;  %v12131_v39 = vcombine.high %v12115_v21, %v24637_v17 }
 0x935   : > { %12488 = vxpose.xlu0.c.b16.start.end [1/1] (short) (narrow) %v11953_v40, 16 }
 0x937   : > { %12536 = vxpose.xlu1.c.b16.start.end [1/1] (short) (narrow) %v11999_v47, 16 }
 0x939   : > { %12552 = vxpose.xlu0.c.b16.start.end [1/1] (short) (narrow) %v12048_v26, 16 }
 0x93b   : > { %12568 = vxpose.xlu1.c.b16.start.end [1/1] (short) (narrow) %v11983_v2, 16  ;;  %v12145_v2 = vrot.slane %v12131_v39, %v22949_v16 }
 0x93d   : > { %12584 = vxpose.xlu0.c.b16.start.end [1/1] (short) (narrow) %v12032_v27, 16  ;;  %v12172_v27 = vrot.slane %v12157_v62, %v22949_v16  ;;  %v12149_v1 = vcombine.high %v12145_v2, %v24637_v17 }
 0x93f   : > { %12632 = vxpose.xlu1.c.b16.start.end [1/1] (short) (narrow) %v11991_v25, 16  ;;  %v12221_v25 = vrot.slane %v12206_v11, %v22949_v16  ;;  %v12195_v10 = vcombine.high %v12172_v27, %v24637_v17 }
 0x941   : > { %12648 = vxpose.xlu0.c.b16.start.end [1/1] (short) (narrow) %v12040_v7, 16  ;;  %v12150_v7 = vcombine.high %v11850_v34, %v24636_v3  ;;  %v12244_v42 = vcombine.high %v12221_v25, %v24637_v17 }
 0x943   : > { %12600 = vxpose.xlu1.c.b16.start.end [1/1] (short) (narrow) %v12000_v9, 16  ;;  %v12165_v9 = vcombine.high %v12157_v62, %v24637_v17  ;;  %v23586_v59 = vrot.slane %v12150_v7, %v22934_v48 }
 0x945   : > { %12616 = vxpose.xlu0.c.b16.start.end [1/1] (short) (narrow) %v12049_v50, 16  ;;  %v23597_v45 = vrot.slane %v23586_v59, %v22949_v16 }
 0x947   : > { %12664 = vxpose.xlu1.c.b16.start.end [1/1] (short) (narrow) %v12001_v46, 16  ;;  %v12214_v46 = vcombine.high %v12206_v11, %v24637_v17 }
 0x949   : > { %12680 = vxpose.xlu0.c.b16.start.end [1/1] (short) (narrow) %v12050_v24, 16  ;;  %v12179_v24 = vrot.slane %v12165_v9, %v22949_v16 }
 0x94b   : > { %12696 = vxpose.xlu1.c.b16.start.end [1/1] (short) (narrow) %v11998_v33, 16 }
 0x94d   : > { %12712 = vxpose.xlu0.c.b16.start.end [1/1] (short) (narrow) %v12047_v43, 16  ;;  %v12228_v43 = vrot.slane %v12214_v46, %v22949_v16 }
 0x94f   : > { %12760 = vxpose.xlu1.c.b16.start.end [1/1] (short) (narrow) %v12074_v37, 16  ;;  %v23593_v37 = vrot.slane %v12199_v12, %v22934_v48  ;;  %v12245_v5 = vcombine.high %v12228_v43, %v24637_v17 }
 0x951   : > { %12776 = vxpose.xlu0.c.b16.start.end [1/1] (short) (narrow) %v12123_v56, 16 }
 0x953   : > { %12728 = vxpose.xlu1.c.b16.start.end [1/1] (short) (narrow) %v12002_v6, 16 }
 0x955   : > { %12744 = vxpose.xlu0.c.b16.start.end [1/1] (short) (narrow) %v12051_v51, 16 }
 0x957   : > { %12792 = vxpose.xlu1.c.b16.start.end [1/1] (short) (narrow) %v12097_v8, 16  ;;  %v23602_v8 = vrot.slane %v23593_v37, %v22949_v16 }
 0x959   : > { %12808 = vxpose.xlu0.c.b16.start.end [1/1] (short) (narrow) %v12146_v52, 16  ;;  %v12196_v52 = vcombine.high %v12179_v24, %v24637_v17 }
 0x95b   : > { %12824 = vxpose.xlu1.c.b16.start.end [1/1] (short) (narrow) %v12081_v55, 16 }
 0x95d   : > { %12840 = vxpose.xlu0.c.b16.start.end [1/1] (short) (narrow) %v12130_v14, 16 }
 0x95f   : > { %12888 = vxpose.xlu1.c.b16.start.end [1/1] (short) (narrow) %v12089_v20, 16 }
 0x961   : > { %12904 = vxpose.xlu0.c.b16.start.end [1/1] (short) (narrow) %v12138_v54, 16 }
 0x963   : > { %12856 = vxpose.xlu1.c.b16.start.end [1/1] (short) (narrow) %v12098_v0, 16 }
 0x965   : > { %12872 = vxpose.xlu0.c.b16.start.end [1/1] (short) (narrow) %v12147_v49, 16 }
 0x967   : > { %12920 = vxpose.xlu1.c.b16.start.end [1/1] (short) (narrow) %v12099_v53, 16  ;;  %v23563_v22 = vpop.f32.mrb[32].mxu0 }
 0x968   : > { %v17750_v40 = vpop.f32.mrb[33].mxu0 }
 0x969   : > { %12936 = vxpose.xlu0.c.b16.start.end [1/1] (short) (narrow) %v12148_v19, 16  ;;  %v11391_v13 = vpop.f32.mrb[34].mxu0  ;;  %v23569_v47 = vpop.f32.mrb[32].mxu1 }
 0x96a   : > { %v17751_v26 = vpop.f32.mrb[35].mxu0  ;;  %v17762_v35 = vpop.f32.mrb[33].mxu1 }
 0x96b   : > { %12952 = vxpose.xlu1.c.b16.start.end [1/1] (short) (narrow) %v12096_v29, 16  ;;  %v11434_v18 = vpop.f32.mrb[34].mxu1  ;;  %v11696_v35 = vsel %vm11695_vm6, %v23563_v22, -inf }
 0x96c   : > { %v17763_v63 = vpop.f32.mrb[35].mxu1 }
 0x96d   : > { %12968 = vxpose.xlu0.c.b16.start.end [1/1] (short) (narrow) %v12145_v2, 16 }
 0x96f   : > { %13016 = vxpose.xlu1.c.b16.start.end [1/1] (short) (narrow) %v12172_v27, 16  ;;  %v11699_v27 = vsel %vm11695_vm6, %v23569_v47, -inf }
 0x971   : > { %13032 = vxpose.xlu0.c.b16.start.end [1/1] (short) (narrow) %v12221_v25, 16 }
 0x973   : > { %12984 = vxpose.xlu1.c.b16.start.end [1/1] (short) (narrow) %v12100_v31, 16 }
 0x975   : > { %13000 = vxpose.xlu0.c.b16.start.end [1/1] (short) (narrow) %v12149_v1, 16 }
 0x977   : > { %13048 = vxpose.xlu1.c.b16.start.end [1/1] (short) (narrow) %v12195_v10, 16  ;;  %v23581_v50 = vpop.f32.mrb[36].mxu0 }
 0x978   : > { %v17774_v58 = vpop.f32.mrb[37].mxu0 }
 0x979   : > { %13064 = vxpose.xlu0.c.b16.start.end [1/1] (short) (narrow) %v12244_v42, 16  ;;  %v11477_v60 = vpop.f32.mrb[38].mxu0  ;;  %v12256_v4 = vpop.trf.xlu1 }
 0x97a   : > { %v23589_v30 = vpop.f32.mrb[36].mxu1  ;;  %v17775_v33 = vpop.f32.mrb[39].mxu0 }
 0x97b   : > { %v17786_v3 = vpop.f32.mrb[37].mxu1  ;;  %13080 = vxpose.xlu1.c.b16.start.end [1/1] (short) (narrow) %v12179_v24, 16  ;;  %v12272_v56 = vpop.trf.xlu0  ;;  %v11705_v25 = vsel %vm11695_vm6, %v23589_v30, -inf }
 0x97c   : > { %v11520_v6 = vpop.f32.mrb[38].mxu1 }
 0x97d   : > { %v17787_v51 = vpop.f32.mrb[39].mxu1  ;;  %13096 = vxpose.xlu0.c.b16.start.end [1/1] (short) (narrow) %v12228_v43, 16  ;;  %v12288_v57 = vpop.trf.xlu1 }
 0x97f   : > { %13144 = vxpose.xlu1.c.b16.start.end [1/1] (short) (narrow) %v23597_v45, 16  ;;  %v12304_v23 = vpop.trf.xlu0 }
 0x981   : > { %13160 = vxpose.xlu0.c.b16.start.end [1/1] (short) (narrow) %v23602_v8, 16  ;;  %v12320_v61 = vpop.trf.xlu1 }
 0x982   : > { %v13272_v21 = vcombine.low %v12256_v4, %v12320_v61 }
 0x983   : > { %13112 = vxpose.xlu1.c.b16.start.end [1/1] (short) (narrow) %v12196_v52, 16  ;;  %v12336_v55 = vpop.trf.xlu0 }
 0x984   : > { %v13340_v54 = vcombine.low %v12272_v56, %v12336_v55  ;;  %v13279_v34 = vrot.slane %v13272_v21, %v22934_v48 }
 0x985   : > { %13128 = vxpose.xlu0.c.b16.start.end [1/1] (short) (narrow) %v12245_v5, 16  ;;  %v12384_v14 = vpop.trf.xlu1 }
 0x986   : > { %v13347_v19 = vrot.slane %v13340_v54, %v22934_v48 }
 0x987   : > { %v23607_v20 = vpop.f32.mrb[40].mxu0  ;;  %v12400_v36 = vpop.trf.xlu0 }
 0x988   : > { %v17798_v41 = vpop.f32.mrb[41].mxu0 }
 0x989   : > { %v11563_v0 = vpop.f32.mrb[42].mxu0  ;;  %v12352_v15 = vpop.trf.xlu1 }
 0x98a   : > { %v23609_v28 = vpop.f32.mrb[40].mxu1  ;;  %v17799_v49 = vpop.f32.mrb[43].mxu0  ;;  %v13280_v53 = vcombine.low %v12288_v57, %v12352_v15 }
 0x98b   : > { %v17810_v44 = vpop.f32.mrb[41].mxu1  ;;  %v12368_v38 = vpop.trf.xlu0 }
 0x98c   : > { %v11606_v62 = vpop.f32.mrb[42].mxu1  ;;  %v13287_v39 = vrot.slane %v13280_v53, %v22934_v48  ;;  %v13348_v40 = vcombine.low %v12304_v23, %v12368_v38 }
 0x98d   : > { %v17811_v11 = vpop.f32.mrb[43].mxu1  ;;  %v12416_v13 = vpop.trf.xlu1 }
 0x98e   : > { %v13305_v29 = vcombine.high %v13279_v34, %v13287_v39  ;;  %v13355_v26 = vrot.slane %v13348_v40, %v22934_v48  ;;  %v13304_v58 = vcombine.low %v13279_v34, %v13287_v39 }
 0x98f   : > { %v12432_v18 = vpop.trf.xlu0 }
 0x990   : > { %11697 = vmax.xlane.f32.xlu1 %v11696_v35  ;;  %v13373_v2 = vcombine.high %v13347_v19, %v13355_v26  ;;  %v13312_v61 = vrot.slane %v13304_v58, %v22949_v16  ;;  %v13372_v5 = vcombine.low %v13347_v19, %v13355_v26 }
 0x991   : > { %v12448_v63 = vpop.trf.xlu1 }
 0x992   : > { %11700 = vmax.xlane.f32.xlu0 %v11699_v27  ;;  %v13288_v7 = vcombine.low %v12384_v14, %v12448_v63  ;;  %v13319_v14 = vrot.slane %v13305_v29, %v22949_v16  ;;  %v13380_v53 = vrot.slane %v13372_v5, %v22949_v16  ;;  %v13387_v44 = vrot.slane %v13373_v2, %v22949_v16 }
 0x993   : > { %v12464_v31 = vpop.trf.xlu0 }
 0x994   : > { %11706 = vmax.xlane.f32.xlu1 %v11705_v25  ;;  %v13356_v42 = vcombine.low %v12400_v36, %v12464_v31  ;;  %v13295_v33 = vrot.slane %v13288_v7, %v22934_v48 }
 0x995   : > { %v23621_v1 = vpop.trf.xlu1 }
 0x996   : > { %v13363_v51 = vrot.slane %v13356_v42, %v22934_v48 }
 0x997   : > { %v23623_v9 = vpop.f32.mrb[44].mxu0  ;;  %v23625_v10 = vpop.trf.xlu0 }
 0x998   : > { %v17822_v12 = vpop.f32.mrb[45].mxu0 }
 0x999   : > { %v11649_v46 = vpop.f32.mrb[46].mxu0  ;;  %v12480_v60 = vpop.trf.xlu1 }
 0x99a   : > { %v23627_v24 = vpop.f32.mrb[44].mxu1  ;;  %v17823_v4 = vpop.f32.mrb[47].mxu0  ;;  %v13296_v3 = vcombine.low %v12416_v13, %v12480_v60 }
 0x99b   : > { %v17834_v43 = vpop.f32.mrb[45].mxu1  ;;  %v12496_v56 = vpop.trf.xlu0 }
 0x99c   : > { %v11692_v6 = vpop.f32.mrb[46].mxu1  ;;  %v13303_v57 = vrot.slane %v13296_v3, %v22934_v48  ;;  %v13364_v23 = vcombine.low %v12432_v18, %v12496_v56 }
 0x99d   : > { %v17835_v52 = vpop.f32.mrb[47].mxu1  ;;  %v12544_v55 = vpop.trf.xlu1 }
 0x99e   : > { %v13320_v21 = vcombine.low %v13295_v33, %v13303_v57  ;;  %v13321_v36 = vcombine.high %v13295_v33, %v13303_v57  ;;  %v13371_v41 = vrot.slane %v13364_v23, %v22934_v48 }
 0x99f   : > { %v12560_v54 = vpop.trf.xlu0 }
 0x9a0   : > { %v13328_v0 = vrot.slane %v13320_v21, %v22949_v16  ;;  %v13335_v15 = vrot.slane %v13321_v36, %v22949_v16  ;;  %v13388_v49 = vcombine.low %v13363_v51, %v13371_v41  ;;  %v13389_v34 = vcombine.high %v13363_v51, %v13371_v41 }
 0x9a1   : > { %v12576_v38 = vpop.trf.xlu1 }
 0x9a2   : > { %v13336_v62 = vcombine.low %v13312_v61, %v13328_v0  ;;  %v23639_v19 = vcombine.high %v13312_v61, %v13328_v0  ;;  %v23641_v39 = vcombine.low %v13319_v14, %v13335_v15  ;;  %v23643_v40 = vcombine.high %v13319_v14, %v13335_v15 }
 0x9a3   : > { %v13396_v11 = vrot.slane %v13388_v49, %v22949_v16  ;;  %v13403_v13 = vrot.slane %v13389_v34, %v22949_v16  ;;  %v13408_v29 = vcombine.low %v23621_v1, %v12576_v38  ;;  %v12592_v26 = vpop.trf.xlu0 }
 0x9a4   : > { %v13476_v35 = vcombine.low %v23625_v10, %v12592_v26  ;;  %v13819_v18 = vshrl.u32 %v13336_v62, 16  ;;  %v13825_v2 = vshrl.u32 %v23639_v19, 16  ;;  %v13831_v12 = vshrl.u32 %v23641_v39, 16 }
 0x9a5   : > { %v13404_v27 = vcombine.low %v13380_v53, %v13396_v11  ;;  %v23650_v63 = vcombine.high %v13380_v53, %v13396_v11  ;;  %v23652_v25 = vcombine.low %v13387_v44, %v13403_v13  ;;  %v23654_v31 = vcombine.high %v13387_v44, %v13403_v13  ;;  %v12640_v7 = vpop.trf.xlu1 }
 0x9a6   : > { %v13837_v42 = vshrl.u32 %v23643_v40, 16  ;;  %v13415_v57 = vrot.slane %v13408_v29, %v22934_v48  ;;  %v13483_v14 = vrot.slane %v13476_v35, %v22934_v48 }
 0x9a7   : > { %v12656_v1 = vpop.trf.xlu0  ;;  %v13818_v46 = vpack.i.b16 %v13404_v27, %v13336_v62  ;;  %v13820_v58 = vshrl.u32 %v13404_v27, 16  ;;  %v13826_v60 = vshrl.u32 %v23650_v63, 16  ;;  %v13832_v33 = vshrl.u32 %v23652_v25, 16 }
 0x9a8   : > { %v13838_v43 = vshrl.u32 %v23654_v31, 16 }
 0x9a9   : > { %v12608_v56 = vpop.trf.xlu1  ;;  %17838 = vmatprep.mubr.msk.bf16.mxu0 %vm13912_vm7, %v13818_v46  ;;  %v13821_v6 = vpack.i.b16 %v13820_v58, %v13819_v18  ;;  %v23668_v51 = vpack.i.b16 %v13826_v60, %v13825_v2  ;;  %v23671_v52 = vpack.i.b16 %v13832_v33, %v13831_v12 }
 0x9aa   : > { %v13416_v23 = vcombine.low %v12544_v55, %v12608_v56  ;;  %v23673_v61 = vpack.i.b16 %v13838_v43, %v13837_v42  ;;  %v12246_v42 = vcombine.high %v23602_v8, %v24637_v17  ;;  %v12197_v43 = vcombine.high %v23597_v45, %v24637_v17 }
 0x9ab   : > { %v12624_v5 = vpop.trf.xlu0  ;;  %17848 = vmatprep.mubr.msk.bf16.mxu1 %vm13912_vm7, %v13821_v6 }
 0x9ac   : > { %v13423_v21 = vrot.slane %v13416_v23, %v22934_v48  ;;  %v13484_v36 = vcombine.low %v12560_v54, %v12624_v5 }
 0x9ad   : > { %v12672_v41 = vpop.trf.xlu1 }
 0x9ae   : > { %v13440_v0 = vcombine.low %v13415_v57, %v13423_v21  ;;  %v13441_v15 = vcombine.high %v13415_v57, %v13423_v21  ;;  %v13491_v49 = vrot.slane %v13484_v36, %v22934_v48 }
 0x9af   : > { %v12688_v34 = vpop.trf.xlu0 }
 0x9b0   : > { %v13508_v53 = vcombine.low %v13483_v14, %v13491_v49  ;;  %v13509_v55 = vcombine.high %v13483_v14, %v13491_v49 }
 0x9b1   : > { %v12704_v44 = vpop.trf.xlu1 }
 0x9b2   : > { %v13424_v38 = vcombine.low %v12640_v7, %v12704_v44  ;;  %v13448_v7 = vrot.slane %v13440_v0, %v22949_v16  ;;  %v13516_v5 = vrot.slane %v13508_v53, %v22949_v16  ;;  %v13523_v14 = vrot.slane %v13509_v55, %v22949_v16 }
 0x9b3   : > { %v12720_v62 = vpop.trf.xlu0 }
 0x9b4   : > { %v13492_v11 = vcombine.low %v12656_v1, %v12720_v62  ;;  %v13431_v35 = vrot.slane %v13424_v38, %v22934_v48  ;;  %v13455_v1 = vrot.slane %v13441_v15, %v22949_v16 }
 0x9b5   : > { %v12768_v13 = vpop.trf.xlu1 }
 0x9b6   : > { %v13499_v2 = vrot.slane %v13492_v11, %v22934_v48 }
 0x9b7   : > { %v23679_v29 = vpop.trf.xlu0 }
 0x9b9   : > { %v12736_v26 = vpop.trf.xlu1 }
 0x9ba   : > { %v13432_v18 = vcombine.low %v12672_v41, %v12736_v26 }
 0x9bb   : > { %v12752_v54 = vpop.trf.xlu0 }
 0x9bc   : > { %v13439_v27 = vrot.slane %v13432_v18, %v22934_v48  ;;  %v13500_v12 = vcombine.low %v12688_v34, %v12752_v54 }
 0x9bd   : > { %v12800_v46 = vpop.trf.xlu1 }
 0x9be   : > { %v13456_v58 = vcombine.low %v13431_v35, %v13439_v27  ;;  %v13457_v60 = vcombine.high %v13431_v35, %v13439_v27  ;;  %v13507_v33 = vrot.slane %v13500_v12, %v22934_v48 }
 0x9bf   : > { %13192 = vxpose.xlu0.c.b16.start.end [1/1] (short) (narrow) %v12246_v42, 16  ;;  %v12816_v56 = vpop.trf.xlu0 }
 0x9c0   : > { %v13464_v6 = vrot.slane %v13456_v58, %v22949_v16  ;;  %v13471_v57 = vrot.slane %v13457_v60, %v22949_v16  ;;  %v13524_v23 = vcombine.low %v13499_v2, %v13507_v33  ;;  %v13525_v8 = vcombine.high %v13499_v2, %v13507_v33 }
 0x9c1   : > { %13176 = vxpose.xlu1.c.b16.start.end [1/1] (short) (narrow) %v12197_v43, 16  ;;  %v12832_v21 = vpop.trf.xlu1 }
 0x9c2   : > { %v23695_v36 = vcombine.low %v13448_v7, %v13464_v6  ;;  %v23697_v41 = vcombine.high %v13448_v7, %v13464_v6  ;;  %v23699_v0 = vcombine.low %v13455_v1, %v13471_v57  ;;  %v23701_v45 = vcombine.high %v13455_v1, %v13471_v57 }
 0x9c3   : > { %v13532_v15 = vrot.slane %v13524_v23, %v22949_v16  ;;  %v13539_v49 = vrot.slane %v13525_v8, %v22949_v16  ;;  %v13544_v34 = vcombine.low %v12768_v13, %v12832_v21  ;;  %v12848_v44 = vpop.trf.xlu0 }
 0x9c4   : > { %24638 = vst [vmem:[#allocation17_spill] sm:$0xff] %v23701_v45  ;;  %v13843_v38 = vshrl.u32 %v23695_v36, 16  ;;  %v13849_v53 = vshrl.u32 %v23697_v41, 16  ;;  %v13855_v18 = vshrl.u32 %v23699_v0, 16  ;;  %v13861_v54 = vshrl.u32 %v23701_v45, 16 }
 0x9c5   : > { %v23707_v55 = vcombine.low %v13516_v5, %v13532_v15  ;;  %v23709_v62 = vcombine.high %v13516_v5, %v13532_v15  ;;  %v23711_v11 = vcombine.low %v13523_v14, %v13539_v49  ;;  %v23713_v26 = vcombine.high %v13523_v14, %v13539_v49  ;;  %v12896_v35 = vpop.trf.xlu1 }
 0x9c6   : > { %v13612_v13 = vcombine.low %v23679_v29, %v12848_v44  ;;  %v13551_v8 = vrot.slane %v13544_v34, %v22934_v48  ;;  %v11702_v14 = vsel %vm11695_vm6, %v23581_v50, -inf }
 0x9c7   : > { %v13844_v27 = vshrl.u32 %v23707_v55, 16  ;;  %v13850_v42 = vshrl.u32 %v23709_v62, 16  ;;  %v12912_v7 = vpop.trf.xlu0  ;;  %v13856_v58 = vshrl.u32 %v23711_v11, 16  ;;  %v13862_v29 = vshrl.u32 %v23713_v26, 16 }
 0x9c8   : > { %v13619_v15 = vrot.slane %v13612_v13, %v22934_v48 }
 0x9c9   : > { %v23730_v33 = vpack.i.b16 %v13850_v42, %v13849_v53  ;;  %v12864_v43 = vpop.trf.xlu1  ;;  %v23732_v6 = vpack.i.b16 %v13844_v27, %v13843_v38  ;;  %v23734_v57 = vpack.i.b16 %v13856_v58, %v13855_v18  ;;  %v23736_v23 = vpack.i.b16 %v13862_v29, %v13861_v54 }
 0x9ca   : > { %v13552_v5 = vcombine.low %v12800_v46, %v12864_v43  ;;  %v11714_v38 = vsel %vm11695_vm6, %v23623_v9, -inf  ;;  %v11708_v46 = vsel %vm11695_vm6, %v23607_v20, -inf }
 0x9cb   : > { %24639 = vst [vmem:[#allocation16_spill] sm:$0xff] %v23736_v23  ;;  %v12880_v21 = vpop.trf.xlu0 }
 0x9cc   : > { %11703 = vmax.xlane.f32.xlu0 %v11702_v14  ;;  %v13559_v49 = vrot.slane %v13552_v5, %v22934_v48  ;;  %v13620_v44 = vcombine.low %v12816_v56, %v12880_v21  ;;  %v11711_v56 = vsel %vm11695_vm6, %v23609_v28, -inf }
 0x9cd   : > { %v12928_v53 = vpop.trf.xlu1 }
 0x9ce   : > { %11715 = vmax.xlane.f32.xlu1 %v11714_v38  ;;  %v13576_v18 = vcombine.low %v13551_v8, %v13559_v49  ;;  %v13577_v54 = vcombine.high %v13551_v8, %v13559_v49  ;;  %v13627_v34 = vrot.slane %v13620_v44, %v22934_v48  ;;  %v11717_v8 = vsel %vm11695_vm6, %v23627_v24, -inf }
 0x9cf   : > { %v12944_v27 = vpop.trf.xlu0 }
 0x9d0   : > { %11709 = vmax.xlane.f32.xlu0 %v11708_v46  ;;  %v13644_v42 = vcombine.low %v13619_v15, %v13627_v34  ;;  %v13645_v58 = vcombine.high %v13619_v15, %v13627_v34 }
 0x9d1   : > { %v12960_v13 = vpop.trf.xlu1 }
 0x9d2   : > { %v13560_v29 = vcombine.low %v12896_v35, %v12960_v13  ;;  %v13584_v13 = vrot.slane %v13576_v18, %v22949_v16 }
 0x9d3   : > { %v12976_v43 = vpop.trf.xlu0 }
 0x9d4   : > { %11712 = vmax.xlane.f32.xlu0 %v11711_v56  ;;  %v13628_v5 = vcombine.low %v12912_v7, %v12976_v43  ;;  %v13567_v44 = vrot.slane %v13560_v29, %v22934_v48  ;;  %v13591_v7 = vrot.slane %v13577_v54, %v22949_v16 }
 0x9d5   : > { %v13024_v14 = vpop.trf.xlu1 }
 0x9d6   : > { %v13635_v15 = vrot.slane %v13628_v5, %v22934_v48  ;;  %v13652_v5 = vrot.slane %v13644_v42, %v22949_v16 }
 0x9d7   : > { %v13040_v21 = vpop.trf.xlu0 }
 0x9d8   : > { %11718 = vmax.xlane.f32.xlu0 %v11717_v8 }
 0x9d9   : > { %v12992_v49 = vpop.trf.xlu1 }
 0x9da   : > { %v13568_v38 = vcombine.low %v12928_v53, %v12992_v49 }
 0x9db   : > { %v13008_v46 = vpop.trf.xlu0 }
 0x9dc   : > { %v13575_v35 = vrot.slane %v13568_v38, %v22934_v48  ;;  %v13636_v34 = vcombine.low %v12944_v27, %v13008_v46  ;;  %v13659_v27 = vrot.slane %v13645_v58, %v22949_v16 }
 0x9dd   : > { %v13056_v56 = vpop.trf.xlu1 }
 0x9de   : > { %v13592_v43 = vcombine.low %v13567_v44, %v13575_v35  ;;  %v13593_v60 = vcombine.high %v13567_v44, %v13575_v35  ;;  %v13643_v3 = vrot.slane %v13636_v34, %v22934_v48 }
 0x9df   : > { %v13072_v8 = vpop.trf.xlu0 }
 0x9e0   : > { %v13600_v1 = vrot.slane %v13592_v43, %v22949_v16  ;;  %v13607_v53 = vrot.slane %v13593_v60, %v22949_v16  ;;  %v13660_v29 = vcombine.low %v13635_v15, %v13643_v3  ;;  %v13661_v49 = vcombine.high %v13635_v15, %v13643_v3 }
 0x9e1   : > { %v13088_v38 = vpop.trf.xlu1 }
 0x9e2   : > { %v23762_v18 = vcombine.low %v13584_v13, %v13600_v1  ;;  %v23764_v46 = vcombine.high %v13584_v13, %v13600_v1  ;;  %v23766_v54 = vcombine.low %v13591_v7, %v13607_v53  ;;  %v23768_v44 = vcombine.high %v13591_v7, %v13607_v53 }
 0x9e3   : > { %v13668_v35 = vrot.slane %v13660_v29, %v22949_v16  ;;  %v13675_v34 = vrot.slane %v13661_v49, %v22949_v16  ;;  %v13680_v60 = vcombine.low %v13024_v14, %v13088_v38  ;;  %v13104_v43 = vpop.trf.xlu0 }
 0x9e4   : > { %24640 = vst [vmem:[#allocation12_spill] sm:$0xff] %v23768_v44  ;;  %v13748_v3 = vcombine.low %v13040_v21, %v13104_v43  ;;  %v13867_v42 = vshrl.u32 %v23762_v18, 16  ;;  %v13873_v58 = vshrl.u32 %v23764_v46, 16  ;;  %v13879_v53 = vshrl.u32 %v23766_v54, 16 }
 0x9e5   : > { %v23774_v15 = vcombine.low %v13652_v5, %v13668_v35  ;;  %v23776_v4 = vcombine.high %v13652_v5, %v13668_v35  ;;  %v23778_v1 = vcombine.low %v13659_v27, %v13675_v34  ;;  %v23780_v13 = vcombine.high %v13659_v27, %v13675_v34  ;;  %v23782_v7 = vpop.trf.xlu1 }
 0x9e6   : > { %v13885_v14 = vshrl.u32 %v23768_v44, 16  ;;  %v23805_v2 = vrot.slane %v13680_v60, %v22934_v48  ;;  %v23812_v45 = vrot.slane %v13748_v3, %v22934_v48 }
 0x9e7   : > { %v23786_v29 = vpop.trf.xlu0  ;;  %v13868_v49 = vshrl.u32 %v23774_v15, 16  ;;  %v13874_v38 = vshrl.u32 %v23776_v4, 16  ;;  %v13880_v35 = vshrl.u32 %v23778_v1, 16  ;;  %v13886_v43 = vshrl.u32 %v23780_v13, 16 }
 0x9e9   : > { %v13120_v12 = vpop.trf.xlu1  ;;  %v23800_v10 = vpack.i.b16 %v13868_v49, %v13867_v42  ;;  %v23802_v21 = vpack.i.b16 %v13874_v38, %v13873_v58  ;;  %v23807_v32 = vpack.i.b16 %v13880_v35, %v13879_v53  ;;  %v23809_v23 = vpack.i.b16 %v13886_v43, %v13885_v14 }
 0x9ea   : > { %v13688_v5 = vcombine.low %v13056_v56, %v13120_v12  ;;  %v12180_v58 = vcombine.high %v23586_v59, %v24637_v17  ;;  %v12229_v53 = vcombine.high %v23593_v37, %v24637_v17 }
 0x9eb   : > { %v13136_v27 = vpop.trf.xlu0 }
 0x9ec   : > { %v23815_v34 = vrot.slane %v13688_v5, %v22934_v48  ;;  %v13756_v44 = vcombine.low %v13072_v8, %v13136_v27  ;;  %v23831_v8 = vrot.slane %v12180_v58, %v22949_v16 }
 0x9ee   : > { %v23822_v12 = vrot.slane %v13756_v44, %v22934_v48  ;;  %v12243_v44 = vrot.slane %v12229_v53, %v22949_v16 }
 0x9fb   : > { %13208 = vxpose.xlu1.c.b16.start.end [1/1] (short) (narrow) %v23831_v8, 16 }
 0xa05   : > { %13224 = vxpose.xlu0.c.b16.start.end [1/1] (short) (narrow) %v12243_v44, 16 }
 0xa1d   : > { %v11698_v14 = vpop.xlane.xlu1 %11697 }
 0xa1e   : > { %v11720_v49 = vsub.f32 %v23563_v22, %v11698_v14 }
 0xa1f   : > { %v11701_v5 = vpop.xlane.xlu0 %11700 }
 0xa20   : > { %v11728_v38 = vmul.f32 1.442695, %v11720_v49  ;;  %v11721_v27 = vsub.f32 %v23569_v47, %v11701_v5 }
 0xa21   : > { %v11707_v35 = vpop.xlane.xlu1 %11706 }
 0xa22   : > { %19344 = vpow2.f32 %v11728_v38  ;;  %v11730_v59 = vmul.f32 1.442695, %v11721_v27  ;;  %v11723_v43 = vsub.f32 %v23589_v30, %v11707_v35 }
 0xa24   : > { %19346 = vpow2.f32 %v11730_v59  ;;  %v11734_v58 = vmul.f32 1.442695, %v11723_v43 }
 0xa25   : > { %v23846_v14 = vpop.trf.xlu0 }
 0xa26   : > { %19348 = vpow2.f32 %v11734_v58 }
 0xa27   : > { %v23848_v30 = vpop.trf.xlu1 }
 0xa2c   : > { %v19345_v3 = vpop.eup %19344 }
 0xa2d   : > { %v11744_v37 = vsel %vm11695_vm6, %v19345_v3, 0.0 }
 0xa2e   : > { %v19347_v53 = vpop.eup %19346  ;;  %11745 = vadd.xlane.f32.xlu1 %v11744_v37 }
 0xa2f   : > { %v11747_v56 = vsel %vm11695_vm6, %v19347_v53, 0.0 }
 0xa30   : > { %v23842_v22 = vpop.eup %19348  ;;  %11748 = vadd.xlane.f32.xlu0 %v11747_v56 }
 0xa31   : > { %v11753_v47 = vsel %vm11695_vm6, %v23842_v22, 0.0 }
 0xa34   : > { %11754 = vadd.xlane.f32.xlu0 %v11753_v47 }
 0xa59   : > { %v11704_v49 = vpop.xlane.xlu0 %11703 }
 0xa5a   : > { %v11722_v5 = vsub.f32 %v23581_v50, %v11704_v49 }
 0xa5b   : > { %v11716_v38 = vpop.xlane.xlu1 %11715 }
 0xa5c   : > { %v11732_v27 = vmul.f32 1.442695, %v11722_v5  ;;  %v11726_v35 = vsub.f32 %v23623_v9, %v11716_v38 }
 0xa5d   : > { %v11710_v59 = vpop.xlane.xlu0 %11709 }
 0xa5e   : > { %19350 = vpow2.f32 %v11732_v27  ;;  %v11724_v43 = vsub.f32 %v23607_v20, %v11710_v59  ;;  %v11740_v56 = vmul.f32 1.442695, %v11726_v35  ;;  %v12198_v59 = vcombine.high %v23831_v8, %v24637_v17 }
 0xa60   : > { %v11736_v58 = vmul.f32 1.442695, %v11724_v43  ;;  %v12247_v43 = vcombine.high %v12243_v44, %v24637_v17 }
 0xa61   : > { %v11713_v37 = vpop.xlane.xlu0 %11712 }
 0xa62   : > { %19352 = vpow2.f32 %v11736_v58  ;;  %v11725_v47 = vsub.f32 %v23609_v28, %v11713_v37 }
 0xa63   : > { %19354 = vpow2.f32 %v11740_v56  ;;  %v13216_v56 = vpop.trf.xlu1 }
 0xa64   : > { %v11738_v60 = vmul.f32 1.442695, %v11725_v47 }
 0xa65   : > { %v11719_v42 = vpop.xlane.xlu0 %11718 }
 0xa66   : > { %19356 = vpow2.f32 %v11738_v60  ;;  %v11727_v50 = vsub.f32 %v23627_v24, %v11719_v42 }
 0xa68   : > { %v19351_v49 = vpop.eup %19350  ;;  %v11742_v5 = vmul.f32 1.442695, %v11727_v50 }
 0xa69   : > { %v11750_v9 = vsel %vm11695_vm6, %v19351_v49, 0.0 }
 0xa6a   : > { %19358 = vpow2.f32 %v11742_v5  ;;  %11751 = vadd.xlane.f32.xlu1 %v11750_v9 }
 0xa6b   : > { %v23875_v58 = vpop.trf.xlu0 }
 0xa6c   : > { %v23856_v38 = vpop.eup %19352 }
 0xa6d   : > { %v11756_v20 = vsel %vm11695_vm6, %v23856_v38, 0.0  ;;  %v23860_v27 = vpop.eup %19354 }
 0xa6e   : > { %11757 = vadd.xlane.f32.xlu1 %v11756_v20  ;;  %v11762_v24 = vsel %vm11695_vm6, %v23860_v27, 0.0 }
 0xa70   : > { %v23862_v28 = vpop.eup %19356 }
 0xa71   : > { %v11759_v60 = vsel %vm11695_vm6, %v23862_v28, 0.0 }
 0xa72   : > { %11760 = vadd.xlane.f32.xlu0 %v11759_v60  ;;  %11763 = vadd.xlane.f32.xlu1 %v11762_v24 }
 0xa74   : > { %v23868_v42 = vpop.eup %19358 }
 0xa75   : > { %v11765_v35 = vsel %vm11695_vm6, %v23868_v42, 0.0 }
 0xa76   : > { %11766 = vadd.xlane.f32.xlu0 %v11765_v35 }
 0xa9f   : > { %13240 = vxpose.xlu1.c.b16.start.end [1/1] (short) (narrow) %v12198_v59, 16 }
 0xaa3   : > { %13256 = vxpose.xlu0.c.b16.start.end [1/1] (short) (narrow) %v12247_v43, 16 }
 0xabb   : > { %v11746_v37 = vpop.xlane.xlu1 %11745 }
 0xabc   : > { %19360 = vrcp.f32 %v11746_v37 }
 0xabd   : > { %v11749_v47 = vpop.xlane.xlu0 %11748 }
 0xabe   : > { %19362 = vrcp.f32 %v11749_v47 }
 0xac1   : > { %v11755_v50 = vpop.xlane.xlu0 %11754 }
 0xac2   : > { %19364 = vrcp.f32 %v11755_v50 }
 0xac6   : > { %v19361_v5 = vpop.eup %19360 }
 0xac7   : > { %v11776_v9 = vmul.f32 %v19361_v5, %v19345_v3  ;;  %v24641_v3 = vpack.i.b16 %v23707_v55, %v23695_v36 }
 0xac8   : > { %v19363_v20 = vpop.eup %19362 }
 0xac9   : > { %v11784_v60 = vpack.c.bf16 %v11776_v9, %v11776_v9  ;;  %v11777_v24 = vmul.f32 %v19363_v20, %v19347_v53  ;;  %v24642_v53 = vpack.i.b16 %v23774_v15, %v23762_v18  ;;  %v13696_v15 = vcombine.low %v23782_v7, %v13216_v56 }
 0xaca   : > { %v13764_v7 = vcombine.low %v23786_v29, %v23875_v58  ;;  %v24643_v58 = vcombine.low %v23805_v2, %v23815_v34 }
 0xacb   : > { %18044 = vmatprep.subr.msk.bf16.mxu0 %vm13912_vm7, %v11784_v60  ;;  %v13926_v8 = vsel %vm13912_vm7, %v11784_v60, 0  ;;  %v11785_v17 = vpack.c.bf16 %v11777_v24, %v11777_v24 }
 0xacc   : > { %v19365_v44 = vpop.eup %19364  ;;  %17837 = vmatpush3.bf16.xpose.msra.mxu0 %v13926_v8  ;;  %v13703_v8 = vrot.slane %v13696_v15, %v22934_v48 }
 0xacd   : > { %18045 = vmatprep.subr.msk.bf16.mxu1 %vm13912_vm7, %v11785_v17  ;;  %v14006_v35 = vsel %vm13912_vm7, %v11785_v17, 0  ;;  %v11779_v59 = vmul.f32 %v19365_v44, %v23842_v22 }
 0xace   : > { %17847 = vmatpush3.bf16.xpose.msra.mxu1 %v14006_v35 }
 0xacf   : > { %v11787_v43 = vpack.c.bf16 %v11779_v59, %v11779_v59 }
 0xad1   : > { %18047 = vmatprep.subr.msk.bf16.mxu1 %vm13912_vm7, %v11787_v43  ;;  %v14166_v37 = vsel %vm13912_vm7, %v11787_v43, 0 }
 0xad3   : > { %17839 = vmatmul.mubr.msk.bf16.vlgmr.msra.gmra.mrb[48].mxu0 %vm13912_vm7, %v24641_v3 }
 0xad4   : > { %17842 = vmatprep.mubr.msk.bf16.mxu0 %vm13912_vm7, %v24642_v53 }
 0xad5   : > { %17849 = vmatmul.mubr.msk.bf16.vlgmr.msra.gmra.mrb[48].mxu1 %vm13912_vm7, %v23732_v6 }
 0xad6   : > { %17852 = vmatprep.mubr.msk.bf16.mxu1 %vm13912_vm7, %v23800_v10  ;;  %17867 = vmatpush3.bf16.xpose.msra.mxu1 %v14166_v37  ;;  %v13771_v37 = vrot.slane %v13764_v7, %v22934_v48 }
 0xaf7   : > { %v11752_v22 = vpop.xlane.xlu1 %11751 }
 0xaf8   : > { %19366 = vrcp.f32 %v11752_v22  ;;  %v13720_v22 = vrot.slane %v24643_v58, %v22949_v16 }
 0xafb   : > { %v11758_v47 = vpop.xlane.xlu1 %11757 }
 0xafc   : > { %19368 = vrcp.f32 %v11758_v47 }
 0xaff   : > { %v11761_v36 = vpop.xlane.xlu0 %11760  ;;  %v11764_v55 = vpop.xlane.xlu1 %11763 }
 0xb00   : > { %19370 = vrcp.f32 %v11761_v36 }
 0xb01   : > { %19372 = vrcp.f32 %v11764_v55 }
 0xb02   : > { %v19367_v50 = vpop.eup %19366 }
 0xb03   : > { %v11778_v18 = vmul.f32 %v19367_v50, %v19351_v49  ;;  %v11767_v5 = vpop.xlane.xlu0 %11766 }
 0xb04   : > { %19374 = vrcp.f32 %v11767_v5 }
 0xb05   : > { %v13248_v9 = vpop.trf.xlu1  ;;  %v11786_v6 = vpack.c.bf16 %v11778_v18, %v11778_v18 }
 0xb06   : > { %v19369_v20 = vpop.eup %19368  ;;  %v13704_v60 = vcombine.low %v23848_v30, %v13248_v9 }
 0xb07   : > { %18046 = vmatprep.subr.msk.bf16.mxu0 %vm13912_vm7, %v11786_v6  ;;  %v14086_v10 = vsel %vm13912_vm7, %v11786_v6, 0  ;;  %v11780_v24 = vmul.f32 %v19369_v20, %v23856_v38  ;;  %v24645_v6 = vcombine.low %v23812_v45, %v23822_v12 }
 0xb08   : > { %v13711_v17 = vrot.slane %v13704_v60, %v22934_v48  ;;  %17857 = vmatpush3.bf16.xpose.msra.mxu0 %v14086_v10 }
 0xb09   : > { %v13264_v49 = vpop.trf.xlu0  ;;  %v11788_v56 = vpack.c.bf16 %v11780_v24, %v11780_v24  ;;  %v13788_v20 = vrot.slane %v24645_v6, %v22949_v16 }
 0xb0a   : > { %v19371_v44 = vpop.eup %19370  ;;  %v13728_v35 = vcombine.low %v13703_v8, %v13711_v17  ;;  %v13729_v59 = vcombine.high %v13703_v8, %v13711_v17  ;;  %v13772_v30 = vcombine.low %v23846_v14, %v13264_v49  ;;  %v24644_v14 = vcombine.high %v23805_v2, %v23815_v34 }
 0xb0b   : > { %18048 = vmatprep.subr.msk.bf16.mxu0 %vm13912_vm7, %v11788_v56  ;;  %v11781_v43 = vmul.f32 %v19371_v44, %v23862_v28  ;;  %v24646_v2 = vcombine.high %v23812_v45, %v23822_v12  ;;  %v19373_v58 = vpop.eup %19372 }
 0xb0c   : > { %v13736_v38 = vrot.slane %v13728_v35, %v22949_v16  ;;  %v13743_v3 = vrot.slane %v13729_v59, %v22949_v16  ;;  %v13779_v53 = vrot.slane %v13772_v30, %v22934_v48  ;;  %v13727_v47 = vrot.slane %v24644_v14, %v22949_v16 }
 0xb0d   : > { %v11789_v29 = vpack.c.bf16 %v11781_v43, %v11781_v43  ;;  %v13795_v34 = vrot.slane %v24646_v2, %v22949_v16 }
 0xb0e   : > { %v13796_v28 = vcombine.low %v13771_v37, %v13779_v53  ;;  %v13797_v36 = vcombine.high %v13771_v37, %v13779_v53  ;;  %v13744_v50 = vcombine.low %v13720_v22, %v13736_v38  ;;  %v13745_v18 = vcombine.high %v13720_v22, %v13736_v38 }
 0xb0f   : > { %18049 = vmatprep.subr.msk.bf16.mxu1 %vm13912_vm7, %v11789_v29  ;;  %v13746_v15 = vcombine.low %v13727_v47, %v13743_v3  ;;  %v23921_v9 = vcombine.high %v13727_v47, %v13743_v3  ;;  %v24647_v22 = vpack.i.b16 %v23650_v63, %v23639_v19  ;;  %v14246_v19 = vsel %vm13912_vm7, %v11788_v56, 0 }
 0xb10   : > { %v13804_v55 = vrot.slane %v13796_v28, %v22949_v16  ;;  %v13811_v5 = vrot.slane %v13797_v36, %v22949_v16  ;;  %v13891_v17 = vshrl.u32 %v13744_v50, 16  ;;  %v13897_v7 = vshrl.u32 %v13745_v18, 16  ;;  %v19375_v28 = vpop.eup %19374 }
 0xb11   : > { %v13903_v49 = vshrl.u32 %v13746_v15, 16  ;;  %v13909_v44 = vshrl.u32 %v23921_v9, 16  ;;  %v11782_v36 = vmul.f32 %v19373_v58, %v23860_v27 }
 0xb12   : > { %v13812_v60 = vcombine.low %v13788_v20, %v13804_v55  ;;  %v13813_v10 = vcombine.high %v13788_v20, %v13804_v55  ;;  %v13814_v24 = vcombine.low %v13795_v34, %v13811_v5  ;;  %v13815_v8 = vcombine.high %v13795_v34, %v13811_v5 }
 0xb13   : > { %v11790_v63 = vpack.c.bf16 %v11782_v36, %v11782_v36 }
 0xb14   : > { %v13890_v35 = vpack.i.b16 %v13812_v60, %v13744_v50  ;;  %v13892_v59 = vshrl.u32 %v13812_v60, 16  ;;  %v13896_v30 = vpack.i.b16 %v13813_v10, %v13745_v18  ;;  %v13898_v43 = vshrl.u32 %v13813_v10, 16 }
 0xb15   : > { %v13902_v38 = vpack.i.b16 %v13814_v24, %v13746_v15  ;;  %v13904_v45 = vshrl.u32 %v13814_v24, 16  ;;  %v13908_v12 = vpack.i.b16 %v13815_v8, %v23921_v9  ;;  %v13910_v3 = vshrl.u32 %v13815_v8, 16 }
 0xb16   : > { %17843 = vmatmul.mubr.msk.bf16.gmra.mrb[52].mxu0 %vm13912_vm7, %v13890_v35  ;;  %v13893_v53 = vpack.i.b16 %v13892_v59, %v13891_v17  ;;  %v13899_v37 = vpack.i.b16 %v13898_v43, %v13897_v7  ;;  %v11783_v50 = vmul.f32 %v19375_v28, %v23868_v42  ;;  %v24648_v18 = vpack.i.b16 %v23709_v62, %v23697_v41 }
 0xb17   : > { %17858 = vmatprep.mubr.msk.bf16.mxu0 %vm13912_vm7, %v24647_v22  ;;  %v13905_v14 = vpack.i.b16 %v13904_v45, %v13903_v49  ;;  %v13911_v47 = vpack.i.b16 %v13910_v3, %v13909_v44  ;;  %v24649_v15 = vpack.i.b16 %v23776_v4, %v23764_v46  ;;  %v24650_v4 = vpack.i.b16 %v23652_v25, %v23641_v39 }
 0xb18   : > { %17853 = vmatmul.mubr.msk.bf16.gmra.mrb[52].mxu1 %vm13912_vm7, %v13893_v53  ;;  %v11791_v27 = vpack.c.bf16 %v11783_v50, %v11783_v50  ;;  %v24651_v41 = vpack.i.b16 %v23711_v11, %v23699_v0  ;;  %v14406_v62 = vsel %vm13912_vm7, %v11790_v63, 0  ;;  %v24653_v25 = vpack.i.b16 %v23654_v31, %v23643_v40  ;;  %v24656_v11 = vld [vmem:[#allocation12_spill] sm:$0xff] }
 0xb19   : > { %17868 = vmatprep.mubr.msk.bf16.mxu1 %vm13912_vm7, %v23668_v51  ;;  %v14326_v51 = vsel %vm13912_vm7, %v11789_v29, 0 }
 0xb1a   : > { %v14486_v39 = vsel %vm13912_vm7, %v11791_v27, 0 }
 0xb1e   : > { %17859 = vmatmul.mubr.msk.bf16.vlgmr.msra.gmra.mrb[56].mxu0 %vm13912_vm7, %v24648_v18 }
 0xb1f   : > { %17877 = vmatpush3.bf16.xpose.msra.mxu0 %v14246_v19  ;;  %17862 = vmatprep.mubr.msk.bf16.mxu0 %vm13912_vm7, %v24649_v15 }
 0xb20   : > { %18050 = vmatprep.subr.msk.bf16.mxu0 %vm13912_vm7, %v11790_v63  ;;  %17869 = vmatmul.mubr.msk.bf16.vlgmr.msra.gmra.mrb[56].mxu1 %vm13912_vm7, %v23730_v33  ;;  %v24652_v33 = vpack.i.b16 %v23778_v1, %v23766_v54 }
 0xb21   : > { %17887 = vmatpush3.bf16.xpose.msra.mxu1 %v14326_v51  ;;  %17872 = vmatprep.mubr.msk.bf16.mxu1 %vm13912_vm7, %v23802_v21 }
 0xb22   : > { %18051 = vmatprep.subr.msk.bf16.mxu1 %vm13912_vm7, %v11791_v27 }
 0xb26   : > { %17863 = vmatmul.mubr.msk.bf16.gmra.mrb[60].mxu0 %vm13912_vm7, %v13896_v30 }
 0xb27   : > { %17878 = vmatprep.mubr.msk.bf16.mxu0 %vm13912_vm7, %v24650_v4 }
 0xb28   : > { %17873 = vmatmul.mubr.msk.bf16.gmra.mrb[60].mxu1 %vm13912_vm7, %v13899_v37 }
 0xb29   : > { %17888 = vmatprep.mubr.msk.bf16.mxu1 %vm13912_vm7, %v23671_v52  ;;  %v24654_v52 = vld [vmem:[#allocation17_spill] sm:$0xff] }
 0xb2a   : > { %v24655_v0 = vpack.i.b16 %v23713_v26, %v24654_v52 }
 0xb2e   : > { %17879 = vmatmul.mubr.msk.bf16.vlgmr.msra.gmra.mrb[64].mxu0 %vm13912_vm7, %v24651_v41 }
 0xb2f   : > { %17897 = vmatpush3.bf16.xpose.msra.mxu0 %v14406_v62  ;;  %17882 = vmatprep.mubr.msk.bf16.mxu0 %vm13912_vm7, %v24652_v33 }
 0xb30   : > { %17889 = vmatmul.mubr.msk.bf16.vlgmr.msra.gmra.mrb[64].mxu1 %vm13912_vm7, %v23734_v57  ;;  %v24658_v57 = vld [vmem:[#allocation16_spill] sm:$0xff] }
 0xb31   : > { %17907 = vmatpush3.bf16.xpose.msra.mxu1 %v14486_v39  ;;  %17892 = vmatprep.mubr.msk.bf16.mxu1 %vm13912_vm7, %v23807_v32  ;;  %v24657_v32 = vpack.i.b16 %v23780_v13, %v24656_v11 }
 0xb36   : > { %17883 = vmatmul.mubr.msk.bf16.gmra.mrb[68].mxu0 %vm13912_vm7, %v13902_v38 }
 0xb37   : > { %17898 = vmatprep.mubr.msk.bf16.mxu0 %vm13912_vm7, %v24653_v25 }
 0xb38   : > { %17893 = vmatmul.mubr.msk.bf16.gmra.mrb[68].mxu1 %vm13912_vm7, %v13905_v14 }
 0xb39   : > { %17908 = vmatprep.mubr.msk.bf16.mxu1 %vm13912_vm7, %v23673_v61 }
 0xb3e   : > { %17899 = vmatmul.mubr.msk.bf16.vlgmr.msra.gmra.mrb[72].mxu0 %vm13912_vm7, %v24655_v0 }
 0xb3f   : > { %17902 = vmatprep.mubr.msk.bf16.mxu0 %vm13912_vm7, %v24657_v32 }
 0xb40   : > { %17909 = vmatmul.mubr.msk.bf16.vlgmr.msra.gmra.mrb[72].mxu1 %vm13912_vm7, %v24658_v57 }
 0xb41   : > { %17912 = vmatprep.mubr.msk.bf16.mxu1 %vm13912_vm7, %v23809_v23 }
 0xb46   : > { %17903 = vmatmul.mubr.msk.bf16.gmra.mrb[76].mxu0 %vm13912_vm7, %v13908_v12 }
 0xb48   : > { %17913 = vmatmul.mubr.msk.bf16.gmra.mrb[76].mxu1 %vm13912_vm7, %v13911_v47 }
 0xba6   : > { %v17840_v40 = vpop.f32.mrb[48].mxu0 }
 0xba7   : > { %v13962_v31 = vpop.f32.mrb[49].mxu0 }
 0xba8   : > { %v17850_v61 = vpop.f32.mrb[48].mxu1  ;;  %14553 = vxpose.xlu1.b32.start [1/8] (short) (narrow) %v13962_v31, 8  ;;  %v17841_v26 = vpop.f32.mrb[50].mxu0 }
 0xba9   : > { %v13965_v46 = vpop.f32.mrb[51].mxu0  ;;  %v14042_v54 = vpop.f32.mrb[49].mxu1 }
 0xbaa   : > { %14585 = vxpose.xlu0.b32.start [1/8] (short) (narrow) %v14042_v54, 8  ;;  %v17851_v1 = vpop.f32.mrb[50].mxu1  ;;  %v19125_v54 = vld [vmem:[%s24576_s10 + $0xc] ss:$16 sps:$4 sm:$0xff]  }
 0xbab   : > { %v14045_v13 = vpop.f32.mrb[51].mxu1  ;;  %15821 = vmatprep.subr.bf16.mxu1 %v19125_v54 }
 0xbac   : > { %14554 = vxpose.xlu1.b32.cont [2/8] (short) (narrow) %v13965_v46, 8  ;;  %v19123_v46 = vld [vmem:[%s24576_s10 + $0x8] ss:$16 sps:$4 sm:$0xff]  }
 0xbad   : > { %15822 = vmatpush1.bf16.msra.mxu1 %v19123_v46 }
 0xbae   : > { %14586 = vxpose.xlu0.b32.cont [2/8] (short) (narrow) %v14045_v13, 8  ;;  %v19131_v13 = vld [vmem:[%s24576_s10 + $0x2c] ss:$16 sps:$4 sm:$0xff]  }
 0xbaf   : > { %15823 = vmatprep.subr.bf16.mxu1 %v19131_v13 }
 0xbb0   : > { %14555 = vxpose.xlu1.b32.cont [3/8] (short) (narrow) %v17840_v40, 8 }
 0xbb2   : > { %14587 = vxpose.xlu0.b32.cont [3/8] (short) (narrow) %v17850_v61, 8  ;;  %v19120_v61 = vld [vmem:[%s24576_s10] ss:$16 sps:$4 sm:$0xff]  }
 0xbb4   : > { %14556 = vxpose.xlu1.b32.cont [4/8] (short) (narrow) %v17841_v26, 8  ;;  %v19122_v26 = vld [vmem:[%s24576_s10 + $0x4] ss:$16 sps:$4 sm:$0xff]  }
 0xbb5   : > { %15739 = vmatprep.subr.bf16.mxu0 %v19122_v26 }
 0xbb6   : > { %14588 = vxpose.xlu0.b32.cont [4/8] (short) (narrow) %v17851_v1, 8  ;;  %v19128_v1 = vld [vmem:[%s24576_s10 + $0x24] ss:$16 sps:$4 sm:$0xff]   ;;  %15740 = vmatpush1.bf16.msra.mxu0 %v19120_v61 }
 0xbb7   : > { %15741 = vmatprep.subr.bf16.mxu0 %v19128_v1 }
 0xbe9   : > { %v17844_v23 = vpop.f32.mrb[52].mxu0 }
 0xbea   : > { %v13978_v21 = vpop.f32.mrb[53].mxu0 }
 0xbeb   : > { %v17854_v42 = vpop.f32.mrb[52].mxu1  ;;  %14557 = vxpose.xlu1.b32.cont [5/8] (short) (narrow) %v13978_v21, 8  ;;  %v17845_v56 = vpop.f32.mrb[54].mxu0  ;;  %v19129_v21 = vld [vmem:[%s24576_s10 + $0x28] ss:$16 sps:$4 sm:$0xff]  }
 0xbec   : > { %v13981_v29 = vpop.f32.mrb[55].mxu0  ;;  %v14058_v9 = vpop.f32.mrb[53].mxu1  ;;  %15824 = vmatpush1.bf16.msra.mxu1 %v19129_v21 }
 0xbed   : > { %14589 = vxpose.xlu0.b32.cont [5/8] (short) (narrow) %v14058_v9, 8  ;;  %v17855_v6 = vpop.f32.mrb[54].mxu1  ;;  %v19135_v9 = vld [vmem:[%s24576_s10 + $0x48] ss:$16 sps:$4 sm:$0xff]  }
 0xbee   : > { %v14061_v20 = vpop.f32.mrb[55].mxu1 }
 0xbef   : > { %14558 = vxpose.xlu1.b32.cont [6/8] (short) (narrow) %v13981_v29, 8  ;;  %v19132_v29 = vld [vmem:[%s24576_s10 + $0x40] ss:$16 sps:$4 sm:$0xff]  }
 0xbf1   : > { %14590 = vxpose.xlu0.b32.cont [6/8] (short) (narrow) %v14061_v20, 8  ;;  %v17860_v2 = vpop.f32.mrb[56].mxu0  ;;  %v19143_v20 = vld [vmem:[%s24576_s10 + $0x6c] ss:$16 sps:$4 sm:$0xff]  }
 0xbf2   : > { %v14122_v34 = vpop.f32.mrb[57].mxu0 }
 0xbf3   : > { %v17870_v55 = vpop.f32.mrb[56].mxu1  ;;  %14559 = vxpose.xlu1.b32.cont [7/8] (short) (narrow) %v17844_v23, 8  ;;  %v17861_v5 = vpop.f32.mrb[58].mxu0  ;;  %v19126_v23 = vld [vmem:[%s24576_s10 + $0x20] ss:$16 sps:$4 sm:$0xff]  }
 0xbf4   : > { %v14125_v60 = vpop.f32.mrb[59].mxu0  ;;  %v14202_v10 = vpop.f32.mrb[57].mxu1  ;;  %15742 = vmatpush1.bf16.msra.mxu0 %v19126_v23 }
 0xbf5   : > { %14591 = vxpose.xlu0.b32.cont [7/8] (short) (narrow) %v17854_v42, 8  ;;  %v17871_v24 = vpop.f32.mrb[58].mxu1  ;;  %v19134_v42 = vld [vmem:[%s24576_s10 + $0x44] ss:$16 sps:$4 sm:$0xff]  }
 0xbf6   : > { %v14205_v8 = vpop.f32.mrb[59].mxu1  ;;  %15743 = vmatprep.subr.bf16.mxu0 %v19134_v42 }
 0xbf7   : > { %14560 = vxpose.xlu1.b32.end [8/8] (short) (narrow) %v17845_v56, 8  ;;  %v19137_v56 = vld [vmem:[%s24576_s10 + $0x4c] ss:$16 sps:$4 sm:$0xff]  }
 0xbf8   : > { %15825 = vmatprep.subr.bf16.mxu1 %v19137_v56  ;;  %15744 = vmatpush1.bf16.msra.mxu0 %v19132_v29 }
 0xbf9   : > { %14592 = vxpose.xlu0.b32.end [8/8] (short) (narrow) %v17855_v6, 8  ;;  %v17864_v17 = vpop.f32.mrb[60].mxu0  ;;  %v19140_v6 = vld [vmem:[%s24576_s10 + $0x64] ss:$16 sps:$4 sm:$0xff]   ;;  %15826 = vmatpush1.bf16.msra.mxu1 %v19135_v9 }
 0xbfa   : > { %v14138_v7 = vpop.f32.mrb[61].mxu0  ;;  %15745 = vmatprep.subr.bf16.mxu0 %v19140_v6  ;;  %15827 = vmatprep.subr.bf16.mxu1 %v19143_v20 }
 0xbfb   : > { %v17874_v49 = vpop.f32.mrb[60].mxu1  ;;  %14649 = vxpose.xlu1.b32.start [1/8] (short) (narrow) %v14202_v10, 8  ;;  %v17865_v44 = vpop.f32.mrb[62].mxu0  ;;  %v19147_v10 = vld [vmem:[%s24576_s10 + $0x88] ss:$16 sps:$4 sm:$0xff]  }
 0xbfc   : > { %v14141_v35 = vpop.f32.mrb[63].mxu0  ;;  %v14218_v59 = vpop.f32.mrb[61].mxu1 }
 0xbfd   : > { %v17875_v30 = vpop.f32.mrb[62].mxu1  ;;  %14617 = vxpose.xlu0.b32.start [1/8] (short) (narrow) %v14122_v34, 8  ;;  %v19141_v34 = vld [vmem:[%s24576_s10 + $0x68] ss:$16 sps:$4 sm:$0xff]  }
 0xbfe   : > { %v14221_v43 = vpop.f32.mrb[63].mxu1  ;;  %15828 = vmatpush1.bf16.msra.mxu1 %v19141_v34 }
 0xbff   : > { %14650 = vxpose.xlu1.b32.cont [2/8] (short) (narrow) %v14205_v8, 8  ;;  %v19155_v8 = vld [vmem:[%s24576_s10 + $0xac] ss:$16 sps:$4 sm:$0xff]  }
 0xc01   : > { %14618 = vxpose.xlu0.b32.cont [2/8] (short) (narrow) %v14125_v60, 8  ;;  %v17880_v38 = vpop.f32.mrb[64].mxu0  ;;  %v19144_v60 = vld [vmem:[%s24576_s10 + $0x80] ss:$16 sps:$4 sm:$0xff]  }
 0xc02   : > { %v14282_v45 = vpop.f32.mrb[65].mxu0 }
 0xc03   : > { %v17890_v12 = vpop.f32.mrb[64].mxu1  ;;  %14651 = vxpose.xlu1.b32.cont [3/8] (short) (narrow) %v17870_v55, 8  ;;  %v17881_v3 = vpop.f32.mrb[66].mxu0  ;;  %v19146_v55 = vld [vmem:[%s24576_s10 + $0x84] ss:$16 sps:$4 sm:$0xff]  }
 0xc04   : > { %v14285_v53 = vpop.f32.mrb[67].mxu0  ;;  %v14362_v37 = vpop.f32.mrb[65].mxu1 }
 0xc05   : > { %v17891_v58 = vpop.f32.mrb[66].mxu1  ;;  %14619 = vxpose.xlu0.b32.cont [3/8] (short) (narrow) %v17860_v2, 8  ;;  %v19138_v2 = vld [vmem:[%s24576_s10 + $0x60] ss:$16 sps:$4 sm:$0xff]  }
 0xc06   : > { %v14365_v22 = vpop.f32.mrb[67].mxu1  ;;  %15746 = vmatpush1.bf16.msra.mxu0 %v19138_v2 }
 0xc07   : > { %14652 = vxpose.xlu1.b32.cont [4/8] (short) (narrow) %v17871_v24, 8  ;;  %15747 = vmatprep.subr.bf16.mxu0 %v19146_v55  ;;  %v19152_v24 = vld [vmem:[%s24576_s10 + $0xa4] ss:$16 sps:$4 sm:$0xff]  }
 0xc09   : > { %14620 = vxpose.xlu0.b32.cont [4/8] (short) (narrow) %v17861_v5, 8  ;;  %v17884_v14 = vpop.f32.mrb[68].mxu0  ;;  %v19149_v5 = vld [vmem:[%s24576_s10 + $0x8c] ss:$16 sps:$4 sm:$0xff]  }
 0xc0a   : > { %v14298_v47 = vpop.f32.mrb[69].mxu0  ;;  %15829 = vmatprep.subr.bf16.mxu1 %v19149_v5  ;;  %15748 = vmatpush1.bf16.msra.mxu0 %v19144_v60 }
 0xc0b   : > { %v17894_v28 = vpop.f32.mrb[68].mxu1  ;;  %14653 = vxpose.xlu1.b32.cont [5/8] (short) (narrow) %v14218_v59, 8  ;;  %v17885_v36 = vpop.f32.mrb[70].mxu0  ;;  %15830 = vmatpush1.bf16.msra.mxu1 %v19147_v10  ;;  %v19159_v59 = vld [vmem:[%s24576_s10 + $0xc8] ss:$16 sps:$4 sm:$0xff]  }
 0xc0c   : > { %v14301_v50 = vpop.f32.mrb[71].mxu0  ;;  %v14378_v18 = vpop.f32.mrb[69].mxu1  ;;  %15749 = vmatprep.subr.bf16.mxu0 %v19152_v24  ;;  %15831 = vmatprep.subr.bf16.mxu1 %v19155_v8  ;;  %v24659_v24 = vmov 0.0  }
 0xc0d   : > { %v17895_v19 = vpop.f32.mrb[70].mxu1  ;;  %14621 = vxpose.xlu0.b32.cont [5/8] (short) (narrow) %v14138_v7, 8  ;;  %v19153_v7 = vld [vmem:[%s24576_s10 + $0xa8] ss:$16 sps:$4 sm:$0xff]  }
 0xc0e   : > { %v14381_v63 = vpop.f32.mrb[71].mxu1 }
 0xc0f   : > { %14654 = vxpose.xlu1.b32.cont [6/8] (short) (narrow) %v14221_v43, 8  ;;  %15832 = vmatpush1.bf16.msra.mxu1 %v19153_v7  ;;  %v19167_v43 = vld [vmem:[%s24576_s10 + $0xec] ss:$16 sps:$4 sm:$0xff]  }
 0xc10   : > { %v19215_v7 = vld [vmem:[%s24576_s10 + $0x1ec] ss:$16 sps:$4 sm:$0xff]  }
 0xc11   : > { %14622 = vxpose.xlu0.b32.cont [6/8] (short) (narrow) %v14141_v35, 8  ;;  %v17900_v15 = vpop.f32.mrb[72].mxu0  ;;  %v19156_v35 = vld [vmem:[%s24576_s10 + $0xc0] ss:$16 sps:$4 sm:$0xff]  }
 0xc12   : > { %v14442_v51 = vpop.f32.mrb[73].mxu0 }
 0xc13   : > { %v17910_v27 = vpop.f32.mrb[72].mxu1  ;;  %14655 = vxpose.xlu1.b32.cont [7/8] (short) (narrow) %v17874_v49, 8  ;;  %v17901_v4 = vpop.f32.mrb[74].mxu0  ;;  %v19158_v49 = vld [vmem:[%s24576_s10 + $0xc4] ss:$16 sps:$4 sm:$0xff]  }
 0xc14   : > { %v14445_v41 = vpop.f32.mrb[75].mxu0  ;;  %v14522_v62 = vpop.f32.mrb[73].mxu1 }
 0xc15   : > { %v17911_v33 = vpop.f32.mrb[74].mxu1  ;;  %14623 = vxpose.xlu0.b32.cont [7/8] (short) (narrow) %v17864_v17, 8  ;;  %v19150_v17 = vld [vmem:[%s24576_s10 + $0xa0] ss:$16 sps:$4 sm:$0xff]  }
 0xc16   : > { %v14525_v39 = vpop.f32.mrb[75].mxu1  ;;  %15750 = vmatpush1.bf16.msra.mxu0 %v19150_v17  ;;  %v19212_v17 = vld [vmem:[%s24576_s10 + $0x1e4] ss:$16 sps:$4 sm:$0xff]  }
 0xc17   : > { %14656 = vxpose.xlu1.b32.end [8/8] (short) (narrow) %v17875_v30, 8  ;;  %15751 = vmatprep.subr.bf16.mxu0 %v19158_v49  ;;  %v19164_v30 = vld [vmem:[%s24576_s10 + $0xe4] ss:$16 sps:$4 sm:$0xff]  }
 0xc19   : > { %14624 = vxpose.xlu0.b32.end [8/8] (short) (narrow) %v17865_v44, 8  ;;  %v17904_v25 = vpop.f32.mrb[76].mxu0  ;;  %v19161_v44 = vld [vmem:[%s24576_s10 + $0xcc] ss:$16 sps:$4 sm:$0xff]  }
 0xc1a   : > { %v14458_v52 = vpop.f32.mrb[77].mxu0  ;;  %15833 = vmatprep.subr.bf16.mxu1 %v19161_v44  ;;  %15752 = vmatpush1.bf16.msra.mxu0 %v19156_v35 }
 0xc1b   : > { %v17914_v0 = vpop.f32.mrb[76].mxu1  ;;  %14713 = vxpose.xlu1.b32.start [1/8] (short) (narrow) %v14362_v37, 8  ;;  %v17905_v11 = vpop.f32.mrb[78].mxu0  ;;  %15834 = vmatpush1.bf16.msra.mxu1 %v19159_v59  ;;  %v19171_v37 = vld [vmem:[%s24576_s10 + $0x108] ss:$16 sps:$4 sm:$0xff]  }
 0xc1c   : > { %v14461_v32 = vpop.f32.mrb[79].mxu0  ;;  %v14538_v57 = vpop.f32.mrb[77].mxu1  ;;  %15753 = vmatprep.subr.bf16.mxu0 %v19164_v30  ;;  %15835 = vmatprep.subr.bf16.mxu1 %v19167_v43  ;;  %v19210_v59 = vld [vmem:[%s24576_s10 + $0x1e0] ss:$16 sps:$4 sm:$0xff]   ;;  %v19213_v30 = vld [vmem:[%s24576_s10 + $0x1e8] ss:$16 sps:$4 sm:$0xff]  }
 0xc1d   : > { %v17915_v40 = vpop.f32.mrb[78].mxu1  ;;  %14681 = vxpose.xlu0.b32.start [1/8] (short) (narrow) %v14282_v45, 8  ;;  %v19165_v45 = vld [vmem:[%s24576_s10 + $0xe8] ss:$16 sps:$4 sm:$0xff]  }
 0xc1e   : > { %v14541_v31 = vpop.f32.mrb[79].mxu1 }
 0xc1f   : > { %14714 = vxpose.xlu1.b32.cont [2/8] (short) (narrow) %v14365_v22, 8  ;;  %15836 = vmatpush1.bf16.msra.mxu1 %v19165_v45  ;;  %v19179_v22 = vld [vmem:[%s24576_s10 + $0x12c] ss:$16 sps:$4 sm:$0xff]  }
 0xc21   : > { %14682 = vxpose.xlu0.b32.cont [2/8] (short) (narrow) %v14285_v53, 8  ;;  %v19168_v53 = vld [vmem:[%s24576_s10 + $0x100] ss:$16 sps:$4 sm:$0xff]  }
 0xc23   : > { %14715 = vxpose.xlu1.b32.cont [3/8] (short) (narrow) %v17890_v12, 8  ;;  %v19170_v12 = vld [vmem:[%s24576_s10 + $0x104] ss:$16 sps:$4 sm:$0xff]  }
 0xc25   : > { %14683 = vxpose.xlu0.b32.cont [3/8] (short) (narrow) %v17880_v38, 8  ;;  %v19162_v38 = vld [vmem:[%s24576_s10 + $0xe0] ss:$16 sps:$4 sm:$0xff]  }
 0xc26   : > { %15754 = vmatpush1.bf16.msra.mxu0 %v19162_v38 }
 0xc27   : > { %14716 = vxpose.xlu1.b32.cont [4/8] (short) (narrow) %v17891_v58, 8  ;;  %15755 = vmatprep.subr.bf16.mxu0 %v19170_v12  ;;  %v19176_v58 = vld [vmem:[%s24576_s10 + $0x124] ss:$16 sps:$4 sm:$0xff]  }
 0xc29   : > { %14684 = vxpose.xlu0.b32.cont [4/8] (short) (narrow) %v17881_v3, 8  ;;  %v19173_v3 = vld [vmem:[%s24576_s10 + $0x10c] ss:$16 sps:$4 sm:$0xff]  }
 0xc2a   : > { %15837 = vmatprep.subr.bf16.mxu1 %v19173_v3  ;;  %15756 = vmatpush1.bf16.msra.mxu0 %v19168_v53  ;;  %v19218_v3 = vld [vmem:[%s24576_s10 + $0x204] ss:$16 sps:$4 sm:$0xff]   ;;  %v19221_v53 = vld [vmem:[%s24576_s10 + $0x20c] ss:$16 sps:$4 sm:$0xff]  }
 0xc2b   : > { %14717 = vxpose.xlu1.b32.cont [5/8] (short) (narrow) %v14378_v18, 8  ;;  %15838 = vmatpush1.bf16.msra.mxu1 %v19171_v37  ;;  %v19183_v18 = vld [vmem:[%s24576_s10 + $0x148] ss:$16 sps:$4 sm:$0xff]  }
 0xc2c   : > { %15757 = vmatprep.subr.bf16.mxu0 %v19176_v58  ;;  %15839 = vmatprep.subr.bf16.mxu1 %v19179_v22 }
 0xc2d   : > { %14685 = vxpose.xlu0.b32.cont [5/8] (short) (narrow) %v14298_v47, 8  ;;  %v19177_v47 = vld [vmem:[%s24576_s10 + $0x128] ss:$16 sps:$4 sm:$0xff]  }
 0xc2f   : > { %14718 = vxpose.xlu1.b32.cont [6/8] (short) (narrow) %v14381_v63, 8  ;;  %15840 = vmatpush1.bf16.msra.mxu1 %v19177_v47  ;;  %v19191_v63 = vld [vmem:[%s24576_s10 + $0x16c] ss:$16 sps:$4 sm:$0xff]  }
 0xc31   : > { %14686 = vxpose.xlu0.b32.cont [6/8] (short) (narrow) %v14301_v50, 8  ;;  %v19180_v50 = vld [vmem:[%s24576_s10 + $0x140] ss:$16 sps:$4 sm:$0xff]  }
 0xc33   : > { %14719 = vxpose.xlu1.b32.cont [7/8] (short) (narrow) %v17894_v28, 8  ;;  %v19182_v28 = vld [vmem:[%s24576_s10 + $0x144] ss:$16 sps:$4 sm:$0xff]  }
 0xc35   : > { %14687 = vxpose.xlu0.b32.cont [7/8] (short) (narrow) %v17884_v14, 8  ;;  %v19174_v14 = vld [vmem:[%s24576_s10 + $0x120] ss:$16 sps:$4 sm:$0xff]  }
 0xc36   : > { %15758 = vmatpush1.bf16.msra.mxu0 %v19174_v14 }
 0xc37   : > { %14720 = vxpose.xlu1.b32.end [8/8] (short) (narrow) %v17895_v19, 8  ;;  %15759 = vmatprep.subr.bf16.mxu0 %v19182_v28  ;;  %v19188_v19 = vld [vmem:[%s24576_s10 + $0x164] ss:$16 sps:$4 sm:$0xff]  }
 0xc39   : > { %14688 = vxpose.xlu0.b32.end [8/8] (short) (narrow) %v17885_v36, 8  ;;  %v19185_v36 = vld [vmem:[%s24576_s10 + $0x14c] ss:$16 sps:$4 sm:$0xff]  }
 0xc3a   : > { %15841 = vmatprep.subr.bf16.mxu1 %v19185_v36  ;;  %15760 = vmatpush1.bf16.msra.mxu0 %v19180_v50 }
 0xc3b   : > { %14777 = vxpose.xlu1.b32.start [1/8] (short) (narrow) %v14522_v62, 8  ;;  %15842 = vmatpush1.bf16.msra.mxu1 %v19183_v18  ;;  %v19195_v62 = vld [vmem:[%s24576_s10 + $0x188] ss:$16 sps:$4 sm:$0xff]  }
 0xc3c   : > { %15761 = vmatprep.subr.bf16.mxu0 %v19188_v19  ;;  %15843 = vmatprep.subr.bf16.mxu1 %v19191_v63 }
 0xc3d   : > { %14745 = vxpose.xlu0.b32.start [1/8] (short) (narrow) %v14442_v51, 8  ;;  %v19189_v51 = vld [vmem:[%s24576_s10 + $0x168] ss:$16 sps:$4 sm:$0xff]  }
 0xc3f   : > { %14778 = vxpose.xlu1.b32.cont [2/8] (short) (narrow) %v14525_v39, 8  ;;  %15844 = vmatpush1.bf16.msra.mxu1 %v19189_v51  ;;  %v19203_v39 = vld [vmem:[%s24576_s10 + $0x1ac] ss:$16 sps:$4 sm:$0xff]  }
 0xc41   : > { %14746 = vxpose.xlu0.b32.cont [2/8] (short) (narrow) %v14445_v41, 8  ;;  %v19192_v41 = vld [vmem:[%s24576_s10 + $0x180] ss:$16 sps:$4 sm:$0xff]  }
 0xc43   : > { %14779 = vxpose.xlu1.b32.cont [3/8] (short) (narrow) %v17910_v27, 8  ;;  %v19194_v27 = vld [vmem:[%s24576_s10 + $0x184] ss:$16 sps:$4 sm:$0xff]  }
 0xc45   : > { %14747 = vxpose.xlu0.b32.cont [3/8] (short) (narrow) %v17900_v15, 8  ;;  %v19186_v15 = vld [vmem:[%s24576_s10 + $0x160] ss:$16 sps:$4 sm:$0xff]  }
 0xc46   : > { %15762 = vmatpush1.bf16.msra.mxu0 %v19186_v15 }
 0xc47   : > { %14780 = vxpose.xlu1.b32.cont [4/8] (short) (narrow) %v17911_v33, 8  ;;  %15763 = vmatprep.subr.bf16.mxu0 %v19194_v27  ;;  %v19200_v33 = vld [vmem:[%s24576_s10 + $0x1a4] ss:$16 sps:$4 sm:$0xff]  }
 0xc49   : > { %14748 = vxpose.xlu0.b32.cont [4/8] (short) (narrow) %v17901_v4, 8  ;;  %v19197_v4 = vld [vmem:[%s24576_s10 + $0x18c] ss:$16 sps:$4 sm:$0xff]  }
 0xc4a   : > { %15845 = vmatprep.subr.bf16.mxu1 %v19197_v4  ;;  %15764 = vmatpush1.bf16.msra.mxu0 %v19192_v41 }
 0xc4b   : > { %14781 = vxpose.xlu1.b32.cont [5/8] (short) (narrow) %v14538_v57, 8  ;;  %15846 = vmatpush1.bf16.msra.mxu1 %v19195_v62  ;;  %v19207_v57 = vld [vmem:[%s24576_s10 + $0x1c8] ss:$16 sps:$4 sm:$0xff]  }
 0xc4c   : > { %15765 = vmatprep.subr.bf16.mxu0 %v19200_v33  ;;  %15847 = vmatprep.subr.bf16.mxu1 %v19203_v39 }
 0xc4d   : > { %14749 = vxpose.xlu0.b32.cont [5/8] (short) (narrow) %v14458_v52, 8  ;;  %v19201_v52 = vld [vmem:[%s24576_s10 + $0x1a8] ss:$16 sps:$4 sm:$0xff]  }
 0xc4f   : > { %14782 = vxpose.xlu1.b32.cont [6/8] (short) (narrow) %v14541_v31, 8  ;;  %15848 = vmatpush1.bf16.msra.mxu1 %v19201_v52  ;;  %v19219_v52 = vld [vmem:[%s24576_s10 + $0x208] ss:$16 sps:$4 sm:$0xff]  }
 0xc51   : > { %14750 = vxpose.xlu0.b32.cont [6/8] (short) (narrow) %v14461_v32, 8  ;;  %v19204_v32 = vld [vmem:[%s24576_s10 + $0x1c0] ss:$16 sps:$4 sm:$0xff]  }
 0xc53   : > { %14783 = vxpose.xlu1.b32.cont [7/8] (short) (narrow) %v17914_v0, 8  ;;  %v19206_v0 = vld [vmem:[%s24576_s10 + $0x1c4] ss:$16 sps:$4 sm:$0xff]  }
 0xc55   : > { %14751 = vxpose.xlu0.b32.cont [7/8] (short) (narrow) %v17904_v25, 8  ;;  %v19198_v25 = vld [vmem:[%s24576_s10 + $0x1a0] ss:$16 sps:$4 sm:$0xff]  }
 0xc56   : > { %15766 = vmatpush1.bf16.msra.mxu0 %v19198_v25  ;;  %v19216_v25 = vld [vmem:[%s24576_s10 + $0x200] ss:$16 sps:$4 sm:$0xff]  }
 0xc57   : > { %14784 = vxpose.xlu1.b32.end [8/8] (short) (narrow) %v17915_v40, 8  ;;  %15767 = vmatprep.subr.bf16.mxu0 %v19206_v0 }
 0xc59   : > { %14752 = vxpose.xlu0.b32.end [8/8] (short) (narrow) %v17905_v11, 8  ;;  %v19209_v11 = vld [vmem:[%s24576_s10 + $0x1cc] ss:$16 sps:$4 sm:$0xff]  }
 0xc5a   : > { %15849 = vmatprep.subr.bf16.mxu1 %v19209_v11  ;;  %15768 = vmatpush1.bf16.msra.mxu0 %v19204_v32  ;;  %v19224_v32 = vld [vmem:[%s24576_s10 + $0x224] ss:$16 sps:$4 sm:$0xff]  }
 0xc5b   : > { %15850 = vmatpush1.bf16.msra.mxu1 %v19207_v57  ;;  %v14569_v40 = vpop.trf.xlu1  ;;  %15769 = vmatprep.subr.bf16.mxu0 %v19212_v17  ;;  %v19227_v57 = vld [vmem:[%s24576_s10 + $0x22c] ss:$16 sps:$4 sm:$0xff]   ;;  %v19258_v17 = vld [vmem:[%s24576_s10 + $0x2e0] ss:$16 sps:$4 sm:$0xff]  }
 0xc5c   : > { %15851 = vmatprep.subr.bf16.mxu1 %v19215_v7  ;;  %v19261_v7 = vld [vmem:[%s24576_s10 + $0x2e8] ss:$16 sps:$4 sm:$0xff]  }
 0xc5d   : > { %v14601_v31 = vpop.trf.xlu0 }
 0xc5e   : > { %15770 = vmatpush1.bf16.msra.mxu0 %v19210_v59  ;;  %v19267_v59 = vld [vmem:[%s24576_s10 + $0x308] ss:$16 sps:$4 sm:$0xff]  }
 0xc5f   : > { %15852 = vmatpush1.bf16.msra.mxu1 %v19213_v30  ;;  %15780 = vmatprep.subr.bf16.mxu0 %v19218_v3  ;;  %v19272_v30 = vld [vmem:[%s24576_s10 + $0x324] ss:$16 sps:$4 sm:$0xff]   ;;  %v19281_v3 = vld [vmem:[%s24576_s10 + $0x34c] ss:$16 sps:$4 sm:$0xff]  }
 0xc60   : > { %15862 = vmatprep.subr.bf16.mxu1 %v19221_v53  ;;  %v19276_v53 = vld [vmem:[%s24576_s10 + $0x340] ss:$16 sps:$4 sm:$0xff]  }
 0xc7b   : > { %v14665_v61 = vpop.trf.xlu1 }
 0xc7c   : > { %v14817_v1 = vcombine.low %v14601_v31, %v14665_v61  ;;  %v19225_v31 = vld [vmem:[%s24576_s10 + $0x228] ss:$16 sps:$4 sm:$0xff]   ;;  %v19230_v61 = vld [vmem:[%s24576_s10 + $0x244] ss:$16 sps:$4 sm:$0xff]  }
 0xc7d   : > { %v14633_v26 = vpop.trf.xlu0 }
 0xc7e   : > { %v14809_v13 = vcombine.low %v14569_v40, %v14633_v26  ;;  %v14824_v21 = vrot.slane %v14817_v1, %v22934_v48  ;;  %v19222_v40 = vld [vmem:[%s24576_s10 + $0x220] ss:$16 sps:$4 sm:$0xff]   ;;  %v19233_v26 = vld [vmem:[%s24576_s10 + $0x24c] ss:$16 sps:$4 sm:$0xff]   ;;  %v19236_v1 = vld [vmem:[%s24576_s10 + $0x264] ss:$16 sps:$4 sm:$0xff]  }
 0xc80   : > { %v14816_v42 = vrot.slane %v14809_v13, %v22934_v48  ;;  %v19239_v13 = vld [vmem:[%s24576_s10 + $0x26c] ss:$16 sps:$4 sm:$0xff]  }
 0xc82   : > { %v14841_v6 = vcombine.low %v14816_v42, %v14824_v21  ;;  %v19237_v21 = vld [vmem:[%s24576_s10 + $0x268] ss:$16 sps:$4 sm:$0xff]   ;;  %v19242_v42 = vld [vmem:[%s24576_s10 + $0x284] ss:$16 sps:$4 sm:$0xff]  }
 0xc84   : > { %v14848_v55 = vrot.slane %v14841_v6, %v22949_v16  ;;  %v19248_v6 = vld [vmem:[%s24576_s10 + $0x2a4] ss:$16 sps:$4 sm:$0xff]  }
 0xc9b   : > { %v14729_v46 = vpop.trf.xlu1 }
 0xc9d   : > { %v14697_v54 = vpop.trf.xlu0 }
 0xcbb   : > { %v14793_v23 = vpop.trf.xlu1 }
 0xcbc   : > { %v14833_v56 = vcombine.low %v14729_v46, %v14793_v23  ;;  %v19228_v46 = vld [vmem:[%s24576_s10 + $0x240] ss:$16 sps:$4 sm:$0xff]  }
 0xcbd   : > { %v14761_v29 = vpop.trf.xlu0  ;;  %v19234_v23 = vld [vmem:[%s24576_s10 + $0x260] ss:$16 sps:$4 sm:$0xff]  }
 0xcbe   : > { %v14825_v9 = vcombine.low %v14697_v54, %v14761_v29  ;;  %v14840_v20 = vrot.slane %v14833_v56, %v22934_v48  ;;  %v19231_v54 = vld [vmem:[%s24576_s10 + $0x248] ss:$16 sps:$4 sm:$0xff]   ;;  %v19245_v56 = vld [vmem:[%s24576_s10 + $0x28c] ss:$16 sps:$4 sm:$0xff]   ;;  %v19240_v29 = vld [vmem:[%s24576_s10 + $0x280] ss:$16 sps:$4 sm:$0xff]  }
 0xcc0   : > { %v14832_v2 = vrot.slane %v14825_v9, %v22934_v48  ;;  %v19243_v9 = vld [vmem:[%s24576_s10 + $0x288] ss:$16 sps:$4 sm:$0xff]  }
 0xcc2   : > { %v14849_v34 = vcombine.low %v14832_v2, %v14840_v20  ;;  %v19251_v20 = vld [vmem:[%s24576_s10 + $0x2ac] ss:$16 sps:$4 sm:$0xff]   ;;  %v19246_v2 = vld [vmem:[%s24576_s10 + $0x2a0] ss:$16 sps:$4 sm:$0xff]  }
 0xcc4   : > { %v14856_v5 = vrot.slane %v14849_v34, %v22949_v16  ;;  %v19249_v34 = vld [vmem:[%s24576_s10 + $0x2a8] ss:$16 sps:$4 sm:$0xff]  }
 0xcc6   : > { %v14857_v60 = vcombine.low %v14848_v55, %v14856_v5  ;;  %v14858_v10 = vcombine.high %v14848_v55, %v14856_v5  ;;  %v17448_v8 = vcombine.high %v14856_v5, %v24659_v24  ;;  %v19254_v55 = vld [vmem:[%s24576_s10 + $0x2c4] ss:$16 sps:$4 sm:$0xff]   ;;  %v19257_v5 = vld [vmem:[%s24576_s10 + $0x2cc] ss:$16 sps:$4 sm:$0xff]  }
 0xcc8   : > { %v14859_v49 = vcombine.high %v14857_v60, %v24659_v24  ;;  %v14866_v44 = vrot.slane %v14857_v60, %v22934_v48  ;;  %v14881_v35 = vrot.slane %v14858_v10, %v22934_v48  ;;  %v14888_v43 = vrot.slane %v17448_v8, %v22934_v48  ;;  %v19252_v60 = vld [vmem:[%s24576_s10 + $0x2c0] ss:$16 sps:$4 sm:$0xff]   ;;  %v19255_v10 = vld [vmem:[%s24576_s10 + $0x2c8] ss:$16 sps:$4 sm:$0xff]   ;;  %v19263_v8 = vld [vmem:[%s24576_s10 + $0x2ec] ss:$16 sps:$4 sm:$0xff]  }
 0xcca   : > { %v14873_v38 = vrot.slane %v14859_v49, %v22934_v48  ;;  %v14889_v45 = vcombine.low %v14866_v44, %v14881_v35  ;;  %v14890_v12 = vcombine.high %v14866_v44, %v14881_v35  ;;  %v19266_v49 = vld [vmem:[%s24576_s10 + $0x304] ss:$16 sps:$4 sm:$0xff]   ;;  %v19269_v44 = vld [vmem:[%s24576_s10 + $0x30c] ss:$16 sps:$4 sm:$0xff]   ;;  %v19264_v35 = vld [vmem:[%s24576_s10 + $0x300] ss:$16 sps:$4 sm:$0xff]  }
 0xccc   : > { %v14897_v37 = vrot.slane %v14889_v45, %v22949_v16  ;;  %v14904_v58 = vrot.slane %v14890_v12, %v22949_v16  ;;  %v14905_v22 = vcombine.low %v14873_v38, %v14888_v43  ;;  %v14906_v14 = vcombine.high %v14873_v38, %v14888_v43  ;;  %v19275_v43 = vld [vmem:[%s24576_s10 + $0x32c] ss:$16 sps:$4 sm:$0xff]   ;;  %v19270_v38 = vld [vmem:[%s24576_s10 + $0x320] ss:$16 sps:$4 sm:$0xff]   ;;  %v19273_v45 = vld [vmem:[%s24576_s10 + $0x328] ss:$16 sps:$4 sm:$0xff]  }
 0xccd   : > { %v19278_v12 = vld [vmem:[%s24576_s10 + $0x344] ss:$16 sps:$4 sm:$0xff]  }
 0xcce   : > { %v14921_v48 = vcombine.high %v14897_v37, %v24659_v24  ;;  %v14922_v47 = vcombine.high %v14904_v58, %v24659_v24  ;;  %v24220_v28 = vrot.slane %v14905_v22, %v22949_v16  ;;  %v14920_v36 = vrot.slane %v14906_v14, %v22949_v16  ;;  %v19287_v22 = vld [vmem:[%s24576_s10 + $0x36c] ss:$16 sps:$4 sm:$0xff]   ;;  %v19282_v14 = vld [vmem:[%s24576_s10 + $0x360] ss:$16 sps:$4 sm:$0xff]  }
 0xcd0   : > { %v18150_v50 = vpack.i.bf16 %v14921_v48, %v14922_v47  ;;  %v14923_v18 = vcombine.high %v24220_v28, %v24659_v24  ;;  %v14924_v19 = vcombine.high %v14920_v36, %v24659_v24  ;;  %v19260_v24 = vld [vmem:[%s24576_s10 + $0x2e4] ss:$16 sps:$4 sm:$0xff]   ;;  %v19285_v48 = vld [vmem:[%s24576_s10 + $0x368] ss:$16 sps:$4 sm:$0xff]  }
 0xcd1   : > { %v19290_v47 = vld [vmem:[%s24576_s10 + $0x384] ss:$16 sps:$4 sm:$0xff]  }
 0xcd2   : > { %18151 = vrot.lane.b32.xlu0 %v18150_v50, %s19436_s29  ;;  %v18155_v63 = vpack.i.bf16 %v14923_v18, %v14924_v19  ;;  %v19288_v50 = vld [vmem:[%s24576_s10 + $0x380] ss:$16 sps:$4 sm:$0xff]   ;;  %v19291_v18 = vld [vmem:[%s24576_s10 + $0x388] ss:$16 sps:$4 sm:$0xff]   ;;  %v19296_v19 = vld [vmem:[%s24576_s10 + $0x3a4] ss:$16 sps:$4 sm:$0xff]  }
 0xcd4   : > { %18156 = vrot.lane.b32.xlu1 %v18155_v63, %s19436_s29  ;;  %v19299_v63 = vld [vmem:[%s24576_s10 + $0x3ac] ss:$16 sps:$4 sm:$0xff]  }
 0xd44   : > { %v18152_v15 = vpop.permute.xlu0 %18151 }
 0xd45   : > { %v18154_v51 = vunpack.i.h.bf16 %v18152_v15  ;;  %v18153_v27 = vunpack.i.l.bf16 %v18152_v15  ;;  %v19294_v15 = vld [vmem:[%s24576_s10 + $0x3a0] ss:$16 sps:$4 sm:$0xff]  }
 0xd46   : > { %v24228_v4 = vpop.permute.xlu1 %18156 }
 0xd47   : > { %v14941_v41 = vsel %vm11350_vm5, %v14897_v37, %v18154_v51  ;;  %v18158_v16 = vunpack.i.l.bf16 %v24228_v4  ;;  %v14942_v62 = vsel %vm11350_vm5, %v14904_v58, %v18153_v27  ;;  %v19279_v37 = vld [vmem:[%s24576_s10 + $0x348] ss:$16 sps:$4 sm:$0xff]   ;;  %v19284_v58 = vld [vmem:[%s24576_s10 + $0x364] ss:$16 sps:$4 sm:$0xff]  }
 0xd48   : > { %v14945_v33 = vpack.c.bf16 %v14941_v41, %v14941_v41  ;;  %v14946_v39 = vpack.c.bf16 %v14942_v62, %v14942_v62  ;;  %v19297_v51 = vld [vmem:[%s24576_s10 + $0x3a8] ss:$16 sps:$4 sm:$0xff]   ;;  %v19302_v27 = vld [vmem:[%s24576_s10 + $0x3c4] ss:$16 sps:$4 sm:$0xff]   ;;  %v19305_v41 = vld [vmem:[%s24576_s10 + $0x3cc] ss:$16 sps:$4 sm:$0xff]  }
 0xd49   : > { %v14944_v0 = vsel %vm11350_vm5, %v14920_v36, %v18158_v16  ;;  %v19293_v36 = vld [vmem:[%s24576_s10 + $0x38c] ss:$16 sps:$4 sm:$0xff]   ;;  %v19300_v16 = vld [vmem:[%s24576_s10 + $0x3c0] ss:$16 sps:$4 sm:$0xff]   ;;  %v19303_v62 = vld [vmem:[%s24576_s10 + $0x3c8] ss:$16 sps:$4 sm:$0xff]  }
 0xd4a   : > { %15771 = vmatprep.mubr.bf16.mxu0 %v14946_v39  ;;  %15853 = vmatprep.mubr.bf16.mxu1 %v14946_v39  ;;  %v14948_v11 = vpack.c.bf16 %v14944_v0, %v14944_v0  ;;  %v19311_v39 = vld [vmem:[%s24576_s10 + $0x3ec] ss:$16 sps:$4 sm:$0xff]   ;;  %v19309_v0 = vld [vmem:[%s24576_s10 + $0x3e8] ss:$16 sps:$4 sm:$0xff]  }
 0xd4b   : > { %15772 = vmatmul.mubr.bf16.vlgmr.msra.gmra.mrb[80].mxu0 %v14945_v33  ;;  %15854 = vmatmul.mubr.bf16.vlgmr.msra.gmra.mrb[80].mxu1 %v14945_v33  ;;  %v19308_v33 = vld [vmem:[%s24576_s10 + $0x3e4] ss:$16 sps:$4 sm:$0xff]  }
 0xd4c   : > { %15781 = vmatpush1.bf16.msra.mxu0 %v19216_v25  ;;  %15863 = vmatpush1.bf16.msra.mxu1 %v19219_v52  ;;  %v18159_v25 = vunpack.i.h.bf16 %v24228_v4  ;;  %v19306_v52 = vld [vmem:[%s24576_s10 + $0x3e0] ss:$16 sps:$4 sm:$0xff]  }
 0xd4d   : > { %15812 = vmatprep.mubr.bf16.mxu0 %v14948_v11  ;;  %15894 = vmatprep.mubr.bf16.mxu1 %v14948_v11  ;;  %v19312_v11 = vld [vmem:[%s24578_s12 + $0x40] sm:$0xff]  }
 0xd4e   : > { %15782 = vmatprep.subr.bf16.mxu0 %v19224_v32  ;;  %15864 = vmatprep.subr.bf16.mxu1 %v19227_v57  ;;  %v19313_v4 = vld [vmem:[%s24578_s12 + $0xc0] sm:$0xff]   ;;  %v14943_v32 = vsel %vm11350_vm5, %v24220_v28, %v18159_v25  ;;  %v19317_v28 = vld [vmem:[%s24578_s12 + $0xc8] sm:$0xff]  }
 0xd4f   : > { %v19314_v57 = vld [vmem:[%s24578_s12] sm:$0xff]  }
 0xd50   : > { %15783 = vmatpush1.bf16.msra.mxu0 %v19222_v40  ;;  %15865 = vmatpush1.bf16.msra.mxu1 %v19225_v31  ;;  %v19315_v40 = vld [vmem:[%s24578_s12 + $0x80] sm:$0xff]   ;;  %v14947_v31 = vpack.c.bf16 %v14943_v32, %v14943_v32 }
 0xd51   : > { %15784 = vmatprep.subr.bf16.mxu0 %v19230_v61  ;;  %15866 = vmatprep.subr.bf16.mxu1 %v19233_v26  ;;  %v19316_v61 = vld [vmem:[%s24578_s12 + $0x48] sm:$0xff]   ;;  %v17577_v25 = vld [vmem:[%s24579_s13] ss:$0 sm:$0xff] }
 0xd52   : > { %v19318_v26 = vld [vmem:[%s24578_s12 + $0x8] sm:$0xff]  }
 0xd54   : > { %15785 = vmatpush1.bf16.msra.mxu0 %v19228_v46  ;;  %15867 = vmatpush1.bf16.msra.mxu1 %v19231_v54  ;;  %v19319_v46 = vld [vmem:[%s24578_s12 + $0x88] sm:$0xff]   ;;  %v19320_v54 = vld [vmem:[%s24578_s12 + $0x50] sm:$0xff]  }
 0xd55   : > { %15786 = vmatprep.subr.bf16.mxu0 %v19236_v1  ;;  %15868 = vmatprep.subr.bf16.mxu1 %v19239_v13  ;;  %v19321_v1 = vld [vmem:[%s24578_s12 + $0xd0] sm:$0xff]  }
 0xd56   : > { %v19322_v13 = vld [vmem:[%s24578_s12 + $0x10] sm:$0xff]  }
 0xd58   : > { %15787 = vmatpush1.bf16.msra.mxu0 %v19234_v23  ;;  %15869 = vmatpush1.bf16.msra.mxu1 %v19237_v21  ;;  %v19323_v23 = vld [vmem:[%s24578_s12 + $0x90] sm:$0xff]   ;;  %v19324_v21 = vld [vmem:[%s24578_s12 + $0x58] sm:$0xff]  }
 0xd59   : > { %15788 = vmatprep.subr.bf16.mxu0 %v19242_v42  ;;  %15870 = vmatprep.subr.bf16.mxu1 %v19245_v56  ;;  %v19325_v42 = vld [vmem:[%s24578_s12 + $0xd8] sm:$0xff]  }
 0xd5a   : > { %v19326_v56 = vld [vmem:[%s24578_s12 + $0x18] sm:$0xff]  }
 0xd5c   : > { %15789 = vmatpush1.bf16.msra.mxu0 %v19240_v29  ;;  %15871 = vmatpush1.bf16.msra.mxu1 %v19243_v9  ;;  %v19327_v29 = vld [vmem:[%s24578_s12 + $0x98] sm:$0xff]   ;;  %v19328_v9 = vld [vmem:[%s24578_s12 + $0x60] sm:$0xff]  }
 0xd5d   : > { %15790 = vmatprep.subr.bf16.mxu0 %v19248_v6  ;;  %15872 = vmatprep.subr.bf16.mxu1 %v19251_v20  ;;  %v19329_v6 = vld [vmem:[%s24578_s12 + $0xe0] sm:$0xff]  }
 0xd5e   : > { %v19330_v20 = vld [vmem:[%s24578_s12 + $0x20] sm:$0xff]  }
 0xd60   : > { %15791 = vmatpush1.bf16.msra.mxu0 %v19246_v2  ;;  %15873 = vmatpush1.bf16.msra.mxu1 %v19249_v34  ;;  %v19331_v2 = vld [vmem:[%s24578_s12 + $0xa0] sm:$0xff]   ;;  %v19332_v34 = vld [vmem:[%s24578_s12 + $0x68] sm:$0xff]  }
 0xd61   : > { %15792 = vmatprep.subr.bf16.mxu0 %v19254_v55  ;;  %15874 = vmatprep.subr.bf16.mxu1 %v19257_v5  ;;  %v19333_v55 = vld [vmem:[%s24578_s12 + $0xe8] sm:$0xff]  }
 0xd62   : > { %v19334_v5 = vld [vmem:[%s24578_s12 + $0x28] sm:$0xff]  }
 0xd64   : > { %15793 = vmatpush1.bf16.msra.mxu0 %v19252_v60  ;;  %15875 = vmatpush1.bf16.msra.mxu1 %v19255_v10  ;;  %v19335_v60 = vld [vmem:[%s24578_s12 + $0xa8] sm:$0xff]   ;;  %v19336_v10 = vld [vmem:[%s24578_s12 + $0x70] sm:$0xff]  }
 0xd65   : > { %15794 = vmatprep.subr.bf16.mxu0 %v19260_v24  ;;  %15876 = vmatprep.subr.bf16.mxu1 %v19263_v8  ;;  %v19337_v24 = vld [vmem:[%s24578_s12 + $0xf0] sm:$0xff]  }
 0xd66   : > { %v19338_v8 = vld [vmem:[%s24578_s12 + $0x30] sm:$0xff]  }
 0xd68   : > { %15795 = vmatpush1.bf16.msra.mxu0 %v19258_v17  ;;  %15877 = vmatpush1.bf16.msra.mxu1 %v19261_v7  ;;  %v19339_v17 = vld [vmem:[%s24578_s12 + $0xb0] sm:$0xff]   ;;  %v19340_v7 = vld [vmem:[%s24578_s12 + $0x78] sm:$0xff]  }
 0xd69   : > { %15796 = vmatprep.subr.bf16.mxu0 %v19266_v49  ;;  %15878 = vmatprep.subr.bf16.mxu1 %v19269_v44  ;;  %v19341_v49 = vld [vmem:[%s24578_s12 + $0xf8] sm:$0xff]  }
 0xd6a   : > { %v19342_v44 = vld [vmem:[%s24578_s12 + $0x38] sm:$0xff]  }
 0xd6c   : > { %15797 = vmatpush1.bf16.msra.mxu0 %v19264_v35  ;;  %15879 = vmatpush1.bf16.msra.mxu1 %v19267_v59  ;;  %v19343_v35 = vld [vmem:[%s24578_s12 + $0xb8] sm:$0xff]   ;;  %v15077_v59 = vld [vmem:[%s24577_s11] sm:$0xf] }
 0xd6d   : > { %15798 = vmatprep.subr.bf16.mxu0 %v19272_v30  ;;  %15880 = vmatprep.subr.bf16.mxu1 %v19275_v43  ;;  %v24660_v30 = vld [vmem:[#allocation7_spill] sm:$0xff] }
 0xd6e   : > { %v15082_v43 = vrot.slane %v15077_v59, %v24660_v30 }
 0xd70   : > { %15799 = vmatpush1.bf16.msra.mxu0 %v19270_v38  ;;  %15881 = vmatpush1.bf16.msra.mxu1 %v19273_v45  ;;  %v24661_v38 = vld [vmem:[#allocation10_spill] sm:$0xff] }
 0xd71   : > { %15800 = vmatprep.subr.bf16.mxu0 %v19278_v12  ;;  %15882 = vmatprep.subr.bf16.mxu1 %v19281_v3  ;;  %v15090_v45 = vrot.slane %v15077_v59, %v24661_v38  ;;  %v24662_v12 = vld [vmem:[#allocation8_spill] sm:$0xff] }
 0xd72   : > { %v15086_v3 = vrot.slane %v15077_v59, %v24662_v12 }
 0xd74   : > { %15801 = vmatpush1.bf16.msra.mxu0 %v19276_v53  ;;  %15883 = vmatpush1.bf16.msra.mxu1 %v19279_v37  ;;  %v24663_v53 = vld [vmem:[#allocation9_spill] sm:$0xff] }
 0xd75   : > { %15802 = vmatprep.subr.bf16.mxu0 %v19284_v58  ;;  %15884 = vmatprep.subr.bf16.mxu1 %v19287_v22  ;;  %v15094_v37 = vrot.slane %v15077_v59, %v24663_v53 }
 0xd78   : > { %15803 = vmatpush1.bf16.msra.mxu0 %v19282_v14  ;;  %15885 = vmatpush1.bf16.msra.mxu1 %v19285_v48 }
 0xd79   : > { %15804 = vmatprep.subr.bf16.mxu0 %v19290_v47  ;;  %15886 = vmatprep.subr.bf16.mxu1 %v19293_v36 }
 0xd7c   : > { %15805 = vmatpush1.bf16.msra.mxu0 %v19288_v50  ;;  %15887 = vmatpush1.bf16.msra.mxu1 %v19291_v18 }
 0xd7d   : > { %15806 = vmatprep.subr.bf16.mxu0 %v19296_v19  ;;  %15888 = vmatprep.subr.bf16.mxu1 %v19299_v63 }
 0xd80   : > { %15807 = vmatpush1.bf16.msra.mxu0 %v19294_v15  ;;  %15889 = vmatpush1.bf16.msra.mxu1 %v19297_v51 }
 0xd81   : > { %15808 = vmatprep.subr.bf16.mxu0 %v19302_v27  ;;  %15890 = vmatprep.subr.bf16.mxu1 %v19305_v41 }
 0xd84   : > { %15809 = vmatpush1.bf16.msra.mxu0 %v19300_v16  ;;  %15891 = vmatpush1.bf16.msra.mxu1 %v19303_v62 }
 0xd85   : > { %15810 = vmatprep.subr.bf16.mxu0 %v19308_v33  ;;  %15892 = vmatprep.subr.bf16.mxu1 %v19311_v39 }
 0xd88   : > { %15811 = vmatpush1.bf16.msra.mxu0 %v19306_v52  ;;  %15893 = vmatpush1.bf16.msra.mxu1 %v19309_v0 }
 0xd89   : > { %17696 = vmatprep.subr.bf16.mxu0 %v19312_v11  ;;  %17718 = vmatprep.subr.bf16.mxu1 %v19313_v4 }
 0xd8b   : > { %15813 = vmatmul.mubr.bf16.vlgmr.msra.gmra.mrb[80].mxu0 %v14947_v31  ;;  %15895 = vmatmul.mubr.bf16.vlgmr.msra.gmra.mrb[80].mxu1 %v14947_v31 }
 0xd8c   : > { %17697 = vmatpush3.bf16.msra.mxu0 %v19314_v57  ;;  %17719 = vmatpush3.bf16.msra.mxu1 %v19315_v40 }
 0xd8d   : > { %17698 = vmatprep.subr.bf16.mxu0 %v19316_v61  ;;  %17720 = vmatprep.subr.bf16.mxu1 %v19317_v28 }
 0xd90   : > { %17699 = vmatpush3.bf16.msra.mxu0 %v19318_v26  ;;  %17721 = vmatpush3.bf16.msra.mxu1 %v19319_v46 }
 0xd91   : > { %17700 = vmatprep.subr.bf16.mxu0 %v19320_v54  ;;  %17722 = vmatprep.subr.bf16.mxu1 %v19321_v1 }
 0xd94   : > { %17701 = vmatpush3.bf16.msra.mxu0 %v19322_v13  ;;  %17723 = vmatpush3.bf16.msra.mxu1 %v19323_v23 }
 0xd95   : > { %17702 = vmatprep.subr.bf16.mxu0 %v19324_v21  ;;  %17724 = vmatprep.subr.bf16.mxu1 %v19325_v42 }
 0xd98   : > { %17703 = vmatpush3.bf16.msra.mxu0 %v19326_v56  ;;  %17725 = vmatpush3.bf16.msra.mxu1 %v19327_v29 }
 0xd99   : > { %17704 = vmatprep.subr.bf16.mxu0 %v19328_v9  ;;  %17726 = vmatprep.subr.bf16.mxu1 %v19329_v6 }
 0xd9c   : > { %17705 = vmatpush3.bf16.msra.mxu0 %v19330_v20  ;;  %17727 = vmatpush3.bf16.msra.mxu1 %v19331_v2 }
 0xd9d   : > { %17706 = vmatprep.subr.bf16.mxu0 %v19332_v34  ;;  %17728 = vmatprep.subr.bf16.mxu1 %v19333_v55 }
 0xda0   : > { %17707 = vmatpush3.bf16.msra.mxu0 %v19334_v5  ;;  %17729 = vmatpush3.bf16.msra.mxu1 %v19335_v60 }
 0xda1   : > { %17708 = vmatprep.subr.bf16.mxu0 %v19336_v10  ;;  %17730 = vmatprep.subr.bf16.mxu1 %v19337_v24 }
 0xda4   : > { %17709 = vmatpush3.bf16.msra.mxu0 %v19338_v8  ;;  %17731 = vmatpush3.bf16.msra.mxu1 %v19339_v17 }
 0xda5   : > { %17710 = vmatprep.subr.bf16.mxu0 %v19340_v7  ;;  %17732 = vmatprep.subr.bf16.mxu1 %v19341_v49 }
 0xda8   : > { %17711 = vmatpush3.bf16.msra.mxu0 %v19342_v44  ;;  %17733 = vmatpush3.bf16.msra.mxu1 %v19343_v35 }
 0xe5e   : > { %v15814_v58 = vpop.f32.mrb[80].mxu0  ;;  %v15896_v22 = vpop.f32.mrb[80].mxu1 }
 0xe5f   : > { %v17952_v14 = vadd.f32 %v15814_v58, %v15082_v43  ;;  %v17954_v48 = vadd.f32 %v15896_v22, %v15090_v45  ;;  %v15816_v47 = vpop.f32.mrb[81].mxu0  ;;  %v15898_v36 = vpop.f32.mrb[81].mxu1 }
 0xe60   : > { %v17953_v50 = vadd.f32 %v15816_v47, %v15086_v3  ;;  %v17955_v18 = vadd.f32 %v15898_v36, %v15094_v37  ;;  %v15818_v19 = vpop.f32.mrb[82].mxu0  ;;  %v15900_v63 = vpop.f32.mrb[82].mxu1 }
 0xe61   : > { %v15819_v15 = vpop.f32.mrb[83].mxu0  ;;  %v15901_v51 = vpop.f32.mrb[83].mxu1  ;;  %v15903_v16 = vpack.c.bf16 %v17952_v14, %v17952_v14  ;;  %v15905_v62 = vpack.c.bf16 %v17954_v48, %v17954_v48 }
 0xe62   : > { %v15904_v27 = vpack.c.bf16 %v17953_v50, %v17953_v50  ;;  %v15906_v41 = vpack.c.bf16 %v17955_v18, %v17955_v18 }
 0xe64   : > { %16202 = vmatprep.mubr.bf16.mxu0 %v15904_v27  ;;  %16242 = vmatprep.mubr.bf16.mxu1 %v15906_v41 }
 0xe65   : > { %16203 = vmatmul.mubr.bf16.vlgmr.msra.gmra.mrb[84].mxu0 %v15903_v16  ;;  %16243 = vmatmul.mubr.bf16.vlgmr.msra.gmra.mrb[84].mxu1 %v15905_v62 }
 0xf38   : > { %v17712_v33 = vpop.f32.mrb[84].mxu0  ;;  %v17734_v39 = vpop.f32.mrb[84].mxu1 }
 0xf39   : > { %v17713_v52 = vpop.f32.mrb[85].mxu0  ;;  %v17735_v0 = vpop.f32.mrb[85].mxu1 }
 0xf3a   : > { %v17714_v11 = vadd.f32 %v17713_v52, %v17712_v33  ;;  %v17736_v4 = vadd.f32 %v17735_v0, %v17734_v39  ;;  %v17715_v32 = vpop.f32.mrb[86].mxu0  ;;  %v17737_v57 = vpop.f32.mrb[86].mxu1 }
 0xf3b   : > { %v17716_v40 = vpop.f32.mrb[87].mxu0  ;;  %v17738_v31 = vpop.f32.mrb[87].mxu1 }
 0xf3c   : > { %v16205_v61 = vadd.f32 %v17714_v11, %v17577_v25 }
 0xf3e   : > { %v16245_v28 = vadd.f32 %v17736_v4, %v16205_v61 }
 0xf40   : > { %16250 = vst [vmem:[#allocation4] sm:$0x3] %v16245_v28 }
 0xf41 PF: > { %p24531_p6 = scmp.eq.s32.totalorder %s16316_s16, 3  ;;  %s19441_s27 = smov [#allocation4]  }
 0xf42   : > { %s16258_s28 = sshll.u32 %s19441_s27, 4  ;;  %s16259_s28 = int_to_ptr.vmem [resolvable:$true] %s16258_s28 }
 0xf43   : > { %s19378_s18 = scalar_lea.vmem %s16259_s28, 32  ;;  %p19385_p10 = scmp.lt.s32.totalorder %s16259_s28, %s16259_s28 }
 0xf44   : > { %p19379_p7 = scmp.ne.s32.totalorder %s16259_s28, %s19378_s18  ;;  %p19386_p11 = scmp.lt.s32.totalorder %s19378_s18, %s19378_s18 }
 0xf46   : > { %p19380_p8 = pnand %p19379_p7, %p24531_p6  ;;  %p19387_p12 = por %p19386_p11, %p19385_p10 }
 0xf48   : > { %p19381_p9 = pneg %p19380_p8 }
 0xf4a   : > { %p19388_p13 = pnand %p19387_p12, %p19381_p9 }
 0xf4c   : > { %19391 = shalt.err (!%p19388_p13)
}
 0xf4d   : > { %s19392_s16 = scalar_lea.hbm %s24580_s14, 32 }
 0xf4e   : > { %p19393_p0 = scmp.ne.s32.totalorder %s24580_s14, %s19392_s16  ;;  %p19398_p3 = scmp.lt.u32.totalorder %s19392_s16, %s24580_s14 }
 0xf50   : > { %p19394_p1 = pnand %p19393_p0, %p24531_p6 }
 0xf52   : > { %p19395_p2 = pneg %p19394_p1 }
 0xf54   : > { %p19400_p4 = pnand %p19398_p3, %p19395_p2 }
 0xf56   : > { %19403 = shalt.err (!%p19400_p4)
}
 0xf57   : > { %18053 = dma.vmem_to_hbm [thread:$0]  (%p24531_p6), %s16259_s28, 32, %s24580_s14, [#allocation5]  }
 0xf58   : > { %19417 = dma.done.wait (%p24531_p6), [#allocation5], 32  }
 0xf59   : > { %19419 = vsyncadd (%p24531_p6), [#allocation5], 4294967264 }
 0xf5a PF: > { %s25_s15 = sadd.s32 1, %s19430_s15   ;;  %s24665_s29 = smov %s19426_s30 }
 0xf5b   : > { %p22_p5 = scmp.ge.s32.totalorder %s25_s15, 6   ;;  %s24666_s30 = smov %s24668_s17 }
 0xf5d   :  { %24 = sbr.rel (!%p22_p5) target bundleno = 2 (0x2), region = 119 }
 0xf64   :  { %16271 = vsyncpa [#allocation5], 1 }
 0xf65   :  { %16273 = vsyncpa [#allocation5 + $0x1], 1 }

</bundles_post_ra>
